<compile_context>
chip_gen: v5e
topology: v5e:2x2
jax: 0.10.0
libtpu: 0.0.40
codegen_flags: <defaults>
</compile_context>

<pallas_src>
import functools

import jax
import jax.numpy as jnp
from jax.experimental import pallas as pl
from jax.experimental.pallas import tpu as pltpu

_BN_EPS = 1e-3              # ultralytics Conv uses BatchNorm2d(eps=1e-3)
_ACT_DTYPE = jnp.bfloat16   # MXU-rate operand dtype; all accumulation is f32


def _silu(y):
    # y is f32; exp goes to the EUP, single divide for the sigmoid.
    return y * (1.0 / (1.0 + jnp.exp(-y)))


def _pick_tile_rows(m, max_rows=1024):
    """Pixel-row tile for the (M, C) 1x1-conv matmuls.

    Multiple of 8 (sublane) unless it is the full extent; small enough to stay
    far inside the 64 MiB v7x VMEM budget with double buffering, while exposing
    >= 2 grid steps for pipelining / megacore whenever possible.
    """
    if m > max_rows:
        return max_rows
    if m >= 64 and m % 16 == 0:
        return m // 2
    return m


# ----------------------------------------------------------------------------
# cv1: 1x1 conv + folded BN + SiLU, emitting the two c-channel halves pre-split
# ----------------------------------------------------------------------------
def _cv1_kernel(x_ref, wa_ref, wb_ref, ba_ref, bb_ref, oa_ref, ob_ref):
    x = x_ref[...]
    ya = jnp.dot(x, wa_ref[...], preferred_element_type=jnp.float32) + ba_ref[...]
    oa_ref[...] = _silu(ya).astype(oa_ref.dtype)
    yb = jnp.dot(x, wb_ref[...], preferred_element_type=jnp.float32) + bb_ref[...]
    ob_ref[...] = _silu(yb).astype(ob_ref.dtype)


def conv1x1_split(x2d, wa, wb, ba, bb):
    """x2d: (M, Cin) bf16 flattened pixels; wa/wb: (Cin, c) bf16 (BN folded)."""
    m, cin = x2d.shape
    c = wa.shape[1]
    tm = _pick_tile_rows(m)
    return pl.pallas_call(
        _cv1_kernel,
        out_shape=(jax.ShapeDtypeStruct((m, c), _ACT_DTYPE),
                   jax.ShapeDtypeStruct((m, c), _ACT_DTYPE)),
        grid=(pl.cdiv(m, tm),),
        in_specs=[
            pl.BlockSpec((tm, cin), lambda i: (i, 0)),
            pl.BlockSpec((cin, c), lambda i: (0, 0)),
            pl.BlockSpec((cin, c), lambda i: (0, 0)),
            pl.BlockSpec((1, c), lambda i: (0, 0)),
            pl.BlockSpec((1, c), lambda i: (0, 0)),
        ],
        out_specs=(pl.BlockSpec((tm, c), lambda i: (i, 0)),
                   pl.BlockSpec((tm, c), lambda i: (i, 0))),
        compiler_params=pltpu.CompilerParams(dimension_semantics=("parallel",)),
    )(x2d, wa, wb, ba, bb)


# ----------------------------------------------------------------------------
# cv2: 1x1 conv over the implicit concat (weight pre-split along Cin)
# ----------------------------------------------------------------------------
def _make_cv2_kernel(n_chunks):
    def kernel(*refs):
        x_refs = refs[:n_chunks]
        w_refs = refs[n_chunks:2 * n_chunks]
        b_ref = refs[2 * n_chunks]
        o_ref = refs[2 * n_chunks + 1]
        acc = jnp.zeros(o_ref.shape, jnp.float32)
        for xr, wr in zip(x_refs, w_refs):
            acc = acc + jnp.dot(xr[...], wr[...], preferred_element_type=jnp.float32)
        o_ref[...] = _silu(acc + b_ref[...]).astype(o_ref.dtype)
    return kernel


def conv1x1_concat(chunks, w_chunks, bias, out_dtype):
    """out = SiLU(sum_i chunks[i] @ w_chunks[i] + bias): concat never built."""
    m, c = chunks[0].shape
    cout = w_chunks[0].shape[1]
    n_chunks = len(chunks)
    tm = _pick_tile_rows(m)
    in_specs = (
        [pl.BlockSpec((tm, c), lambda i: (i, 0)) for _ in range(n_chunks)]
        + [pl.BlockSpec((c, cout), lambda i: (0, 0)) for _ in range(n_chunks)]
        + [pl.BlockSpec((1, cout), lambda i: (0, 0))]
    )
    return pl.pallas_call(
        _make_cv2_kernel(n_chunks),
        out_shape=jax.ShapeDtypeStruct((m, cout), out_dtype),
        grid=(pl.cdiv(m, tm),),
        in_specs=in_specs,
        out_specs=pl.BlockSpec((tm, cout), lambda i: (i, 0)),
        compiler_params=pltpu.CompilerParams(dimension_semantics=("parallel",)),
    )(*chunks, *w_chunks, bias)


# ----------------------------------------------------------------------------
# Bottleneck: fused (3x3 Conv+BN+SiLU) -> (3x3 Conv+BN+SiLU), intermediate in VMEM
# ----------------------------------------------------------------------------
def _make_bottleneck_kernel(hw, img_w, add_residual):
    padr = img_w + 1  # zero halo rows on each side of the flattened image

    def conv3x3(pad_ref, w_ref, bias_row, mask_m1, mask_p1):
        cout = w_ref.shape[-1]
        acc = jnp.zeros((hw, cout), jnp.float32)
        for dx, mask in ((-1, mask_m1), (0, None), (1, mask_p1)):
            part = jnp.zeros((hw, cout), jnp.float32)
            for dy in (-1, 0, 1):
                tap = (dy + 1) * 3 + (dx + 1)      # PyTorch cross-correlation order
                window = pad_ref[pl.ds(padr + dy * img_w + dx, hw), :]
                part = part + jnp.dot(window, w_ref[tap],
                                      preferred_element_type=jnp.float32)
            if mask is not None:                   # cancel column wrap of dx=+-1 taps
                part = part * mask
            acc = acc + part
        return _silu(acc + bias_row)

    def kernel(x_ref, w1_ref, b1_ref, w2_ref, b2_ref, mm1_ref, mp1_ref,
               o_ref, pad_ref):
        mask_m1 = mm1_ref[...]
        mask_p1 = mp1_ref[...]
        x = x_ref[0]

        # zero halo + interior = current image (no wrapper-side jnp.pad / HBM pass)
        pad_ref[...] = jnp.zeros(pad_ref.shape, pad_ref.dtype)
        pad_ref[pl.ds(padr, hw), :] = x
        t = conv3x3(pad_ref, w1_ref, b1_ref[...], mask_m1, mask_p1)

        # second conv reads the intermediate straight from VMEM (no HBM round trip)
        pad_ref[pl.ds(padr, hw), :] = t.astype(pad_ref.dtype)
        y = conv3x3(pad_ref, w2_ref, b2_ref[...], mask_m1, mask_p1)

        if add_residual:
            y = y + x.astype(jnp.float32)
        o_ref[0] = y.astype(o_ref.dtype)

    return kernel


def bottleneck_3x3x2(x3d, img_w, w1, b1, w2, b2, add_residual=False):
    """x3d: (N, H*W, c) bf16 activations; returns (N, H*W, c) bf16."""
    n, hw, c = x3d.shape
    padr = img_w + 1

    col = jnp.arange(hw, dtype=jnp.int32) % img_w
    mask_m1 = (col >= 1).astype(jnp.float32).reshape(hw, 1)          # dx = -1 valid
    mask_p1 = (col <= img_w - 2).astype(jnp.float32).reshape(hw, 1)  # dx = +1 valid

    # TODO(synk): for very large feature maps, add a second grid axis over row
    # tiles (2-row halo) so one whole image block need not fit VMEM at once.
    return pl.pallas_call(
        _make_bottleneck_kernel(hw, img_w, add_residual),
        out_shape=jax.ShapeDtypeStruct((n, hw, c), _ACT_DTYPE),
        grid=(n,),
        in_specs=[
            pl.BlockSpec((1, hw, c), lambda b: (b, 0, 0)),
            pl.BlockSpec((9, c, c), lambda b: (0, 0, 0)),
            pl.BlockSpec((1, c), lambda b: (0, 0)),
            pl.BlockSpec((9, c, c), lambda b: (0, 0, 0)),
            pl.BlockSpec((1, c), lambda b: (0, 0)),
            pl.BlockSpec((hw, 1), lambda b: (0, 0)),
            pl.BlockSpec((hw, 1), lambda b: (0, 0)),
        ],
        out_specs=pl.BlockSpec((1, hw, c), lambda b: (b, 0, 0)),
        scratch_shapes=[pltpu.VMEM((hw + 2 * padr, c), _ACT_DTYPE)],
        compiler_params=pltpu.CompilerParams(dimension_semantics=("parallel",)),
    )(x3d, w1, b1, w2, b2, mask_m1, mask_p1)


# ----------------------------------------------------------------------------
# Deterministic parameter construction (Conv2d weight + folded BatchNorm)
# ----------------------------------------------------------------------------
def _make_conv_params(key, cin, cout, k):
    """Conv2d(bias=False) HWIO weight + BatchNorm2d stats, BN folded in."""
    kw, kg, kb, km, kv = jax.random.split(key, 5)
    w = 0.1 * jax.random.normal(kw, (k, k, cin, cout), jnp.float32)
    gamma = 1.0 + 0.1 * jax.random.normal(kg, (cout,), jnp.float32)
    beta = 0.1 * jax.random.normal(kb, (cout,), jnp.float32)
    mean = 0.1 * jax.random.normal(km, (cout,), jnp.float32)
    var = jnp.abs(jax.random.normal(kv, (cout,), jnp.float32)) + 0.5
    scale = gamma / jnp.sqrt(var + _BN_EPS)
    bias = beta - mean * scale
    w_folded = (w * scale).astype(_ACT_DTYPE)   # fold BN scale into weight columns
    return w_folded, bias.reshape(1, cout)      # bias stays f32


def make_c2f_params(key, c1, c2, n=1, e=0.5):
    """Kernel-ready C2f parameters; leaves are arrays only (jit-safe pytree)."""
    c = int(c2 * e)
    keys = jax.random.split(key, 2 + 2 * n)

    w1, b1 = _make_conv_params(keys[0], c1, 2 * c, 1)          # cv1: c1 -> 2c, 1x1
    w1 = w1.reshape(c1, 2 * c)
    wc, bc = _make_conv_params(keys[1], (2 + n) * c, c2, 1)    # cv2: (2+n)c -> c2, 1x1
    wc = wc.reshape((2 + n) * c, c2)

    params = {
        "cv1_wa": w1[:, :c], "cv1_wb": w1[:, c:],
        "cv1_ba": b1[:, :c], "cv1_bb": b1[:, c:],
        # cv2 weight pre-split along Cin so the y-chunk concat is never built.
        "cv2_w": [wc[i * c:(i + 1) * c, :] for i in range(2 + n)],
        "cv2_b": bc,
        "m": [],
    }
    for i in range(n):
        wm1, bm1 = _make_conv_params(keys[2 + 2 * i], c, c, 3)
        wm2, bm2 = _make_conv_params(keys[3 + 2 * i], c, c, 3)
        params["m"].append({"w1": wm1.reshape(9, c, c), "b1": bm1,
                            "w2": wm2.reshape(9, c, c), "b2": bm2})
    return params


# ----------------------------------------------------------------------------
# C2f forward
# ----------------------------------------------------------------------------
def c2f_forward_nhwc(x_nhwc, params, shortcut=False):
    n, h, w, _ = x_nhwc.shape
    m = n * h * w
    x2d = x_nhwc.reshape(m, -1).astype(_ACT_DTYPE)

    ya, yb = conv1x1_split(x2d, params["cv1_wa"], params["cv1_wb"],
                           params["cv1_ba"], params["cv1_bb"])
    c = ya.shape[1]                      # static, derived from weight shapes

    chunks = [ya, yb]
    prev = yb
    for mp in params["m"]:
        t = bottleneck_3x3x2(prev.reshape(n, h * w, c), w,
                             mp["w1"], mp["b1"], mp["w2"], mp["b2"],
                             add_residual=shortcut)
        t = t.reshape(m, c)
        chunks.append(t)
        prev = t

    out2d = conv1x1_concat(chunks, params["cv2_w"], params["cv2_b"], x_nhwc.dtype)
    return out2d.reshape(n, h, w, out2d.shape[-1])


@functools.partial(jax.jit, static_argnames=("shortcut",))
def c2f_nchw(x_nchw, params, shortcut=False):
    # PyTorch NCHW in/out; kernels run channels-last internally.
    x = jnp.transpose(x_nchw, (0, 2, 3, 1))
    y = c2f_forward_nhwc(x, params, shortcut=shortcut)
    return jnp.transpose(y, (0, 3, 1, 2))


# ----------------------------------------------------------------------------
if __name__ == "__main__":
    key = jax.random.PRNGKey(0)
    kx, kp = jax.random.split(key)

    N, C1, H, W = 2, 4, 16, 16
    C2, n = 8, 1
    x = jax.random.normal(kx, (N, C1, H, W), jnp.float32)   # PyTorch-style NCHW input

    params = make_c2f_params(kp, C1, C2, n=n)

    out = c2f_nchw(x, params, shortcut=False)
    out = jax.block_until_ready(out)
    assert out.shape == (N, C2, H, W), out.shape
    assert bool(jnp.all(jnp.isfinite(out))), "non-finite output"
    print("KERNEL_OK")
</pallas_src>

<mosaic_0001>
module attributes {stable_mosaic.version = 11 : i64} {
  func.func @_cv1_kernel(%arg0: i32, %arg1: memref<256x4xbf16, #tpu.memory_space<vmem>>, %arg2: memref<4x4xbf16, #tpu.memory_space<vmem>>, %arg3: memref<4x4xbf16, #tpu.memory_space<vmem>>, %arg4: memref<1x4xf32, #tpu.memory_space<vmem>>, %arg5: memref<1x4xf32, #tpu.memory_space<vmem>>, %arg6: memref<256x4xbf16, #tpu.memory_space<vmem>>, %arg7: memref<256x4xbf16, #tpu.memory_space<vmem>>) attributes {dimension_semantics = [#tpu.dimension_semantics<parallel>], iteration_bounds = array<i64: 2>, scalar_prefetch = 0 : i64, scratch_operands = 0 : i64, tpu.core_type = #tpu.core_type<tc>, window_params = [{transform_indices = @transform_0, window_bounds = array<i64: 256, 4>}, {pipeline_mode = #tpu.pipeline_mode<synchronous>, transform_indices = @transform_1, window_bounds = array<i64: 4, 4>}, {pipeline_mode = #tpu.pipeline_mode<synchronous>, transform_indices = @transform_2, window_bounds = array<i64: 4, 4>}, {pipeline_mode = #tpu.pipeline_mode<synchronous>, transform_indices = @transform_3, window_bounds = array<i64: 1, 4>}, {pipeline_mode = #tpu.pipeline_mode<synchronous>, transform_indices = @transform_4, window_bounds = array<i64: 1, 4>}, {transform_indices = @transform_5, window_bounds = array<i64: 256, 4>}, {transform_indices = @transform_6, window_bounds = array<i64: 256, 4>}]} {
    %c0 = arith.constant 0 : index
    %c0_0 = arith.constant 0 : index
    %0 = vector.load %arg1[%c0, %c0_0] : memref<256x4xbf16, #tpu.memory_space<vmem>>, vector<256x4xbf16>
    %c0_1 = arith.constant 0 : index
    %c0_2 = arith.constant 0 : index
    %1 = vector.load %arg2[%c0_1, %c0_2] : memref<4x4xbf16, #tpu.memory_space<vmem>>, vector<4x4xbf16>
    %cst = arith.constant dense<0.000000e+00> : vector<256x4xf32>
    %2 = tpu.matmul %0, %1, %cst {dimension_numbers = #tpu.dot_dimension_numbers<[1], [0], [0], [1], [0, 0, 1, 1], [], []>} : vector<256x4xbf16>, vector<4x4xbf16>, vector<256x4xf32> -> vector<256x4xf32>
    %c0_3 = arith.constant 0 : index
    %c0_4 = arith.constant 0 : index
    %3 = vector.load %arg4[%c0_3, %c0_4] : memref<1x4xf32, #tpu.memory_space<vmem>>, vector<1x4xf32>
    %4 = vector.broadcast %3 : vector<1x4xf32> to vector<256x4xf32>
    %5 = arith.addf %2, %4 : vector<256x4xf32>
    %cst_5 = arith.constant 0.000000e+00 : f32
    %6 = vector.broadcast %cst_5 : f32 to vector<256x4xf32>
    %7 = arith.subf %6, %5 : vector<256x4xf32>
    %8 = math.exp %7 : vector<256x4xf32>
    %cst_6 = arith.constant 1.000000e+00 : f32
    %9 = vector.broadcast %cst_6 : f32 to vector<256x4xf32>
    %10 = arith.addf %9, %8 : vector<256x4xf32>
    %cst_7 = arith.constant 1.000000e+00 : f32
    %11 = vector.broadcast %cst_7 : f32 to vector<256x4xf32>
    %12 = arith.divf %11, %10 : vector<256x4xf32>
    %13 = arith.mulf %5, %12 : vector<256x4xf32>
    %14 = arith.truncf %13 : vector<256x4xf32> to vector<256x4xbf16>
    %c0_8 = arith.constant 0 : index
    %c0_9 = arith.constant 0 : index
    %15 = vector.load %arg6[%c0_8, %c0_9] : memref<256x4xbf16, #tpu.memory_space<vmem>>, vector<256x4xbf16>
    tpu.vector_store %arg6[%c0_8, %c0_9], %14 {strides = array<i32>} : memref<256x4xbf16, #tpu.memory_space<vmem>>, vector<256x4xbf16>,
    %c0_10 = arith.constant 0 : index
    %c0_11 = arith.constant 0 : index
    %16 = vector.load %arg3[%c0_10, %c0_11] : memref<4x4xbf16, #tpu.memory_space<vmem>>, vector<4x4xbf16>
    %cst_12 = arith.constant dense<0.000000e+00> : vector<256x4xf32>
    %17 = tpu.matmul %0, %16, %cst_12 {dimension_numbers = #tpu.dot_dimension_numbers<[1], [0], [0], [1], [0, 0, 1, 1], [], []>} : vector<256x4xbf16>, vector<4x4xbf16>, vector<256x4xf32> -> vector<256x4xf32>
    %c0_13 = arith.constant 0 : index
    %c0_14 = arith.constant 0 : index
    %18 = vector.load %arg5[%c0_13, %c0_14] : memref<1x4xf32, #tpu.memory_space<vmem>>, vector<1x4xf32>
    %19 = vector.broadcast %18 : vector<1x4xf32> to vector<256x4xf32>
    %20 = arith.addf %17, %19 : vector<256x4xf32>
    %cst_15 = arith.constant 0.000000e+00 : f32
    %21 = vector.broadcast %cst_15 : f32 to vector<256x4xf32>
    %22 = arith.subf %21, %20 : vector<256x4xf32>
    %23 = math.exp %22 : vector<256x4xf32>
    %cst_16 = arith.constant 1.000000e+00 : f32
    %24 = vector.broadcast %cst_16 : f32 to vector<256x4xf32>
    %25 = arith.addf %24, %23 : vector<256x4xf32>
    %cst_17 = arith.constant 1.000000e+00 : f32
    %26 = vector.broadcast %cst_17 : f32 to vector<256x4xf32>
    %27 = arith.divf %26, %25 : vector<256x4xf32>
    %28 = arith.mulf %20, %27 : vector<256x4xf32>
    %29 = arith.truncf %28 : vector<256x4xf32> to vector<256x4xbf16>
    %c0_18 = arith.constant 0 : index
    %c0_19 = arith.constant 0 : index
    %30 = vector.load %arg7[%c0_18, %c0_19] : memref<256x4xbf16, #tpu.memory_space<vmem>>, vector<256x4xbf16>
    tpu.vector_store %arg7[%c0_18, %c0_19], %29 {strides = array<i32>} : memref<256x4xbf16, #tpu.memory_space<vmem>>, vector<256x4xbf16>,
    return
  }
  func.func @transform_0(%arg0: i32) -> (i32, i32) {
    %c0_i32 = arith.constant 0 : i32
    %c0_i32_0 = arith.constant 0 : i32
    return %arg0, %c0_i32 : i32, i32
  }
  func.func @transform_1(%arg0: i32) -> (i32, i32) {
    %c0_i32 = arith.constant 0 : i32
    %c0_i32_0 = arith.constant 0 : i32
    %c0_i32_1 = arith.constant 0 : i32
    return %c0_i32, %c0_i32_0 : i32, i32
  }
  func.func @transform_2(%arg0: i32) -> (i32, i32) {
    %c0_i32 = arith.constant 0 : i32
    %c0_i32_0 = arith.constant 0 : i32
    %c0_i32_1 = arith.constant 0 : i32
    return %c0_i32, %c0_i32_0 : i32, i32
  }
  func.func @transform_3(%arg0: i32) -> (i32, i32) {
    %c0_i32 = arith.constant 0 : i32
    %c0_i32_0 = arith.constant 0 : i32
    %c0_i32_1 = arith.constant 0 : i32
    return %c0_i32, %c0_i32_0 : i32, i32
  }
  func.func @transform_4(%arg0: i32) -> (i32, i32) {
    %c0_i32 = arith.constant 0 : i32
    %c0_i32_0 = arith.constant 0 : i32
    %c0_i32_1 = arith.constant 0 : i32
    return %c0_i32, %c0_i32_0 : i32, i32
  }
  func.func @transform_5(%arg0: i32) -> (i32, i32) {
    %c0_i32 = arith.constant 0 : i32
    %c0_i32_0 = arith.constant 0 : i32
    return %arg0, %c0_i32 : i32, i32
  }
  func.func @transform_6(%arg0: i32) -> (i32, i32) {
    %c0_i32 = arith.constant 0 : i32
    %c0_i32_0 = arith.constant 0 : i32
    return %arg0, %c0_i32 : i32, i32
  }
}

module attributes {stable_mosaic.version = 11 : i64} {
  func.func @kernel(%arg0: i32, %arg1: memref<256x4xbf16, #tpu.memory_space<vmem>>, %arg2: memref<256x4xbf16, #tpu.memory_space<vmem>>, %arg3: memref<256x4xbf16, #tpu.memory_space<vmem>>, %arg4: memref<4x8xbf16, #tpu.memory_space<vmem>>, %arg5: memref<4x8xbf16, #tpu.memory_space<vmem>>, %arg6: memref<4x8xbf16, #tpu.memory_space<vmem>>, %arg7: memref<1x8xf32, #tpu.memory_space<vmem>>, %arg8: memref<256x8xf32, #tpu.memory_space<vmem>>) attributes {dimension_semantics = [#tpu.dimension_semantics<parallel>], iteration_bounds = array<i64: 2>, scalar_prefetch = 0 : i64, scratch_operands = 0 : i64, tpu.core_type = #tpu.core_type<tc>, window_params = [{transform_indices = @transform_0, window_bounds = array<i64: 256, 4>}, {transform_indices = @transform_1, window_bounds = array<i64: 256, 4>}, {transform_indices = @transform_2, window_bounds = array<i64: 256, 4>}, {pipeline_mode = #tpu.pipeline_mode<synchronous>, transform_indices = @transform_3, window_bounds = array<i64: 4, 8>}, {pipeline_mode = #tpu.pipeline_mode<synchronous>, transform_indices = @transform_4, window_bounds = array<i64: 4, 8>}, {pipeline_mode = #tpu.pipeline_mode<synchronous>, transform_indices = @transform_5, window_bounds = array<i64: 4, 8>}, {pipeline_mode = #tpu.pipeline_mode<synchronous>, transform_indices = @transform_6, window_bounds = array<i64: 1, 8>}, {transform_indices = @transform_7, window_bounds = array<i64: 256, 8>}]} {
    %cst = arith.constant 0.000000e+00 : f32
    %0 = vector.broadcast %cst : f32 to vector<256x8xf32>
    %c0 = arith.constant 0 : index
    %c0_0 = arith.constant 0 : index
    %1 = vector.load %arg1[%c0, %c0_0] : memref<256x4xbf16, #tpu.memory_space<vmem>>, vector<256x4xbf16>
    %c0_1 = arith.constant 0 : index
    %c0_2 = arith.constant 0 : index
    %2 = vector.load %arg4[%c0_1, %c0_2] : memref<4x8xbf16, #tpu.memory_space<vmem>>, vector<4x8xbf16>
    %cst_3 = arith.constant dense<0.000000e+00> : vector<256x8xf32>
    %3 = tpu.matmul %1, %2, %cst_3 {dimension_numbers = #tpu.dot_dimension_numbers<[1], [0], [0], [1], [0, 0, 1, 1], [], []>} : vector<256x4xbf16>, vector<4x8xbf16>, vector<256x8xf32> -> vector<256x8xf32>
    %4 = arith.addf %0, %3 : vector<256x8xf32>
    %c0_4 = arith.constant 0 : index
    %c0_5 = arith.constant 0 : index
    %5 = vector.load %arg2[%c0_4, %c0_5] : memref<256x4xbf16, #tpu.memory_space<vmem>>, vector<256x4xbf16>
    %c0_6 = arith.constant 0 : index
    %c0_7 = arith.constant 0 : index
    %6 = vector.load %arg5[%c0_6, %c0_7] : memref<4x8xbf16, #tpu.memory_space<vmem>>, vector<4x8xbf16>
    %cst_8 = arith.constant dense<0.000000e+00> : vector<256x8xf32>
    %7 = tpu.matmul %5, %6, %cst_8 {dimension_numbers = #tpu.dot_dimension_numbers<[1], [0], [0], [1], [0, 0, 1, 1], [], []>} : vector<256x4xbf16>, vector<4x8xbf16>, vector<256x8xf32> -> vector<256x8xf32>
    %8 = arith.addf %4, %7 : vector<256x8xf32>
    %c0_9 = arith.constant 0 : index
    %c0_10 = arith.constant 0 : index
    %9 = vector.load %arg3[%c0_9, %c0_10] : memref<256x4xbf16, #tpu.memory_space<vmem>>, vector<256x4xbf16>
    %c0_11 = arith.constant 0 : index
    %c0_12 = arith.constant 0 : index
    %10 = vector.load %arg6[%c0_11, %c0_12] : memref<4x8xbf16, #tpu.memory_space<vmem>>, vector<4x8xbf16>
    %cst_13 = arith.constant dense<0.000000e+00> : vector<256x8xf32>
    %11 = tpu.matmul %9, %10, %cst_13 {dimension_numbers = #tpu.dot_dimension_numbers<[1], [0], [0], [1], [0, 0, 1, 1], [], []>} : vector<256x4xbf16>, vector<4x8xbf16>, vector<256x8xf32> -> vector<256x8xf32>
    %12 = arith.addf %8, %11 : vector<256x8xf32>
    %c0_14 = arith.constant 0 : index
    %c0_15 = arith.constant 0 : index
    %13 = vector.load %arg7[%c0_14, %c0_15] : memref<1x8xf32, #tpu.memory_space<vmem>>, vector<1x8xf32>
    %14 = vector.broadcast %13 : vector<1x8xf32> to vector<256x8xf32>
    %15 = arith.addf %12, %14 : vector<256x8xf32>
    %cst_16 = arith.constant 0.000000e+00 : f32
    %16 = vector.broadcast %cst_16 : f32 to vector<256x8xf32>
    %17 = arith.subf %16, %15 : vector<256x8xf32>
    %18 = math.exp %17 : vector<256x8xf32>
    %cst_17 = arith.constant 1.000000e+00 : f32
    %19 = vector.broadcast %cst_17 : f32 to vector<256x8xf32>
    %20 = arith.addf %19, %18 : vector<256x8xf32>
    %cst_18 = arith.constant 1.000000e+00 : f32
    %21 = vector.broadcast %cst_18 : f32 to vector<256x8xf32>
    %22 = arith.divf %21, %20 : vector<256x8xf32>
    %23 = arith.mulf %15, %22 : vector<256x8xf32>
    %c0_19 = arith.constant 0 : index
    %c0_20 = arith.constant 0 : index
    %24 = vector.load %arg8[%c0_19, %c0_20] : memref<256x8xf32, #tpu.memory_space<vmem>>, vector<256x8xf32>
    tpu.vector_store %arg8[%c0_19, %c0_20], %23 {strides = array<i32>} : memref<256x8xf32, #tpu.memory_space<vmem>>, vector<256x8xf32>,
    return
  }
  func.func @transform_0(%arg0: i32) -> (i32, i32) {
    %c0_i32 = arith.constant 0 : i32
    %c0_i32_0 = arith.constant 0 : i32
    return %arg0, %c0_i32 : i32, i32
  }
  func.func @transform_1(%arg0: i32) -> (i32, i32) {
    %c0_i32 = arith.constant 0 : i32
    %c0_i32_0 = arith.constant 0 : i32
    return %arg0, %c0_i32 : i32, i32
  }
  func.func @transform_2(%arg0: i32) -> (i32, i32) {
    %c0_i32 = arith.constant 0 : i32
    %c0_i32_0 = arith.constant 0 : i32
    return %arg0, %c0_i32 : i32, i32
  }
  func.func @transform_3(%arg0: i32) -> (i32, i32) {
    %c0_i32 = arith.constant 0 : i32
    %c0_i32_0 = arith.constant 0 : i32
    %c0_i32_1 = arith.constant 0 : i32
    return %c0_i32, %c0_i32_0 : i32, i32
  }
  func.func @transform_4(%arg0: i32) -> (i32, i32) {
    %c0_i32 = arith.constant 0 : i32
    %c0_i32_0 = arith.constant 0 : i32
    %c0_i32_1 = arith.constant 0 : i32
    return %c0_i32, %c0_i32_0 : i32, i32
  }
  func.func @transform_5(%arg0: i32) -> (i32, i32) {
    %c0_i32 = arith.constant 0 : i32
    %c0_i32_0 = arith.constant 0 : i32
    %c0_i32_1 = arith.constant 0 : i32
    return %c0_i32, %c0_i32_0 : i32, i32
  }
  func.func @transform_6(%arg0: i32) -> (i32, i32) {
    %c0_i32 = arith.constant 0 : i32
    %c0_i32_0 = arith.constant 0 : i32
    %c0_i32_1 = arith.constant 0 : i32
    return %c0_i32, %c0_i32_0 : i32, i32
  }
  func.func @transform_7(%arg0: i32) -> (i32, i32) {
    %c0_i32 = arith.constant 0 : i32
    %c0_i32_0 = arith.constant 0 : i32
    return %arg0, %c0_i32 : i32, i32
  }
}

module attributes {stable_mosaic.version = 11 : i64} {
  func.func @kernel(%arg0: i32, %arg1: memref<1x256x4xbf16, #tpu.memory_space<vmem>>, %arg2: memref<9x4x4xbf16, #tpu.memory_space<vmem>>, %arg3: memref<1x4xf32, #tpu.memory_space<vmem>>, %arg4: memref<9x4x4xbf16, #tpu.memory_space<vmem>>, %arg5: memref<1x4xf32, #tpu.memory_space<vmem>>, %arg6: memref<256x1xf32, #tpu.memory_space<vmem>>, %arg7: memref<256x1xf32, #tpu.memory_space<vmem>>, %arg8: memref<1x256x4xbf16, #tpu.memory_space<vmem>>, %arg9: memref<290x4xbf16, #tpu.memory_space<vmem>>) attributes {dimension_semantics = [#tpu.dimension_semantics<parallel>], iteration_bounds = array<i64: 2>, scalar_prefetch = 0 : i64, scratch_operands = 1 : i64, tpu.core_type = #tpu.core_type<tc>, window_params = [{transform_indices = @transform_0, window_bounds = array<i64: 1, 256, 4>}, {pipeline_mode = #tpu.pipeline_mode<synchronous>, transform_indices = @transform_1, window_bounds = array<i64: 9, 4, 4>}, {pipeline_mode = #tpu.pipeline_mode<synchronous>, transform_indices = @transform_2, window_bounds = array<i64: 1, 4>}, {pipeline_mode = #tpu.pipeline_mode<synchronous>, transform_indices = @transform_3, window_bounds = array<i64: 9, 4, 4>}, {pipeline_mode = #tpu.pipeline_mode<synchronous>, transform_indices = @transform_4, window_bounds = array<i64: 1, 4>}, {pipeline_mode = #tpu.pipeline_mode<synchronous>, transform_indices = @transform_5, window_bounds = array<i64: 256, 1>}, {pipeline_mode = #tpu.pipeline_mode<synchronous>, transform_indices = @transform_6, window_bounds = array<i64: 256, 1>}, {transform_indices = @transform_7, window_bounds = array<i64: 1, 256, 4>}]} {
    %c0 = arith.constant 0 : index
    %c0_0 = arith.constant 0 : index
    %0 = vector.load %arg6[%c0, %c0_0] : memref<256x1xf32, #tpu.memory_space<vmem>>, vector<256x1xf32>
    %c0_1 = arith.constant 0 : index
    %c0_2 = arith.constant 0 : index
    %1 = vector.load %arg7[%c0_1, %c0_2] : memref<256x1xf32, #tpu.memory_space<vmem>>, vector<256x1xf32>
    %c0_3 = arith.constant 0 : index
    %c0_4 = arith.constant 0 : index
    %c0_5 = arith.constant 0 : index
    %2 = vector.load %arg1[%c0_3, %c0_4, %c0_5] : memref<1x256x4xbf16, #tpu.memory_space<vmem>>, vector<1x256x4xbf16>
    %3 = vector.shape_cast %2 : vector<1x256x4xbf16> to vector<256x4xbf16>
    %cst = arith.constant 0.000000e+00 : bf16
    %4 = vector.broadcast %cst : bf16 to vector<290x4xbf16>
    %c0_6 = arith.constant 0 : index
    %c0_7 = arith.constant 0 : index
    %5 = vector.load %arg9[%c0_6, %c0_7] : memref<290x4xbf16, #tpu.memory_space<vmem>>, vector<290x4xbf16>
    tpu.vector_store %arg9[%c0_6, %c0_7], %4 {strides = array<i32>} : memref<290x4xbf16, #tpu.memory_space<vmem>>, vector<290x4xbf16>,
    %c17 = arith.constant 17 : index
    %c0_8 = arith.constant 0 : index
    %6 = vector.load %arg9[%c17, %c0_8] : memref<290x4xbf16, #tpu.memory_space<vmem>>, vector<256x4xbf16>
    tpu.vector_store %arg9[%c17, %c0_8], %3 {strides = array<i32>} : memref<290x4xbf16, #tpu.memory_space<vmem>>, vector<256x4xbf16>,
    %c0_9 = arith.constant 0 : index
    %c0_10 = arith.constant 0 : index
    %7 = vector.load %arg3[%c0_9, %c0_10] : memref<1x4xf32, #tpu.memory_space<vmem>>, vector<1x4xf32>
    %cst_11 = arith.constant 0.000000e+00 : f32
    %8 = vector.broadcast %cst_11 : f32 to vector<256x4xf32>
    %cst_12 = arith.constant 0.000000e+00 : f32
    %9 = vector.broadcast %cst_12 : f32 to vector<256x4xf32>
    %c0_13 = arith.constant 0 : index
    %c0_14 = arith.constant 0 : index
    %10 = vector.load %arg9[%c0_13, %c0_14] : memref<290x4xbf16, #tpu.memory_space<vmem>>, vector<256x4xbf16>
    %c0_15 = arith.constant 0 : index
    %c0_16 = arith.constant 0 : index
    %c0_17 = arith.constant 0 : index
    %11 = vector.load %arg2[%c0_15, %c0_16, %c0_17] : memref<9x4x4xbf16, #tpu.memory_space<vmem>>, vector<1x4x4xbf16>
    %12 = vector.shape_cast %11 : vector<1x4x4xbf16> to vector<4x4xbf16>
    %cst_18 = arith.constant dense<0.000000e+00> : vector<256x4xf32>
    %13 = tpu.matmul %10, %12, %cst_18 {dimension_numbers = #tpu.dot_dimension_numbers<[1], [0], [0], [1], [0, 0, 1, 1], [], []>} : vector<256x4xbf16>, vector<4x4xbf16>, vector<256x4xf32> -> vector<256x4xf32>
    %14 = arith.addf %9, %13 : vector<256x4xf32>
    %c16 = arith.constant 16 : index
    %c0_19 = arith.constant 0 : index
    %15 = vector.load %arg9[%c16, %c0_19] : memref<290x4xbf16, #tpu.memory_space<vmem>>, vector<256x4xbf16>
    %c3 = arith.constant 3 : index
    %c0_20 = arith.constant 0 : index
    %c0_21 = arith.constant 0 : index
    %16 = vector.load %arg2[%c3, %c0_20, %c0_21] : memref<9x4x4xbf16, #tpu.memory_space<vmem>>, vector<1x4x4xbf16>
    %17 = vector.shape_cast %16 : vector<1x4x4xbf16> to vector<4x4xbf16>
    %cst_22 = arith.constant dense<0.000000e+00> : vector<256x4xf32>
    %18 = tpu.matmul %15, %17, %cst_22 {dimension_numbers = #tpu.dot_dimension_numbers<[1], [0], [0], [1], [0, 0, 1, 1], [], []>} : vector<256x4xbf16>, vector<4x4xbf16>, vector<256x4xf32> -> vector<256x4xf32>
    %19 = arith.addf %14, %18 : vector<256x4xf32>
    %c32 = arith.constant 32 : index
    %c0_23 = arith.constant 0 : index
    %20 = vector.load %arg9[%c32, %c0_23] : memref<290x4xbf16, #tpu.memory_space<vmem>>, vector<256x4xbf16>
    %c6 = arith.constant 6 : index
    %c0_24 = arith.constant 0 : index
    %c0_25 = arith.constant 0 : index
    %21 = vector.load %arg2[%c6, %c0_24, %c0_25] : memref<9x4x4xbf16, #tpu.memory_space<vmem>>, vector<1x4x4xbf16>
    %22 = vector.shape_cast %21 : vector<1x4x4xbf16> to vector<4x4xbf16>
    %cst_26 = arith.constant dense<0.000000e+00> : vector<256x4xf32>
    %23 = tpu.matmul %20, %22, %cst_26 {dimension_numbers = #tpu.dot_dimension_numbers<[1], [0], [0], [1], [0, 0, 1, 1], [], []>} : vector<256x4xbf16>, vector<4x4xbf16>, vector<256x4xf32> -> vector<256x4xf32>
    %24 = arith.addf %19, %23 : vector<256x4xf32>
    %25 = vector.broadcast %0 : vector<256x1xf32> to vector<256x4xf32>
    %26 = arith.mulf %24, %25 : vector<256x4xf32>
    %27 = arith.addf %8, %26 : vector<256x4xf32>
    %cst_27 = arith.constant 0.000000e+00 : f32
    %28 = vector.broadcast %cst_27 : f32 to vector<256x4xf32>
    %c1 = arith.constant 1 : index
    %c0_28 = arith.constant 0 : index
    %29 = vector.load %arg9[%c1, %c0_28] : memref<290x4xbf16, #tpu.memory_space<vmem>>, vector<256x4xbf16>
    %c1_29 = arith.constant 1 : index
    %c0_30 = arith.constant 0 : index
    %c0_31 = arith.constant 0 : index
    %30 = vector.load %arg2[%c1_29, %c0_30, %c0_31] : memref<9x4x4xbf16, #tpu.memory_space<vmem>>, vector<1x4x4xbf16>
    %31 = vector.shape_cast %30 : vector<1x4x4xbf16> to vector<4x4xbf16>
    %cst_32 = arith.constant dense<0.000000e+00> : vector<256x4xf32>
    %32 = tpu.matmul %29, %31, %cst_32 {dimension_numbers = #tpu.dot_dimension_numbers<[1], [0], [0], [1], [0, 0, 1, 1], [], []>} : vector<256x4xbf16>, vector<4x4xbf16>, vector<256x4xf32> -> vector<256x4xf32>
    %33 = arith.addf %28, %32 : vector<256x4xf32>
    %c17_33 = arith.constant 17 : index
    %c0_34 = arith.constant 0 : index
    %34 = vector.load %arg9[%c17_33, %c0_34] : memref<290x4xbf16, #tpu.memory_space<vmem>>, vector<256x4xbf16>
    %c4 = arith.constant 4 : index
    %c0_35 = arith.constant 0 : index
    %c0_36 = arith.constant 0 : index
    %35 = vector.load %arg2[%c4, %c0_35, %c0_36] : memref<9x4x4xbf16, #tpu.memory_space<vmem>>, vector<1x4x4xbf16>
    %36 = vector.shape_cast %35 : vector<1x4x4xbf16> to vector<4x4xbf16>
    %cst_37 = arith.constant dense<0.000000e+00> : vector<256x4xf32>
    %37 = tpu.matmul %34, %36, %cst_37 {dimension_numbers = #tpu.dot_dimension_numbers<[1], [0], [0], [1], [0, 0, 1, 1], [], []>} : vector<256x4xbf16>, vector<4x4xbf16>, vector<256x4xf32> -> vector<256x4xf32>
    %38 = arith.addf %33, %37 : vector<256x4xf32>
    %c33 = arith.constant 33 : index
    %c0_38 = arith.constant 0 : index
    %39 = vector.load %arg9[%c33, %c0_38] : memref<290x4xbf16, #tpu.memory_space<vmem>>, vector<256x4xbf16>
    %c7 = arith.constant 7 : index
    %c0_39 = arith.constant 0 : index
    %c0_40 = arith.constant 0 : index
    %40 = vector.load %arg2[%c7, %c0_39, %c0_40] : memref<9x4x4xbf16, #tpu.memory_space<vmem>>, vector<1x4x4xbf16>
    %41 = vector.shape_cast %40 : vector<1x4x4xbf16> to vector<4x4xbf16>
    %cst_41 = arith.constant dense<0.000000e+00> : vector<256x4xf32>
    %42 = tpu.matmul %39, %41, %cst_41 {dimension_numbers = #tpu.dot_dimension_numbers<[1], [0], [0], [1], [0, 0, 1, 1], [], []>} : vector<256x4xbf16>, vector<4x4xbf16>, vector<256x4xf32> -> vector<256x4xf32>
    %43 = arith.addf %38, %42 : vector<256x4xf32>
    %44 = arith.addf %27, %43 : vector<256x4xf32>
    %cst_42 = arith.constant 0.000000e+00 : f32
    %45 = vector.broadcast %cst_42 : f32 to vector<256x4xf32>
    %c2 = arith.constant 2 : index
    %c0_43 = arith.constant 0 : index
    %46 = vector.load %arg9[%c2, %c0_43] : memref<290x4xbf16, #tpu.memory_space<vmem>>, vector<256x4xbf16>
    %c2_44 = arith.constant 2 : index
    %c0_45 = arith.constant 0 : index
    %c0_46 = arith.constant 0 : index
    %47 = vector.load %arg2[%c2_44, %c0_45, %c0_46] : memref<9x4x4xbf16, #tpu.memory_space<vmem>>, vector<1x4x4xbf16>
    %48 = vector.shape_cast %47 : vector<1x4x4xbf16> to vector<4x4xbf16>
    %cst_47 = arith.constant dense<0.000000e+00> : vector<256x4xf32>
    %49 = tpu.matmul %46, %48, %cst_47 {dimension_numbers = #tpu.dot_dimension_numbers<[1], [0], [0], [1], [0, 0, 1, 1], [], []>} : vector<256x4xbf16>, vector<4x4xbf16>, vector<256x4xf32> -> vector<256x4xf32>
    %50 = arith.addf %45, %49 : vector<256x4xf32>
    %c18 = arith.constant 18 : index
    %c0_48 = arith.constant 0 : index
    %51 = vector.load %arg9[%c18, %c0_48] : memref<290x4xbf16, #tpu.memory_space<vmem>>, vector<256x4xbf16>
    %c5 = arith.constant 5 : index
    %c0_49 = arith.constant 0 : index
    %c0_50 = arith.constant 0 : index
    %52 = vector.load %arg2[%c5, %c0_49, %c0_50] : memref<9x4x4xbf16, #tpu.memory_space<vmem>>, vector<1x4x4xbf16>
    %53 = vector.shape_cast %52 : vector<1x4x4xbf16> to vector<4x4xbf16>
    %cst_51 = arith.constant dense<0.000000e+00> : vector<256x4xf32>
    %54 = tpu.matmul %51, %53, %cst_51 {dimension_numbers = #tpu.dot_dimension_numbers<[1], [0], [0], [1], [0, 0, 1, 1], [], []>} : vector<256x4xbf16>, vector<4x4xbf16>, vector<256x4xf32> -> vector<256x4xf32>
    %55 = arith.addf %50, %54 : vector<256x4xf32>
    %c34 = arith.constant 34 : index
    %c0_52 = arith.constant 0 : index
    %56 = vector.load %arg9[%c34, %c0_52] : memref<290x4xbf16, #tpu.memory_space<vmem>>, vector<256x4xbf16>
    %c8 = arith.constant 8 : index
    %c0_53 = arith.constant 0 : index
    %c0_54 = arith.constant 0 : index
    %57 = vector.load %arg2[%c8, %c0_53, %c0_54] : memref<9x4x4xbf16, #tpu.memory_space<vmem>>, vector<1x4x4xbf16>
    %58 = vector.shape_cast %57 : vector<1x4x4xbf16> to vector<4x4xbf16>
    %cst_55 = arith.constant dense<0.000000e+00> : vector<256x4xf32>
    %59 = tpu.matmul %56, %58, %cst_55 {dimension_numbers = #tpu.dot_dimension_numbers<[1], [0], [0], [1], [0, 0, 1, 1], [], []>} : vector<256x4xbf16>, vector<4x4xbf16>, vector<256x4xf32> -> vector<256x4xf32>
    %60 = arith.addf %55, %59 : vector<256x4xf32>
    %61 = vector.broadcast %1 : vector<256x1xf32> to vector<256x4xf32>
    %62 = arith.mulf %60, %61 : vector<256x4xf32>
    %63 = arith.addf %44, %62 : vector<256x4xf32>
    %64 = vector.broadcast %7 : vector<1x4xf32> to vector<256x4xf32>
    %65 = arith.addf %63, %64 : vector<256x4xf32>
    %cst_56 = arith.constant 0.000000e+00 : f32
    %66 = vector.broadcast %cst_56 : f32 to vector<256x4xf32>
    %67 = arith.subf %66, %65 : vector<256x4xf32>
    %68 = math.exp %67 : vector<256x4xf32>
    %cst_57 = arith.constant 1.000000e+00 : f32
    %69 = vector.broadcast %cst_57 : f32 to vector<256x4xf32>
    %70 = arith.addf %69, %68 : vector<256x4xf32>
    %cst_58 = arith.constant 1.000000e+00 : f32
    %71 = vector.broadcast %cst_58 : f32 to vector<256x4xf32>
    %72 = arith.divf %71, %70 : vector<256x4xf32>
    %73 = arith.mulf %65, %72 : vector<256x4xf32>
    %74 = arith.truncf %73 : vector<256x4xf32> to vector<256x4xbf16>
    %c17_59 = arith.constant 17 : index
    %c0_60 = arith.constant 0 : index
    %75 = vector.load %arg9[%c17_59, %c0_60] : memref<290x4xbf16, #tpu.memory_space<vmem>>, vector<256x4xbf16>
    tpu.vector_store %arg9[%c17_59, %c0_60], %74 {strides = array<i32>} : memref<290x4xbf16, #tpu.memory_space<vmem>>, vector<256x4xbf16>,
    %c0_61 = arith.constant 0 : index
    %c0_62 = arith.constant 0 : index
    %76 = vector.load %arg5[%c0_61, %c0_62] : memref<1x4xf32, #tpu.memory_space<vmem>>, vector<1x4xf32>
    %cst_63 = arith.constant 0.000000e+00 : f32
    %77 = vector.broadcast %cst_63 : f32 to vector<256x4xf32>
    %cst_64 = arith.constant 0.000000e+00 : f32
    %78 = vector.broadcast %cst_64 : f32 to vector<256x4xf32>
    %c0_65 = arith.constant 0 : index
    %c0_66 = arith.constant 0 : index
    %79 = vector.load %arg9[%c0_65, %c0_66] : memref<290x4xbf16, #tpu.memory_space<vmem>>, vector<256x4xbf16>
    %c0_67 = arith.constant 0 : index
    %c0_68 = arith.constant 0 : index
    %c0_69 = arith.constant 0 : index
    %80 = vector.load %arg4[%c0_67, %c0_68, %c0_69] : memref<9x4x4xbf16, #tpu.memory_space<vmem>>, vector<1x4x4xbf16>
    %81 = vector.shape_cast %80 : vector<1x4x4xbf16> to vector<4x4xbf16>
    %cst_70 = arith.constant dense<0.000000e+00> : vector<256x4xf32>
    %82 = tpu.matmul %79, %81, %cst_70 {dimension_numbers = #tpu.dot_dimension_numbers<[1], [0], [0], [1], [0, 0, 1, 1], [], []>} : vector<256x4xbf16>, vector<4x4xbf16>, vector<256x4xf32> -> vector<256x4xf32>
    %83 = arith.addf %78, %82 : vector<256x4xf32>
    %c16_71 = arith.constant 16 : index
    %c0_72 = arith.constant 0 : index
    %84 = vector.load %arg9[%c16_71, %c0_72] : memref<290x4xbf16, #tpu.memory_space<vmem>>, vector<256x4xbf16>
    %c3_73 = arith.constant 3 : index
    %c0_74 = arith.constant 0 : index
    %c0_75 = arith.constant 0 : index
    %85 = vector.load %arg4[%c3_73, %c0_74, %c0_75] : memref<9x4x4xbf16, #tpu.memory_space<vmem>>, vector<1x4x4xbf16>
    %86 = vector.shape_cast %85 : vector<1x4x4xbf16> to vector<4x4xbf16>
    %cst_76 = arith.constant dense<0.000000e+00> : vector<256x4xf32>
    %87 = tpu.matmul %84, %86, %cst_76 {dimension_numbers = #tpu.dot_dimension_numbers<[1], [0], [0], [1], [0, 0, 1, 1], [], []>} : vector<256x4xbf16>, vector<4x4xbf16>, vector<256x4xf32> -> vector<256x4xf32>
    %88 = arith.addf %83, %87 : vector<256x4xf32>
    %c32_77 = arith.constant 32 : index
    %c0_78 = arith.constant 0 : index
    %89 = vector.load %arg9[%c32_77, %c0_78] : memref<290x4xbf16, #tpu.memory_space<vmem>>, vector<256x4xbf16>
    %c6_79 = arith.constant 6 : index
    %c0_80 = arith.constant 0 : index
    %c0_81 = arith.constant 0 : index
    %90 = vector.load %arg4[%c6_79, %c0_80, %c0_81] : memref<9x4x4xbf16, #tpu.memory_space<vmem>>, vector<1x4x4xbf16>
    %91 = vector.shape_cast %90 : vector<1x4x4xbf16> to vector<4x4xbf16>
    %cst_82 = arith.constant dense<0.000000e+00> : vector<256x4xf32>
    %92 = tpu.matmul %89, %91, %cst_82 {dimension_numbers = #tpu.dot_dimension_numbers<[1], [0], [0], [1], [0, 0, 1, 1], [], []>} : vector<256x4xbf16>, vector<4x4xbf16>, vector<256x4xf32> -> vector<256x4xf32>
    %93 = arith.addf %88, %92 : vector<256x4xf32>
    %94 = vector.broadcast %0 : vector<256x1xf32> to vector<256x4xf32>
    %95 = arith.mulf %93, %94 : vector<256x4xf32>
    %96 = arith.addf %77, %95 : vector<256x4xf32>
    %cst_83 = arith.constant 0.000000e+00 : f32
    %97 = vector.broadcast %cst_83 : f32 to vector<256x4xf32>
    %c1_84 = arith.constant 1 : index
    %c0_85 = arith.constant 0 : index
    %98 = vector.load %arg9[%c1_84, %c0_85] : memref<290x4xbf16, #tpu.memory_space<vmem>>, vector<256x4xbf16>
    %c1_86 = arith.constant 1 : index
    %c0_87 = arith.constant 0 : index
    %c0_88 = arith.constant 0 : index
    %99 = vector.load %arg4[%c1_86, %c0_87, %c0_88] : memref<9x4x4xbf16, #tpu.memory_space<vmem>>, vector<1x4x4xbf16>
    %100 = vector.shape_cast %99 : vector<1x4x4xbf16> to vector<4x4xbf16>
    %cst_89 = arith.constant dense<0.000000e+00> : vector<256x4xf32>
    %101 = tpu.matmul %98, %100, %cst_89 {dimension_numbers = #tpu.dot_dimension_numbers<[1], [0], [0], [1], [0, 0, 1, 1], [], []>} : vector<256x4xbf16>, vector<4x4xbf16>, vector<256x4xf32> -> vector<256x4xf32>
    %102 = arith.addf %97, %101 : vector<256x4xf32>
    %c17_90 = arith.constant 17 : index
    %c0_91 = arith.constant 0 : index
    %103 = vector.load %arg9[%c17_90, %c0_91] : memref<290x4xbf16, #tpu.memory_space<vmem>>, vector<256x4xbf16>
    %c4_92 = arith.constant 4 : index
    %c0_93 = arith.constant 0 : index
    %c0_94 = arith.constant 0 : index
    %104 = vector.load %arg4[%c4_92, %c0_93, %c0_94] : memref<9x4x4xbf16, #tpu.memory_space<vmem>>, vector<1x4x4xbf16>
    %105 = vector.shape_cast %104 : vector<1x4x4xbf16> to vector<4x4xbf16>
    %cst_95 = arith.constant dense<0.000000e+00> : vector<256x4xf32>
    %106 = tpu.matmul %103, %105, %cst_95 {dimension_numbers = #tpu.dot_dimension_numbers<[1], [0], [0], [1], [0, 0, 1, 1], [], []>} : vector<256x4xbf16>, vector<4x4xbf16>, vector<256x4xf32> -> vector<256x4xf32>
    %107 = arith.addf %102, %106 : vector<256x4xf32>
    %c33_96 = arith.constant 33 : index
    %c0_97 = arith.constant 0 : index
    %108 = vector.load %arg9[%c33_96, %c0_97] : memref<290x4xbf16, #tpu.memory_space<vmem>>, vector<256x4xbf16>
    %c7_98 = arith.constant 7 : index
    %c0_99 = arith.constant 0 : index
    %c0_100 = arith.constant 0 : index
    %109 = vector.load %arg4[%c7_98, %c0_99, %c0_100] : memref<9x4x4xbf16, #tpu.memory_space<vmem>>, vector<1x4x4xbf16>
    %110 = vector.shape_cast %109 : vector<1x4x4xbf16> to vector<4x4xbf16>
    %cst_101 = arith.constant dense<0.000000e+00> : vector<256x4xf32>
    %111 = tpu.matmul %108, %110, %cst_101 {dimension_numbers = #tpu.dot_dimension_numbers<[1], [0], [0], [1], [0, 0, 1, 1], [], []>} : vector<256x4xbf16>, vector<4x4xbf16>, vector<256x4xf32> -> vector<256x4xf32>
    %112 = arith.addf %107, %111 : vector<256x4xf32>
    %113 = arith.addf %96, %112 : vector<256x4xf32>
    %cst_102 = arith.constant 0.000000e+00 : f32
    %114 = vector.broadcast %cst_102 : f32 to vector<256x4xf32>
    %c2_103 = arith.constant 2 : index
    %c0_104 = arith.constant 0 : index
    %115 = vector.load %arg9[%c2_103, %c0_104] : memref<290x4xbf16, #tpu.memory_space<vmem>>, vector<256x4xbf16>
    %c2_105 = arith.constant 2 : index
    %c0_106 = arith.constant 0 : index
    %c0_107 = arith.constant 0 : index
    %116 = vector.load %arg4[%c2_105, %c0_106, %c0_107] : memref<9x4x4xbf16, #tpu.memory_space<vmem>>, vector<1x4x4xbf16>
    %117 = vector.shape_cast %116 : vector<1x4x4xbf16> to vector<4x4xbf16>
    %cst_108 = arith.constant dense<0.000000e+00> : vector<256x4xf32>
    %118 = tpu.matmul %115, %117, %cst_108 {dimension_numbers = #tpu.dot_dimension_numbers<[1], [0], [0], [1], [0, 0, 1, 1], [], []>} : vector<256x4xbf16>, vector<4x4xbf16>, vector<256x4xf32> -> vector<256x4xf32>
    %119 = arith.addf %114, %118 : vector<256x4xf32>
    %c18_109 = arith.constant 18 : index
    %c0_110 = arith.constant 0 : index
    %120 = vector.load %arg9[%c18_109, %c0_110] : memref<290x4xbf16, #tpu.memory_space<vmem>>, vector<256x4xbf16>
    %c5_111 = arith.constant 5 : index
    %c0_112 = arith.constant 0 : index
    %c0_113 = arith.constant 0 : index
    %121 = vector.load %arg4[%c5_111, %c0_112, %c0_113] : memref<9x4x4xbf16, #tpu.memory_space<vmem>>, vector<1x4x4xbf16>
    %122 = vector.shape_cast %121 : vector<1x4x4xbf16> to vector<4x4xbf16>
    %cst_114 = arith.constant dense<0.000000e+00> : vector<256x4xf32>
    %123 = tpu.matmul %120, %122, %cst_114 {dimension_numbers = #tpu.dot_dimension_numbers<[1], [0], [0], [1], [0, 0, 1, 1], [], []>} : vector<256x4xbf16>, vector<4x4xbf16>, vector<256x4xf32> -> vector<256x4xf32>
    %124 = arith.addf %119, %123 : vector<256x4xf32>
    %c34_115 = arith.constant 34 : index
    %c0_116 = arith.constant 0 : index
    %125 = vector.load %arg9[%c34_115, %c0_116] : memref<290x4xbf16, #tpu.memory_space<vmem>>, vector<256x4xbf16>
    %c8_117 = arith.constant 8 : index
    %c0_118 = arith.constant 0 : index
    %c0_119 = arith.constant 0 : index
    %126 = vector.load %arg4[%c8_117, %c0_118, %c0_119] : memref<9x4x4xbf16, #tpu.memory_space<vmem>>, vector<1x4x4xbf16>
    %127 = vector.shape_cast %126 : vector<1x4x4xbf16> to vector<4x4xbf16>
    %cst_120 = arith.constant dense<0.000000e+00> : vector<256x4xf32>
    %128 = tpu.matmul %125, %127, %cst_120 {dimension_numbers = #tpu.dot_dimension_numbers<[1], [0], [0], [1], [0, 0, 1, 1], [], []>} : vector<256x4xbf16>, vector<4x4xbf16>, vector<256x4xf32> -> vector<256x4xf32>
    %129 = arith.addf %124, %128 : vector<256x4xf32>
    %130 = vector.broadcast %1 : vector<256x1xf32> to vector<256x4xf32>
    %131 = arith.mulf %129, %130 : vector<256x4xf32>
    %132 = arith.addf %113, %131 : vector<256x4xf32>
    %133 = vector.broadcast %76 : vector<1x4xf32> to vector<256x4xf32>
    %134 = arith.addf %132, %133 : vector<256x4xf32>
    %cst_121 = arith.constant 0.000000e+00 : f32
    %135 = vector.broadcast %cst_121 : f32 to vector<256x4xf32>
    %136 = arith.subf %135, %134 : vector<256x4xf32>
    %137 = math.exp %136 : vector<256x4xf32>
    %cst_122 = arith.constant 1.000000e+00 : f32
    %138 = vector.broadcast %cst_122 : f32 to vector<256x4xf32>
    %139 = arith.addf %138, %137 : vector<256x4xf32>
    %cst_123 = arith.constant 1.000000e+00 : f32
    %140 = vector.broadcast %cst_123 : f32 to vector<256x4xf32>
    %141 = arith.divf %140, %139 : vector<256x4xf32>
    %142 = arith.mulf %134, %141 : vector<256x4xf32>
    %143 = arith.truncf %142 : vector<256x4xf32> to vector<256x4xbf16>
    %c0_124 = arith.constant 0 : index
    %c0_125 = arith.constant 0 : index
    %c0_126 = arith.constant 0 : index
    %144 = vector.load %arg8[%c0_124, %c0_125, %c0_126] : memref<1x256x4xbf16, #tpu.memory_space<vmem>>, vector<1x256x4xbf16>
    %145 = vector.shape_cast %144 : vector<1x256x4xbf16> to vector<256x4xbf16>
    %146 = vector.shape_cast %143 : vector<256x4xbf16> to vector<1x256x4xbf16>
    tpu.vector_store %arg8[%c0_124, %c0_125, %c0_126], %146 {strides = array<i32>} : memref<1x256x4xbf16, #tpu.memory_space<vmem>>, vector<1x256x4xbf16>,
    return
  }
  func.func @transform_0(%arg0: i32) -> (i32, i32, i32) {
    %c0_i32 = arith.constant 0 : i32
    %c0_i32_0 = arith.constant 0 : i32
    %c0_i32_1 = arith.constant 0 : i32
    return %arg0, %c0_i32, %c0_i32_0 : i32, i32, i32
  }
  func.func @transform_1(%arg0: i32) -> (i32, i32, i32) {
    %c0_i32 = arith.constant 0 : i32
    %c0_i32_0 = arith.constant 0 : i32
    %c0_i32_1 = arith.constant 0 : i32
    %c0_i32_2 = arith.constant 0 : i32
    return %c0_i32, %c0_i32_0, %c0_i32_1 : i32, i32, i32
  }
  func.func @transform_2(%arg0: i32) -> (i32, i32) {
    %c0_i32 = arith.constant 0 : i32
    %c0_i32_0 = arith.constant 0 : i32
    %c0_i32_1 = arith.constant 0 : i32
    return %c0_i32, %c0_i32_0 : i32, i32
  }
  func.func @transform_3(%arg0: i32) -> (i32, i32, i32) {
    %c0_i32 = arith.constant 0 : i32
    %c0_i32_0 = arith.constant 0 : i32
    %c0_i32_1 = arith.constant 0 : i32
    %c0_i32_2 = arith.constant 0 : i32
    return %c0_i32, %c0_i32_0, %c0_i32_1 : i32, i32, i32
  }
  func.func @transform_4(%arg0: i32) -> (i32, i32) {
    %c0_i32 = arith.constant 0 : i32
    %c0_i32_0 = arith.constant 0 : i32
    %c0_i32_1 = arith.constant 0 : i32
    return %c0_i32, %c0_i32_0 : i32, i32
  }
  func.func @transform_5(%arg0: i32) -> (i32, i32) {
    %c0_i32 = arith.constant 0 : i32
    %c0_i32_0 = arith.constant 0 : i32
    %c0_i32_1 = arith.constant 0 : i32
    return %c0_i32, %c0_i32_0 : i32, i32
  }
  func.func @transform_6(%arg0: i32) -> (i32, i32) {
    %c0_i32 = arith.constant 0 : i32
    %c0_i32_0 = arith.constant 0 : i32
    %c0_i32_1 = arith.constant 0 : i32
    return %c0_i32, %c0_i32_0 : i32, i32
  }
  func.func @transform_7(%arg0: i32) -> (i32, i32, i32) {
    %c0_i32 = arith.constant 0 : i32
    %c0_i32_0 = arith.constant 0 : i32
    %c0_i32_1 = arith.constant 0 : i32
    return %arg0, %c0_i32, %c0_i32_0 : i32, i32, i32
  }
}

</mosaic_0001>

<bundles_post_ra>
// kernel: c2f_nchw.5
= control target key start
LH: loop header
LB: loop body
LE: loop exit
PB: predicated region body
PF: predicated region fallthrough
CT: control target
= control target key end

     0   :  { %s2401_s24 = smov 0   ;;  %s3092_s0 = inlined_call_operand.vmem [shape: bf16[512,4], index: 0, kind: input, shape index: {}]   ;;  %s3093_s1 = inlined_call_operand.vmem [shape: bf16[512,4], index: 1, kind: input, shape index: {}]   ;;  %s3094_s2 = inlined_call_operand.vmem [shape: bf16[512,4], index: 2, kind: input, shape index: {}]   ;;  %s3095_s3 = inlined_call_operand.vmem [shape: bf16[4,8], index: 3, kind: input, shape index: {}]   ;;  %s3096_s4 = inlined_call_operand.vmem [shape: bf16[4,8], index: 4, kind: input, shape index: {}]   ;;  %s3097_s5 = inlined_call_operand.vmem [shape: bf16[4,8], index: 5, kind: input, shape index: {}]   ;;  %s3098_s6 = inlined_call_operand.vmem [shape: f32[1,8], index: 6, kind: input, shape index: {}]   ;;  %s3099_s7 = inlined_call_operand.vmem [shape: f32[512,8], index: 7, kind: output, shape index: {}]  }
   0x1 LB: > { %s1909_s25 = sadd.s32 4294967295, %s2359_s24   ;;  %p1913_p0 = scmp.ge.s32.totalorder %s2359_s24, 1  ;;  %s2359_s24 = sphi %s2401_s24, %s17_s24  }
   0x2   : > { %p260_p1 = scmp.lt.s32.totalorder %s2359_s24, 3 }
   0x4   : > { %p261_p2 = pnand %p1913_p0, %p260_p1 }
   0x5   : > { %s1914_s30 = sshll.u32 (!%p261_p2), %s1909_s25, 5 }
   0x6   : > { %264 = sbr.rel (%p261_p2) target bundleno = 389 (0x185), region = 48  ;;  %p303_p3 = scmp.lt.s32.totalorder (!%p261_p2), %s1914_s30, 63 }
   0xb   : > { %v392_v0 = vld [vmem:[%s3096_s4] sm:$0x3]  ;;  %vm522_vm0 = vcmask 1041408   ;;  %s3123_s30 = smov (!%p303_p3, %s1914_s30), 63  ;;  %vm473_vm1 = vcmask 31744   ;;  %vm1796_vm6 = vcmask 64512  }
   0xc   : > { %v359_v1 = vld [vmem:[%s3095_s3] sm:$0x3]  ;;  %v524_v2 = vsel %vm522_vm0, %v392_v0, 0  ;;  %s1915_s10 = sshll.u32 %s3123_s30, 2  ;;  %s1921_s22 = sshll.u32 %s3123_s30, 3 }
   0xd   : > { %v744_v3 = vsel %vm522_vm0, %v359_v1, 0  ;;  %v867_v4 = vld [vmem:[%s3097_s5] sm:$0x3]  ;;  %533 = vmatpush.bf16.msra.mxu0 %v524_v2  ;;  %2212 = vmatpush.bf16.msra.mxu3 %v524_v2  ;;  %s2424_s13 = scalar_lea.vmem %s3093_s1, %s1915_s10  ;;  %s2429_s16 = scalar_lea.vmem %s3092_s0, %s1915_s10 }
   0xe   : > { %v997_v5 = vsel %vm522_vm0, %v867_v4, 0  ;;  %753 = vmatpush.bf16.msra.mxu1 %v744_v3  ;;  %v2180_v6 = vld [vmem:[%s2424_s13] sm:$0xff]  ;;  %s2437_s19 = scalar_lea.vmem %s3094_s2, %s1915_s10  ;;  %v2181_v10 = vld [vmem:[%s2424_s13 + $0x8] sm:$0xff]  ;;  %v2182_v14 = vld [vmem:[%s2424_s13 + $0x10] sm:$0xff]  ;;  %s2565_s26 = scalar_lea.vmem %s3099_s7, %s1921_s22 }
   0xf   : > { %1006 = vmatpush.bf16.msra.mxu2 %v997_v5  ;;  %v2192_v7 = vld [vmem:[%s2424_s13 + $0x60] sm:$0xff]  ;;  %v2193_v11 = vld [vmem:[%s2424_s13 + $0x68] sm:$0xff]  ;;  %v2194_v15 = vld [vmem:[%s2424_s13 + $0x70] sm:$0xff] }
  0x10   : > { %v2164_v8 = vld [vmem:[%s2429_s16] sm:$0xff]  ;;  %1986 = vmatmul.msk.bf16.vlgmr.msra.gmra.mxu0 %vm473_vm1, %v2180_v6  ;;  %1998 = vmatmul.msk.bf16.vlgmr.msra.gmra.mxu3 %vm473_vm1, %v2192_v7  ;;  %v2165_v12 = vld [vmem:[%s2429_s16 + $0x8] sm:$0xff]  ;;  %v2166_v16 = vld [vmem:[%s2429_s16 + $0x10] sm:$0xff] }
  0x11   : > { %2213 = vmatpush.bf16.msrb.mxu3 %v744_v3  ;;  %v2196_v9 = vld [vmem:[%s2437_s19] sm:$0xff]  ;;  %2066 = vmatmul.msk.bf16.vlgmr.msra.gmra.mxu1 %vm473_vm1, %v2164_v8  ;;  %v2197_v13 = vld [vmem:[%s2437_s19 + $0x8] sm:$0xff]  ;;  %v2198_v17 = vld [vmem:[%s2437_s19 + $0x10] sm:$0xff] }
  0x12   : > { %2146 = vmatmul.msk.bf16.vlgmr.msra.gmra.mxu2 %vm473_vm1, %v2196_v9  ;;  %v2183_v18 = vld [vmem:[%s2424_s13 + $0x18] sm:$0xff]  ;;  %v2184_v22 = vld [vmem:[%s2424_s13 + $0x20] sm:$0xff]  ;;  %v2185_v26 = vld [vmem:[%s2424_s13 + $0x28] sm:$0xff] }
  0x13   : > { %v2195_v19 = vld [vmem:[%s2424_s13 + $0x78] sm:$0xff]  ;;  %v2176_v23 = vld [vmem:[%s2429_s16 + $0x60] sm:$0xff]  ;;  %v2177_v27 = vld [vmem:[%s2429_s16 + $0x68] sm:$0xff] }
  0x14   : > { %v2167_v20 = vld [vmem:[%s2429_s16 + $0x18] sm:$0xff]  ;;  %v2168_v24 = vld [vmem:[%s2429_s16 + $0x20] sm:$0xff]  ;;  %v2169_v28 = vld [vmem:[%s2429_s16 + $0x28] sm:$0xff] }
  0x15   : > { %2214 = vmatpush.bf16.msra.mxu3 %v997_v5  ;;  %v2199_v21 = vld [vmem:[%s2437_s19 + $0x18] sm:$0xff]  ;;  %v2200_v25 = vld [vmem:[%s2437_s19 + $0x20] sm:$0xff]  ;;  %v2201_v29 = vld [vmem:[%s2437_s19 + $0x28] sm:$0xff] }
  0x16   : > { %v2186_v30 = vld [vmem:[%s2424_s13 + $0x30] sm:$0xff]  ;;  %v2187_v34 = vld [vmem:[%s2424_s13 + $0x38] sm:$0xff]  ;;  %v2188_v38 = vld [vmem:[%s2424_s13 + $0x40] sm:$0xff] }
  0x17   : > { %v2178_v31 = vld [vmem:[%s2429_s16 + $0x70] sm:$0xff]  ;;  %v2179_v35 = vld [vmem:[%s2429_s16 + $0x78] sm:$0xff]  ;;  %v2208_v39 = vld [vmem:[%s2437_s19 + $0x60] sm:$0xff] }
  0x18   : > { %v2170_v32 = vld [vmem:[%s2429_s16 + $0x30] sm:$0xff]  ;;  %v2171_v36 = vld [vmem:[%s2429_s16 + $0x38] sm:$0xff]  ;;  %v2172_v41 = vld [vmem:[%s2429_s16 + $0x40] sm:$0xff] }
  0x19   : > { %v2202_v33 = vld [vmem:[%s2437_s19 + $0x30] sm:$0xff]  ;;  %v2203_v37 = vld [vmem:[%s2437_s19 + $0x38] sm:$0xff]  ;;  %v2204_v42 = vld [vmem:[%s2437_s19 + $0x40] sm:$0xff] }
  0x1a   : > { %v2513_v46 = vld [vmem:[%s3098_s6] ss:$0 sm:$0xff]  ;;  %v2189_v57 = vld [vmem:[%s2424_s13 + $0x48] sm:$0xff] }
  0x1b   : > { %v2209_v58 = vld [vmem:[%s2437_s19 + $0x68] sm:$0xff] }
  0x1c   : > { %v2173_v61 = vld [vmem:[%s2429_s16 + $0x48] sm:$0xff] }
  0x1d   : > { %v2205_v62 = vld [vmem:[%s2437_s19 + $0x48] sm:$0xff] }
  0x20   : > { %1987 = vmatmul.msk.bf16.gmra.mxu0 %vm473_vm1, %v2181_v10  ;;  %1999 = vmatmul.msk.bf16.gmra.mxu3 %vm473_vm1, %v2193_v11 }
  0x21   : > { %2067 = vmatmul.msk.bf16.gmra.mxu1 %vm473_vm1, %v2165_v12 }
  0x22   : > { %2147 = vmatmul.msk.bf16.gmra.mxu2 %vm473_vm1, %v2197_v13 }
  0x30   : > { %1988 = vmatmul.msk.bf16.gmra.mxu0 %vm473_vm1, %v2182_v14  ;;  %2000 = vmatmul.msk.bf16.gmra.mxu3 %vm473_vm1, %v2194_v15 }
  0x31   : > { %2068 = vmatmul.msk.bf16.gmra.mxu1 %vm473_vm1, %v2166_v16 }
  0x32   : > { %2148 = vmatmul.msk.bf16.gmra.mxu2 %vm473_vm1, %v2198_v17 }
  0x40   : > { %1989 = vmatmul.msk.bf16.gmra.mxu0 %vm473_vm1, %v2183_v18  ;;  %2001 = vmatmul.msk.bf16.gmra.mxu3 %vm473_vm1, %v2195_v19 }
  0x41   : > { %2069 = vmatmul.msk.bf16.gmra.mxu1 %vm473_vm1, %v2167_v20  ;;  %v2190_v20 = vld [vmem:[%s2424_s13 + $0x50] sm:$0xff] }
  0x42   : > { %2149 = vmatmul.msk.bf16.gmra.mxu2 %vm473_vm1, %v2199_v21  ;;  %v2210_v21 = vld [vmem:[%s2437_s19 + $0x70] sm:$0xff] }
  0x50   : > { %1990 = vmatmul.msk.bf16.gmra.mxu0 %vm473_vm1, %v2184_v22  ;;  %2078 = vmatmul.msk.bf16.vlgmr.msrb.gmra.mxu3 %vm473_vm1, %v2176_v23 }
  0x51   : > { %2070 = vmatmul.msk.bf16.gmra.mxu1 %vm473_vm1, %v2168_v24 }
  0x52   : > { %2150 = vmatmul.msk.bf16.gmra.mxu2 %vm473_vm1, %v2200_v25  ;;  %v2174_v25 = vld [vmem:[%s2429_s16 + $0x50] sm:$0xff] }
  0x60   : > { %1991 = vmatmul.msk.bf16.gmra.mxu0 %vm473_vm1, %v2185_v26  ;;  %2079 = vmatmul.msk.bf16.gmra.mxu3 %vm473_vm1, %v2177_v27  ;;  %v2206_v26 = vld [vmem:[%s2437_s19 + $0x50] sm:$0xff] }
  0x61   : > { %2071 = vmatmul.msk.bf16.gmra.mxu1 %vm473_vm1, %v2169_v28 }
  0x62   : > { %2151 = vmatmul.msk.bf16.gmra.mxu2 %vm473_vm1, %v2201_v29 }
  0x70   : > { %1992 = vmatmul.msk.bf16.gmra.mxu0 %vm473_vm1, %v2186_v30  ;;  %2080 = vmatmul.msk.bf16.gmra.mxu3 %vm473_vm1, %v2178_v31 }
  0x71   : > { %2072 = vmatmul.msk.bf16.gmra.mxu1 %vm473_vm1, %v2170_v32 }
  0x72   : > { %2152 = vmatmul.msk.bf16.gmra.mxu2 %vm473_vm1, %v2202_v33 }
  0x80   : > { %1993 = vmatmul.msk.bf16.gmra.mxu0 %vm473_vm1, %v2187_v34  ;;  %2081 = vmatmul.msk.bf16.gmra.mxu3 %vm473_vm1, %v2179_v35 }
  0x81   : > { %2073 = vmatmul.msk.bf16.gmra.mxu1 %vm473_vm1, %v2171_v36 }
  0x82   : > { %2153 = vmatmul.msk.bf16.gmra.mxu2 %vm473_vm1, %v2203_v37 }
  0x8d   : > { %v535_v40 = vpop.f32.mrf.mxu0 }
  0x8e   : > { %v755_v43 = vpop.f32.mrf.mxu1 }
  0x8f   : > { %v756_v44 = vadd.f32 %v755_v43, %v535_v40 }
  0x90   : > { %1994 = vmatmul.msk.bf16.gmra.mxu0 %vm473_vm1, %v2188_v38  ;;  %2158 = vmatmul.msk.bf16.vlgmr.msra.gmra.mxu3 %vm473_vm1, %v2208_v39 }
  0x91   : > { %2074 = vmatmul.msk.bf16.gmra.mxu1 %vm473_vm1, %v2172_v41 }
  0x92   : > { %2154 = vmatmul.msk.bf16.gmra.mxu2 %vm473_vm1, %v2204_v42 }
  0x93   : > { %v2508_v45 = vpop.f32.mrf.mxu3 }
  0x95   : > { %v1008_v47 = vpop.f32.mrf.mxu2  ;;  %v537_v49 = vpop.f32.mrf.mxu0 }
  0x96   : > { %v1088_v48 = vadd.f32 %v1008_v47, %v756_v44  ;;  %v757_v50 = vpop.f32.mrf.mxu1 }
  0x97   : > { %v758_v54 = vadd.f32 %v757_v50, %v537_v49 }
  0x98   : > { %v2516_v51 = vadd.f32 %v2513_v46, %v1088_v48 }
  0x9a   : > { %v1156_v52 = vsub.f32 0.0, %v2516_v51 }
  0x9b   : > { %v2519_v55 = vpop.f32.mrf.mxu3 }
  0x9c   : > { %v1188_v53 = vmul.f32 1.442695, %v1156_v52 }
  0x9d   : > { %v1010_v56 = vpop.f32.mrf.mxu2  ;;  %v540_v60 = vpop.f32.mrf.mxu0 }
  0x9e   : > { %2224 = vpow2.f32 %v1188_v53  ;;  %v1089_v59 = vadd.f32 %v1010_v56, %v758_v54  ;;  %v760_v63 = vpop.f32.mrf.mxu1 }
  0x9f   : > { %v761_v2 = vadd.f32 %v760_v63, %v540_v60 }
  0xa0   : > { %v2526_v0 = vadd.f32 %v2513_v46, %v1089_v59  ;;  %1995 = vmatmul.msk.bf16.gmra.mxu0 %vm473_vm1, %v2189_v57  ;;  %2159 = vmatmul.msk.bf16.gmra.mxu3 %vm473_vm1, %v2209_v58 }
  0xa1   : > { %2075 = vmatmul.msk.bf16.gmra.mxu1 %vm473_vm1, %v2173_v61 }
  0xa2   : > { %v1157_v1 = vsub.f32 0.0, %v2526_v0  ;;  %2155 = vmatmul.msk.bf16.gmra.mxu2 %vm473_vm1, %v2205_v62 }
  0xa3   : > { %v2533_v5 = vpop.f32.mrf.mxu3 }
  0xa4   : > { %v2225_v3 = vpop.eup %2224  ;;  %v1190_v4 = vmul.f32 1.442695, %v1157_v1 }
  0xa5   : > { %v1252_v6 = vadd.f32 1.0, %v2225_v3  ;;  %v1013_v7 = vpop.f32.mrf.mxu2  ;;  %v542_v9 = vpop.f32.mrf.mxu0  ;;  %v2191_v3 = vld [vmem:[%s2424_s13 + $0x58] sm:$0xff] }
  0xa6   : > { %2226 = vpow2.f32 %v1190_v4  ;;  %v1090_v8 = vadd.f32 %v1013_v7, %v761_v2  ;;  %v762_v10 = vpop.f32.mrf.mxu1  ;;  %v2211_v4 = vld [vmem:[%s2437_s19 + $0x78] sm:$0xff] }
  0xa7   : > { %2228 = vrcp.f32 %v1252_v6  ;;  %v763_v15 = vadd.f32 %v762_v10, %v542_v9  ;;  %v1295_v30 = vand.u32 2147483648, %v1252_v6  ;;  %v1293_v32 = vand.u32 2147483647, %v1252_v6  ;;  %v2175_v10 = vld [vmem:[%s2429_s16 + $0x58] sm:$0xff] }
  0xa8   : > { %v2536_v11 = vadd.f32 %v2513_v46, %v1090_v8  ;;  %vm1289_vm3 = vweird.f32 %v1252_v6 }
  0xa9   : > { %v1296_v40 = vor.u32 1.1754944e-38, %v1295_v30  ;;  %vm1294_vm5 = vcmp.eq.f32.partialorder %v1293_v32, 8.507059e+37 }
  0xaa   : > { %v1158_v12 = vsub.f32 0.0, %v2536_v11 }
  0xab   : > { %v2539_v16 = vpop.f32.mrf.mxu3 }
  0xac   : > { %v2227_v13 = vpop.eup %2226  ;;  %v1192_v14 = vmul.f32 1.442695, %v1158_v12  ;;  %v2207_v12 = vld [vmem:[%s2437_s19 + $0x58] sm:$0xff] }
  0xad   : > { %v2229_v17 = vpop.eup %2228  ;;  %v2541_v18 = vadd.f32 1.0, %v2227_v13  ;;  %v1015_v19 = vpop.f32.mrf.mxu2 }
  0xae   : > { %v1285_v22 = vmul.f32 %v2229_v17, %v1252_v6  ;;  %2230 = vpow2.f32 %v1192_v14  ;;  %v1091_v23 = vadd.f32 %v1015_v19, %v763_v15  ;;  %v545_v24 = vpop.f32.mrf.mxu0  ;;  %v765_v27 = vpop.f32.mrf.mxu1  ;;  %vm1290_vm2 = vweird.f32 %v2229_v17 }
  0xaf   : > { %2232 = vrcp.f32 %v2541_v18  ;;  %v766_v37 = vadd.f32 %v765_v27, %v545_v24  ;;  %vm1291_vm4 = vmor %vm1289_vm3, %vm1290_vm2  ;;  %v1310_v54 = vand.u32 2147483648, %v2541_v18  ;;  %v1308_v57 = vand.u32 2147483647, %v2541_v18 }
  0xb0   : > { %v1286_v28 = vsub.f32 1.0, %v1285_v22  ;;  %v2549_v29 = vadd.f32 %v2513_v46, %v1091_v23  ;;  %1996 = vmatmul.msk.bf16.gmra.mxu0 %vm473_vm1, %v2190_v20  ;;  %2160 = vmatmul.msk.bf16.gmra.mxu3 %vm473_vm1, %v2210_v21  ;;  %vm1304_vm8 = vweird.f32 %v2541_v18 }
  0xb1   : > { %2076 = vmatmul.msk.bf16.gmra.mxu1 %vm473_vm1, %v2174_v25  ;;  %v1311_v63 = vor.u32 1.1754944e-38, %v1310_v54  ;;  %vm1309_vm10 = vcmp.eq.f32.partialorder %v1308_v57, 8.507059e+37 }
  0xb2   : > { %v1287_v31 = vmul.f32 %v2229_v17, %v1286_v28  ;;  %v1159_v33 = vsub.f32 0.0, %v2549_v29  ;;  %2156 = vmatmul.msk.bf16.gmra.mxu2 %vm473_vm1, %v2206_v26 }
  0xb3   : > { %v2557_v38 = vpop.f32.mrf.mxu3 }
  0xb4   : > { %v2231_v34 = vpop.eup %2230  ;;  %v1288_v35 = vadd.f32 %v2229_v17, %v1287_v31  ;;  %v1194_v36 = vmul.f32 1.442695, %v1159_v33 }
  0xb5   : > { %v2233_v39 = vpop.eup %2232  ;;  %v2559_v41 = vadd.f32 1.0, %v2231_v34  ;;  %v1018_v42 = vpop.f32.mrf.mxu2 }
  0xb6   : > { %v1292_v43 = vsel %vm1291_vm4, %v2229_v17, %v1288_v35  ;;  %v1300_v44 = vmul.f32 %v2233_v39, %v2541_v18  ;;  %2234 = vpow2.f32 %v1194_v36  ;;  %v547_v47 = vpop.f32.mrf.mxu0  ;;  %v767_v49 = vpop.f32.mrf.mxu1  ;;  %v1092_v53 = vadd.f32 %v1018_v42, %v766_v37 }
  0xb7   : > { %v1297_v48 = vsel %vm1294_vm5, %v1296_v40, %v1292_v43  ;;  %2236 = vrcp.f32 %v2559_v41  ;;  %vm1305_vm7 = vweird.f32 %v2233_v39  ;;  %v768_v14 = vadd.f32 %v767_v49, %v547_v47 }
  0xb8   : > { %v1764_v50 = vmul.f32 %v1297_v48, %v2516_v51  ;;  %v1301_v52 = vsub.f32 1.0, %v1300_v44  ;;  %v2574_v58 = vadd.f32 %v2513_v46, %v1092_v53  ;;  %vm1306_vm9 = vmor %vm1304_vm8, %vm1305_vm7  ;;  %v1325_v19 = vand.u32 2147483648, %v2559_v41 }
  0xb9   : > { %v1323_v22 = vand.u32 2147483647, %v2559_v41  ;;  %vm1319_vm12 = vweird.f32 %v2559_v41 }
  0xba   : > { %1797 = vst.msk [vmem:[%s2565_s26] sm:$0xff] %vm1796_vm6, %v1764_v50  ;;  %v1302_v56 = vmul.f32 %v2233_v39, %v1301_v52  ;;  %v1160_v51 = vsub.f32 0.0, %v2574_v58  ;;  %v1326_v27 = vor.u32 1.1754944e-38, %v1325_v19 }
  0xbb   : > { %v2578_v61 = vpop.f32.mrf.mxu3  ;;  %vm1324_vm14 = vcmp.eq.f32.partialorder %v1323_v22, 8.507059e+37 }
  0xbc   : > { %v2235_v59 = vpop.eup %2234  ;;  %v1303_v60 = vadd.f32 %v2233_v39, %v1302_v56  ;;  %v1196_v8 = vmul.f32 1.442695, %v1160_v51 }
  0xbd   : > { %v2237_v62 = vpop.eup %2236  ;;  %v2580_v1 = vadd.f32 1.0, %v2235_v59  ;;  %v1020_v2 = vpop.f32.mrf.mxu2 }
  0xbe   : > { %v1307_v6 = vsel %vm1306_vm9, %v2233_v39, %v1303_v60  ;;  %v1315_v7 = vmul.f32 %v2237_v62, %v2559_v41  ;;  %v550_v9 = vpop.f32.mrf.mxu0  ;;  %v770_v15 = vpop.f32.mrf.mxu1  ;;  %v1093_v20 = vadd.f32 %v1020_v2, %v768_v14  ;;  %vm1320_vm11 = vweird.f32 %v2237_v62 }
  0xbf   : > { %v1312_v13 = vsel %vm1309_vm10, %v1311_v63, %v1307_v6  ;;  %2238 = vrcp.f32 %v2580_v1  ;;  %v771_v23 = vadd.f32 %v770_v15, %v550_v9  ;;  %vm1321_vm13 = vmor %vm1319_vm12, %vm1320_vm11  ;;  %v1338_v44 = vand.u32 2147483647, %v2580_v1 }
  0xc0   : > { %v1765_v17 = vmul.f32 %v1312_v13, %v2526_v0  ;;  %v1316_v18 = vsub.f32 1.0, %v1315_v7  ;;  %2240 = vpow2.f32 %v1196_v8  ;;  %1997 = vmatmul.msk.bf16.gmra.mxu0 %vm473_vm1, %v2191_v3  ;;  %2161 = vmatmul.msk.bf16.gmra.mxu3 %vm473_vm1, %v2211_v4  ;;  %v2598_v0 = vadd.f32 %v2513_v46, %v1093_v20 }
  0xc1   : > { %2077 = vmatmul.msk.bf16.gmra.mxu1 %vm473_vm1, %v2175_v10  ;;  %v1340_v47 = vand.u32 2147483648, %v2580_v1  ;;  %vm1334_vm0 = vweird.f32 %v2580_v1  ;;  %vm1339_vm2 = vcmp.eq.f32.partialorder %v1338_v44, 8.507059e+37 }
  0xc2   : > { %1798 = vst.msk [vmem:[%s2565_s26 + $0x8] sm:$0xff] %vm1796_vm6, %v1765_v17  ;;  %v1317_v21 = vmul.f32 %v2237_v62, %v1316_v18  ;;  %2157 = vmatmul.msk.bf16.gmra.mxu2 %vm473_vm1, %v2207_v12  ;;  %v1161_v28 = vsub.f32 0.0, %v2598_v0 }
  0xc3   : > { %v2601_v25 = vpop.f32.mrf.mxu3  ;;  %v1341_v54 = vor.u32 1.1754944e-38, %v1340_v47 }
  0xc4   : > { %v1318_v24 = vadd.f32 %v2237_v62, %v1317_v21  ;;  %v1198_v39 = vmul.f32 1.442695, %v1161_v28 }
  0xc5   : > { %v2239_v26 = vpop.eup %2238  ;;  %v1023_v30 = vpop.f32.mrf.mxu2 }
  0xc6   : > { %v2241_v31 = vpop.eup %2240  ;;  %v1322_v32 = vsel %vm1321_vm13, %v2237_v62, %v1318_v24  ;;  %v1330_v33 = vmul.f32 %v2239_v26, %v2580_v1  ;;  %v1094_v34 = vadd.f32 %v1023_v30, %v771_v23  ;;  %v552_v35 = vpop.f32.mrf.mxu0  ;;  %vm1335_vm15 = vweird.f32 %v2239_v26 }
  0xc7   : > { %v1327_v36 = vsel %vm1324_vm14, %v1326_v27, %v1322_v32  ;;  %v1256_v37 = vadd.f32 1.0, %v2241_v31  ;;  %v772_v40 = vpop.f32.mrf.mxu1  ;;  %vm1336_vm1 = vmor %vm1334_vm0, %vm1335_vm15 }
  0xc8   : > { %v1766_v41 = vmul.f32 %v1327_v36, %v2536_v11  ;;  %v1331_v42 = vsub.f32 1.0, %v1330_v33  ;;  %v2607_v43 = vadd.f32 %v2513_v46, %v1094_v34  ;;  %v773_v52 = vadd.f32 %v772_v40, %v552_v35 }
  0xc9   : > { %2242 = vrcp.f32 %v1256_v37  ;;  %v1355_v10 = vand.u32 2147483648, %v1256_v37  ;;  %v1353_v14 = vand.u32 2147483647, %v1256_v37  ;;  %vm1349_vm4 = vweird.f32 %v1256_v37 }
  0xca   : > { %1799 = vst.msk [vmem:[%s2565_s26 + $0x10] sm:$0xff] %vm1796_vm6, %v1766_v41  ;;  %v1332_v48 = vmul.f32 %v2239_v26, %v1331_v42  ;;  %2244 = vpow2.f32 %v1198_v39  ;;  %v1162_v49 = vsub.f32 0.0, %v2607_v43 }
  0xcb   : > { %v2615_v53 = vpop.f32.mrf.mxu3  ;;  %v1356_v22 = vor.u32 1.1754944e-38, %v1355_v10  ;;  %vm1354_vm7 = vcmp.eq.f32.partialorder %v1353_v14, 8.507059e+37 }
  0xcc   : > { %v1333_v50 = vadd.f32 %v2239_v26, %v1332_v48  ;;  %v1200_v11 = vmul.f32 1.442695, %v1162_v49 }
  0xcd   : > { %v1025_v56 = vpop.f32.mrf.mxu2 }
  0xce   : > { %v1337_v57 = vsel %vm1336_vm1, %v2239_v26, %v1333_v50  ;;  %2246 = vpow2.f32 %v1200_v11  ;;  %v1095_v59 = vadd.f32 %v1025_v56, %v773_v52  ;;  %v555_v60 = vpop.f32.mrf.mxu0 }
  0xcf   : > { %v2243_v51 = vpop.eup %2242  ;;  %v1342_v62 = vsel %vm1339_vm2, %v1341_v54, %v1337_v57  ;;  %v775_v63 = vpop.f32.mrf.mxu1 }
  0xd0   : > { %v2245_v2 = vpop.eup %2244  ;;  %v1767_v3 = vmul.f32 %v1342_v62, %v2549_v29  ;;  %v1345_v1 = vmul.f32 %v2243_v51, %v1256_v37  ;;  %v2619_v4 = vadd.f32 %v2513_v46, %v1095_v59  ;;  %v776_v9 = vadd.f32 %v775_v63, %v555_v60 }
  0xd1   : > { %v1257_v6 = vadd.f32 1.0, %v2245_v2  ;;  %vm1350_vm3 = vweird.f32 %v2243_v51 }
  0xd2   : > { %1800 = vst.msk [vmem:[%s2565_s26 + $0x18] sm:$0xff] %vm1796_vm6, %v1767_v3  ;;  %v1346_v7 = vsub.f32 1.0, %v1345_v1  ;;  %v1163_v8 = vsub.f32 0.0, %v2619_v4  ;;  %vm1351_vm5 = vmor %vm1349_vm4, %vm1350_vm3 }
  0xd3   : > { %2248 = vrcp.f32 %v1257_v6  ;;  %v2624_v17 = vpop.f32.mrf.mxu3  ;;  %v1368_v35 = vand.u32 2147483647, %v1257_v6  ;;  %v1370_v40 = vand.u32 2147483648, %v1257_v6  ;;  %vm1364_vm9 = vweird.f32 %v1257_v6 }
  0xd4   : > { %v2247_v12 = vpop.eup %2246  ;;  %v1347_v13 = vmul.f32 %v2243_v51, %v1346_v7  ;;  %v1202_v15 = vmul.f32 1.442695, %v1163_v8 }
  0xd5   : > { %v2626_v29 = vadd.f32 1.0, %v2247_v12  ;;  %v1028_v18 = vpop.f32.mrf.mxu2  ;;  %vm1369_vm11 = vcmp.eq.f32.partialorder %v1368_v35, 8.507059e+37  ;;  %v1371_v56 = vor.u32 1.1754944e-38, %v1370_v40 }
  0xd6   : > { %v1348_v19 = vadd.f32 %v2243_v51, %v1347_v13  ;;  %2250 = vpow2.f32 %v1202_v15  ;;  %v1096_v20 = vadd.f32 %v1028_v18, %v776_v9  ;;  %v557_v21 = vpop.f32.mrf.mxu0 }
  0xd7   : > { %2252 = vrcp.f32 %v2626_v29  ;;  %v777_v23 = vpop.f32.mrf.mxu1  ;;  %v1385_v57 = vand.u32 2147483648, %v2626_v29  ;;  %vm1379_vm13 = vweird.f32 %v2626_v29 }
  0xd8   : > { %v1352_v24 = vsel %vm1351_vm5, %v2243_v51, %v1348_v19  ;;  %v2630_v26 = vadd.f32 %v2513_v46, %v1096_v20  ;;  %v778_v42 = vadd.f32 %v777_v23, %v557_v21 }
  0xd9   : > { %v2249_v27 = vpop.eup %2248  ;;  %v1357_v28 = vsel %vm1354_vm7, %v1356_v22, %v1352_v24  ;;  %v1386_v8 = vor.u32 1.1754944e-38, %v1385_v57 }
  0xda   : > { %v1768_v30 = vmul.f32 %v1357_v28, %v2574_v58  ;;  %v1360_v31 = vmul.f32 %v2249_v27, %v1257_v6  ;;  %v1164_v32 = vsub.f32 0.0, %v2630_v26  ;;  %vm1365_vm8 = vweird.f32 %v2249_v27 }
  0xdb   : > { %v817_v37 = vpop.f32.mrf.mxu3  ;;  %vm1366_vm10 = vmor %vm1364_vm9, %vm1365_vm8 }
  0xdc   : > { %v2251_v33 = vpop.eup %2250  ;;  %1801 = vst.msk [vmem:[%s2565_s26 + $0x20] sm:$0xff] %vm1796_vm6, %v1768_v30  ;;  %v1361_v34 = vsub.f32 1.0, %v1360_v31  ;;  %v1204_v36 = vmul.f32 1.442695, %v1164_v32  ;;  %v2639_v44 = vadd.f32 %v817_v37, %v2519_v55  ;;  %v1383_v55 = vand.u32 2147483647, %v2626_v29 }
  0xdd   : > { %v2253_v39 = vpop.eup %2252  ;;  %v2636_v41 = vadd.f32 1.0, %v2251_v33  ;;  %v1030_v47 = vpop.f32.mrf.mxu2 }
  0xde   : > { %v1362_v58 = vmul.f32 %v2249_v27, %v1361_v34  ;;  %v1375_v48 = vmul.f32 %v2253_v39, %v2626_v29  ;;  %2254 = vpow2.f32 %v1204_v36  ;;  %v560_v49 = vpop.f32.mrf.mxu0  ;;  %v1097_v54 = vadd.f32 %v1030_v47, %v778_v42 }
  0xdf   : > { %2256 = vrcp.f32 %v2636_v41  ;;  %v780_v50 = vpop.f32.mrf.mxu1  ;;  %vm1380_vm12 = vweird.f32 %v2253_v39  ;;  %vm1384_vm15 = vcmp.eq.f32.partialorder %v1383_v55, 8.507059e+37  ;;  %v1398_v24 = vand.u32 2147483647, %v2636_v41 }
  0xe0   : > { %v1363_v11 = vadd.f32 %v2249_v27, %v1362_v58  ;;  %v1376_v52 = vsub.f32 1.0, %v1375_v48  ;;  %v2646_v51 = vadd.f32 %v2513_v46, %v1097_v54  ;;  %vm1381_vm14 = vmor %vm1379_vm13, %vm1380_vm12  ;;  %v781_v10 = vadd.f32 %v780_v50, %v560_v49 }
  0xe1   : > { %vm1394_vm1 = vweird.f32 %v2636_v41  ;;  %vm1399_vm3 = vcmp.eq.f32.partialorder %v1398_v24, 8.507059e+37 }
  0xe2   : > { %v1367_v59 = vsel %vm1366_vm10, %v2249_v27, %v1363_v11  ;;  %v1377_v60 = vmul.f32 %v2253_v39, %v1376_v52  ;;  %v1165_v1 = vsub.f32 0.0, %v2646_v51 }
  0xe3   : > { %v1372_v62 = vsel %vm1369_vm11, %v1371_v56, %v1367_v59  ;;  %v820_v6 = vpop.f32.mrf.mxu3 }
  0xe4   : > { %v2255_v63 = vpop.eup %2254  ;;  %v1769_v2 = vmul.f32 %v1372_v62, %v2598_v0  ;;  %v1378_v3 = vadd.f32 %v2253_v39, %v1377_v60  ;;  %v2654_v12 = vadd.f32 %v820_v6, %v2533_v5  ;;  %v1206_v15 = vmul.f32 1.442695, %v1165_v1 }
  0xe5   : > { %v2257_v7 = vpop.eup %2256  ;;  %v2651_v9 = vadd.f32 1.0, %v2255_v63  ;;  %v1033_v13 = vpop.f32.mrf.mxu2  ;;  %v1400_v5 = vand.u32 2147483648, %v2636_v41 }
  0xe6   : > { %1802 = vst.msk [vmem:[%s2565_s26 + $0x28] sm:$0xff] %vm1796_vm6, %v1769_v2  ;;  %v1382_v0 = vsel %vm1381_vm14, %v2253_v39, %v1378_v3  ;;  %v1390_v14 = vmul.f32 %v2257_v7, %v2636_v41  ;;  %v562_v29 = vpop.f32.mrf.mxu0  ;;  %v1098_v22 = vadd.f32 %v1033_v13, %v781_v10  ;;  %vm1395_vm0 = vweird.f32 %v2257_v7 }
  0xe7   : > { %v1387_v18 = vsel %vm1384_vm15, %v1386_v8, %v1382_v0  ;;  %2258 = vrcp.f32 %v2651_v9  ;;  %v782_v19 = vpop.f32.mrf.mxu1  ;;  %vm1396_vm2 = vmor %vm1394_vm1, %vm1395_vm0  ;;  %v1401_v32 = vor.u32 1.1754944e-38, %v1400_v5  ;;  %v1415_v52 = vand.u32 2147483648, %v2651_v9 }
  0xe8   : > { %v1770_v20 = vmul.f32 %v1387_v18, %v2607_v43  ;;  %v1391_v21 = vsub.f32 1.0, %v1390_v14  ;;  %2260 = vpow2.f32 %v1206_v15  ;;  %v2666_v27 = vadd.f32 %v2513_v46, %v1098_v22 }
  0xe9   : > { %v783_v30 = vadd.f32 %v782_v19, %v562_v29  ;;  %vm1409_vm5 = vweird.f32 %v2651_v9  ;;  %v1416_v60 = vor.u32 1.1754944e-38, %v1415_v52 }
  0xea   : > { %1803 = vst.msk [vmem:[%s2565_s26 + $0x30] sm:$0xff] %vm1796_vm6, %v1770_v20  ;;  %v1392_v23 = vmul.f32 %v2257_v7, %v1391_v21  ;;  %v1166_v33 = vsub.f32 0.0, %v2666_v27 }
  0xeb   : > { %v822_v31 = vpop.f32.mrf.mxu3 }
  0xec   : > { %v1393_v28 = vadd.f32 %v2257_v7, %v1392_v23  ;;  %v2671_v34 = vadd.f32 %v822_v31, %v2539_v16  ;;  %v1208_v58 = vmul.f32 1.442695, %v1166_v33  ;;  %v1413_v16 = vand.u32 2147483647, %v2651_v9 }
  0xed   : > { %v2259_v43 = vpop.eup %2258  ;;  %v1035_v35 = vpop.f32.mrf.mxu2 }
  0xee   : > { %v2261_v36 = vpop.eup %2260  ;;  %v1397_v37 = vsel %vm1396_vm2, %v2257_v7, %v1393_v28  ;;  %v1405_v39 = vmul.f32 %v2259_v43, %v2651_v9  ;;  %v1099_v40 = vadd.f32 %v1035_v35, %v783_v30  ;;  %v565_v42 = vpop.f32.mrf.mxu0  ;;  %vm1410_vm4 = vweird.f32 %v2259_v43 }
  0xef   : > { %v1402_v41 = vsel %vm1399_vm3, %v1401_v32, %v1397_v37  ;;  %v1261_v47 = vadd.f32 1.0, %v2261_v36  ;;  %v785_v48 = vpop.f32.mrf.mxu1  ;;  %vm1411_vm7 = vmor %vm1409_vm5, %vm1410_vm4  ;;  %vm1414_vm8 = vcmp.eq.f32.partialorder %v1413_v16, 8.507059e+37 }
  0xf0   : > { %v1771_v49 = vmul.f32 %v1402_v41, %v2619_v4  ;;  %v1406_v50 = vsub.f32 1.0, %v1405_v39  ;;  %v2676_v11 = vadd.f32 %v2513_v46, %v1099_v40  ;;  %v786_v55 = vadd.f32 %v785_v48, %v565_v42 }
  0xf1   : > { %2262 = vrcp.f32 %v1261_v47  ;;  %v1428_v29 = vand.u32 2147483647, %v1261_v47  ;;  %v1430_v18 = vand.u32 2147483648, %v1261_v47  ;;  %vm1424_vm10 = vweird.f32 %v1261_v47 }
  0xf2   : > { %1804 = vst.msk [vmem:[%s2565_s26 + $0x38] sm:$0xff] %vm1796_vm6, %v1771_v49  ;;  %v1407_v54 = vmul.f32 %v2259_v43, %v1406_v50  ;;  %2264 = vpow2.f32 %v1208_v58  ;;  %v1167_v56 = vsub.f32 0.0, %v2676_v11 }
  0xf3   : > { %v825_v59 = vpop.f32.mrf.mxu3  ;;  %vm1429_vm12 = vcmp.eq.f32.partialorder %v1428_v29, 8.507059e+37 }
  0xf4   : > { %v1408_v57 = vadd.f32 %v2259_v43, %v1407_v54  ;;  %v1210_v4 = vmul.f32 1.442695, %v1167_v56  ;;  %v2685_v62 = vadd.f32 %v825_v59, %v2557_v38 }
  0xf5   : > { %v1038_v63 = vpop.f32.mrf.mxu2 }
  0xf6   : > { %v1412_v2 = vsel %vm1411_vm7, %v2259_v43, %v1408_v57  ;;  %2266 = vpow2.f32 %v1210_v4  ;;  %v1100_v3 = vadd.f32 %v1038_v63, %v786_v55  ;;  %v567_v1 = vpop.f32.mrf.mxu0  ;;  %v1431_v43 = vor.u32 1.1754944e-38, %v1430_v18 }
  0xf7   : > { %v2263_v6 = vpop.eup %2262  ;;  %v1417_v7 = vsel %vm1414_vm8, %v1416_v60, %v1412_v2  ;;  %v787_v8 = vpop.f32.mrf.mxu1 }
  0xf8   : > { %v2265_v10 = vpop.eup %2264  ;;  %v1772_v9 = vmul.f32 %v1417_v7, %v2630_v26  ;;  %v1420_v13 = vmul.f32 %v2263_v6, %v1261_v47  ;;  %v2689_v0 = vadd.f32 %v2513_v46, %v1100_v3  ;;  %vm1425_vm9 = vweird.f32 %v2263_v6 }
  0xf9   : > { %v1262_v14 = vadd.f32 1.0, %v2265_v10  ;;  %v788_v5 = vadd.f32 %v787_v8, %v567_v1  ;;  %vm1426_vm11 = vmor %vm1424_vm10, %vm1425_vm9 }
  0xfa   : > { %1805 = vst.msk [vmem:[%s2565_s26 + $0x40] sm:$0xff] %vm1796_vm6, %v1772_v9  ;;  %v1421_v38 = vsub.f32 1.0, %v1420_v13  ;;  %v1168_v15 = vsub.f32 0.0, %v2689_v0 }
  0xfb   : > { %2268 = vrcp.f32 %v1262_v14  ;;  %v827_v22 = vpop.f32.mrf.mxu3  ;;  %v1443_v50 = vand.u32 2147483647, %v1262_v14  ;;  %v1445_v16 = vand.u32 2147483648, %v1262_v14  ;;  %vm1439_vm14 = vweird.f32 %v1262_v14 }
  0xfc   : > { %v2267_v19 = vpop.eup %2266  ;;  %v1422_v20 = vmul.f32 %v2263_v6, %v1421_v38  ;;  %v1212_v21 = vmul.f32 1.442695, %v1168_v15  ;;  %v2697_v23 = vadd.f32 %v827_v22, %v2578_v61 }
  0xfd   : > { %v2694_v26 = vadd.f32 1.0, %v2267_v19  ;;  %v1040_v24 = vpop.f32.mrf.mxu2  ;;  %vm1444_vm0 = vcmp.eq.f32.partialorder %v1443_v50, 8.507059e+37  ;;  %v1446_v2 = vor.u32 1.1754944e-38, %v1445_v16 }
  0xfe   : > { %v1423_v28 = vadd.f32 %v2263_v6, %v1422_v20  ;;  %2270 = vpow2.f32 %v1212_v21  ;;  %v1101_v30 = vadd.f32 %v1040_v24, %v788_v5  ;;  %v570_v31 = vpop.f32.mrf.mxu0 }
  0xff   : > { %2272 = vrcp.f32 %v2694_v26  ;;  %v790_v32 = vpop.f32.mrf.mxu1  ;;  %v1460_v3 = vand.u32 2147483648, %v2694_v26  ;;  %vm1454_vm2 = vweird.f32 %v2694_v26 }
 0x100   : > { %v1427_v33 = vsel %vm1426_vm11, %v2263_v6, %v1423_v28  ;;  %v2701_v35 = vadd.f32 %v2513_v46, %v1101_v30  ;;  %v791_v58 = vadd.f32 %v790_v32, %v570_v31 }
 0x101   : > { %v2269_v36 = vpop.eup %2268  ;;  %v1432_v61 = vsel %vm1429_vm12, %v1431_v43, %v1427_v33  ;;  %v1461_v29 = vor.u32 1.1754944e-38, %v1460_v3 }
 0x102   : > { %v1773_v37 = vmul.f32 %v1432_v61, %v2646_v51  ;;  %v1435_v39 = vmul.f32 %v2269_v36, %v1262_v14  ;;  %v1169_v40 = vsub.f32 0.0, %v2701_v35  ;;  %vm1440_vm13 = vweird.f32 %v2269_v36 }
 0x103   : > { %v830_v48 = vpop.f32.mrf.mxu3  ;;  %vm1441_vm15 = vmor %vm1439_vm14, %vm1440_vm13  ;;  %v816_v61 = vadd.f32 %v2624_v17, %v2508_v45 }
 0x104   : > { %v2271_v42 = vpop.eup %2270  ;;  %1806 = vst.msk [vmem:[%s2565_s26 + $0x48] sm:$0xff] %vm1796_vm6, %v1773_v37  ;;  %v1436_v41 = vsub.f32 1.0, %v1435_v39  ;;  %v1214_v47 = vmul.f32 1.442695, %v1169_v40  ;;  %v2710_v54 = vadd.f32 %v830_v48, %v2601_v25  ;;  %v1458_v25 = vand.u32 2147483647, %v2694_v26 }
 0x105   : > { %v2273_v49 = vpop.eup %2272  ;;  %v2707_v52 = vadd.f32 1.0, %v2271_v42  ;;  %v1043_v56 = vpop.f32.mrf.mxu2 }
 0x106   : > { %v1437_v51 = vmul.f32 %v2269_v36, %v1436_v41  ;;  %v1450_v55 = vmul.f32 %v2273_v49, %v2694_v26  ;;  %2274 = vpow2.f32 %v1214_v47  ;;  %v572_v57 = vpop.f32.mrf.mxu0  ;;  %v1102_v63 = vadd.f32 %v1043_v56, %v791_v58 }
 0x107   : > { %2276 = vrcp.f32 %v2707_v52  ;;  %v792_v4 = vpop.f32.mrf.mxu1  ;;  %vm1455_vm1 = vweird.f32 %v2273_v49  ;;  %vm1459_vm4 = vcmp.eq.f32.partialorder %v1458_v25, 8.507059e+37  ;;  %v1473_v33 = vand.u32 2147483647, %v2707_v52 }
 0x108   : > { %v1438_v59 = vadd.f32 %v2269_v36, %v1437_v51  ;;  %v1451_v60 = vsub.f32 1.0, %v1450_v55  ;;  %v2717_v7 = vadd.f32 %v2513_v46, %v1102_v63  ;;  %vm1456_vm3 = vmor %vm1454_vm2, %vm1455_vm1  ;;  %v793_v24 = vadd.f32 %v792_v4, %v572_v57 }
 0x109   : > { %vm1469_vm7 = vweird.f32 %v2707_v52  ;;  %vm1474_vm9 = vcmp.eq.f32.partialorder %v1473_v33, 8.507059e+37 }
 0x10a   : > { %v1442_v1 = vsel %vm1441_vm15, %v2269_v36, %v1438_v59  ;;  %v1452_v6 = vmul.f32 %v2273_v49, %v1451_v60  ;;  %v1170_v14 = vsub.f32 0.0, %v2717_v7 }
 0x10b   : > { %v1447_v8 = vsel %vm1444_vm0, %v1446_v2, %v1442_v1  ;;  %v832_v38 = vpop.f32.mrf.mxu3 }
 0x10c   : > { %v2275_v10 = vpop.eup %2274  ;;  %v1774_v9 = vmul.f32 %v1447_v8, %v2666_v27  ;;  %v1453_v13 = vadd.f32 %v2273_v49, %v1452_v6  ;;  %v2725_v19 = vadd.f32 %v832_v38, %v2615_v53  ;;  %v1216_v5 = vmul.f32 1.442695, %v1170_v14 }
 0x10d   : > { %v2277_v15 = vpop.eup %2276  ;;  %v2722_v18 = vadd.f32 1.0, %v2275_v10  ;;  %v1045_v20 = vpop.f32.mrf.mxu2  ;;  %v1475_v53 = vand.u32 2147483648, %v2707_v52 }
 0x10e   : > { %1807 = vst.msk [vmem:[%s2565_s26 + $0x50] sm:$0xff] %vm1796_vm6, %v1774_v9  ;;  %v1457_v21 = vsel %vm1456_vm3, %v2273_v49, %v1453_v13  ;;  %v1465_v27 = vmul.f32 %v2277_v15, %v2707_v52  ;;  %v575_v22 = vpop.f32.mrf.mxu0  ;;  %v1103_v43 = vadd.f32 %v1045_v20, %v793_v24  ;;  %vm1470_vm5 = vweird.f32 %v2277_v15 }
 0x10f   : > { %v1462_v26 = vsel %vm1459_vm4, %v1461_v29, %v1457_v21  ;;  %2278 = vrcp.f32 %v2722_v18  ;;  %v795_v28 = vpop.f32.mrf.mxu1  ;;  %vm1471_vm8 = vmor %vm1469_vm7, %vm1470_vm5  ;;  %v1476_v42 = vor.u32 1.1754944e-38, %v1475_v53  ;;  %v1488_v60 = vand.u32 2147483647, %v2722_v18 }
 0x110   : > { %v1775_v30 = vmul.f32 %v1462_v26, %v2676_v11  ;;  %v1466_v31 = vsub.f32 1.0, %v1465_v27  ;;  %2280 = vpow2.f32 %v1216_v5  ;;  %v796_v36 = vadd.f32 %v795_v28, %v575_v22 }
 0x111   : > { %v2739_v37 = vadd.f32 %v2513_v46, %v1103_v43  ;;  %v1490_v63 = vand.u32 2147483648, %v2722_v18  ;;  %vm1484_vm11 = vweird.f32 %v2722_v18  ;;  %vm1489_vm13 = vcmp.eq.f32.partialorder %v1488_v60, 8.507059e+37 }
 0x112   : > { %1808 = vst.msk [vmem:[%s2565_s26 + $0x58] sm:$0xff] %vm1796_vm6, %v1775_v30  ;;  %v1467_v32 = vmul.f32 %v2277_v15, %v1466_v31 }
 0x113   : > { %v1068_v11 = vpop.f32.mrf.mxu3  ;;  %v1171_v41 = vsub.f32 0.0, %v2739_v37  ;;  %v1491_v9 = vor.u32 1.1754944e-38, %v1490_v63 }
 0x114   : > { %v1468_v39 = vadd.f32 %v2277_v15, %v1467_v32  ;;  %v1112_v58 = vadd.f32 %v1068_v11, %v816_v61 }
 0x115   : > { %v2279_v40 = vpop.eup %2278  ;;  %v1048_v47 = vpop.f32.mrf.mxu2  ;;  %v1218_v52 = vmul.f32 1.442695, %v1171_v41 }
 0x116   : > { %v2281_v48 = vpop.eup %2280  ;;  %v1472_v49 = vsel %vm1471_vm8, %v2277_v15, %v1468_v39  ;;  %v1480_v45 = vmul.f32 %v2279_v40, %v2722_v18  ;;  %v1104_v17 = vadd.f32 %v1048_v47, %v796_v36  ;;  %v577_v50 = vpop.f32.mrf.mxu0  ;;  %v2747_v51 = vadd.f32 %v2513_v46, %v1112_v58 }
 0x117   : > { %v1477_v16 = vsel %vm1474_vm9, %v1476_v42, %v1472_v49  ;;  %v2744_v56 = vadd.f32 1.0, %v2281_v48  ;;  %v797_v55 = vpop.f32.mrf.mxu1  ;;  %vm1485_vm10 = vweird.f32 %v2279_v40 }
 0x118   : > { %v1776_v57 = vmul.f32 %v1477_v16, %v2689_v0  ;;  %v1481_v4 = vsub.f32 1.0, %v1480_v45  ;;  %v2751_v59 = vadd.f32 %v2513_v46, %v1104_v17  ;;  %v1180_v3 = vsub.f32 0.0, %v2747_v51  ;;  %vm1486_vm12 = vmor %vm1484_vm11, %vm1485_vm10 }
 0x119   : > { %2282 = vrcp.f32 %v2744_v56  ;;  %v798_v8 = vadd.f32 %v797_v55, %v577_v50  ;;  %v1505_v24 = vand.u32 2147483648, %v2744_v56  ;;  %vm1499_vm15 = vweird.f32 %v2744_v56 }
 0x11a   : > { %1809 = vst.msk [vmem:[%s2565_s26 + $0x60] sm:$0xff] %vm1796_vm6, %v1776_v57  ;;  %v1482_v2 = vmul.f32 %v2279_v40, %v1481_v4  ;;  %2284 = vpow2.f32 %v1218_v52  ;;  %v1172_v25 = vsub.f32 0.0, %v2751_v59  ;;  %v1236_v6 = vmul.f32 1.442695, %v1180_v3 }
 0x11b   : > { %v1070_v10 = vpop.f32.mrf.mxu3  ;;  %v1506_v39 = vor.u32 1.1754944e-38, %v1505_v24 }
 0x11c   : > { %v1483_v0 = vadd.f32 %v2279_v40, %v1482_v2  ;;  %v1220_v1 = vmul.f32 1.442695, %v1172_v25  ;;  %v1113_v14 = vadd.f32 %v1070_v10, %v2639_v44  ;;  %v2802_v2 = vld [vmem:[%s3098_s6] ss:$0 sm:$0xff] }
 0x11d   : > { %v1050_v13 = vpop.f32.mrf.mxu2 }
 0x11e   : > { %v1487_v38 = vsel %vm1486_vm12, %v2279_v40, %v1483_v0  ;;  %2286 = vpow2.f32 %v1220_v1  ;;  %v1105_v15 = vadd.f32 %v1050_v13, %v798_v8  ;;  %v580_v29 = vpop.f32.mrf.mxu0  ;;  %v2764_v18 = vadd.f32 %v2513_v46, %v1113_v14 }
 0x11f   : > { %v2283_v20 = vpop.eup %2282  ;;  %v1492_v21 = vsel %vm1489_vm13, %v1491_v9, %v1487_v38  ;;  %2288 = vpow2.f32 %v1236_v6  ;;  %v800_v27 = vpop.f32.mrf.mxu1 }
 0x120   : > { %v2285_v5 = vpop.eup %2284  ;;  %v1777_v22 = vmul.f32 %v1492_v21, %v2701_v35  ;;  %v1495_v26 = vmul.f32 %v2283_v20, %v2744_v56  ;;  %v2769_v44 = vadd.f32 %v2513_v46, %v1105_v15  ;;  %v1181_v53 = vsub.f32 0.0, %v2764_v18 }
 0x121   : > { %v2772_v28 = vadd.f32 1.0, %v2285_v5  ;;  %v801_v43 = vadd.f32 %v800_v27, %v580_v29  ;;  %vm1500_vm14 = vweird.f32 %v2283_v20  ;;  %v1503_v46 = vand.u32 2147483647, %v2744_v56 }
 0x122   : > { %1810 = vst.msk [vmem:[%s2565_s26 + $0x68] sm:$0xff] %vm1796_vm6, %v1777_v22  ;;  %v1496_v30 = vsub.f32 1.0, %v1495_v26  ;;  %v1173_v31 = vsub.f32 0.0, %v2769_v44  ;;  %vm1501_vm0 = vmor %vm1499_vm15, %vm1500_vm14  ;;  %v1238_v48 = vmul.f32 1.442695, %v1181_v53 }
 0x123   : > { %2290 = vrcp.f32 %v2772_v28  ;;  %v1073_v36 = vpop.f32.mrf.mxu3  ;;  %v1518_v11 = vand.u32 2147483647, %v2772_v28  ;;  %v1520_v47 = vand.u32 2147483648, %v2772_v28  ;;  %vm1504_vm1 = vcmp.eq.f32.partialorder %v1503_v46, 8.507059e+37 }
 0x124   : > { %v2287_v35 = vpop.eup %2286  ;;  %v1497_v32 = vmul.f32 %v2283_v20, %v1496_v30  ;;  %v1222_v33 = vmul.f32 1.442695, %v1173_v31  ;;  %v1114_v45 = vadd.f32 %v1073_v36, %v2654_v12  ;;  %vm1514_vm2 = vweird.f32 %v2772_v28 }
 0x125   : > { %v2289_v61 = vpop.eup %2288  ;;  %v2782_v40 = vadd.f32 1.0, %v2287_v35  ;;  %v1053_v42 = vpop.f32.mrf.mxu2  ;;  %vm2793_vm3 = vcmp.eq.f32.partialorder %v1518_v11, 8.507059e+37  ;;  %v1521_v12 = vor.u32 1.1754944e-38, %v1520_v47 }
 0x126   : > { %v1498_v41 = vadd.f32 %v2283_v20, %v1497_v32  ;;  %v2785_v58 = vadd.f32 1.0, %v2289_v61  ;;  %2292 = vpow2.f32 %v1222_v33  ;;  %v1106_v49 = vadd.f32 %v1053_v42, %v801_v43  ;;  %v582_v17 = vpop.f32.mrf.mxu0 }
 0x127   : > { %2294 = vrcp.f32 %v2782_v40  ;;  %v802_v16 = vpop.f32.mrf.mxu1  ;;  %v1533_v60 = vand.u32 2147483647, %v2782_v40  ;;  %v1535_v63 = vand.u32 2147483648, %v2782_v40  ;;  %vm1529_vm4 = vweird.f32 %v2782_v40 }
 0x128   : > { %v1502_v50 = vsel %vm1501_vm0, %v2283_v20, %v1498_v41  ;;  %2296 = vrcp.f32 %v2785_v58  ;;  %v2805_v25 = vadd.f32 %v2802_v2, %v1106_v49  ;;  %v1653_v1 = vand.u32 2147483647, %v2785_v58 }
 0x129   : > { %v2291_v56 = vpop.eup %2290  ;;  %v1507_v52 = vsel %vm1504_vm1, %v1506_v39, %v1502_v50  ;;  %2298 = vpow2.f32 %v1238_v48  ;;  %v803_v6 = vadd.f32 %v802_v16, %v582_v17  ;;  %vm1649_vm5 = vweird.f32 %v2785_v58 }
 0x12a   : > { %v1778_v55 = vmul.f32 %v1507_v52, %v2717_v7  ;;  %v1510_v57 = vmul.f32 %v2291_v56, %v2772_v28  ;;  %v2808_v7 = vadd.f32 %v2802_v2, %v1114_v45  ;;  %v1174_v13 = vsub.f32 0.0, %v2805_v25 }
 0x12b   : > { %v1075_v8 = vpop.f32.mrf.mxu3  ;;  %vm1515_vm7 = vweird.f32 %v2291_v56  ;;  %vm2820_vm8 = vcmp.eq.f32.partialorder %v1533_v60, 8.507059e+37  ;;  %v1536_v5 = vor.u32 1.1754944e-38, %v1535_v63  ;;  %vm2826_vm9 = vcmp.eq.f32.partialorder %v1653_v1, 8.507059e+37 }
 0x12c   : > { %v2293_v3 = vpop.eup %2292  ;;  %1811 = vst.msk [vmem:[%s2565_s26 + $0x70] sm:$0xff] %vm1796_vm6, %v1778_v55  ;;  %v1511_v0 = vsub.f32 1.0, %v1510_v57  ;;  %v1182_v14 = vsub.f32 0.0, %v2808_v7  ;;  %v1655_v31 = vand.u32 2147483648, %v2785_v58  ;;  %vm1516_vm10 = vmor %vm1514_vm2, %vm1515_vm7  ;;  %v1224_v35 = vmul.f32 1.442695, %v1174_v13 }
 0x12d   : > { %v2295_v10 = vpop.eup %2294  ;;  %v2815_v9 = vadd.f32 1.0, %v2293_v3  ;;  %v1055_v38 = vpop.f32.mrf.mxu2  ;;  %v1115_v16 = vadd.f32 %v1075_v8, %v2671_v34 }
 0x12e   : > { %v2297_v15 = vpop.eup %2296  ;;  %v1512_v29 = vmul.f32 %v2291_v56, %v1511_v0  ;;  %v1525_v20 = vmul.f32 %v2295_v10, %v2782_v40  ;;  %v1107_v21 = vadd.f32 %v1055_v38, %v803_v6  ;;  %v1240_v32 = vmul.f32 1.442695, %v1182_v14  ;;  %v585_v33 = vpop.f32.mrf.mxu0 }
 0x12f   : > { %v1645_v22 = vmul.f32 %v2297_v15, %v2785_v58  ;;  %2300 = vrcp.f32 %v2815_v9  ;;  %v2299_v53 = vpop.eup %2298  ;;  %vm1530_vm11 = vweird.f32 %v2295_v10  ;;  %vm1650_vm12 = vweird.f32 %v2297_v15  ;;  %v805_v39 = vpop.f32.mrf.mxu1 }
 0x130   : > { %v1513_v26 = vadd.f32 %v2291_v56, %v1512_v29  ;;  %v1526_v24 = vsub.f32 1.0, %v1525_v20  ;;  %v2834_v46 = vadd.f32 %v2802_v2, %v1107_v21  ;;  %v2838_v41 = vadd.f32 1.0, %v2299_v53  ;;  %vm1531_vm13 = vmor %vm1529_vm4, %vm1530_vm11 }
 0x131   : > { %v1646_v43 = vsub.f32 1.0, %v1645_v22  ;;  %2302 = vpow2.f32 %v1224_v35  ;;  %v1656_v50 = vor.u32 1.1754944e-38, %v1655_v31  ;;  %vm1651_vm14 = vmor %vm1649_vm5, %vm1650_vm12  ;;  %v1548_v55 = vand.u32 2147483647, %v2815_v9 }
 0x132   : > { %v1517_v36 = vsel %vm1516_vm10, %v2291_v56, %v1513_v26  ;;  %v1527_v61 = vmul.f32 %v2295_v10, %v1526_v24  ;;  %2304 = vpow2.f32 %v1240_v32  ;;  %v1175_v48 = vsub.f32 0.0, %v2834_v46 }
 0x133   : > { %v1522_v11 = vsel %vm2793_vm3, %v1521_v12, %v1517_v36  ;;  %v1647_v42 = vmul.f32 %v2297_v15, %v1646_v43  ;;  %v1078_v49 = vpop.f32.mrf.mxu3  ;;  %2306 = vrcp.f32 %v2838_v41  ;;  %v1550_v40 = vand.u32 2147483648, %v2815_v9 }
 0x134   : > { %v1779_v28 = vmul.f32 %v1522_v11, %v2739_v37  ;;  %v1528_v47 = vadd.f32 %v2295_v10, %v1527_v61  ;;  %v1668_v34 = vand.u32 2147483647, %v2838_v41  ;;  %v1226_v12 = vmul.f32 1.442695, %v1175_v48 }
 0x135   : > { %v2301_v45 = vpop.eup %2300  ;;  %v1648_v17 = vadd.f32 %v2297_v15, %v1647_v42  ;;  %v1058_v56 = vpop.f32.mrf.mxu2  ;;  %v1670_v3 = vand.u32 2147483648, %v2838_v41  ;;  %v2863_v6 = vadd.f32 %v2802_v2, %v1115_v16  ;;  %v806_v8 = vadd.f32 %v805_v39, %v585_v33 }
 0x136   : > { %1812 = vst.msk [vmem:[%s2565_s26 + $0x78] sm:$0xff] %vm1796_vm6, %v1779_v28  ;;  %v1532_v52 = vsel %vm1531_vm13, %v2295_v10, %v1528_v47  ;;  %v1540_v37 = vmul.f32 %v2301_v45, %v2815_v9  ;;  %2308 = vpow2.f32 %v1226_v12  ;;  %vm1544_vm15 = vweird.f32 %v2815_v9  ;;  %v587_v29 = vpop.f32.mrf.mxu0 }
 0x137   : > { %v1537_v57 = vsel %vm2820_vm8, %v1536_v5, %v1532_v52  ;;  %v1652_v4 = vsel %vm1651_vm14, %v2297_v15, %v1648_v17  ;;  %v2303_v0 = vpop.eup %2302  ;;  %vm1545_vm0 = vweird.f32 %v2301_v45  ;;  %vm2872_vm1 = vcmp.eq.f32.partialorder %v1548_v55, 8.507059e+37  ;;  %v807_v5 = vpop.f32.mrf.mxu1 }
 0x138   : > { %v1780_v60 = vmul.f32 %v1537_v57, %v2751_v59  ;;  %v1657_v58 = vsel %vm2826_vm9, %v1656_v50, %v1652_v4  ;;  %v1541_v63 = vsub.f32 1.0, %v1540_v37  ;;  %v2305_v10 = vpop.eup %2304  ;;  %v2868_v59 = vadd.f32 1.0, %v2303_v0  ;;  %vm1546_vm4 = vmor %vm1544_vm15, %vm1545_vm0 }
 0x139   : > { %v1788_v1 = vmul.f32 %v1657_v58, %v2747_v51  ;;  %v2307_v14 = vpop.eup %2306  ;;  %v1551_v51 = vor.u32 1.1754944e-38, %v1550_v40  ;;  %vm1664_vm2 = vweird.f32 %v2838_v41  ;;  %v2877_v15 = vadd.f32 1.0, %v2305_v10 }
 0x13a   : > { %1813 = vst.msk [vmem:[%s2565_s26 + $0x80] sm:$0xff] %vm1796_vm6, %v1780_v60  ;;  %v1542_v13 = vmul.f32 %v2301_v45, %v1541_v63  ;;  %v1660_v21 = vmul.f32 %v2307_v14, %v2838_v41  ;;  %vm2880_vm3 = vcmp.eq.f32.partialorder %v1668_v34, 8.507059e+37  ;;  %2310 = vrcp.f32 %v2868_v59 }
 0x13b   : > { %1821 = vst.msk [vmem:[%s2565_s26 + $0xc0] sm:$0xff] %vm1796_vm6, %v1788_v1  ;;  %v1080_v22 = vpop.f32.mrf.mxu3  ;;  %v1671_v26 = vor.u32 1.1754944e-38, %v1670_v3  ;;  %2312 = vrcp.f32 %v2877_v15  ;;  %v1183_v24 = vsub.f32 0.0, %v2863_v6  ;;  %v1108_v30 = vadd.f32 %v1058_v56, %v806_v8 }
 0x13c   : > { %v1543_v20 = vadd.f32 %v2301_v45, %v1542_v13  ;;  %v1661_v53 = vsub.f32 1.0, %v1660_v21  ;;  %vm1665_vm5 = vweird.f32 %v2307_v14  ;;  %v1116_v43 = vadd.f32 %v1078_v49, %v2685_v62  ;;  %v2309_v32 = vpop.eup %2308 }
 0x13d   : > { %v1060_v35 = vpop.f32.mrf.mxu2  ;;  %v1563_v9 = vand.u32 2147483647, %v2868_v59  ;;  %v1565_v36 = vand.u32 2147483648, %v2868_v59  ;;  %v1683_v61 = vand.u32 2147483647, %v2877_v15  ;;  %v1685_v42 = vand.u32 2147483648, %v2877_v15  ;;  %vm1666_vm9 = vmor %vm1664_vm2, %vm1665_vm5 }
 0x13e   : > { %v1547_v31 = vsel %vm1546_vm4, %v2301_v45, %v1543_v20  ;;  %v1662_v11 = vmul.f32 %v2307_v14, %v1661_v53  ;;  %v2898_v28 = vadd.f32 1.0, %v2309_v32  ;;  %vm1559_vm7 = vweird.f32 %v2868_v59  ;;  %v590_v12 = vpop.f32.mrf.mxu0 }
 0x13f   : > { %v1552_v33 = vsel %vm2872_vm1, %v1551_v51, %v1547_v31  ;;  %v1242_v62 = vmul.f32 1.442695, %v1183_v24  ;;  %v2902_v47 = vadd.f32 %v2802_v2, %v1108_v30  ;;  %v808_v48 = vadd.f32 %v807_v5, %v587_v29  ;;  %v810_v0 = vpop.f32.mrf.mxu1 }
 0x140   : > { %v1781_v39 = vmul.f32 %v1552_v33, %v2769_v44  ;;  %v2311_v49 = vpop.eup %2310  ;;  %v1663_v45 = vadd.f32 %v2307_v14, %v1662_v11  ;;  %vm1679_vm8 = vweird.f32 %v2877_v15  ;;  %2314 = vrcp.f32 %v2898_v28 }
 0x141   : > { %v2909_v44 = vadd.f32 %v2802_v2, %v1116_v43  ;;  %v2313_v17 = vpop.eup %2312  ;;  %v1555_v50 = vmul.f32 %v2311_v49, %v2868_v59  ;;  %vm2915_vm10 = vcmp.eq.f32.partialorder %v1563_v9, 8.507059e+37  ;;  %v1566_v56 = vor.u32 1.1754944e-38, %v1565_v36 }
 0x142   : > { %1814 = vst.msk [vmem:[%s2565_s26 + $0x88] sm:$0xff] %vm1796_vm6, %v1781_v39  ;;  %2316 = vpow2.f32 %v1242_v62  ;;  %v1667_v52 = vsel %vm1666_vm9, %v2307_v14, %v1663_v45  ;;  %v1675_v37 = vmul.f32 %v2313_v17, %v2877_v15  ;;  %vm2920_vm11 = vcmp.eq.f32.partialorder %v1683_v61, 8.507059e+37 }
 0x143   : > { %v1686_v40 = vor.u32 1.1754944e-38, %v1685_v42  ;;  %v1578_v57 = vand.u32 2147483647, %v2898_v28  ;;  %v1672_v41 = vsel %vm2880_vm3, %v1671_v26, %v1667_v52  ;;  %v1556_v4 = vsub.f32 1.0, %v1555_v50  ;;  %v1083_v1 = vpop.f32.mrf.mxu3 }
 0x144   : > { %vm1560_vm12 = vweird.f32 %v2311_v49  ;;  %v1176_v34 = vsub.f32 0.0, %v2902_v47  ;;  %v1789_v60 = vmul.f32 %v1672_v41, %v2764_v18  ;;  %v1676_v58 = vsub.f32 1.0, %v1675_v37 }
 0x145   : > { %v1184_v63 = vsub.f32 0.0, %v2909_v44  ;;  %v1109_v3 = vadd.f32 %v1060_v35, %v808_v48  ;;  %v1557_v8 = vmul.f32 %v2311_v49, %v1556_v4  ;;  %v1117_v13 = vadd.f32 %v1080_v22, %v2697_v23  ;;  %v1063_v18 = vpop.f32.mrf.mxu2  ;;  %vm1561_vm14 = vmor %vm1559_vm7, %vm1560_vm12 }
 0x146   : > { %v1228_v10 = vmul.f32 1.442695, %v1176_v34  ;;  %v811_v14 = vadd.f32 %v810_v0, %v590_v12  ;;  %v2315_v38 = vpop.eup %2314  ;;  %1822 = vst.msk [vmem:[%s2565_s26 + $0xc8] sm:$0xff] %vm1796_vm6, %v1789_v60  ;;  %v1677_v51 = vmul.f32 %v2313_v17, %v1676_v58  ;;  %vm1680_vm13 = vweird.f32 %v2313_v17 }
 0x147   : > { %v1244_v29 = vmul.f32 1.442695, %v1184_v63  ;;  %v2934_v20 = vadd.f32 %v2802_v2, %v1109_v3  ;;  %v1558_v27 = vadd.f32 %v2311_v49, %v1557_v8  ;;  %v1570_v5 = vmul.f32 %v2315_v38, %v2898_v28  ;;  %vm1681_vm15 = vmor %vm1679_vm8, %vm1680_vm13  ;;  %v812_v41 = vpop.f32.mrf.mxu1 }
 0x148   : > { %v2317_v21 = vpop.eup %2316  ;;  %2318 = vpow2.f32 %v1228_v10  ;;  %v1118_v26 = vadd.f32 %v1083_v1, %v2710_v54  ;;  %v1678_v23 = vadd.f32 %v2313_v17, %v1677_v51  ;;  %v2948_v53 = vadd.f32 %v2802_v2, %v1117_v13 }
 0x149   : > { %v2941_v22 = vadd.f32 1.0, %v2317_v21  ;;  %2320 = vpow2.f32 %v1244_v29  ;;  %v1177_v24 = vsub.f32 0.0, %v2934_v20  ;;  %v1562_v30 = vsel %vm1561_vm14, %v2311_v49, %v1558_v27 }
 0x14a   : > { %v1571_v31 = vsub.f32 1.0, %v1570_v5  ;;  %v1110_v54 = vadd.f32 %v1063_v18, %v811_v14  ;;  %v1567_v59 = vsel %vm2915_vm10, %v1566_v56, %v1562_v30  ;;  %v1682_v43 = vsel %vm1681_vm15, %v2313_v17, %v1678_v23 }
 0x14b   : > { %v1580_v35 = vand.u32 2147483648, %v2898_v28  ;;  %2322 = vrcp.f32 %v2941_v22  ;;  %v1782_v32 = vmul.f32 %v1567_v59, %v2805_v25  ;;  %v1687_v15 = vsel %vm2920_vm11, %v1686_v40, %v1682_v43 }
 0x14c   : > { %v1572_v33 = vmul.f32 %v2315_v38, %v1571_v31  ;;  %vm1575_vm0 = vweird.f32 %v2315_v38  ;;  %v1790_v9 = vmul.f32 %v1687_v15, %v2808_v7  ;;  %v1230_v36 = vmul.f32 1.442695, %v1177_v24 }
 0x14d   : > { %v1185_v61 = vsub.f32 0.0, %v2948_v53  ;;  %1815 = vst.msk [vmem:[%s2565_s26 + $0x90] sm:$0xff] %vm1796_vm6, %v1782_v32  ;;  %vm1574_vm1 = vweird.f32 %v2898_v28  ;;  %v2963_v42 = vadd.f32 %v2802_v2, %v1110_v54  ;;  %v2966_v25 = vadd.f32 %v2802_v2, %v1118_v26  ;;  %v1065_v58 = vpop.f32.mrf.mxu2  ;;  %v1085_v32 = vpop.f32.mrf.mxu3 }
 0x14e   : > { %v2319_v39 = vpop.eup %2318  ;;  %v1573_v11 = vadd.f32 %v2315_v38, %v1572_v33  ;;  %1823 = vst.msk [vmem:[%s2565_s26 + $0xd0] sm:$0xff] %vm1796_vm6, %v1790_v9  ;;  %vm1576_vm2 = vmor %vm1574_vm1, %vm1575_vm0  ;;  %v1581_v7 = vor.u32 1.1754944e-38, %v1580_v35  ;;  %2324 = vpow2.f32 %v1230_v36  ;;  %vm1579_vm3 = vcmp.eq.f32.partialorder %v1578_v57, 8.507059e+37  ;;  %v592_v57 = vpop.f32.mrf.mxu0 }
 0x14f   : > { %v2321_v62 = vpop.eup %2320  ;;  %v2970_v48 = vadd.f32 1.0, %v2319_v39  ;;  %v1246_v17 = vmul.f32 1.442695, %v1185_v61  ;;  %v1178_v56 = vsub.f32 0.0, %v2963_v42  ;;  %v1186_v52 = vsub.f32 0.0, %v2966_v25 }
 0x150   : > { %v1577_v49 = vsel %vm1576_vm2, %v2315_v38, %v1573_v11  ;;  %v2974_v45 = vadd.f32 1.0, %v2321_v62  ;;  %v1698_v40 = vand.u32 2147483647, %v2941_v22  ;;  %v1700_v28 = vand.u32 2147483648, %v2941_v22 }
 0x151   : > { %v2323_v50 = vpop.eup %2322  ;;  %v1582_v16 = vsel %vm1579_vm3, %v1581_v7, %v1577_v49  ;;  %2326 = vrcp.f32 %v2970_v48  ;;  %v1232_v12 = vmul.f32 1.442695, %v1178_v56  ;;  %v1248_v60 = vmul.f32 1.442695, %v1186_v52 }
 0x152   : > { %v1783_v37 = vmul.f32 %v1582_v16, %v2834_v46  ;;  %v1690_v55 = vmul.f32 %v2323_v50, %v2941_v22  ;;  %2328 = vrcp.f32 %v2974_v45  ;;  %vm1695_vm4 = vweird.f32 %v2323_v50 }
 0x153   : > { %2330 = vpow2.f32 %v1246_v17  ;;  %v813_v3 = vadd.f32 %v812_v41, %v592_v57  ;;  %vm1694_vm5 = vweird.f32 %v2941_v22  ;;  %vm2989_vm7 = vcmp.eq.f32.partialorder %v1698_v40, 8.507059e+37 }
 0x154   : > { %1816 = vst.msk [vmem:[%s2565_s26 + $0x98] sm:$0xff] %vm1796_vm6, %v1783_v37  ;;  %v1691_v4 = vsub.f32 1.0, %v1690_v55  ;;  %v2325_v34 = vpop.eup %2324  ;;  %v1701_v8 = vor.u32 1.1754944e-38, %v1700_v28  ;;  %2332 = vpow2.f32 %v1232_v12  ;;  %vm1696_vm8 = vmor %vm1694_vm5, %vm1695_vm4  ;;  %vm1589_vm9 = vweird.f32 %v2970_v48 }
 0x155   : > { %v2986_v46 = vadd.f32 1.0, %v2325_v34  ;;  %v1111_v14 = vadd.f32 %v1065_v58, %v813_v3  ;;  %v1593_v51 = vand.u32 2147483647, %v2970_v48  ;;  %v1595_v29 = vand.u32 2147483648, %v2970_v48 }
 0x156   : > { %v1692_v63 = vmul.f32 %v2323_v50, %v1691_v4  ;;  %v1713_v26 = vand.u32 2147483647, %v2974_v45  ;;  %v1715_v22 = vand.u32 2147483648, %v2974_v45  ;;  %vm1709_vm12 = vweird.f32 %v2974_v45 }
 0x157   : > { %v2327_v0 = vpop.eup %2326  ;;  %2334 = vrcp.f32 %v2986_v46  ;;  %v3007_v59 = vadd.f32 %v2802_v2, %v1111_v14  ;;  %vm3009_vm11 = vcmp.eq.f32.partialorder %v1593_v51, 8.507059e+37  ;;  %v1596_v39 = vor.u32 1.1754944e-38, %v1595_v29 }
 0x158   : > { %v1693_v10 = vadd.f32 %v2323_v50, %v1692_v63  ;;  %v1585_v13 = vmul.f32 %v2327_v0, %v2970_v48  ;;  %v2329_v38 = vpop.eup %2328  ;;  %2336 = vpow2.f32 %v1248_v60  ;;  %vm1590_vm10 = vweird.f32 %v2327_v0 }
 0x159   : > { %v2331_v18 = vpop.eup %2330  ;;  %v1705_v5 = vmul.f32 %v2329_v38, %v2974_v45  ;;  %vm1710_vm13 = vweird.f32 %v2329_v38  ;;  %v1179_v36 = vsub.f32 0.0, %v3007_v59  ;;  %vm1591_vm14 = vmor %vm1589_vm9, %vm1590_vm10  ;;  %vm3023_vm15 = vcmp.eq.f32.partialorder %v1713_v26, 8.507059e+37 }
 0x15a   : > { %v1697_v21 = vsel %vm1696_vm8, %v2323_v50, %v1693_v10  ;;  %v1586_v27 = vsub.f32 1.0, %v1585_v13  ;;  %v3003_v24 = vadd.f32 1.0, %v2331_v18  ;;  %v2333_v43 = vpop.eup %2332  ;;  %v1716_v62 = vor.u32 1.1754944e-38, %v1715_v22  ;;  %vm1711_vm0 = vmor %vm1709_vm12, %vm1710_vm13 }
 0x15b   : > { %v1702_v23 = vsel %vm2989_vm7, %v1701_v8, %v1697_v21  ;;  %v1706_v54 = vsub.f32 1.0, %v1705_v5  ;;  %v3017_v9 = vadd.f32 1.0, %v2333_v43  ;;  %v1119_v50 = vadd.f32 %v1085_v32, %v2725_v19 }
 0x15c   : > { %v1791_v30 = vmul.f32 %v1702_v23, %v2863_v6  ;;  %v1587_v31 = vmul.f32 %v2327_v0, %v1586_v27  ;;  %2338 = vrcp.f32 %v3003_v24  ;;  %v1608_v56 = vand.u32 2147483647, %v2986_v46 }
 0x15d   : > { %v2335_v15 = vpop.eup %2334  ;;  %v1707_v33 = vmul.f32 %v2329_v38, %v1706_v54  ;;  %2340 = vrcp.f32 %v3017_v9  ;;  %v1610_v52 = vand.u32 2147483648, %v2986_v46  ;;  %v1234_v28 = vmul.f32 1.442695, %v1179_v36 }
 0x15e   : > { %1824 = vst.msk [vmem:[%s2565_s26 + $0xd8] sm:$0xff] %vm1796_vm6, %v1791_v30  ;;  %v1588_v6 = vadd.f32 %v2327_v0, %v1587_v31  ;;  %v2337_v61 = vpop.eup %2336  ;;  %v1600_v7 = vmul.f32 %v2335_v15, %v2986_v46  ;;  %vm1605_vm1 = vweird.f32 %v2335_v15  ;;  %vm1604_vm2 = vweird.f32 %v2986_v46 }
 0x15f   : > { %v1708_v17 = vadd.f32 %v2329_v38, %v1707_v33  ;;  %v3038_v40 = vadd.f32 1.0, %v2337_v61  ;;  %vm1609_vm3 = vcmp.eq.f32.partialorder %v1608_v56, 8.507059e+37  ;;  %v1611_v34 = vor.u32 1.1754944e-38, %v1610_v52  ;;  %vm1606_vm4 = vmor %vm1604_vm2, %vm1605_vm1 }
 0x160   : > { %v1592_v49 = vsel %vm1591_vm14, %v2327_v0, %v1588_v6  ;;  %v1601_v48 = vsub.f32 1.0, %v1600_v7  ;;  %v1728_v58 = vand.u32 2147483647, %v3003_v24  ;;  %v3052_v63 = vadd.f32 %v2802_v2, %v1119_v50 }
 0x161   : > { %v1597_v16 = vsel %vm3009_vm11, %v1596_v39, %v1592_v49  ;;  %v1712_v55 = vsel %vm1711_vm0, %v2329_v38, %v1708_v17  ;;  %2342 = vrcp.f32 %v3038_v40  ;;  %v1730_v3 = vand.u32 2147483648, %v3003_v24 }
 0x162   : > { %v1784_v37 = vmul.f32 %v1597_v16, %v2902_v47  ;;  %v2339_v19 = vpop.eup %2338  ;;  %v1717_v57 = vsel %vm3023_vm15, %v1716_v62, %v1712_v55  ;;  %v1602_v41 = vmul.f32 %v2335_v15, %v1601_v48  ;;  %2344 = vpow2.f32 %v1234_v28 }
 0x163   : > { %v1792_v45 = vmul.f32 %v1717_v57, %v2909_v44  ;;  %v1720_v4 = vmul.f32 %v2339_v19, %v3003_v24  ;;  %v2341_v12 = vpop.eup %2340  ;;  %v1623_v46 = vand.u32 2147483647, %v3017_v9  ;;  %vm1725_vm5 = vweird.f32 %v2339_v19 }
 0x164   : > { %1817 = vst.msk [vmem:[%s2565_s26 + $0xa0] sm:$0xff] %vm1796_vm6, %v1784_v37  ;;  %v1603_v47 = vadd.f32 %v2335_v15, %v1602_v41  ;;  %v1615_v0 = vmul.f32 %v2341_v12, %v3017_v9  ;;  %v1187_v10 = vsub.f32 0.0, %v3052_v63  ;;  %vm1724_vm7 = vweird.f32 %v3003_v24 }
 0x165   : > { %1825 = vst.msk [vmem:[%s2565_s26 + $0xe0] sm:$0xff] %vm1796_vm6, %v1792_v45  ;;  %v1721_v60 = vsub.f32 1.0, %v1720_v4  ;;  %vm1729_vm8 = vcmp.eq.f32.partialorder %v1728_v58, 8.507059e+37  ;;  %v1625_v51 = vand.u32 2147483648, %v3017_v9  ;;  %vm1726_vm9 = vmor %vm1724_vm7, %vm1725_vm5  ;;  %v1731_v18 = vor.u32 1.1754944e-38, %v1730_v3 }
 0x166   : > { %v1607_v44 = vsel %vm1606_vm4, %v2335_v15, %v1603_v47  ;;  %v1616_v14 = vsub.f32 1.0, %v1615_v0  ;;  %v1250_v29 = vmul.f32 1.442695, %v1187_v10  ;;  %vm1620_vm10 = vweird.f32 %v2341_v12 }
 0x167   : > { %v1612_v1 = vsel %vm1609_vm3, %v1611_v34, %v1607_v44  ;;  %v1722_v8 = vmul.f32 %v2339_v19, %v1721_v60  ;;  %v2343_v2 = vpop.eup %2342  ;;  %vm1619_vm11 = vweird.f32 %v3017_v9  ;;  %vm3065_vm12 = vcmp.eq.f32.partialorder %v1623_v46, 8.507059e+37 }
 0x168   : > { %v1785_v13 = vmul.f32 %v1612_v1, %v2934_v20  ;;  %v1617_v21 = vmul.f32 %v2341_v12, %v1616_v14  ;;  %v1735_v27 = vmul.f32 %v2343_v2, %v3038_v40  ;;  %v2345_v5 = vpop.eup %2344  ;;  %2346 = vpow2.f32 %v1250_v29  ;;  %vm1621_vm13 = vmor %vm1619_vm11, %vm1620_vm10 }
 0x169   : > { %v1723_v38 = vadd.f32 %v2339_v19, %v1722_v8  ;;  %v1275_v30 = vadd.f32 1.0, %v2345_v5  ;;  %v1626_v54 = vor.u32 1.1754944e-38, %v1625_v51  ;;  %v1743_v43 = vand.u32 2147483647, %v3038_v40 }
 0x16a   : > { %1818 = vst.msk [vmem:[%s2565_s26 + $0xa8] sm:$0xff] %vm1796_vm6, %v1785_v13  ;;  %v1618_v22 = vadd.f32 %v2341_v12, %v1617_v21  ;;  %v1736_v24 = vsub.f32 1.0, %v1735_v27  ;;  %v1745_v35 = vand.u32 2147483648, %v3038_v40  ;;  %vm1740_vm14 = vweird.f32 %v2343_v2 }
 0x16b   : > { %v1727_v26 = vsel %vm1726_vm9, %v2339_v19, %v1723_v38  ;;  %2348 = vrcp.f32 %v1275_v30  ;;  %vm1739_vm15 = vweird.f32 %v3038_v40  ;;  %vm1744_vm1 = vcmp.eq.f32.partialorder %v1743_v43, 8.507059e+37 }
 0x16c   : > { %v1732_v23 = vsel %vm1729_vm8, %v1731_v18, %v1727_v26  ;;  %v1622_v32 = vsel %vm1621_vm13, %v2341_v12, %v1618_v22  ;;  %v1737_v15 = vmul.f32 %v2343_v2, %v1736_v24  ;;  %vm1741_vm0 = vmor %vm1739_vm15, %vm1740_vm14  ;;  %v1746_v36 = vor.u32 1.1754944e-38, %v1745_v35 }
 0x16d   : > { %v1793_v31 = vmul.f32 %v1732_v23, %v2948_v53  ;;  %v1627_v6 = vsel %vm3065_vm12, %v1626_v54, %v1622_v32  ;;  %v1640_v17 = vand.u32 2147483648, %v1275_v30  ;;  %v1638_v16 = vand.u32 2147483647, %v1275_v30 }
 0x16e   : > { %v1786_v33 = vmul.f32 %v1627_v6, %v2963_v42  ;;  %v1738_v53 = vadd.f32 %v2343_v2, %v1737_v15  ;;  %v2347_v9 = vpop.eup %2346  ;;  %vm1634_vm3 = vweird.f32 %v1275_v30 }
 0x16f   : > { %1826 = vst.msk [vmem:[%s2565_s26 + $0xe8] sm:$0xff] %vm1796_vm6, %v1793_v31  ;;  %v1283_v39 = vadd.f32 1.0, %v2347_v9  ;;  %v1641_v37 = vor.u32 1.1754944e-38, %v1640_v17  ;;  %vm1639_vm5 = vcmp.eq.f32.partialorder %v1638_v16, 8.507059e+37 }
 0x170   : > { %1819 = vst.msk [vmem:[%s2565_s26 + $0xb0] sm:$0xff] %vm1796_vm6, %v1786_v33  ;;  %v1742_v61 = vsel %vm1741_vm0, %v2343_v2, %v1738_v53 }
 0x171   : > { %v1747_v11 = vsel %vm1744_vm1, %v1746_v36, %v1742_v61  ;;  %v2349_v62 = vpop.eup %2348  ;;  %2350 = vrcp.f32 %v1283_v39  ;;  %v1760_v28 = vand.u32 2147483648, %v1283_v39  ;;  %v1758_v41 = vand.u32 2147483647, %v1283_v39 }
 0x172   : > { %v1794_v7 = vmul.f32 %v1747_v11, %v2966_v25  ;;  %v1630_v49 = vmul.f32 %v2349_v62, %v1275_v30  ;;  %vm1635_vm2 = vweird.f32 %v2349_v62  ;;  %vm1754_vm8 = vweird.f32 %v1283_v39 }
 0x173   : > { %vm1636_vm4 = vmor %vm1634_vm3, %vm1635_vm2  ;;  %v1761_v4 = vor.u32 1.1754944e-38, %v1760_v28  ;;  %vm1759_vm10 = vcmp.eq.f32.partialorder %v1758_v41, 8.507059e+37 }
 0x174   : > { %1827 = vst.msk [vmem:[%s2565_s26 + $0xf0] sm:$0xff] %vm1796_vm6, %v1794_v7  ;;  %v1631_v42 = vsub.f32 1.0, %v1630_v49 }
 0x176   : > { %v1632_v50 = vmul.f32 %v2349_v62, %v1631_v42 }
 0x177   : > { %v2351_v48 = vpop.eup %2350 }
 0x178   : > { %v1633_v56 = vadd.f32 %v2349_v62, %v1632_v50  ;;  %v1750_v52 = vmul.f32 %v2351_v48, %v1283_v39  ;;  %vm1755_vm7 = vweird.f32 %v2351_v48 }
 0x179   : > { %vm1756_vm9 = vmor %vm1754_vm8, %vm1755_vm7 }
 0x17a   : > { %v1637_v55 = vsel %vm1636_vm4, %v2349_v62, %v1633_v56  ;;  %v1751_v40 = vsub.f32 1.0, %v1750_v52 }
 0x17b   : > { %v1642_v25 = vsel %vm1639_vm5, %v1641_v37, %v1637_v55 }
 0x17c   : > { %v1787_v19 = vmul.f32 %v1642_v25, %v3007_v59  ;;  %v1752_v57 = vmul.f32 %v2351_v48, %v1751_v40 }
 0x17e   : > { %1820 = vst.msk [vmem:[%s2565_s26 + $0xb8] sm:$0xff] %vm1796_vm6, %v1787_v19  ;;  %v1753_v45 = vadd.f32 %v2351_v48, %v1752_v57 }
 0x180   : > { %v1757_v47 = vsel %vm1756_vm9, %v2351_v48, %v1753_v45 }
 0x181   : > { %v1762_v34 = vsel %vm1759_vm10, %v1761_v4, %v1757_v47 }
 0x182   : > { %v1795_v12 = vmul.f32 %v1762_v34, %v3052_v63 }
 0x184   : > { %1828 = vst.msk [vmem:[%s2565_s26 + $0xf8] sm:$0xff] %vm1796_vm6, %v1795_v12 }
 0x185 PF: > { %s17_s24 = sadd.s32 1, %s2359_s24  }
 0x186   : > { %p14_p4 = scmp.ge.s32.totalorder %s17_s24, 4  }
 0x188   :  { %16 = sbr.rel (!%p14_p4) target bundleno = 1 (0x1), region = 84 }

// kernel: c2f_nchw.3
= control target key start
LH: loop header
LB: loop body
LE: loop exit
PB: predicated region body
PF: predicated region fallthrough
CT: control target
= control target key end

     0   :  { %s2565_s21 = smov 0   ;;  %s4058_s0 = inlined_call_operand.vmem [shape: bf16[512,4], index: 0, kind: input, shape index: {}]   ;;  %s4059_s1 = inlined_call_operand.vmem [shape: bf16[4,4], index: 1, kind: input, shape index: {}]   ;;  %s4060_s2 = inlined_call_operand.vmem [shape: bf16[4,4], index: 2, kind: input, shape index: {}]   ;;  %s4061_s3 = inlined_call_operand.vmem [shape: f32[1,4], index: 3, kind: input, shape index: {}]   ;;  %s4062_s4 = inlined_call_operand.vmem [shape: f32[1,4], index: 4, kind: input, shape index: {}]   ;;  %s4063_s5 = inlined_call_operand.vmem [shape: bf16[512,4], index: 5, kind: output, shape index: {0}]   ;;  %s4064_s6 = inlined_call_operand.vmem [shape: bf16[512,4], index: 6, kind: output, shape index: {1}]  }
   0x1 LB: > { %s2125_s22 = sadd.s32 4294967295, %s2528_s21   ;;  %p2129_p0 = scmp.ge.s32.totalorder %s2528_s21, 1  ;;  %s2528_s21 = sphi %s2565_s21, %s17_s21  }
   0x2   : > { %p216_p1 = scmp.lt.s32.totalorder %s2528_s21, 3 }
   0x4   : > { %p217_p2 = pnand %p2129_p0, %p216_p1 }
   0x5   : > { %s2130_s27 = sshll.u32 (!%p217_p2), %s2125_s22, 5 }
   0x6   : > { %220 = sbr.rel (%p217_p2) target bundleno = 481 (0x1e1), region = 40  ;;  %p252_p3 = scmp.lt.s32.totalorder (!%p217_p2), %s2130_s27, 63 }
   0xb   : > { %v302_v0 = vld [vmem:[%s4059_s1] sm:$0x3]  ;;  %vm436_vm0 = vcmask 1041408   ;;  %s4170_s27 = smov (!%p252_p3, %s2130_s27), 63  ;;  %vm387_vm1 = vcmask 31744   ;;  %vm1201_vm6 = vcmask 27648  }
   0xc   : > { %v1234_v1 = vld [vmem:[%s4060_s2] sm:$0x3]  ;;  %v438_v2 = vsel %vm436_vm0, %v302_v0, 0  ;;  %s2579_s28 = sshll.u32 %s4170_s27, 2 }
   0xd   : > { %v1240_v3 = vsel %vm436_vm0, %v1234_v1, 0  ;;  %447 = vmatpush.bf16.msra.mxu0 %v438_v2  ;;  %2250 = vmatpush.bf16.msra.mxu2 %v438_v2  ;;  %s2585_s7 = scalar_lea.vmem %s4058_s0, %s2579_s28  ;;  %v2638_v20 = vld [vmem:[%s4061_s3] ss:$0 sm:$0xff]  ;;  %s2752_s14 = scalar_lea.vmem %s4063_s5, %s2579_s28 }
   0xe   : > { %1249 = vmatpush.bf16.msra.mxu1 %v1240_v3  ;;  %2251 = vmatpush.bf16.msra.mxu3 %v1240_v3  ;;  %v2234_v4 = vld [vmem:[%s2585_s7] sm:$0xff]  ;;  %v2235_v6 = vld [vmem:[%s2585_s7 + $0x8] sm:$0xff]  ;;  %v2236_v8 = vld [vmem:[%s2585_s7 + $0x10] sm:$0xff]  ;;  %s2764_s17 = scalar_lea.vmem %s4064_s6, %s2579_s28 }
   0xf   : > { %v2242_v5 = vld [vmem:[%s2585_s7 + $0x40] sm:$0xff]  ;;  %v2243_v7 = vld [vmem:[%s2585_s7 + $0x48] sm:$0xff]  ;;  %v2244_v9 = vld [vmem:[%s2585_s7 + $0x50] sm:$0xff] }
  0x10   : > { %2200 = vmatmul.msk.bf16.vlgmr.msra.gmra.mxu0 %vm387_vm1, %v2234_v4  ;;  %2208 = vmatmul.msk.bf16.vlgmr.msra.gmra.mxu2 %vm387_vm1, %v2242_v5  ;;  %v2237_v10 = vld [vmem:[%s2585_s7 + $0x18] sm:$0xff]  ;;  %v2238_v12 = vld [vmem:[%s2585_s7 + $0x20] sm:$0xff]  ;;  %v2239_v14 = vld [vmem:[%s2585_s7 + $0x28] sm:$0xff] }
  0x11   : > { %2216 = vmatmul.msk.bf16.vlgmr.msra.gmra.mxu1 %vm387_vm1, %v2234_v4  ;;  %2224 = vmatmul.msk.bf16.vlgmr.msra.gmra.mxu3 %vm387_vm1, %v2242_v5  ;;  %v2245_v11 = vld [vmem:[%s2585_s7 + $0x58] sm:$0xff]  ;;  %v2246_v13 = vld [vmem:[%s2585_s7 + $0x60] sm:$0xff]  ;;  %v2247_v15 = vld [vmem:[%s2585_s7 + $0x68] sm:$0xff] }
  0x12   : > { %v2240_v16 = vld [vmem:[%s2585_s7 + $0x30] sm:$0xff]  ;;  %v2241_v18 = vld [vmem:[%s2585_s7 + $0x38] sm:$0xff]  ;;  %v2643_v21 = vld [vmem:[%s4062_s4] ss:$0 sm:$0xff] }
  0x13   : > { %v2248_v17 = vld [vmem:[%s2585_s7 + $0x70] sm:$0xff]  ;;  %v2249_v19 = vld [vmem:[%s2585_s7 + $0x78] sm:$0xff] }
  0x20   : > { %2201 = vmatmul.msk.bf16.gmra.mxu0 %vm387_vm1, %v2235_v6  ;;  %2209 = vmatmul.msk.bf16.gmra.mxu2 %vm387_vm1, %v2243_v7 }
  0x21   : > { %2217 = vmatmul.msk.bf16.gmra.mxu1 %vm387_vm1, %v2235_v6  ;;  %2225 = vmatmul.msk.bf16.gmra.mxu3 %vm387_vm1, %v2243_v7 }
  0x30   : > { %2202 = vmatmul.msk.bf16.gmra.mxu0 %vm387_vm1, %v2236_v8  ;;  %2210 = vmatmul.msk.bf16.gmra.mxu2 %vm387_vm1, %v2244_v9 }
  0x31   : > { %2218 = vmatmul.msk.bf16.gmra.mxu1 %vm387_vm1, %v2236_v8  ;;  %2226 = vmatmul.msk.bf16.gmra.mxu3 %vm387_vm1, %v2244_v9 }
  0x40   : > { %2203 = vmatmul.msk.bf16.gmra.mxu0 %vm387_vm1, %v2237_v10  ;;  %2211 = vmatmul.msk.bf16.gmra.mxu2 %vm387_vm1, %v2245_v11 }
  0x41   : > { %2219 = vmatmul.msk.bf16.gmra.mxu1 %vm387_vm1, %v2237_v10  ;;  %2227 = vmatmul.msk.bf16.gmra.mxu3 %vm387_vm1, %v2245_v11 }
  0x50   : > { %2204 = vmatmul.msk.bf16.gmra.mxu0 %vm387_vm1, %v2238_v12  ;;  %2212 = vmatmul.msk.bf16.gmra.mxu2 %vm387_vm1, %v2246_v13 }
  0x51   : > { %2220 = vmatmul.msk.bf16.gmra.mxu1 %vm387_vm1, %v2238_v12  ;;  %2228 = vmatmul.msk.bf16.gmra.mxu3 %vm387_vm1, %v2246_v13 }
  0x60   : > { %2205 = vmatmul.msk.bf16.gmra.mxu0 %vm387_vm1, %v2239_v14  ;;  %2213 = vmatmul.msk.bf16.gmra.mxu2 %vm387_vm1, %v2247_v15 }
  0x61   : > { %2221 = vmatmul.msk.bf16.gmra.mxu1 %vm387_vm1, %v2239_v14  ;;  %2229 = vmatmul.msk.bf16.gmra.mxu3 %vm387_vm1, %v2247_v15 }
  0x70   : > { %2206 = vmatmul.msk.bf16.gmra.mxu0 %vm387_vm1, %v2240_v16  ;;  %2214 = vmatmul.msk.bf16.gmra.mxu2 %vm387_vm1, %v2248_v17 }
  0x71   : > { %2222 = vmatmul.msk.bf16.gmra.mxu1 %vm387_vm1, %v2240_v16  ;;  %2230 = vmatmul.msk.bf16.gmra.mxu3 %vm387_vm1, %v2248_v17 }
  0x80   : > { %2207 = vmatmul.msk.bf16.gmra.mxu0 %vm387_vm1, %v2241_v18  ;;  %2215 = vmatmul.msk.bf16.gmra.mxu2 %vm387_vm1, %v2249_v19 }
  0x81   : > { %2223 = vmatmul.msk.bf16.gmra.mxu1 %vm387_vm1, %v2241_v18  ;;  %2231 = vmatmul.msk.bf16.gmra.mxu3 %vm387_vm1, %v2249_v19 }
  0x8d   : > { %v449_v22 = vpop.f32.mrf.mxu0 }
  0x8e   : > { %v2646_v23 = vadd.f32 %v2638_v20, %v449_v22  ;;  %v1251_v24 = vpop.f32.mrf.mxu1 }
  0x8f   : > { %v2649_v25 = vadd.f32 %v2643_v21, %v1251_v24 }
  0x90   : > { %v529_v26 = vsub.f32 0.0, %v2646_v23 }
  0x91   : > { %v1331_v27 = vsub.f32 0.0, %v2649_v25 }
  0x92   : > { %v561_v28 = vmul.f32 1.442695, %v529_v26 }
  0x93   : > { %v1363_v29 = vmul.f32 1.442695, %v1331_v27  ;;  %v489_v30 = vpop.f32.mrf.mxu2 }
  0x94   : > { %2262 = vpow2.f32 %v561_v28  ;;  %v2654_v31 = vadd.f32 %v2638_v20, %v489_v30  ;;  %v1291_v32 = vpop.f32.mrf.mxu3 }
  0x95   : > { %2264 = vpow2.f32 %v1363_v29  ;;  %v2657_v33 = vadd.f32 %v2643_v21, %v1291_v32  ;;  %v451_v34 = vpop.f32.mrf.mxu0 }
  0x96   : > { %v545_v35 = vsub.f32 0.0, %v2654_v31  ;;  %v2661_v36 = vadd.f32 %v2638_v20, %v451_v34  ;;  %v1253_v37 = vpop.f32.mrf.mxu1 }
  0x97   : > { %v1347_v38 = vsub.f32 0.0, %v2657_v33  ;;  %v2665_v39 = vadd.f32 %v2643_v21, %v1253_v37 }
  0x98   : > { %v593_v40 = vmul.f32 1.442695, %v545_v35  ;;  %v530_v41 = vsub.f32 0.0, %v2661_v36 }
  0x99   : > { %v1395_v42 = vmul.f32 1.442695, %v1347_v38  ;;  %v1332_v43 = vsub.f32 0.0, %v2665_v39 }
  0x9a   : > { %v2263_v44 = vpop.eup %2262  ;;  %2266 = vpow2.f32 %v593_v40  ;;  %v563_v45 = vmul.f32 1.442695, %v530_v41 }
  0x9b   : > { %v2265_v46 = vpop.eup %2264  ;;  %v2669_v47 = vadd.f32 1.0, %v2263_v44  ;;  %2268 = vpow2.f32 %v1395_v42  ;;  %v1365_v48 = vmul.f32 1.442695, %v1332_v43  ;;  %v491_v49 = vpop.f32.mrf.mxu2 }
  0x9c   : > { %v2671_v50 = vadd.f32 1.0, %v2265_v46  ;;  %2270 = vpow2.f32 %v563_v45  ;;  %v2675_v51 = vadd.f32 %v2638_v20, %v491_v49  ;;  %v1293_v52 = vpop.f32.mrf.mxu3 }
  0x9d   : > { %2272 = vrcp.f32 %v2669_v47  ;;  %v666_v54 = vand.u32 2147483647, %v2669_v47  ;;  %v668_v55 = vand.u32 2147483648, %v2669_v47  ;;  %v454_v57 = vpop.f32.mrf.mxu0  ;;  %v2688_v0 = vadd.f32 %v2643_v21, %v1293_v52 }
  0x9e   : > { %2274 = vrcp.f32 %v2671_v50  ;;  %v1470_v56 = vand.u32 2147483648, %v2671_v50  ;;  %v1468_v59 = vand.u32 2147483647, %v2671_v50  ;;  %v546_v61 = vsub.f32 0.0, %v2675_v51  ;;  %v1256_v1 = vpop.f32.mrf.mxu1 }
  0x9f   : > { %2276 = vpow2.f32 %v1365_v48  ;;  %vm662_vm2 = vweird.f32 %v2669_v47  ;;  %vm1464_vm3 = vweird.f32 %v2671_v50  ;;  %v2694_v3 = vadd.f32 %v2638_v20, %v454_v57 }
  0xa0   : > { %v2267_v53 = vpop.eup %2266  ;;  %vm2697_vm4 = vcmp.eq.f32.partialorder %v666_v54, 8.507059e+37  ;;  %v669_v7 = vor.u32 1.1754944e-38, %v668_v55  ;;  %v1471_v8 = vor.u32 1.1754944e-38, %v1470_v56  ;;  %vm2703_vm5 = vcmp.eq.f32.partialorder %v1468_v59, 8.507059e+37 }
  0xa1   : > { %v2269_v58 = vpop.eup %2268  ;;  %v2682_v60 = vadd.f32 1.0, %v2267_v53  ;;  %v595_v13 = vmul.f32 1.442695, %v546_v61  ;;  %v2709_v14 = vadd.f32 %v2643_v21, %v1256_v1  ;;  %v1348_v18 = vsub.f32 0.0, %v2688_v0 }
  0xa2   : > { %v2271_v62 = vpop.eup %2270  ;;  %v2685_v63 = vadd.f32 1.0, %v2269_v58  ;;  %v531_v26 = vsub.f32 0.0, %v2694_v3 }
  0xa3   : > { %v2273_v2 = vpop.eup %2272  ;;  %2278 = vrcp.f32 %v2682_v60  ;;  %v908_v12 = vand.u32 2147483648, %v2682_v60  ;;  %v906_v16 = vand.u32 2147483647, %v2682_v60  ;;  %v2712_v17 = vadd.f32 1.0, %v2271_v62 }
  0xa4   : > { %v2275_v4 = vpop.eup %2274  ;;  %v658_v5 = vmul.f32 %v2273_v2, %v2669_v47  ;;  %2280 = vrcp.f32 %v2685_v63  ;;  %v1708_v22 = vand.u32 2147483647, %v2685_v63  ;;  %vm663_vm7 = vweird.f32 %v2273_v2 }
  0xa5   : > { %v2277_v9 = vpop.eup %2276  ;;  %v1460_v10 = vmul.f32 %v2275_v4, %v2671_v50  ;;  %vm902_vm8 = vweird.f32 %v2682_v60  ;;  %v1710_v28 = vand.u32 2147483648, %v2685_v63  ;;  %2282 = vrcp.f32 %v2712_v17  ;;  %vm664_vm12 = vmor %vm662_vm2, %vm663_vm7  ;;  %v456_v38 = vpop.f32.mrf.mxu0 }
  0xa6   : > { %v659_v15 = vsub.f32 1.0, %v658_v5  ;;  %v2716_v24 = vadd.f32 1.0, %v2277_v9  ;;  %vm1465_vm9 = vweird.f32 %v2275_v4  ;;  %v909_v32 = vor.u32 1.1754944e-38, %v908_v12 }
  0xa7   : > { %v1461_v19 = vsub.f32 1.0, %v1460_v10  ;;  %vm1704_vm10 = vweird.f32 %v2685_v63  ;;  %2284 = vpow2.f32 %v595_v13  ;;  %vm2724_vm11 = vcmp.eq.f32.partialorder %v906_v16, 8.507059e+37  ;;  %vm1466_vm14 = vmor %vm1464_vm3, %vm1465_vm9 }
  0xa8   : > { %v660_v27 = vmul.f32 %v2273_v2, %v659_v15  ;;  %2286 = vrcp.f32 %v2716_v24  ;;  %v1397_v40 = vmul.f32 1.442695, %v1348_v18  ;;  %vm2733_vm13 = vcmp.eq.f32.partialorder %v1708_v22, 8.507059e+37 }
  0xa9   : > { %v2279_v29 = vpop.eup %2278  ;;  %v1462_v30 = vmul.f32 %v2275_v4, %v1461_v19  ;;  %v681_v44 = vand.u32 2147483647, %v2712_v17  ;;  %v1711_v48 = vor.u32 1.1754944e-38, %v1710_v28  ;;  %v683_v47 = vand.u32 2147483648, %v2712_v17 }
  0xaa   : > { %v2281_v34 = vpop.eup %2280  ;;  %v661_v35 = vadd.f32 %v2273_v2, %v660_v27  ;;  %v898_v37 = vmul.f32 %v2279_v29, %v2682_v60  ;;  %vm903_vm15 = vweird.f32 %v2279_v29  ;;  %vm677_vm0 = vweird.f32 %v2712_v17  ;;  %v494_v27 = vpop.f32.mrf.mxu2 }
  0xab   : > { %v1463_v41 = vadd.f32 %v2275_v4, %v1462_v30  ;;  %v1700_v42 = vmul.f32 %v2281_v34, %v2685_v63  ;;  %v2283_v54 = vpop.eup %2282  ;;  %vm1705_vm1 = vweird.f32 %v2281_v34  ;;  %vm2756_vm2 = vcmp.eq.f32.partialorder %v681_v44, 8.507059e+37  ;;  %vm904_vm3 = vmor %vm902_vm8, %vm903_vm15  ;;  %v1296_v30 = vpop.f32.mrf.mxu3 }
  0xac   : > { %v665_v45 = vsel %vm664_vm12, %v2273_v2, %v661_v35  ;;  %v899_v46 = vsub.f32 1.0, %v898_v37  ;;  %v673_v61 = vmul.f32 %v2283_v54, %v2712_v17  ;;  %v1483_v5 = vand.u32 2147483647, %v2716_v24 }
  0xad   : > { %v670_v49 = vsel %vm2697_vm4, %v669_v7, %v665_v45  ;;  %v1467_v52 = vsel %vm1466_vm14, %v2275_v4, %v1463_v41  ;;  %v1701_v53 = vsub.f32 1.0, %v1700_v42  ;;  %v2285_v57 = vpop.eup %2284  ;;  %v684_v4 = vor.u32 1.1754944e-38, %v683_v47  ;;  %vm1706_vm4 = vmor %vm1704_vm10, %vm1705_vm1 }
  0xae   : > { %v1137_v55 = vmul.f32 %v670_v49, %v2646_v23  ;;  %v1472_v50 = vsel %vm2703_vm5, %v1471_v8, %v1467_v52  ;;  %v900_v56 = vmul.f32 %v2279_v29, %v899_v46  ;;  %v2287_v23 = vpop.eup %2286  ;;  %v674_v7 = vsub.f32 1.0, %v673_v61  ;;  %v1258_v49 = vpop.f32.mrf.mxu1 }
  0xaf   : > { %v1939_v58 = vmul.f32 %v1472_v50, %v2649_v25  ;;  %v1702_v59 = vmul.f32 %v2281_v34, %v1701_v53  ;;  %v1475_v8 = vmul.f32 %v2287_v23, %v2716_v24  ;;  %vm678_vm5 = vweird.f32 %v2283_v54 }
  0xb0   : > { %v1169_v1 = vpack.c.bf16 %v1137_v55, %v1137_v55  ;;  %v901_v2 = vadd.f32 %v2279_v29, %v900_v56  ;;  %v2776_v10 = vadd.f32 1.0, %v2285_v57  ;;  %2288 = vpow2.f32 %v1397_v40  ;;  %vm679_vm8 = vmor %vm677_vm0, %vm678_vm5 }
  0xb1   : > { %v1971_v25 = vpack.c.bf16 %v1939_v58, %v1939_v58  ;;  %v1703_v6 = vadd.f32 %v2281_v34, %v1702_v59  ;;  %v675_v12 = vmul.f32 %v2283_v54, %v674_v7  ;;  %v1476_v13 = vsub.f32 1.0, %v1475_v8 }
  0xb2   : > { %1202 = vst.msk [vmem:[%s2752_s14] sm:$0xf] %vm1201_vm6, %v1169_v1  ;;  %v905_v9 = vsel %vm904_vm3, %v2279_v29, %v901_v2  ;;  %v1485_v63 = vand.u32 2147483648, %v2716_v24  ;;  %2290 = vrcp.f32 %v2776_v10  ;;  %vm1480_vm7 = vweird.f32 %v2287_v23 }
  0xb3   : > { %2003 = vst.msk [vmem:[%s2764_s17] sm:$0xf] %vm1201_vm6, %v1971_v25  ;;  %v910_v60 = vsel %vm2724_vm11, %v909_v32, %v905_v9  ;;  %v1707_v11 = vsel %vm1706_vm4, %v2281_v34, %v1703_v6  ;;  %v676_v19 = vadd.f32 %v2283_v54, %v675_v12  ;;  %v1477_v22 = vmul.f32 %v2287_v23, %v1476_v13  ;;  %v1298_v25 = vpop.f32.mrf.mxu3 }
  0xb4   : > { %v1153_v15 = vmul.f32 %v910_v60, %v2654_v31  ;;  %v1712_v16 = vsel %vm2733_vm13, %v1711_v48, %v1707_v11  ;;  %vm1479_vm9 = vweird.f32 %v2716_v24  ;;  %v565_v31 = vmul.f32 1.442695, %v531_v26 }
  0xb5   : > { %v1955_v18 = vmul.f32 %v1712_v16, %v2657_v33  ;;  %v1333_v29 = vsub.f32 0.0, %v2709_v14  ;;  %v680_v32 = vsel %vm679_vm8, %v2283_v54, %v676_v19  ;;  %v1478_v34 = vadd.f32 %v2287_v23, %v1477_v22  ;;  %vm1481_vm11 = vmor %vm1479_vm9, %vm1480_vm7 }
  0xb6   : > { %v1185_v28 = vpack.c.bf16 %v1153_v15, %v1153_v15  ;;  %vm1484_vm10 = vcmp.eq.f32.partialorder %v1483_v5, 8.507059e+37  ;;  %v2289_v35 = vpop.eup %2288  ;;  %v685_v17 = vsel %vm2756_vm2, %v684_v4, %v680_v32  ;;  %v1486_v24 = vor.u32 1.1754944e-38, %v1485_v63 }
  0xb7   : > { %v1987_v33 = vpack.c.bf16 %v1955_v18, %v1955_v18  ;;  %2292 = vpow2.f32 %v565_v31  ;;  %v1367_v37 = vmul.f32 1.442695, %v1333_v29  ;;  %v1138_v26 = vmul.f32 %v685_v17, %v2661_v36 }
  0xb8   : > { %1218 = vst.msk [vmem:[%s2752_s14 + $0x40] sm:$0xf] %vm1201_vm6, %v1185_v28  ;;  %v1482_v40 = vsel %vm1481_vm11, %v2287_v23, %v1478_v34  ;;  %v2803_v41 = vadd.f32 1.0, %v2289_v35  ;;  %v2806_v42 = vadd.f32 %v2638_v20, %v494_v27  ;;  %v2291_v43 = vpop.eup %2290  ;;  %v2809_v45 = vadd.f32 %v2643_v21, %v1296_v30  ;;  %v496_v23 = vpop.f32.mrf.mxu2 }
  0xb9   : > { %2019 = vst.msk [vmem:[%s2764_s17 + $0x40] sm:$0xf] %vm1201_vm6, %v1987_v33  ;;  %v1487_v44 = vsel %vm1484_vm10, %v1486_v24, %v1482_v40  ;;  %2294 = vpow2.f32 %v1367_v37  ;;  %v1170_v46 = vpack.c.bf16 %v1138_v26, %v1138_v26  ;;  %v913_v47 = vmul.f32 %v2291_v43, %v2776_v10 }
  0xba   : > { %v1940_v48 = vmul.f32 %v1487_v44, %v2665_v39  ;;  %v2814_v36 = vadd.f32 %v2638_v20, %v456_v38  ;;  %v921_v52 = vand.u32 2147483647, %v2776_v10  ;;  %v923_v53 = vand.u32 2147483648, %v2776_v10 }
  0xbb   : > { %2296 = vrcp.f32 %v2803_v41  ;;  %1203 = vst.msk [vmem:[%s2752_s14 + $0x4] sm:$0xf] %vm1201_vm6, %v1170_v46  ;;  %v914_v55 = vsub.f32 1.0, %v913_v47  ;;  %v547_v50 = vsub.f32 0.0, %v2806_v42  ;;  %vm918_vm12 = vweird.f32 %v2291_v43 }
  0xbc   : > { %v1972_v54 = vpack.c.bf16 %v1940_v48, %v1940_v48  ;;  %v1349_v39 = vsub.f32 0.0, %v2809_v45  ;;  %v2824_v57 = vadd.f32 %v2643_v21, %v1258_v49  ;;  %v532_v62 = vsub.f32 0.0, %v2814_v36 }
  0xbd   : > { %v2293_v56 = vpop.eup %2292  ;;  %v915_v58 = vmul.f32 %v2291_v43, %v914_v55  ;;  %v597_v61 = vmul.f32 1.442695, %v547_v50  ;;  %vm917_vm13 = vweird.f32 %v2776_v10  ;;  %vm2832_vm14 = vcmp.eq.f32.partialorder %v921_v52, 8.507059e+37 }
  0xbe   : > { %2004 = vst.msk [vmem:[%s2764_s17 + $0x4] sm:$0xf] %vm1201_vm6, %v1972_v54  ;;  %v2828_v59 = vadd.f32 1.0, %v2293_v56  ;;  %v924_v4 = vor.u32 1.1754944e-38, %v923_v53  ;;  %v1723_v5 = vand.u32 2147483647, %v2803_v41  ;;  %vm1719_vm15 = vweird.f32 %v2803_v41  ;;  %vm919_vm0 = vmor %vm917_vm13, %vm918_vm12 }
  0xbf   : > { %v2295_v1 = vpop.eup %2294  ;;  %v916_v6 = vadd.f32 %v2291_v43, %v915_v58  ;;  %v1725_v7 = vand.u32 2147483648, %v2803_v41  ;;  %v1334_v8 = vsub.f32 0.0, %v2824_v57  ;;  %v1399_v60 = vmul.f32 1.442695, %v1349_v39 }
  0xc0   : > { %2298 = vrcp.f32 %v2828_v59  ;;  %v2842_v10 = vadd.f32 1.0, %v2295_v1  ;;  %v2845_v11 = vadd.f32 %v2638_v20, %v496_v23  ;;  %v567_v15 = vmul.f32 1.442695, %v532_v62  ;;  %v1261_v23 = vpop.f32.mrf.mxu1 }
  0xc1   : > { %v2297_v9 = vpop.eup %2296  ;;  %2300 = vpow2.f32 %v597_v61  ;;  %v920_v12 = vsel %vm919_vm0, %v2291_v43, %v916_v6  ;;  %v2849_v16 = vadd.f32 %v2643_v21, %v1298_v25  ;;  %v696_v18 = vand.u32 2147483647, %v2828_v59 }
  0xc2   : > { %v1715_v13 = vmul.f32 %v2297_v9, %v2803_v41  ;;  %v925_v63 = vsel %vm2832_vm14, %v924_v4, %v920_v12  ;;  %v698_v19 = vand.u32 2147483648, %v2828_v59  ;;  %2302 = vrcp.f32 %v2842_v10 }
  0xc3   : > { %v1154_v22 = vmul.f32 %v925_v63, %v2675_v51  ;;  %vm2857_vm1 = vcmp.eq.f32.partialorder %v1723_v5, 8.507059e+37  ;;  %v1369_v31 = vmul.f32 1.442695, %v1334_v8  ;;  %v1726_v29 = vor.u32 1.1754944e-38, %v1725_v7  ;;  %v459_v51 = vpop.f32.mrf.mxu0 }
  0xc4   : > { %v1716_v27 = vsub.f32 1.0, %v1715_v13  ;;  %vm692_vm2 = vweird.f32 %v2828_v59  ;;  %2304 = vpow2.f32 %v1399_v60  ;;  %v548_v30 = vsub.f32 0.0, %v2845_v11 }
  0xc5   : > { %v1186_v32 = vpack.c.bf16 %v1154_v22, %v1154_v22  ;;  %vm1720_vm3 = vweird.f32 %v2297_v9  ;;  %v1498_v35 = vand.u32 2147483647, %v2842_v10  ;;  %vm2865_vm4 = vcmp.eq.f32.partialorder %v696_v18, 8.507059e+37 }
  0xc6   : > { %v2299_v33 = vpop.eup %2298  ;;  %v1717_v34 = vmul.f32 %v2297_v9, %v1716_v27  ;;  %v699_v38 = vor.u32 1.1754944e-38, %v698_v19  ;;  %2306 = vpow2.f32 %v567_v15  ;;  %v1350_v26 = vsub.f32 0.0, %v2849_v16  ;;  %vm1721_vm5 = vmor %vm1719_vm15, %vm1720_vm3  ;;  %v499_v19 = vpop.f32.mrf.mxu2 }
  0xc7   : > { %v2301_v17 = vpop.eup %2300  ;;  %v688_v24 = vmul.f32 %v2299_v33, %v2828_v59  ;;  %1219 = vst.msk [vmem:[%s2752_s14 + $0x44] sm:$0xf] %vm1201_vm6, %v1186_v32  ;;  %v1500_v43 = vand.u32 2147483648, %v2842_v10  ;;  %2308 = vpow2.f32 %v1369_v31  ;;  %vm1494_vm7 = vweird.f32 %v2842_v10 }
  0xc8   : > { %v1718_v40 = vadd.f32 %v2297_v9, %v1717_v34  ;;  %v2873_v44 = vadd.f32 1.0, %v2301_v17  ;;  %v2303_v46 = vpop.eup %2302  ;;  %v599_v47 = vmul.f32 1.442695, %v548_v30  ;;  %v2880_v49 = vadd.f32 %v2638_v20, %v459_v51 }
  0xc9   : > { %v689_v48 = vsub.f32 1.0, %v688_v24  ;;  %v1490_v53 = vmul.f32 %v2303_v46, %v2842_v10  ;;  %vm2883_vm8 = vcmp.eq.f32.partialorder %v1498_v35, 8.507059e+37  ;;  %vm693_vm9 = vweird.f32 %v2299_v33 }
  0xca   : > { %v1722_v52 = vsel %vm1721_vm5, %v2297_v9, %v1718_v40  ;;  %2310 = vrcp.f32 %v2873_v44  ;;  %v2305_v55 = vpop.eup %2304  ;;  %v1401_v56 = vmul.f32 1.442695, %v1350_v26  ;;  %v1501_v61 = vor.u32 1.1754944e-38, %v1500_v43  ;;  %vm694_vm10 = vmor %vm692_vm2, %vm693_vm9 }
  0xcb   : > { %v1727_v41 = vsel %vm2857_vm1, %v1726_v29, %v1722_v52  ;;  %v690_v50 = vmul.f32 %v2299_v33, %v689_v48  ;;  %v1491_v58 = vsub.f32 1.0, %v1490_v53  ;;  %v2891_v62 = vadd.f32 1.0, %v2305_v55 }
  0xcc   : > { %v1956_v39 = vmul.f32 %v1727_v41, %v2688_v0  ;;  %v2307_v1 = vpop.eup %2306  ;;  %v936_v4 = vand.u32 2147483647, %v2873_v44  ;;  %2312 = vpow2.f32 %v599_v47  ;;  %v533_v5 = vsub.f32 0.0, %v2880_v49 }
  0xcd   : > { %v691_v2 = vadd.f32 %v2299_v33, %v690_v50  ;;  %v2309_v25 = vpop.eup %2308  ;;  %v1492_v7 = vmul.f32 %v2303_v46, %v1491_v58  ;;  %vm1495_vm11 = vweird.f32 %v2303_v46  ;;  %2314 = vrcp.f32 %v2891_v62 }
  0xce   : > { %v1988_v6 = vpack.c.bf16 %v1956_v39, %v1956_v39  ;;  %v938_v8 = vand.u32 2147483648, %v2873_v44  ;;  %2316 = vpow2.f32 %v1401_v56  ;;  %v2900_v9 = vadd.f32 %v2643_v21, %v1261_v23  ;;  %vm1496_vm12 = vmor %vm1494_vm7, %vm1495_vm11 }
  0xcf   : > { %v695_v0 = vsel %vm694_vm10, %v2299_v33, %v691_v2  ;;  %v1493_v13 = vadd.f32 %v2303_v46, %v1492_v7  ;;  %v2906_v59 = vadd.f32 1.0, %v2307_v1  ;;  %v2908_v15 = vadd.f32 1.0, %v2309_v25 }
  0xd0   : > { %v2311_v60 = vpop.eup %2310  ;;  %2020 = vst.msk [vmem:[%s2764_s17 + $0x44] sm:$0xf] %vm1201_vm6, %v1988_v6  ;;  %v700_v12 = vsel %vm2865_vm4, %v699_v38, %v695_v0  ;;  %vm932_vm13 = vweird.f32 %v2873_v44  ;;  %vm2915_vm14 = vcmp.eq.f32.partialorder %v936_v4, 8.507059e+37  ;;  %v1738_v27 = vand.u32 2147483647, %v2891_v62 }
  0xd1   : > { %v1139_v63 = vmul.f32 %v700_v12, %v2694_v3  ;;  %v928_v18 = vmul.f32 %v2311_v60, %v2873_v44  ;;  %v1497_v22 = vsel %vm1496_vm12, %v2303_v46, %v1493_v13  ;;  %v1740_v28 = vand.u32 2147483648, %v2891_v62 }
  0xd2   : > { %2318 = vrcp.f32 %v2906_v59  ;;  %v2313_v3 = vpop.eup %2312  ;;  %v1502_v10 = vsel %vm2883_vm8, %v1501_v61, %v1497_v22  ;;  %v569_v30 = vmul.f32 1.442695, %v533_v5  ;;  %v939_v34 = vor.u32 1.1754944e-38, %v938_v8 }
  0xd3   : > { %v1171_v31 = vpack.c.bf16 %v1139_v63, %v1139_v63  ;;  %v929_v29 = vsub.f32 1.0, %v928_v18  ;;  %v2315_v33 = vpop.eup %2314  ;;  %v1941_v32 = vmul.f32 %v1502_v10, %v2709_v14  ;;  %vm1734_vm15 = vweird.f32 %v2891_v62 }
  0xd4   : > { %2320 = vrcp.f32 %v2908_v15  ;;  %v2317_v35 = vpop.eup %2316  ;;  %vm933_vm0 = vweird.f32 %v2311_v60  ;;  %v1730_v17 = vmul.f32 %v2315_v33, %v2891_v62  ;;  %v711_v24 = vand.u32 2147483647, %v2906_v59 }
  0xd5   : > { %1204 = vst.msk [vmem:[%s2752_s14 + $0x8] sm:$0xf] %vm1201_vm6, %v1171_v31  ;;  %v930_v51 = vmul.f32 %v2311_v60, %v929_v29  ;;  %v1973_v37 = vpack.c.bf16 %v1941_v32, %v1941_v32  ;;  %vm2931_vm1 = vcmp.eq.f32.partialorder %v1738_v27, 8.507059e+37  ;;  %v1741_v14 = vor.u32 1.1754944e-38, %v1740_v28  ;;  %vm934_vm2 = vmor %vm932_vm13, %vm933_vm0 }
  0xd6   : > { %v713_v26 = vand.u32 2147483648, %v2906_v59  ;;  %v1731_v43 = vsub.f32 1.0, %v1730_v17  ;;  %v1513_v46 = vand.u32 2147483647, %v2908_v15  ;;  %v2937_v48 = vadd.f32 1.0, %v2313_v3 }
  0xd7   : > { %v931_v40 = vadd.f32 %v2311_v60, %v930_v51  ;;  %2005 = vst.msk [vmem:[%s2764_s17 + $0x8] sm:$0xf] %vm1201_vm6, %v1973_v37  ;;  %vm1735_vm3 = vweird.f32 %v2315_v33  ;;  %vm707_vm4 = vweird.f32 %v2906_v59  ;;  %v2944_v52 = vadd.f32 1.0, %v2317_v35 }
  0xd8   : > { %v2319_v47 = vpop.eup %2318  ;;  %2322 = vpow2.f32 %v569_v30  ;;  %v1732_v54 = vmul.f32 %v2315_v33, %v1731_v43  ;;  %vm2947_vm5 = vcmp.eq.f32.partialorder %v711_v24, 8.507059e+37  ;;  %vm1509_vm7 = vweird.f32 %v2908_v15  ;;  %vm1736_vm9 = vmor %vm1734_vm15, %vm1735_vm3 }
  0xd9   : > { %v935_v53 = vsel %vm934_vm2, %v2311_v60, %v931_v40  ;;  %v703_v55 = vmul.f32 %v2319_v47, %v2906_v59  ;;  %v714_v56 = vor.u32 1.1754944e-38, %v713_v26  ;;  %v1515_v39 = vand.u32 2147483648, %v2908_v15  ;;  %v1301_v59 = vpop.f32.mrf.mxu3 }
  0xda   : > { %v2321_v50 = vpop.eup %2320  ;;  %v940_v44 = vsel %vm2915_vm14, %v939_v34, %v935_v53  ;;  %2324 = vrcp.f32 %v2937_v48  ;;  %v1733_v61 = vadd.f32 %v2315_v33, %v1732_v54  ;;  %vm2958_vm8 = vcmp.eq.f32.partialorder %v1513_v46, 8.507059e+37  ;;  %v461_v46 = vpop.f32.mrf.mxu0 }
  0xdb   : > { %v1155_v58 = vmul.f32 %v940_v44, %v2806_v42  ;;  %v704_v23 = vsub.f32 1.0, %v703_v55  ;;  %v1505_v1 = vmul.f32 %v2321_v50, %v2908_v15  ;;  %vm708_vm10 = vweird.f32 %v2319_v47 }
  0xdc   : > { %v951_v4 = vand.u32 2147483647, %v2937_v48  ;;  %v953_v5 = vand.u32 2147483648, %v2937_v48  ;;  %2326 = vrcp.f32 %v2944_v52  ;;  %v1737_v25 = vsel %vm1736_vm9, %v2315_v33, %v1733_v61  ;;  %vm709_vm12 = vmor %vm707_vm4, %vm708_vm10 }
  0xdd   : > { %v1187_v42 = vpack.c.bf16 %v1155_v58, %v1155_v58  ;;  %v705_v6 = vmul.f32 %v2319_v47, %v704_v23  ;;  %v1506_v7 = vsub.f32 1.0, %v1505_v1  ;;  %v1742_v8 = vsel %vm2931_vm1, %v1741_v14, %v1737_v25 }
  0xde   : > { %v2323_v0 = vpop.eup %2322  ;;  %vm1510_vm11 = vweird.f32 %v2321_v50  ;;  %v1516_v60 = vor.u32 1.1754944e-38, %v1515_v39  ;;  %v1335_v62 = vsub.f32 0.0, %v2900_v9  ;;  %v1957_v12 = vmul.f32 %v1742_v8, %v2809_v45 }
  0xdf   : > { %1220 = vst.msk [vmem:[%s2752_s14 + $0x48] sm:$0xf] %vm1201_vm6, %v1187_v42  ;;  %v706_v13 = vadd.f32 %v2319_v47, %v705_v6  ;;  %v1507_v63 = vmul.f32 %v2321_v50, %v1506_v7  ;;  %v1753_v18 = vand.u32 2147483647, %v2944_v52  ;;  %vm947_vm13 = vweird.f32 %v2937_v48  ;;  %vm1511_vm0 = vmor %vm1509_vm7, %vm1510_vm11 }
  0xe0   : > { %v2325_v22 = vpop.eup %2324  ;;  %v954_v27 = vor.u32 1.1754944e-38, %v953_v5  ;;  %v1755_v28 = vand.u32 2147483648, %v2944_v52  ;;  %v2980_v3 = vadd.f32 1.0, %v2323_v0  ;;  %v1989_v31 = vpack.c.bf16 %v1957_v12, %v1957_v12 }
  0xe1   : > { %v710_v45 = vsel %vm709_vm12, %v2319_v47, %v706_v13  ;;  %v1508_v10 = vadd.f32 %v2321_v50, %v1507_v63  ;;  %v943_v29 = vmul.f32 %v2325_v22, %v2937_v48  ;;  %vm2983_vm14 = vcmp.eq.f32.partialorder %v951_v4, 8.507059e+37  ;;  %v1263_v47 = vpop.f32.mrf.mxu1  ;;  %v501_v4 = vpop.f32.mrf.mxu2 }
  0xe2   : > { %vm1749_vm15 = vweird.f32 %v2944_v52  ;;  %v2327_v33 = vpop.eup %2326  ;;  %v715_v32 = vsel %vm2947_vm5, %v714_v56, %v710_v45  ;;  %2328 = vrcp.f32 %v2980_v3  ;;  %v1371_v34 = vmul.f32 1.442695, %v1335_v62  ;;  %2021 = vst.msk [vmem:[%s2764_s17 + $0x48] sm:$0xf] %vm1201_vm6, %v1989_v31  ;;  %v1303_v8 = vpop.f32.mrf.mxu3 }
  0xe3   : > { %v2995_v35 = vadd.f32 %v2638_v20, %v499_v19  ;;  %v1140_v51 = vmul.f32 %v715_v32, %v2814_v36  ;;  %v1512_v17 = vsel %vm1511_vm0, %v2321_v50, %v1508_v10  ;;  %v944_v24 = vsub.f32 1.0, %v943_v29 }
  0xe4   : > { %v1745_v37 = vmul.f32 %v2327_v33, %v2944_v52  ;;  %vm3001_vm1 = vcmp.eq.f32.partialorder %v1753_v18, 8.507059e+37  ;;  %v1517_v15 = vsel %vm2958_vm8, %v1516_v60, %v1512_v17  ;;  %vm948_vm2 = vweird.f32 %v2325_v22 }
  0xe5   : > { %vm1750_vm3 = vweird.f32 %v2327_v33  ;;  %v1756_v14 = vor.u32 1.1754944e-38, %v1755_v28  ;;  %v1172_v26 = vpack.c.bf16 %v1140_v51, %v1140_v51  ;;  %v1942_v40 = vmul.f32 %v1517_v15, %v2824_v57  ;;  %vm949_vm5 = vmor %vm947_vm13, %vm948_vm2 }
  0xe6   : > { %v945_v43 = vmul.f32 %v2325_v22, %v944_v24  ;;  %v1746_v36 = vsub.f32 1.0, %v1745_v37  ;;  %vm722_vm4 = vweird.f32 %v2980_v3  ;;  %v726_v53 = vand.u32 2147483647, %v2980_v3  ;;  %vm1751_vm8 = vmor %vm1749_vm15, %vm1750_vm3  ;;  %v464_v37 = vpop.f32.mrf.mxu0 }
  0xe7   : > { %2330 = vpow2.f32 %v1371_v34  ;;  %v549_v54 = vsub.f32 0.0, %v2995_v35  ;;  %1205 = vst.msk [vmem:[%s2752_s14 + $0xc] sm:$0xf] %vm1201_vm6, %v1172_v26  ;;  %v1974_v55 = vpack.c.bf16 %v1942_v40, %v1942_v40  ;;  %v3014_v44 = vadd.f32 %v2643_v21, %v1301_v59 }
  0xe8   : > { %v946_v41 = vadd.f32 %v2325_v22, %v945_v43  ;;  %v1747_v50 = vmul.f32 %v2327_v33, %v1746_v36  ;;  %v2329_v57 = vpop.eup %2328  ;;  %v728_v56 = vand.u32 2147483648, %v2980_v3  ;;  %v3021_v58 = vadd.f32 %v2638_v20, %v461_v46 }
  0xe9   : > { %v601_v39 = vmul.f32 1.442695, %v549_v54  ;;  %v3024_v61 = vadd.f32 %v2643_v21, %v1263_v47  ;;  %2006 = vst.msk [vmem:[%s2764_s17 + $0xc] sm:$0xf] %vm1201_vm6, %v1974_v55  ;;  %v718_v2 = vmul.f32 %v2329_v57, %v2980_v3  ;;  %vm723_vm7 = vweird.f32 %v2329_v57  ;;  %v1266_v36 = vpop.f32.mrf.mxu1 }
  0xea   : > { %v950_v23 = vsel %vm949_vm5, %v2325_v22, %v946_v41  ;;  %v1748_v1 = vadd.f32 %v2327_v33, %v1747_v50  ;;  %v1351_v5 = vsub.f32 0.0, %v3014_v44  ;;  %v534_v42 = vsub.f32 0.0, %v3021_v58  ;;  %vm724_vm9 = vmor %vm722_vm4, %vm723_vm7 }
  0xeb   : > { %v955_v48 = vsel %vm2983_vm14, %v954_v27, %v950_v23  ;;  %2332 = vpow2.f32 %v601_v39  ;;  %v719_v7 = vsub.f32 1.0, %v718_v2  ;;  %v1336_v0 = vsub.f32 0.0, %v3024_v61 }
  0xec   : > { %v1156_v25 = vmul.f32 %v955_v48, %v2845_v11  ;;  %v1752_v6 = vsel %vm1751_vm8, %v2327_v33, %v1748_v1  ;;  %v1403_v12 = vmul.f32 1.442695, %v1351_v5  ;;  %v571_v52 = vmul.f32 1.442695, %v534_v42 }
  0xed   : > { %v2331_v60 = vpop.eup %2330  ;;  %v1757_v62 = vsel %vm3001_vm1, %v1756_v14, %v1752_v6  ;;  %v3041_v13 = vadd.f32 %v2638_v20, %v501_v4  ;;  %v720_v19 = vmul.f32 %v2329_v57, %v719_v7  ;;  %v1373_v22 = vmul.f32 1.442695, %v1336_v0 }
  0xee   : > { %v1188_v63 = vpack.c.bf16 %v1156_v25, %v1156_v25  ;;  %v1958_v18 = vmul.f32 %v1757_v62, %v2849_v16  ;;  %v3044_v11 = vadd.f32 1.0, %v2331_v60  ;;  %2334 = vpow2.f32 %v1403_v12 }
  0xef   : > { %v550_v27 = vsub.f32 0.0, %v3041_v13  ;;  %v3048_v28 = vadd.f32 %v2643_v21, %v1303_v8  ;;  %v721_v45 = vadd.f32 %v2329_v57, %v720_v19  ;;  %vm727_vm10 = vcmp.eq.f32.partialorder %v726_v53, 8.507059e+37 }
  0xf0   : > { %1221 = vst.msk [vmem:[%s2752_s14 + $0x4c] sm:$0xf] %vm1201_vm6, %v1188_v63  ;;  %v1990_v31 = vpack.c.bf16 %v1958_v18, %v1958_v18  ;;  %2336 = vrcp.f32 %v3044_v11  ;;  %v729_v16 = vor.u32 1.1754944e-38, %v728_v56  ;;  %v1528_v34 = vand.u32 2147483647, %v3044_v11  ;;  %v504_v56 = vpop.f32.mrf.mxu2 }
  0xf1   : > { %v2333_v10 = vpop.eup %2332  ;;  %2338 = vpow2.f32 %v571_v52  ;;  %v603_v29 = vmul.f32 1.442695, %v550_v27  ;;  %v725_v30 = vsel %vm724_vm9, %v2329_v57, %v721_v45  ;;  %v1352_v33 = vsub.f32 0.0, %v3048_v28 }
  0xf2   : > { %2022 = vst.msk [vmem:[%s2764_s17 + $0x4c] sm:$0xf] %vm1201_vm6, %v1990_v31  ;;  %v3058_v59 = vadd.f32 1.0, %v2333_v10  ;;  %2340 = vpow2.f32 %v1373_v22  ;;  %v730_v32 = vsel %vm727_vm10, %v729_v16, %v725_v30  ;;  %v1530_v3 = vand.u32 2147483648, %v3044_v11 }
  0xf3   : > { %2342 = vpow2.f32 %v603_v29  ;;  %v1141_v51 = vmul.f32 %v730_v32, %v2880_v49  ;;  %v1405_v24 = vmul.f32 1.442695, %v1352_v33  ;;  %vm1524_vm11 = vweird.f32 %v3044_v11 }
  0xf4   : > { %2344 = vrcp.f32 %v3058_v59  ;;  %v2335_v17 = vpop.eup %2334  ;;  %vm3069_vm12 = vcmp.eq.f32.partialorder %v1528_v34, 8.507059e+37  ;;  %v966_v49 = vand.u32 2147483647, %v3058_v59  ;;  %v1531_v47 = vor.u32 1.1754944e-38, %v1530_v3 }
  0xf5   : > { %v1173_v15 = vpack.c.bf16 %v1141_v51, %v1141_v51  ;;  %v3065_v14 = vadd.f32 1.0, %v2335_v17  ;;  %v968_v53 = vand.u32 2147483648, %v3058_v59  ;;  %v3079_v54 = vadd.f32 %v2638_v20, %v464_v37 }
  0xf6   : > { %v2337_v38 = vpop.eup %2336  ;;  %vm962_vm14 = vweird.f32 %v3058_v59  ;;  %v3089_v1 = vadd.f32 %v2643_v21, %v1266_v36  ;;  %vm3092_vm15 = vcmp.eq.f32.partialorder %v966_v49, 8.507059e+37  ;;  %v3101_v6 = vadd.f32 %v2638_v20, %v504_v56  ;;  %v1306_v49 = vpop.f32.mrf.mxu3 }
  0xf7   : > { %v2339_v26 = vpop.eup %2338  ;;  %v1520_v40 = vmul.f32 %v2337_v38, %v3044_v11  ;;  %1206 = vst.msk [vmem:[%s2752_s14 + $0x10] sm:$0xf] %vm1201_vm6, %v1173_v15  ;;  %2346 = vrcp.f32 %v3065_v14  ;;  %vm1525_vm13 = vweird.f32 %v2337_v38  ;;  %v1768_v5 = vand.u32 2147483647, %v3065_v14 }
  0xf8   : > { %v2341_v46 = vpop.eup %2340  ;;  %v3081_v50 = vadd.f32 1.0, %v2339_v26  ;;  %2348 = vpow2.f32 %v1405_v24  ;;  %v969_v42 = vor.u32 1.1754944e-38, %v968_v53  ;;  %v1770_v25 = vand.u32 2147483648, %v3065_v14  ;;  %vm1526_vm1 = vmor %vm1524_vm11, %vm1525_vm13 }
  0xf9   : > { %v2343_v55 = vpop.eup %2342  ;;  %v1521_v41 = vsub.f32 1.0, %v1520_v40  ;;  %v3083_v57 = vadd.f32 1.0, %v2341_v46  ;;  %vm1764_vm0 = vweird.f32 %v3065_v14  ;;  %v535_v8 = vsub.f32 0.0, %v3079_v54 }
  0xfa   : > { %v2345_v39 = vpop.eup %2344  ;;  %v3086_v23 = vadd.f32 1.0, %v2343_v55  ;;  %2350 = vrcp.f32 %v3081_v50  ;;  %v743_v0 = vand.u32 2147483648, %v3081_v50  ;;  %v741_v62 = vand.u32 2147483647, %v3081_v50 }
  0xfb   : > { %v1522_v2 = vmul.f32 %v2337_v38, %v1521_v41  ;;  %v958_v4 = vmul.f32 %v2345_v39, %v3058_v59  ;;  %2352 = vrcp.f32 %v3083_v57  ;;  %vm963_vm2 = vweird.f32 %v2345_v39 }
  0xfc   : > { %v1545_v12 = vand.u32 2147483648, %v3083_v57  ;;  %2354 = vrcp.f32 %v3086_v23  ;;  %vm3113_vm3 = vcmp.eq.f32.partialorder %v1768_v5, 8.507059e+37  ;;  %v1543_v22 = vand.u32 2147483647, %v3083_v57  ;;  %vm964_vm7 = vmor %vm962_vm14, %vm963_vm2 }
  0xfd   : > { %v1523_v21 = vadd.f32 %v2337_v38, %v1522_v2  ;;  %v959_v7 = vsub.f32 1.0, %v958_v4  ;;  %v2347_v60 = vpop.eup %2346  ;;  %v1771_v27 = vor.u32 1.1754944e-38, %v1770_v25  ;;  %vm737_vm4 = vweird.f32 %v3081_v50 }
  0xfe   : > { %v2349_v20 = vpop.eup %2348  ;;  %v1760_v18 = vmul.f32 %v2347_v60, %v3065_v14  ;;  %v1337_v31 = vsub.f32 0.0, %v3089_v1  ;;  %v744_v30 = vor.u32 1.1754944e-38, %v743_v0  ;;  %vm1539_vm5 = vweird.f32 %v3083_v57 }
  0xff   : > { %v1527_v52 = vsel %vm1526_vm1, %v2337_v38, %v1523_v21  ;;  %v960_v63 = vmul.f32 %v2345_v39, %v959_v7  ;;  %vm1765_vm8 = vweird.f32 %v2347_v60  ;;  %vm3128_vm9 = vcmp.eq.f32.partialorder %v741_v62, 8.507059e+37 }
 0x100   : > { %v1532_v11 = vsel %vm3069_vm12, %v1531_v47, %v1527_v52  ;;  %v2351_v45 = vpop.eup %2350  ;;  %v1761_v29 = vsub.f32 1.0, %v1760_v18  ;;  %v1546_v51 = vor.u32 1.1754944e-38, %v1545_v12  ;;  %vm3135_vm10 = vcmp.eq.f32.partialorder %v1543_v22, 8.507059e+37  ;;  %vm1766_vm12 = vmor %vm1764_vm0, %vm1765_vm8 }
 0x101   : > { %v1943_v10 = vmul.f32 %v1532_v11, %v2900_v9  ;;  %v961_v16 = vadd.f32 %v2345_v39, %v960_v63  ;;  %v2353_v33 = vpop.eup %2352  ;;  %v733_v32 = vmul.f32 %v2351_v45, %v3081_v50  ;;  %v3132_v9 = vadd.f32 1.0, %v2349_v20  ;;  %v506_v11 = vpop.f32.mrf.mxu2 }
 0x102   : > { %v1762_v24 = vmul.f32 %v2347_v60, %v1761_v29  ;;  %v1535_v37 = vmul.f32 %v2353_v33, %v3083_v57  ;;  %vm977_vm11 = vweird.f32 %v3086_v23  ;;  %v2355_v59 = vpop.eup %2354  ;;  %v981_v40 = vand.u32 2147483647, %v3086_v23  ;;  %v3189_v29 = vld [vmem:[%s4062_s4] ss:$0 sm:$0xff] }
 0x103   : > { %v1975_v3 = vpack.c.bf16 %v1943_v10, %v1943_v10  ;;  %v965_v17 = vsel %vm964_vm7, %v2345_v39, %v961_v16  ;;  %v734_v26 = vsub.f32 1.0, %v733_v32  ;;  %v983_v43 = vand.u32 2147483648, %v3086_v23  ;;  %v3199_v32 = vld [vmem:[%s4061_s3] ss:$0 sm:$0xff] }
 0x104   : > { %v970_v15 = vsel %vm3092_vm15, %v969_v42, %v965_v17  ;;  %v1763_v46 = vadd.f32 %v2347_v60, %v1762_v24  ;;  %v1536_v47 = vsub.f32 1.0, %v1535_v37  ;;  %v973_v53 = vmul.f32 %v2355_v59, %v3086_v23 }
 0x105   : > { %2007 = vst.msk [vmem:[%s2764_s17 + $0x10] sm:$0xf] %vm1201_vm6, %v1975_v3  ;;  %v1157_v36 = vmul.f32 %v970_v15, %v2995_v35  ;;  %v735_v55 = vmul.f32 %v2351_v45, %v734_v26  ;;  %vm738_vm13 = vweird.f32 %v2351_v45  ;;  %vm1540_vm14 = vweird.f32 %v2353_v33 }
 0x106   : > { %2356 = vrcp.f32 %v3132_v9  ;;  %v1767_v56 = vsel %vm1766_vm12, %v2347_v60, %v1763_v46  ;;  %v1537_v39 = vmul.f32 %v2353_v33, %v1536_v47  ;;  %v974_v2 = vsub.f32 1.0, %v973_v53  ;;  %vm739_vm0 = vmor %vm737_vm4, %vm738_vm13 }
 0x107   : > { %v1189_v41 = vpack.c.bf16 %v1157_v36, %v1157_v36  ;;  %v1772_v35 = vsel %vm3113_vm3, %v1771_v27, %v1767_v56  ;;  %v736_v4 = vadd.f32 %v2351_v45, %v735_v55  ;;  %vm978_vm15 = vweird.f32 %v2355_v59  ;;  %vm1541_vm2 = vmor %vm1539_vm5, %vm1540_vm14 }
 0x108   : > { %vm3154_vm1 = vcmp.eq.f32.partialorder %v981_v40, 8.507059e+37  ;;  %v1959_v14 = vmul.f32 %v1772_v35, %v3014_v44  ;;  %v1538_v5 = vadd.f32 %v2353_v33, %v1537_v39  ;;  %v975_v42 = vmul.f32 %v2355_v59, %v974_v2  ;;  %vm979_vm3 = vmor %vm977_vm11, %vm978_vm15 }
 0x109   : > { %1222 = vst.msk [vmem:[%s2752_s14 + $0x50] sm:$0xf] %vm1201_vm6, %v1189_v41  ;;  %v984_v25 = vor.u32 1.1754944e-38, %v983_v43  ;;  %v740_v21 = vsel %vm739_vm0, %v2351_v45, %v736_v4  ;;  %v1783_v7 = vand.u32 2147483647, %v3132_v9  ;;  %v1785_v63 = vand.u32 2147483648, %v3132_v9  ;;  %v1308_v45 = vpop.f32.mrf.mxu3 }
 0x10a   : > { %v573_v0 = vmul.f32 1.442695, %v535_v8  ;;  %v1375_v60 = vmul.f32 1.442695, %v1337_v31  ;;  %v1991_v62 = vpack.c.bf16 %v1959_v14, %v1959_v14  ;;  %v745_v44 = vsel %vm3128_vm9, %v744_v30, %v740_v21  ;;  %v466_v8 = vpop.f32.mrf.mxu0 }
 0x10b   : > { %v1542_v50 = vsel %vm1541_vm2, %v2353_v33, %v1538_v5  ;;  %v976_v12 = vadd.f32 %v2355_v59, %v975_v42  ;;  %v1142_v52 = vmul.f32 %v745_v44, %v3021_v58  ;;  %v1268_v58 = vpop.f32.mrf.mxu1  ;;  %v551_v31 = vsub.f32 0.0, %v3101_v6 }
 0x10c   : > { %v2357_v20 = vpop.eup %2356  ;;  %v1547_v57 = vsel %vm3135_vm10, %v1546_v51, %v1542_v50  ;;  %2358 = vpow2.f32 %v573_v0  ;;  %2023 = vst.msk [vmem:[%s2764_s17 + $0x50] sm:$0xf] %vm1201_vm6, %v1991_v62  ;;  %v3192_v30 = vadd.f32 %v3189_v29, %v1306_v49  ;;  %v3205_v34 = vadd.f32 %v3189_v29, %v1268_v58 }
 0x10d   : > { %v1944_v18 = vmul.f32 %v1547_v57, %v3024_v61  ;;  %v980_v19 = vsel %vm979_vm3, %v2355_v59, %v976_v12  ;;  %v1775_v22 = vmul.f32 %v2357_v20, %v3132_v9  ;;  %vm1780_vm4 = vweird.f32 %v2357_v20 }
 0x10e   : > { %v1174_v27 = vpack.c.bf16 %v1142_v52, %v1142_v52  ;;  %v985_v23 = vsel %vm3154_vm1, %v984_v25, %v980_v19  ;;  %2360 = vpow2.f32 %v1375_v60  ;;  %v605_v33 = vmul.f32 1.442695, %v551_v31  ;;  %v509_v31 = vpop.f32.mrf.mxu2 }
 0x10f   : > { %v1976_v10 = vpack.c.bf16 %v1944_v18, %v1944_v18  ;;  %v1158_v16 = vmul.f32 %v985_v23, %v3041_v13  ;;  %v1776_v61 = vsub.f32 1.0, %v1775_v22  ;;  %v3202_v13 = vadd.f32 %v3199_v32, %v466_v8 }
 0x110   : > { %1207 = vst.msk [vmem:[%s2752_s14 + $0x14] sm:$0xf] %vm1201_vm6, %v1174_v27  ;;  %v3208_v51 = vadd.f32 %v3199_v32, %v506_v11  ;;  %v1353_v24 = vsub.f32 0.0, %v3192_v30  ;;  %v3214_v37 = vadd.f32 %v3189_v29, %v1308_v45  ;;  %2362 = vpow2.f32 %v605_v33 }
 0x111   : > { %2008 = vst.msk [vmem:[%s2764_s17 + $0x14] sm:$0xf] %vm1201_vm6, %v1976_v10  ;;  %v1190_v3 = vpack.c.bf16 %v1158_v16, %v1158_v16  ;;  %v1777_v17 = vmul.f32 %v2357_v20, %v1776_v61  ;;  %v536_v59 = vsub.f32 0.0, %v3202_v13  ;;  %v1338_v15 = vsub.f32 0.0, %v3205_v34 }
 0x112   : > { %v2359_v38 = vpop.eup %2358  ;;  %vm1779_vm5 = vweird.f32 %v3132_v9  ;;  %v1407_v43 = vmul.f32 1.442695, %v1353_v24  ;;  %v1786_v36 = vor.u32 1.1754944e-38, %v1785_v63  ;;  %v552_v47 = vsub.f32 0.0, %v3208_v51  ;;  %v469_v39 = vpop.f32.mrf.mxu0 }
 0x113   : > { %1223 = vst.msk [vmem:[%s2752_s14 + $0x54] sm:$0xf] %vm1201_vm6, %v1190_v3  ;;  %v1778_v26 = vadd.f32 %v2357_v20, %v1777_v17  ;;  %v3221_v40 = vadd.f32 1.0, %v2359_v38  ;;  %vm1781_vm7 = vmor %vm1779_vm5, %vm1780_vm4  ;;  %v575_v46 = vmul.f32 1.442695, %v536_v59  ;;  %vm1784_vm8 = vcmp.eq.f32.partialorder %v1783_v7, 8.507059e+37  ;;  %v1271_v7 = vpop.f32.mrf.mxu1 }
 0x114   : > { %v2361_v49 = vpop.eup %2360  ;;  %v1354_v55 = vsub.f32 0.0, %v3214_v37  ;;  %v1377_v9 = vmul.f32 1.442695, %v1338_v15  ;;  %v607_v14 = vmul.f32 1.442695, %v552_v47  ;;  %v3236_v25 = vadd.f32 %v3199_v32, %v469_v39 }
 0x115   : > { %v1782_v53 = vsel %vm1781_vm7, %v2357_v20, %v1778_v26  ;;  %2364 = vrcp.f32 %v3221_v40  ;;  %v3227_v56 = vadd.f32 1.0, %v2361_v49  ;;  %v756_v4 = vand.u32 2147483647, %v3221_v40 }
 0x116   : > { %v1787_v41 = vsel %vm1784_vm8, %v1786_v36, %v1782_v53  ;;  %2366 = vpow2.f32 %v1407_v43  ;;  %v2363_v35 = vpop.eup %2362  ;;  %v758_v48 = vand.u32 2147483648, %v3221_v40  ;;  %v1409_v21 = vmul.f32 1.442695, %v1354_v55 }
 0x117   : > { %v1960_v2 = vmul.f32 %v1787_v41, %v3048_v28  ;;  %2368 = vpow2.f32 %v575_v46  ;;  %v3233_v42 = vadd.f32 1.0, %v2363_v35  ;;  %vm752_vm9 = vweird.f32 %v3221_v40 }
 0x118   : > { %2370 = vrcp.f32 %v3227_v56  ;;  %v1558_v28 = vand.u32 2147483647, %v3227_v56  ;;  %v1560_v60 = vand.u32 2147483648, %v3227_v56  ;;  %vm3245_vm10 = vcmp.eq.f32.partialorder %v756_v4, 8.507059e+37 }
 0x119   : > { %v1992_v5 = vpack.c.bf16 %v1960_v2, %v1960_v2  ;;  %2372 = vpow2.f32 %v1377_v9  ;;  %v759_v12 = vor.u32 1.1754944e-38, %v758_v48  ;;  %vm1554_vm11 = vweird.f32 %v3227_v56 }
 0x11a   : > { %2374 = vrcp.f32 %v3233_v42  ;;  %v998_v52 = vand.u32 2147483648, %v3233_v42  ;;  %v537_v63 = vsub.f32 0.0, %v3236_v25  ;;  %v3255_v8 = vadd.f32 %v3189_v29, %v1271_v7 }
 0x11b   : > { %v2365_v0 = vpop.eup %2364  ;;  %2024 = vst.msk [vmem:[%s2764_s17 + $0x54] sm:$0xf] %vm1201_vm6, %v1992_v5  ;;  %2376 = vpow2.f32 %v607_v14  ;;  %v996_v22 = vand.u32 2147483647, %v3233_v42  ;;  %vm3261_vm12 = vcmp.eq.f32.partialorder %v1558_v28, 8.507059e+37  ;;  %v1561_v23 = vor.u32 1.1754944e-38, %v1560_v60 }
 0x11c   : > { %v2367_v62 = vpop.eup %2366  ;;  %v748_v44 = vmul.f32 %v2365_v0, %v3221_v40  ;;  %2378 = vpow2.f32 %v1409_v21  ;;  %vm753_vm13 = vweird.f32 %v2365_v0  ;;  %vm992_vm14 = vweird.f32 %v3233_v42 }
 0x11d   : > { %v2369_v20 = vpop.eup %2368  ;;  %v3251_v57 = vadd.f32 1.0, %v2367_v62  ;;  %v999_v33 = vor.u32 1.1754944e-38, %v998_v52  ;;  %v577_v3 = vmul.f32 1.442695, %v537_v63  ;;  %v1339_v17 = vsub.f32 0.0, %v3255_v8  ;;  %vm754_vm1 = vmor %vm752_vm9, %vm753_vm13 }
 0x11e   : > { %v2371_v18 = vpop.eup %2370  ;;  %v749_v19 = vsub.f32 1.0, %v748_v44  ;;  %v3258_v58 = vadd.f32 1.0, %v2369_v20  ;;  %vm3270_vm15 = vcmp.eq.f32.partialorder %v996_v22, 8.507059e+37  ;;  %v3276_v43 = vadd.f32 %v3199_v32, %v509_v31 }
 0x11f   : > { %v1550_v11 = vmul.f32 %v2371_v18, %v3227_v56  ;;  %2380 = vrcp.f32 %v3251_v57  ;;  %v2373_v45 = vpop.eup %2372  ;;  %v1798_v26 = vand.u32 2147483647, %v3251_v57  ;;  %vm1555_vm0 = vweird.f32 %v2371_v18 }
 0x120   : > { %v750_v10 = vmul.f32 %v2365_v0, %v749_v19  ;;  %2382 = vrcp.f32 %v3258_v58  ;;  %v2375_v16 = vpop.eup %2374  ;;  %v1800_v36 = vand.u32 2147483648, %v3251_v57  ;;  %v771_v46 = vand.u32 2147483647, %v3258_v58  ;;  %vm1556_vm5 = vmor %vm1554_vm11, %vm1555_vm0 }
 0x121   : > { %v1551_v61 = vsub.f32 1.0, %v1550_v11  ;;  %v2377_v24 = vpop.eup %2376  ;;  %v988_v59 = vmul.f32 %v2375_v16, %v3233_v42  ;;  %vm1794_vm2 = vweird.f32 %v3251_v57  ;;  %v773_v41 = vand.u32 2147483648, %v3258_v58 }
 0x122   : > { %v751_v38 = vadd.f32 %v2365_v0, %v750_v10  ;;  %v2379_v47 = vpop.eup %2378  ;;  %v3284_v9 = vadd.f32 1.0, %v2373_v45  ;;  %vm993_vm3 = vweird.f32 %v2375_v16  ;;  %vm767_vm4 = vweird.f32 %v3258_v58 }
 0x123   : > { %v1552_v49 = vmul.f32 %v2371_v18, %v1551_v61  ;;  %v989_v55 = vsub.f32 1.0, %v988_v59  ;;  %v3289_v35 = vadd.f32 1.0, %v2377_v24  ;;  %vm3296_vm7 = vcmp.eq.f32.partialorder %v1798_v26, 8.507059e+37  ;;  %vm994_vm8 = vmor %vm992_vm14, %vm993_vm3 }
 0x124   : > { %v755_v53 = vsel %vm754_vm1, %v2365_v0, %v751_v38  ;;  %2384 = vpow2.f32 %v577_v3  ;;  %v3302_v28 = vadd.f32 1.0, %v2379_v47  ;;  %v1573_v52 = vand.u32 2147483647, %v3284_v9 }
 0x125   : > { %v2381_v39 = vpop.eup %2380  ;;  %v760_v40 = vsel %vm3245_vm10, %v759_v12, %v755_v53  ;;  %v1553_v2 = vadd.f32 %v2371_v18, %v1552_v49  ;;  %v990_v14 = vmul.f32 %v2375_v16, %v989_v55  ;;  %2386 = vrcp.f32 %v3284_v9 }
 0x126   : > { %v2383_v4 = vpop.eup %2382  ;;  %v1143_v48 = vmul.f32 %v760_v40, %v3079_v54  ;;  %v1790_v5 = vmul.f32 %v2381_v39, %v3251_v57  ;;  %vm1795_vm9 = vweird.f32 %v2381_v39  ;;  %2388 = vrcp.f32 %v3289_v35 }
 0x127   : > { %v1557_v7 = vsel %vm1556_vm5, %v2371_v18, %v1553_v2  ;;  %v763_v0 = vmul.f32 %v2383_v4, %v3258_v58  ;;  %v991_v60 = vadd.f32 %v2375_v16, %v990_v14  ;;  %vm768_vm10 = vweird.f32 %v2383_v4 }
 0x128   : > { %v1175_v54 = vpack.c.bf16 %v1143_v48, %v1143_v48  ;;  %v1562_v56 = vsel %vm3261_vm12, %v1561_v23, %v1557_v7  ;;  %v1791_v62 = vsub.f32 1.0, %v1790_v5  ;;  %v1575_v42 = vand.u32 2147483648, %v3284_v9  ;;  %vm1796_vm12 = vmor %vm1794_vm2, %vm1795_vm9 }
 0x129   : > { %v1945_v44 = vmul.f32 %v1562_v56, %v3089_v1  ;;  %v764_v50 = vsub.f32 1.0, %v763_v0  ;;  %v995_v12 = vsel %vm994_vm8, %v2375_v16, %v991_v60  ;;  %v1801_v27 = vor.u32 1.1754944e-38, %v1800_v36  ;;  %vm769_vm14 = vmor %vm767_vm4, %vm768_vm10  ;;  %v471_v56 = vpop.f32.mrf.mxu0  ;;  %v1273_v60 = vpop.f32.mrf.mxu1 }
 0x12a   : > { %1208 = vst.msk [vmem:[%s2752_s14 + $0x18] sm:$0xf] %vm1201_vm6, %v1175_v54  ;;  %v1792_v20 = vmul.f32 %v2381_v39, %v1791_v62  ;;  %v1000_v1 = vsel %vm3270_vm15, %v999_v33, %v995_v12  ;;  %v2385_v19 = vpop.eup %2384  ;;  %vm3318_vm11 = vcmp.eq.f32.partialorder %v771_v46, 8.507059e+37  ;;  %v774_v10 = vor.u32 1.1754944e-38, %v773_v41  ;;  %v1311_v41 = vpop.f32.mrf.mxu3 }
 0x12b   : > { %v1977_v63 = vpack.c.bf16 %v1945_v44, %v1945_v44  ;;  %v765_v18 = vmul.f32 %v2383_v4, %v764_v50  ;;  %v1159_v22 = vmul.f32 %v1000_v1, %v3101_v6  ;;  %v2387_v31 = vpop.eup %2386  ;;  %vm1569_vm13 = vweird.f32 %v3284_v9 }
 0x12c   : > { %v1793_v11 = vadd.f32 %v2381_v39, %v1792_v20  ;;  %2390 = vrcp.f32 %v3302_v28  ;;  %v1565_v61 = vmul.f32 %v2387_v31, %v3284_v9  ;;  %vm3333_vm15 = vcmp.eq.f32.partialorder %v1573_v52, 8.507059e+37  ;;  %v2389_v59 = vpop.eup %2388 }
 0x12d   : > { %2009 = vst.msk [vmem:[%s2764_s17 + $0x18] sm:$0xf] %vm1201_vm6, %v1977_v63  ;;  %v766_v45 = vadd.f32 %v2383_v4, %v765_v18  ;;  %v1191_v6 = vpack.c.bf16 %v1159_v22, %v1159_v22  ;;  %v1576_v24 = vor.u32 1.1754944e-38, %v1575_v42  ;;  %v1011_v38 = vand.u32 2147483647, %v3289_v35 }
 0x12e   : > { %v1797_v16 = vsel %vm1796_vm12, %v2381_v39, %v1793_v11  ;;  %v1566_v26 = vsub.f32 1.0, %v1565_v61  ;;  %v1013_v49 = vand.u32 2147483648, %v3289_v35  ;;  %vm1570_vm1 = vweird.f32 %v2387_v31  ;;  %v511_v11 = vpop.f32.mrf.mxu2 }
 0x12f   : > { %v1802_v57 = vsel %vm3296_vm7, %v1801_v27, %v1797_v16  ;;  %v770_v3 = vsel %vm769_vm14, %v2383_v4, %v766_v45  ;;  %1224 = vst.msk [vmem:[%s2752_s14 + $0x58] sm:$0xf] %vm1201_vm6, %v1191_v6  ;;  %v1003_v46 = vmul.f32 %v2389_v59, %v3289_v35  ;;  %vm1007_vm0 = vweird.f32 %v3289_v35  ;;  %vm1571_vm3 = vmor %vm1569_vm13, %vm1570_vm1 }
 0x130   : > { %v1961_v15 = vmul.f32 %v1802_v57, %v3192_v30  ;;  %v775_v58 = vsel %vm3318_vm11, %v774_v10, %v770_v3  ;;  %v1567_v53 = vmul.f32 %v2387_v31, %v1566_v26  ;;  %v1813_v55 = vand.u32 2147483647, %v3302_v28 }
 0x131   : > { %v1144_v36 = vmul.f32 %v775_v58, %v3202_v13  ;;  %v3350_v30 = vadd.f32 1.0, %v2385_v19  ;;  %v1004_v2 = vsub.f32 1.0, %v1003_v46  ;;  %vm3352_vm2 = vcmp.eq.f32.partialorder %v1011_v38, 8.507059e+37 }
 0x132   : > { %v1993_v47 = vpack.c.bf16 %v1961_v15, %v1961_v15  ;;  %v2391_v39 = vpop.eup %2390  ;;  %v1379_v13 = vmul.f32 1.442695, %v1339_v17  ;;  %v1568_v48 = vadd.f32 %v2387_v31, %v1567_v53  ;;  %v1014_v14 = vor.u32 1.1754944e-38, %v1013_v49 }
 0x133   : > { %v1176_v40 = vpack.c.bf16 %v1144_v36, %v1144_v36  ;;  %v1805_v5 = vmul.f32 %v2391_v39, %v3302_v28  ;;  %v1815_v21 = vand.u32 2147483648, %v3302_v28  ;;  %v1005_v7 = vmul.f32 %v2389_v59, %v1004_v2  ;;  %v474_v2 = vpop.f32.mrf.mxu0 }
 0x134   : > { %2025 = vst.msk [vmem:[%s2764_s17 + $0x58] sm:$0xf] %vm1201_vm6, %v1993_v47  ;;  %vm1008_vm4 = vweird.f32 %v2389_v59  ;;  %vm1809_vm5 = vweird.f32 %v3302_v28  ;;  %2392 = vrcp.f32 %v3350_v30  ;;  %v1572_v17 = vsel %vm1571_vm3, %v2387_v31, %v1568_v48  ;;  %v1276_v48 = vpop.f32.mrf.mxu1 }
 0x135   : > { %1209 = vst.msk [vmem:[%s2752_s14 + $0x1c] sm:$0xf] %vm1201_vm6, %v1176_v40  ;;  %v1806_v0 = vsub.f32 1.0, %v1805_v5  ;;  %vm3369_vm7 = vcmp.eq.f32.partialorder %v1813_v55, 8.507059e+37  ;;  %2394 = vpow2.f32 %v1379_v13  ;;  %v1577_v62 = vsel %vm3333_vm15, %v1576_v24, %v1572_v17  ;;  %vm1009_vm9 = vmor %vm1007_vm0, %vm1008_vm4 }
 0x136   : > { %v1006_v9 = vadd.f32 %v2389_v59, %v1005_v7  ;;  %vm1810_vm8 = vweird.f32 %v2391_v39  ;;  %v553_v44 = vsub.f32 0.0, %v3276_v43  ;;  %v1946_v50 = vmul.f32 %v1577_v62, %v3205_v34 }
 0x137   : > { %v1807_v12 = vmul.f32 %v2391_v39, %v1806_v0  ;;  %v1816_v20 = vor.u32 1.1754944e-38, %v1815_v21  ;;  %v3380_v52 = vadd.f32 %v3189_v29, %v1311_v41  ;;  %v3383_v18 = vadd.f32 %v3199_v32, %v471_v56  ;;  %vm1811_vm10 = vmor %vm1809_vm5, %vm1810_vm8 }
 0x138   : > { %v1010_v63 = vsel %vm1009_vm9, %v2389_v59, %v1006_v9  ;;  %v609_v1 = vmul.f32 1.442695, %v553_v44  ;;  %v3386_v42 = vadd.f32 %v3189_v29, %v1273_v60  ;;  %v1978_v19 = vpack.c.bf16 %v1946_v50, %v1946_v50 }
 0x139   : > { %v1015_v34 = vsel %vm3352_vm2, %v1014_v14, %v1010_v63  ;;  %v1808_v35 = vadd.f32 %v2391_v39, %v1807_v12  ;;  %v1355_v22 = vsub.f32 0.0, %v3380_v52  ;;  %v538_v31 = vsub.f32 0.0, %v3383_v18  ;;  %v514_v14 = vpop.f32.mrf.mxu2 }
 0x13a   : > { %v2393_v27 = vpop.eup %2392  ;;  %v1160_v23 = vmul.f32 %v1015_v34, %v3208_v51  ;;  %2396 = vpow2.f32 %v609_v1  ;;  %v1340_v45 = vsub.f32 0.0, %v3386_v42  ;;  %2010 = vst.msk [vmem:[%s2764_s17 + $0x1c] sm:$0xf] %vm1201_vm6, %v1978_v19  ;;  %vm782_vm11 = vweird.f32 %v3350_v30  ;;  %v1313_v51 = vpop.f32.mrf.mxu3 }
 0x13b   : > { %v2395_v10 = vpop.eup %2394  ;;  %v1812_v6 = vsel %vm1811_vm10, %v2391_v39, %v1808_v35  ;;  %v778_v16 = vmul.f32 %v2393_v27, %v3350_v30  ;;  %v1411_v61 = vmul.f32 1.442695, %v1355_v22  ;;  %v579_v3 = vmul.f32 1.442695, %v538_v31 }
 0x13c   : > { %v1192_v33 = vpack.c.bf16 %v1160_v23, %v1160_v23  ;;  %v1817_v28 = vsel %vm3369_vm7, %v1816_v20, %v1812_v6  ;;  %v3403_v57 = vadd.f32 1.0, %v2395_v10  ;;  %v1381_v59 = vmul.f32 1.442695, %v1340_v45 }
 0x13d   : > { %v1962_v24 = vmul.f32 %v1817_v28, %v3214_v37  ;;  %v779_v38 = vsub.f32 1.0, %v778_v16  ;;  %2398 = vpow2.f32 %v1411_v61  ;;  %vm783_vm12 = vweird.f32 %v2393_v27 }
 0x13e   : > { %1225 = vst.msk [vmem:[%s2752_s14 + $0x5c] sm:$0xf] %vm1201_vm6, %v1192_v33  ;;  %v786_v15 = vand.u32 2147483647, %v3350_v30  ;;  %v788_v58 = vand.u32 2147483648, %v3350_v30  ;;  %2400 = vrcp.f32 %v3403_v57  ;;  %v3412_v36 = vadd.f32 %v3199_v32, %v511_v11  ;;  %vm784_vm13 = vmor %vm782_vm11, %vm783_vm12 }
 0x13f   : > { %v1994_v26 = vpack.c.bf16 %v1962_v24, %v1962_v24  ;;  %v780_v49 = vmul.f32 %v2393_v27, %v779_v38  ;;  %2402 = vpow2.f32 %v579_v3  ;;  %v1588_v46 = vand.u32 2147483647, %v3403_v57 }
 0x140   : > { %v2397_v37 = vpop.eup %2396  ;;  %v1590_v47 = vand.u32 2147483648, %v3403_v57  ;;  %2404 = vpow2.f32 %v1381_v59  ;;  %v554_v41 = vsub.f32 0.0, %v3412_v36  ;;  %v3422_v39 = vadd.f32 %v3189_v29, %v1313_v51 }
 0x141   : > { %2026 = vst.msk [vmem:[%s2764_s17 + $0x5c] sm:$0xf] %vm1201_vm6, %v1994_v26  ;;  %v781_v53 = vadd.f32 %v2393_v27, %v780_v49  ;;  %v3418_v55 = vadd.f32 1.0, %v2397_v37  ;;  %v789_v40 = vor.u32 1.1754944e-38, %v788_v58  ;;  %vm787_vm14 = vcmp.eq.f32.partialorder %v786_v15, 8.507059e+37  ;;  %v1278_v15 = vpop.f32.mrf.mxu1 }
 0x142   : > { %vm1584_vm15 = vweird.f32 %v3403_v57  ;;  %v1591_v7 = vor.u32 1.1754944e-38, %v1590_v47  ;;  %v611_v0 = vmul.f32 1.442695, %v554_v41  ;;  %vm3433_vm1 = vcmp.eq.f32.partialorder %v1588_v46, 8.507059e+37  ;;  %v1316_v44 = vpop.f32.mrf.mxu3 }
 0x143   : > { %v2399_v4 = vpop.eup %2398  ;;  %v785_v13 = vsel %vm784_vm13, %v2393_v27, %v781_v53  ;;  %2406 = vrcp.f32 %v3418_v55  ;;  %v1356_v62 = vsub.f32 0.0, %v3422_v39  ;;  %v3439_v9 = vadd.f32 %v3199_v32, %v474_v2 }
 0x144   : > { %v2401_v5 = vpop.eup %2400  ;;  %v790_v21 = vsel %vm787_vm14, %v789_v40, %v785_v13  ;;  %v3429_v17 = vadd.f32 1.0, %v2399_v4  ;;  %v1026_v12 = vand.u32 2147483647, %v3418_v55  ;;  %v3447_v20 = vadd.f32 %v3199_v32, %v514_v14 }
 0x145   : > { %v2403_v54 = vpop.eup %2402  ;;  %v1145_v30 = vmul.f32 %v790_v21, %v3236_v25  ;;  %v1580_v56 = vmul.f32 %v2401_v5, %v3403_v57  ;;  %v3444_v25 = vadd.f32 %v3189_v29, %v1276_v48  ;;  %v1028_v19 = vand.u32 2147483648, %v3418_v55 }
 0x146   : > { %v2405_v50 = vpop.eup %2404  ;;  %2408 = vrcp.f32 %v3429_v17  ;;  %v3450_v34 = vadd.f32 1.0, %v2403_v54  ;;  %v1830_v35 = vand.u32 2147483648, %v3429_v17  ;;  %v3456_v11 = vadd.f32 %v3189_v29, %v1316_v44 }
 0x147   : > { %v1177_v63 = vpack.c.bf16 %v1145_v30, %v1145_v30  ;;  %v1581_v1 = vsub.f32 1.0, %v1580_v56  ;;  %v3453_v22 = vadd.f32 1.0, %v2405_v50  ;;  %2410 = vpow2.f32 %v611_v0 }
 0x148   : > { %vm1585_vm0 = vweird.f32 %v2401_v5  ;;  %v1828_v31 = vand.u32 2147483647, %v3429_v17  ;;  %2412 = vrcp.f32 %v3450_v34  ;;  %vm1022_vm2 = vweird.f32 %v3418_v55 }
 0x149   : > { %v2407_v27 = vpop.eup %2406  ;;  %1210 = vst.msk [vmem:[%s2752_s14 + $0x20] sm:$0xf] %vm1201_vm6, %v1177_v63  ;;  %v1582_v23 = vmul.f32 %v2401_v5, %v1581_v1  ;;  %vm3464_vm3 = vcmp.eq.f32.partialorder %v1026_v12, 8.507059e+37  ;;  %v1413_v6 = vmul.f32 1.442695, %v1356_v62  ;;  %v1029_v61 = vor.u32 1.1754944e-38, %v1028_v19  ;;  %vm1586_vm5 = vmor %vm1584_vm15, %vm1585_vm0 }
 0x14a   : > { %v1018_v45 = vmul.f32 %v2407_v27, %v3418_v55  ;;  %vm1824_vm4 = vweird.f32 %v3429_v17  ;;  %2414 = vrcp.f32 %v3453_v22  ;;  %v1831_v28 = vor.u32 1.1754944e-38, %v1830_v35 }
 0x14b   : > { %v1583_v16 = vadd.f32 %v2401_v5, %v1582_v23  ;;  %v801_v3 = vand.u32 2147483647, %v3450_v34  ;;  %v803_v24 = vand.u32 2147483648, %v3450_v34  ;;  %vm1023_vm7 = vweird.f32 %v2407_v27 }
 0x14c   : > { %v2409_v51 = vpop.eup %2408  ;;  %v1019_v33 = vsub.f32 1.0, %v1018_v45  ;;  %vm3475_vm8 = vcmp.eq.f32.partialorder %v1828_v31, 8.507059e+37  ;;  %v1603_v58 = vand.u32 2147483647, %v3453_v22  ;;  %v1605_v37 = vand.u32 2147483648, %v3453_v22  ;;  %vm1024_vm13 = vmor %vm1022_vm2, %vm1023_vm7 }
 0x14d   : > { %v1587_v38 = vsel %vm1586_vm5, %v2401_v5, %v1583_v16  ;;  %v1820_v59 = vmul.f32 %v2409_v51, %v3429_v17  ;;  %v2411_v26 = vpop.eup %2410  ;;  %2416 = vpow2.f32 %v1413_v6  ;;  %vm797_vm9 = vweird.f32 %v3450_v34 }
 0x14e   : > { %v1592_v57 = vsel %vm3433_vm1, %v1591_v7, %v1587_v38  ;;  %v1020_v49 = vmul.f32 %v2407_v27, %v1019_v33  ;;  %v2413_v46 = vpop.eup %2412  ;;  %v3485_v41 = vadd.f32 1.0, %v2411_v26  ;;  %vm1825_vm10 = vweird.f32 %v2409_v51 }
 0x14f   : > { %v1947_v47 = vmul.f32 %v1592_v57, %v3255_v8  ;;  %v1821_v53 = vsub.f32 1.0, %v1820_v59  ;;  %v793_v2 = vmul.f32 %v2413_v46, %v3450_v34  ;;  %vm3488_vm11 = vcmp.eq.f32.partialorder %v801_v3, 8.507059e+37  ;;  %vm1826_vm0 = vmor %vm1824_vm4, %vm1825_vm10  ;;  %v476_v59 = vpop.f32.mrf.mxu0 }
 0x150   : > { %v1021_v40 = vadd.f32 %v2407_v27, %v1020_v49  ;;  %v804_v13 = vor.u32 1.1754944e-38, %v803_v24  ;;  %vm1599_vm12 = vweird.f32 %v3453_v22  ;;  %v2415_v48 = vpop.eup %2414  ;;  %2418 = vrcp.f32 %v3485_v41 }
 0x151   : > { %v1979_v14 = vpack.c.bf16 %v1947_v47, %v1947_v47  ;;  %v1822_v8 = vmul.f32 %v2409_v51, %v1821_v53  ;;  %v539_v5 = vsub.f32 0.0, %v3439_v9  ;;  %v794_v7 = vsub.f32 1.0, %v793_v2  ;;  %v516_v2 = vpop.f32.mrf.mxu2 }
 0x152   : > { %v1025_v21 = vsel %vm1024_vm13, %v2407_v27, %v1021_v40  ;;  %v1595_v0 = vmul.f32 %v2415_v48, %v3453_v22  ;;  %vm3499_vm14 = vcmp.eq.f32.partialorder %v1603_v58, 8.507059e+37  ;;  %v1606_v30 = vor.u32 1.1754944e-38, %v1605_v37 }
 0x153   : > { %2011 = vst.msk [vmem:[%s2764_s17 + $0x20] sm:$0xf] %vm1201_vm6, %v1979_v14  ;;  %v1030_v55 = vsel %vm3464_vm3, %v1029_v61, %v1025_v21  ;;  %v1823_v56 = vadd.f32 %v2409_v51, %v1822_v8  ;;  %vm798_vm15 = vweird.f32 %v2413_v46  ;;  %vm1600_vm1 = vweird.f32 %v2415_v48  ;;  %v2417_v60 = vpop.eup %2416 }
 0x154   : > { %v1161_v62 = vmul.f32 %v1030_v55, %v3276_v43  ;;  %v795_v44 = vmul.f32 %v2413_v46, %v794_v7  ;;  %v1596_v50 = vsub.f32 1.0, %v1595_v0  ;;  %v1041_v12 = vand.u32 2147483647, %v3485_v41  ;;  %vm799_vm2 = vmor %vm797_vm9, %vm798_vm15 }
 0x155   : > { %v1827_v63 = vsel %vm1826_vm0, %v2409_v51, %v1823_v56  ;;  %v1043_v1 = vand.u32 2147483648, %v3485_v41  ;;  %v3513_v19 = vadd.f32 1.0, %v2417_v60  ;;  %v581_v35 = vmul.f32 1.442695, %v539_v5  ;;  %vm1601_vm5 = vmor %vm1599_vm12, %vm1600_vm1 }
 0x156   : > { %v1193_v27 = vpack.c.bf16 %v1161_v62, %v1161_v62  ;;  %v1832_v23 = vsel %vm3475_vm8, %v1831_v28, %v1827_v63  ;;  %v796_v43 = vadd.f32 %v2413_v46, %v795_v44  ;;  %v1597_v31 = vmul.f32 %v2415_v48, %v1596_v50  ;;  %v2419_v45 = vpop.eup %2418 }
 0x157   : > { %v1963_v17 = vmul.f32 %v1832_v23, %v3380_v52  ;;  %vm1037_vm3 = vweird.f32 %v3485_v41  ;;  %2420 = vrcp.f32 %v3513_v19  ;;  %v1341_v10 = vsub.f32 0.0, %v3444_v25 }
 0x158   : > { %1226 = vst.msk [vmem:[%s2752_s14 + $0x60] sm:$0xf] %vm1201_vm6, %v1193_v27  ;;  %v800_v6 = vsel %vm799_vm2, %v2413_v46, %v796_v43  ;;  %v1598_v16 = vadd.f32 %v2415_v48, %v1597_v31  ;;  %v1033_v61 = vmul.f32 %v2419_v45, %v3485_v41  ;;  %vm3527_vm4 = vcmp.eq.f32.partialorder %v1041_v12, 8.507059e+37 }
 0x159   : > { %v1995_v52 = vpack.c.bf16 %v1963_v17, %v1963_v17  ;;  %v805_v34 = vsel %vm3488_vm11, %v804_v13, %v800_v6  ;;  %v1044_v33 = vor.u32 1.1754944e-38, %v1043_v1  ;;  %v1843_v28 = vand.u32 2147483647, %v3513_v19 }
 0x15a   : > { %v1146_v3 = vmul.f32 %v805_v34, %v3383_v18  ;;  %v1602_v24 = vsel %vm1601_vm5, %v2415_v48, %v1598_v16  ;;  %v1034_v38 = vsub.f32 1.0, %v1033_v61  ;;  %2422 = vpow2.f32 %v581_v35  ;;  %v1318_v35 = vpop.f32.mrf.mxu3 }
 0x15b   : > { %2027 = vst.msk [vmem:[%s2764_s17 + $0x60] sm:$0xf] %vm1201_vm6, %v1995_v52  ;;  %v1607_v58 = vsel %vm3499_vm14, %v1606_v30, %v1602_v24  ;;  %vm1038_vm7 = vweird.f32 %v2419_v45  ;;  %v1383_v26 = vmul.f32 1.442695, %v1341_v10  ;;  %v555_v22 = vsub.f32 0.0, %v3447_v20 }
 0x15c   : > { %v1178_v57 = vpack.c.bf16 %v1146_v3, %v1146_v3  ;;  %v1948_v49 = vmul.f32 %v1607_v58, %v3386_v42  ;;  %v1035_v37 = vmul.f32 %v2419_v45, %v1034_v38  ;;  %v1357_v18 = vsub.f32 0.0, %v3456_v11  ;;  %vm1039_vm8 = vmor %vm1037_vm3, %vm1038_vm7 }
 0x15d   : > { %v2421_v46 = vpop.eup %2420  ;;  %2424 = vpow2.f32 %v1383_v26  ;;  %v613_v47 = vmul.f32 1.442695, %v555_v22  ;;  %v3546_v53 = vadd.f32 %v3199_v32, %v476_v59  ;;  %v3549_v40 = vadd.f32 %v3189_v29, %v1278_v15 }
 0x15e   : > { %1211 = vst.msk [vmem:[%s2752_s14 + $0x24] sm:$0xf] %vm1201_vm6, %v1178_v57  ;;  %v1980_v4 = vpack.c.bf16 %v1948_v49, %v1948_v49  ;;  %v1036_v13 = vadd.f32 %v2419_v45, %v1035_v37  ;;  %v1835_v42 = vmul.f32 %v2421_v46, %v3513_v19  ;;  %v1845_v48 = vand.u32 2147483648, %v3513_v19 }
 0x15f   : > { %2426 = vpow2.f32 %v613_v47  ;;  %v1415_v14 = vmul.f32 1.442695, %v1357_v18  ;;  %v540_v8 = vsub.f32 0.0, %v3546_v53  ;;  %v1342_v5 = vsub.f32 0.0, %v3549_v40 }
 0x160   : > { %v2423_v21 = vpop.eup %2422  ;;  %2012 = vst.msk [vmem:[%s2764_s17 + $0x24] sm:$0xf] %vm1201_vm6, %v1980_v4  ;;  %v1040_v7 = vsel %vm1039_vm8, %v2419_v45, %v1036_v13  ;;  %v1836_v0 = vsub.f32 1.0, %v1835_v42  ;;  %vm1840_vm9 = vweird.f32 %v2421_v46  ;;  %v3563_v54 = vadd.f32 %v3199_v32, %v516_v2 }
 0x161   : > { %v1045_v30 = vsel %vm3527_vm4, %v1044_v33, %v1040_v7  ;;  %v3567_v41 = vadd.f32 1.0, %v2423_v21  ;;  %2428 = vpow2.f32 %v1415_v14  ;;  %v583_v55 = vmul.f32 1.442695, %v540_v8  ;;  %v3709_v8 = vld [vmem:[%s4062_s4] ss:$0 sm:$0xff] }
 0x162   : > { %v1162_v56 = vmul.f32 %v1045_v30, %v3412_v36  ;;  %v1837_v60 = vmul.f32 %v2421_v46, %v1836_v0  ;;  %v1385_v62 = vmul.f32 1.442695, %v1342_v5  ;;  %v556_v44 = vsub.f32 0.0, %v3563_v54 }
 0x163   : > { %v2425_v50 = vpop.eup %2424  ;;  %vm1839_vm10 = vweird.f32 %v3513_v19  ;;  %2430 = vrcp.f32 %v3567_v41  ;;  %vm1844_vm12 = vcmp.eq.f32.partialorder %v1843_v28, 8.507059e+37  ;;  %v1846_v36 = vor.u32 1.1754944e-38, %v1845_v48 }
 0x164   : > { %v1194_v32 = vpack.c.bf16 %v1162_v56, %v1162_v56  ;;  %v1838_v12 = vadd.f32 %v2421_v46, %v1837_v60  ;;  %v3573_v63 = vadd.f32 1.0, %v2425_v50  ;;  %2432 = vpow2.f32 %v583_v55  ;;  %vm1841_vm11 = vmor %vm1839_vm10, %vm1840_vm9 }
 0x165   : > { %v2427_v1 = vpop.eup %2426  ;;  %2434 = vpow2.f32 %v1385_v62  ;;  %v816_v23 = vand.u32 2147483647, %v3567_v41  ;;  %v615_v19 = vmul.f32 1.442695, %v556_v44  ;;  %v818_v45 = vand.u32 2147483648, %v3567_v41 }
 0x166   : > { %1227 = vst.msk [vmem:[%s2752_s14 + $0x64] sm:$0xf] %vm1201_vm6, %v1194_v32  ;;  %v1842_v27 = vsel %vm1841_vm11, %v2421_v46, %v1838_v12  ;;  %2436 = vrcp.f32 %v3573_v63  ;;  %v3581_v17 = vadd.f32 1.0, %v2427_v1  ;;  %v3587_v16 = vadd.f32 %v3189_v29, %v1318_v35 }
 0x167   : > { %v2429_v43 = vpop.eup %2428  ;;  %v1847_v31 = vsel %vm1844_vm12, %v1846_v36, %v1842_v27  ;;  %vm812_vm13 = vweird.f32 %v3567_v41  ;;  %v1618_v51 = vand.u32 2147483647, %v3573_v63  ;;  %v1620_v52 = vand.u32 2147483648, %v3573_v63 }
 0x168   : > { %v1964_v10 = vmul.f32 %v1847_v31, %v3422_v39  ;;  %v3584_v6 = vadd.f32 1.0, %v2429_v43  ;;  %2438 = vrcp.f32 %v3581_v17  ;;  %vm3594_vm14 = vcmp.eq.f32.partialorder %v816_v23, 8.507059e+37 }
 0x169   : > { %v2431_v61 = vpop.eup %2430  ;;  %2440 = vpow2.f32 %v615_v19  ;;  %v819_v3 = vor.u32 1.1754944e-38, %v818_v45  ;;  %vm1614_vm15 = vweird.f32 %v3573_v63  ;;  %v1056_v24 = vand.u32 2147483647, %v3581_v17 }
 0x16a   : > { %v2433_v34 = vpop.eup %2432  ;;  %v1996_v33 = vpack.c.bf16 %v1964_v10, %v1964_v10  ;;  %v808_v28 = vmul.f32 %v2431_v61, %v3567_v41  ;;  %2442 = vrcp.f32 %v3584_v6  ;;  %v1058_v15 = vand.u32 2147483648, %v3581_v17 }
 0x16b   : > { %v2435_v29 = vpop.eup %2434  ;;  %v3604_v58 = vadd.f32 1.0, %v2433_v34  ;;  %v1358_v26 = vsub.f32 0.0, %v3587_v16  ;;  %vm3608_vm1 = vcmp.eq.f32.partialorder %v1618_v51, 8.507059e+37  ;;  %v1621_v49 = vor.u32 1.1754944e-38, %v1620_v52  ;;  %v1281_v52 = vpop.f32.mrf.mxu1 }
 0x16c   : > { %v2437_v38 = vpop.eup %2436  ;;  %2028 = vst.msk [vmem:[%s2764_s17 + $0x64] sm:$0xf] %vm1201_vm6, %v1996_v33  ;;  %v809_v59 = vsub.f32 1.0, %v808_v28  ;;  %v1860_v37 = vand.u32 2147483648, %v3584_v6  ;;  %v3613_v18 = vadd.f32 1.0, %v2435_v29  ;;  %vm813_vm0 = vweird.f32 %v2431_v61  ;;  %v519_v29 = vpop.f32.mrf.mxu2 }
 0x16d   : > { %v1610_v22 = vmul.f32 %v2437_v38, %v3573_v63  ;;  %v1858_v47 = vand.u32 2147483647, %v3584_v6  ;;  %2444 = vrcp.f32 %v3604_v58  ;;  %vm1052_vm2 = vweird.f32 %v3581_v17  ;;  %vm814_vm5 = vmor %vm812_vm13, %vm813_vm0  ;;  %v479_v63 = vpop.f32.mrf.mxu0 }
 0x16e   : > { %v810_v46 = vmul.f32 %v2431_v61, %v809_v59  ;;  %v2439_v2 = vpop.eup %2438  ;;  %v833_v13 = vand.u32 2147483648, %v3604_v58  ;;  %2446 = vrcp.f32 %v3613_v18  ;;  %vm3621_vm3 = vcmp.eq.f32.partialorder %v1056_v24, 8.507059e+37 }
 0x16f   : > { %v1611_v4 = vsub.f32 1.0, %v1610_v22  ;;  %v2441_v42 = vpop.eup %2440  ;;  %v1048_v14 = vmul.f32 %v2439_v2, %v3581_v17  ;;  %v1059_v5 = vor.u32 1.1754944e-38, %v1058_v15  ;;  %vm1854_vm4 = vweird.f32 %v3584_v6 }
 0x170   : > { %v811_v48 = vadd.f32 %v2431_v61, %v810_v46  ;;  %v2443_v21 = vpop.eup %2442  ;;  %vm1615_vm7 = vweird.f32 %v2437_v38  ;;  %v1861_v0 = vor.u32 1.1754944e-38, %v1860_v37  ;;  %v831_v30 = vand.u32 2147483647, %v3604_v58 }
 0x171   : > { %v1612_v7 = vmul.f32 %v2437_v38, %v1611_v4  ;;  %v1049_v56 = vsub.f32 1.0, %v1048_v14  ;;  %vm1053_vm8 = vweird.f32 %v2439_v2  ;;  %v1850_v60 = vmul.f32 %v2443_v21, %v3584_v6  ;;  %vm1616_vm11 = vmor %vm1614_vm15, %vm1615_vm7 }
 0x172   : > { %v815_v55 = vsel %vm814_vm5, %v2431_v61, %v811_v48  ;;  %vm3631_vm9 = vcmp.eq.f32.partialorder %v1858_v47, 8.507059e+37  ;;  %vm827_vm10 = vweird.f32 %v3604_v58  ;;  %v834_v41 = vor.u32 1.1754944e-38, %v833_v13  ;;  %vm1054_vm15 = vmor %vm1052_vm2, %vm1053_vm8  ;;  %v3693_v48 = vld [vmem:[%s4061_s3] ss:$0 sm:$0xff] }
 0x173   : > { %v820_v44 = vsel %vm3594_vm14, %v819_v3, %v815_v55  ;;  %v1613_v50 = vadd.f32 %v2437_v38, %v1612_v7  ;;  %v1633_v32 = vand.u32 2147483647, %v3613_v18  ;;  %v2445_v12 = vpop.eup %2444  ;;  %v1050_v36 = vmul.f32 %v2439_v2, %v1049_v56  ;;  %v1321_v7 = vpop.f32.mrf.mxu3 }
 0x174   : > { %v1147_v1 = vmul.f32 %v820_v44, %v3439_v9  ;;  %v1851_v35 = vsub.f32 1.0, %v1850_v60  ;;  %v3643_v27 = vadd.f32 1.0, %v2441_v42  ;;  %v3645_v23 = vpop.eup %2446  ;;  %vm1855_vm12 = vweird.f32 %v2443_v21 }
 0x175   : > { %v1617_v19 = vsel %vm1616_vm11, %v2437_v38, %v1613_v50  ;;  %v823_v43 = vmul.f32 %v2445_v12, %v3604_v58  ;;  %vm3648_vm13 = vcmp.eq.f32.partialorder %v831_v30, 8.507059e+37  ;;  %vm1629_vm14 = vweird.f32 %v3613_v18  ;;  %vm1856_vm2 = vmor %vm1854_vm4, %vm1855_vm12  ;;  %v1283_v50 = vpop.f32.mrf.mxu1 }
 0x176   : > { %v1635_v9 = vand.u32 2147483648, %v3613_v18  ;;  %v1179_v45 = vpack.c.bf16 %v1147_v1, %v1147_v1  ;;  %v1622_v10 = vsel %vm3608_vm1, %v1621_v49, %v1617_v19  ;;  %v1051_v61 = vadd.f32 %v2439_v2, %v1050_v36  ;;  %v521_v1 = vpop.f32.mrf.mxu2 }
 0x177   : > { %v1852_v51 = vmul.f32 %v2443_v21, %v1851_v35  ;;  %v1949_v34 = vmul.f32 %v1622_v10, %v3444_v25  ;;  %v824_v33 = vsub.f32 1.0, %v823_v43  ;;  %v1625_v28 = vmul.f32 %v3645_v23, %v3613_v18  ;;  %v481_v18 = vpop.f32.mrf.mxu0 }
 0x178   : > { %vm3662_vm0 = vcmp.eq.f32.partialorder %v1633_v32, 8.507059e+37  ;;  %1212 = vst.msk [vmem:[%s2752_s14 + $0x28] sm:$0xf] %vm1201_vm6, %v1179_v45  ;;  %v1055_v3 = vsel %vm1054_vm15, %v2439_v2, %v1051_v61  ;;  %vm828_vm1 = vweird.f32 %v2445_v12  ;;  %2448 = vrcp.f32 %v3643_v27 }
 0x179   : > { %v1853_v24 = vadd.f32 %v2443_v21, %v1852_v51  ;;  %v1981_v25 = vpack.c.bf16 %v1949_v34, %v1949_v34  ;;  %v1060_v17 = vsel %vm3621_vm3, %v1059_v5, %v1055_v3  ;;  %v825_v38 = vmul.f32 %v2445_v12, %v824_v33  ;;  %vm829_vm3 = vmor %vm827_vm10, %vm828_vm1 }
 0x17a   : > { %v1626_v59 = vsub.f32 1.0, %v1625_v28  ;;  %v1163_v15 = vmul.f32 %v1060_v17, %v3447_v20  ;;  %vm1630_vm5 = vweird.f32 %v3645_v23  ;;  %v1636_v57 = vor.u32 1.1754944e-38, %v1635_v9 }
 0x17b   : > { %v1857_v22 = vsel %vm1856_vm2, %v2443_v21, %v1853_v24  ;;  %2013 = vst.msk [vmem:[%s2764_s17 + $0x28] sm:$0xf] %vm1201_vm6, %v1981_v25  ;;  %v826_v37 = vadd.f32 %v2445_v12, %v825_v38  ;;  %v1417_v6 = vmul.f32 1.442695, %v1358_v26  ;;  %v1071_v20 = vand.u32 2147483647, %v3643_v27  ;;  %vm1631_vm4 = vmor %vm1629_vm14, %vm1630_vm5  ;;  %v1323_v17 = vpop.f32.mrf.mxu3 }
 0x17c   : > { %v1862_v49 = vsel %vm3631_vm9, %v1861_v0, %v1857_v22  ;;  %v1627_v46 = vmul.f32 %v3645_v23, %v1626_v59  ;;  %v1195_v47 = vpack.c.bf16 %v1163_v15, %v1163_v15  ;;  %v1073_v4 = vand.u32 2147483648, %v3643_v27 }
 0x17d   : > { %v1965_v2 = vmul.f32 %v1862_v49, %v3456_v11  ;;  %v830_v13 = vsel %vm829_vm3, %v2445_v12, %v826_v37  ;;  %2450 = vpow2.f32 %v1417_v6  ;;  %v3696_v11 = vadd.f32 %v3693_v48, %v479_v63  ;;  %v1286_v37 = vpop.f32.mrf.mxu1 }
 0x17e   : > { %v1628_v42 = vadd.f32 %v3645_v23, %v1627_v46  ;;  %v2449_v26 = vpop.eup %2448  ;;  %1228 = vst.msk [vmem:[%s2752_s14 + $0x68] sm:$0xf] %vm1201_vm6, %v1195_v47  ;;  %v835_v14 = vsel %vm3648_vm13, %v834_v41, %v830_v13  ;;  %v3712_v5 = vadd.f32 %v3709_v8, %v1281_v52  ;;  %v3715_v21 = vadd.f32 %v3693_v48, %v519_v29  ;;  %v524_v46 = vpop.f32.mrf.mxu2 }
 0x17f   : > { %v1997_v58 = vpack.c.bf16 %v1965_v2, %v1965_v2  ;;  %v1148_v0 = vmul.f32 %v835_v14, %v3546_v53  ;;  %v1063_v55 = vmul.f32 %v2449_v26, %v3643_v27  ;;  %vm1068_vm7 = vweird.f32 %v2449_v26  ;;  %v484_v59 = vpop.f32.mrf.mxu0 }
 0x180   : > { %v1632_v30 = vsel %vm1631_vm4, %v3645_v23, %v1628_v42  ;;  %v541_v60 = vsub.f32 0.0, %v3696_v11  ;;  %v1343_v62 = vsub.f32 0.0, %v3712_v5  ;;  %v557_v44 = vsub.f32 0.0, %v3715_v21 }
 0x181   : > { %2029 = vst.msk [vmem:[%s2764_s17 + $0x68] sm:$0xf] %vm1201_vm6, %v1997_v58  ;;  %v1637_v56 = vsel %vm3662_vm0, %v1636_v57, %v1632_v30  ;;  %v1180_v53 = vpack.c.bf16 %v1148_v0, %v1148_v0  ;;  %v1064_v32 = vsub.f32 1.0, %v1063_v55  ;;  %v3729_v12 = vadd.f32 %v3709_v8, %v1321_v7 }
 0x182   : > { %v1950_v41 = vmul.f32 %v1637_v56, %v3549_v40  ;;  %v585_v36 = vmul.f32 1.442695, %v541_v60  ;;  %v1387_v35 = vmul.f32 1.442695, %v1343_v62  ;;  %v617_v23 = vmul.f32 1.442695, %v557_v44 }
 0x183   : > { %v3732_v19 = vadd.f32 %v3693_v48, %v481_v18  ;;  %v2451_v43 = vpop.eup %2450  ;;  %1213 = vst.msk [vmem:[%s2752_s14 + $0x2c] sm:$0xf] %vm1201_vm6, %v1180_v53  ;;  %v1065_v9 = vmul.f32 %v2449_v26, %v1064_v32  ;;  %v1359_v63 = vsub.f32 0.0, %v3729_v12  ;;  %v3738_v40 = vadd.f32 %v3709_v8, %v1283_v50 }
 0x184   : > { %v1982_v31 = vpack.c.bf16 %v1950_v41, %v1950_v41  ;;  %vm1067_vm8 = vweird.f32 %v3643_v27  ;;  %v3741_v45 = vadd.f32 1.0, %v2451_v43  ;;  %2452 = vpow2.f32 %v585_v36 }
 0x185   : > { %v542_v10 = vsub.f32 0.0, %v3732_v19  ;;  %v1066_v61 = vadd.f32 %v2449_v26, %v1065_v9  ;;  %2454 = vpow2.f32 %v1387_v35  ;;  %v1419_v51 = vmul.f32 1.442695, %v1359_v63  ;;  %vm1069_vm9 = vmor %vm1067_vm8, %vm1068_vm7 }
 0x186   : > { %2014 = vst.msk [vmem:[%s2764_s17 + $0x2c] sm:$0xf] %vm1201_vm6, %v1982_v31  ;;  %v1344_v52 = vsub.f32 0.0, %v3738_v40  ;;  %vm1072_vm10 = vcmp.eq.f32.partialorder %v1071_v20, 8.507059e+37  ;;  %v1074_v34 = vor.u32 1.1754944e-38, %v1073_v4  ;;  %2456 = vrcp.f32 %v3741_v45 }
 0x187   : > { %v1070_v33 = vsel %vm1069_vm9, %v2449_v26, %v1066_v61  ;;  %2458 = vpow2.f32 %v617_v23  ;;  %v587_v27 = vmul.f32 1.442695, %v542_v10  ;;  %v3750_v28 = vadd.f32 %v3693_v48, %v521_v1 }
 0x188   : > { %v1075_v39 = vsel %vm1072_vm10, %v1074_v34, %v1070_v33  ;;  %2460 = vpow2.f32 %v1419_v51  ;;  %v1389_v29 = vmul.f32 1.442695, %v1344_v52  ;;  %v1873_v24 = vand.u32 2147483647, %v3741_v45 }
 0x189   : > { %v1164_v3 = vmul.f32 %v1075_v39, %v3563_v54  ;;  %v1875_v25 = vand.u32 2147483648, %v3741_v45  ;;  %2462 = vpow2.f32 %v587_v27  ;;  %v558_v49 = vsub.f32 0.0, %v3750_v28 }
 0x18a   : > { %v2453_v38 = vpop.eup %2452  ;;  %vm1869_vm11 = vweird.f32 %v3741_v45  ;;  %2464 = vpow2.f32 %v1389_v29  ;;  %v3762_v47 = vadd.f32 %v3709_v8, %v1323_v17  ;;  %vm3767_vm12 = vcmp.eq.f32.partialorder %v1873_v24, 8.507059e+37 }
 0x18b   : > { %v2455_v15 = vpop.eup %2454  ;;  %v1196_v22 = vpack.c.bf16 %v1164_v3, %v1164_v3  ;;  %v3755_v57 = vadd.f32 1.0, %v2453_v38  ;;  %v1876_v13 = vor.u32 1.1754944e-38, %v1875_v25  ;;  %v3774_v26 = vadd.f32 %v3693_v48, %v484_v59 }
 0x18c   : > { %v2457_v6 = vpop.eup %2456  ;;  %v3759_v54 = vadd.f32 1.0, %v2455_v15  ;;  %v3777_v58 = vadd.f32 %v3709_v8, %v1286_v37  ;;  %v3780_v14 = vadd.f32 %v3693_v48, %v524_v46  ;;  %v619_v18 = vmul.f32 1.442695, %v558_v49 }
 0x18d   : > { %v2459_v2 = vpop.eup %2458  ;;  %1229 = vst.msk [vmem:[%s2752_s14 + $0x6c] sm:$0xf] %vm1201_vm6, %v1196_v22  ;;  %v1865_v20 = vmul.f32 %v2457_v6, %v3741_v45  ;;  %2466 = vrcp.f32 %v3755_v57  ;;  %v848_v30 = vand.u32 2147483648, %v3755_v57  ;;  %v846_v56 = vand.u32 2147483647, %v3755_v57 }
 0x18e   : > { %v2461_v42 = vpop.eup %2460  ;;  %2468 = vrcp.f32 %v3759_v54  ;;  %v3783_v55 = vadd.f32 1.0, %v2459_v2  ;;  %v1650_v60 = vand.u32 2147483648, %v3759_v54  ;;  %v1360_v44 = vsub.f32 0.0, %v3762_v47 }
 0x18f   : > { %v2463_v7 = vpop.eup %2462  ;;  %v1866_v0 = vsub.f32 1.0, %v1865_v20  ;;  %v3787_v62 = vadd.f32 1.0, %v2461_v42  ;;  %vm1870_vm13 = vweird.f32 %v2457_v6  ;;  %v1648_v53 = vand.u32 2147483647, %v3759_v54 }
 0x190   : > { %2470 = vrcp.f32 %v3783_v55  ;;  %v2465_v41 = vpop.eup %2464  ;;  %v3793_v32 = vadd.f32 1.0, %v2463_v7  ;;  %v543_v1 = vsub.f32 0.0, %v3774_v26  ;;  %v1345_v36 = vsub.f32 0.0, %v3777_v58  ;;  %vm1871_vm0 = vmor %vm1869_vm11, %vm1870_vm13 }
 0x191   : > { %v1867_v50 = vmul.f32 %v2457_v6, %v1866_v0  ;;  %2472 = vrcp.f32 %v3787_v62  ;;  %vm842_vm14 = vweird.f32 %v3755_v57  ;;  %v849_v43 = vor.u32 1.1754944e-38, %v848_v30 }
 0x192   : > { %vm1644_vm15 = vweird.f32 %v3759_v54  ;;  %vm3802_vm1 = vcmp.eq.f32.partialorder %v846_v56, 8.507059e+37  ;;  %v1651_v10 = vor.u32 1.1754944e-38, %v1650_v60  ;;  %v1086_v61 = vand.u32 2147483647, %v3783_v55 }
 0x193   : > { %v2467_v35 = vpop.eup %2466  ;;  %v1868_v23 = vadd.f32 %v2457_v6, %v1867_v50  ;;  %v1088_v51 = vand.u32 2147483648, %v3783_v55  ;;  %vm3809_vm2 = vcmp.eq.f32.partialorder %v1648_v53, 8.507059e+37  ;;  %v1888_v45 = vand.u32 2147483647, %v3787_v62 }
 0x194   : > { %v2469_v31 = vpop.eup %2468  ;;  %v838_v9 = vmul.f32 %v2467_v35, %v3755_v57  ;;  %v1890_v27 = vand.u32 2147483648, %v3787_v62  ;;  %vm1082_vm5 = vweird.f32 %v3783_v55  ;;  %2474 = vrcp.f32 %v3793_v32 }
 0x195   : > { %v1872_v52 = vsel %vm1871_vm0, %v2457_v6, %v1868_v23  ;;  %v1640_v34 = vmul.f32 %v2469_v31, %v3759_v54  ;;  %vm843_vm3 = vweird.f32 %v2467_v35  ;;  %vm1884_vm4 = vweird.f32 %v3787_v62 }
 0x196   : > { %v1877_v39 = vsel %vm3767_vm12, %v1876_v13, %v1872_v52  ;;  %v839_v29 = vsub.f32 1.0, %v838_v9  ;;  %v2471_v3 = vpop.eup %2470  ;;  %vm1645_vm7 = vweird.f32 %v2469_v31  ;;  %vm3822_vm8 = vcmp.eq.f32.partialorder %v1086_v61, 8.507059e+37  ;;  %vm844_vm11 = vmor %vm842_vm14, %vm843_vm3 }
 0x197   : > { %v1966_v24 = vmul.f32 %v1877_v39, %v3587_v16  ;;  %v1641_v25 = vsub.f32 1.0, %v1640_v34  ;;  %v2473_v17 = vpop.eup %2472  ;;  %v1078_v59 = vmul.f32 %v2471_v3, %v3783_v55  ;;  %v1089_v22 = vor.u32 1.1754944e-38, %v1088_v51  ;;  %vm1646_vm12 = vmor %vm1644_vm15, %vm1645_vm7  ;;  %v1326_v39 = vpop.f32.mrf.mxu3 }
 0x198   : > { %v840_v38 = vmul.f32 %v2467_v35, %v839_v29  ;;  %v1880_v46 = vmul.f32 %v2473_v17, %v3787_v62  ;;  %vm3827_vm9 = vcmp.eq.f32.partialorder %v1888_v45, 8.507059e+37  ;;  %v1891_v6 = vor.u32 1.1754944e-38, %v1890_v27 }
 0x199   : > { %v1998_v49 = vpack.c.bf16 %v1966_v24, %v1966_v24  ;;  %v1642_v37 = vmul.f32 %v2469_v31, %v1641_v25  ;;  %v1079_v20 = vsub.f32 1.0, %v1078_v59  ;;  %vm1083_vm10 = vweird.f32 %v2471_v3 }
 0x19a   : > { %v841_v2 = vadd.f32 %v2467_v35, %v840_v38  ;;  %v861_v4 = vand.u32 2147483647, %v3793_v32  ;;  %v1881_v42 = vsub.f32 1.0, %v1880_v46  ;;  %v3837_v7 = vadd.f32 1.0, %v2465_v41  ;;  %v2475_v0 = vpop.eup %2474  ;;  %vm1084_vm14 = vmor %vm1082_vm5, %vm1083_vm10  ;;  %v486_v38 = vpop.f32.mrf.mxu0 }
 0x19b   : > { %2030 = vst.msk [vmem:[%s2764_s17 + $0x6c] sm:$0xf] %vm1201_vm6, %v1998_v49  ;;  %v1643_v13 = vadd.f32 %v2469_v31, %v1642_v37  ;;  %2476 = vpow2.f32 %v619_v18  ;;  %v1080_v56 = vmul.f32 %v2471_v3, %v1079_v20  ;;  %vm1885_vm13 = vweird.f32 %v2473_v17 }
 0x19c   : > { %v845_v30 = vsel %vm844_vm11, %v2467_v35, %v841_v2  ;;  %v863_v60 = vand.u32 2147483648, %v3793_v32  ;;  %v1882_v53 = vmul.f32 %v2473_v17, %v1881_v42  ;;  %v853_v23 = vmul.f32 %v2475_v0, %v3793_v32  ;;  %vm1886_vm15 = vmor %vm1884_vm4, %vm1885_vm13 }
 0x19d   : > { %v850_v50 = vsel %vm3802_vm1, %v849_v43, %v845_v30  ;;  %v1647_v57 = vsel %vm1646_vm12, %v2469_v31, %v1643_v13  ;;  %v1081_v35 = vadd.f32 %v2471_v3, %v1080_v56  ;;  %v1421_v54 = vmul.f32 1.442695, %v1360_v44 }
 0x19e   : > { %v1149_v41 = vmul.f32 %v850_v50, %v3696_v11  ;;  %v1652_v18 = vsel %vm3809_vm2, %v1651_v10, %v1647_v57  ;;  %v1883_v43 = vadd.f32 %v2473_v17, %v1882_v53  ;;  %v854_v31 = vsub.f32 1.0, %v853_v23  ;;  %v526_v50 = vpop.f32.mrf.mxu2 }
 0x19f   : > { %v1951_v9 = vmul.f32 %v1652_v18, %v3712_v5  ;;  %2478 = vrcp.f32 %v3837_v7  ;;  %v1085_v63 = vsel %vm1084_vm14, %v2471_v3, %v1081_v35  ;;  %vm858_vm0 = vweird.f32 %v2475_v0 }
 0x1a0   : > { %v1181_v11 = vpack.c.bf16 %v1149_v41, %v1149_v41  ;;  %v589_v44 = vmul.f32 1.442695, %v543_v1  ;;  %v1090_v55 = vsel %vm3822_vm8, %v1089_v22, %v1085_v63  ;;  %v1887_v61 = vsel %vm1886_vm15, %v2473_v17, %v1883_v43  ;;  %v1288_v22 = vpop.f32.mrf.mxu1  ;;  %v1328_v63 = vpop.f32.mrf.mxu3 }
 0x1a1   : > { %v2477_v5 = vpop.eup %2476  ;;  %v1983_v10 = vpack.c.bf16 %v1951_v9, %v1951_v9  ;;  %v855_v51 = vmul.f32 %v2475_v0, %v854_v31  ;;  %v1165_v52 = vmul.f32 %v1090_v55, %v3715_v21  ;;  %v1892_v34 = vsel %vm3827_vm9, %v1891_v6, %v1887_v61 }
 0x1a2   : > { %1214 = vst.msk [vmem:[%s2752_s14 + $0x30] sm:$0xf] %vm1201_vm6, %v1181_v11  ;;  %vm857_vm1 = vweird.f32 %v3793_v32  ;;  %v559_v62 = vsub.f32 0.0, %v3780_v14  ;;  %v1967_v1 = vmul.f32 %v1892_v34, %v3729_v12  ;;  %v3873_v45 = vadd.f32 1.0, %v2477_v5 }
 0x1a3   : > { %2015 = vst.msk [vmem:[%s2764_s17 + $0x30] sm:$0xf] %vm1201_vm6, %v1983_v10  ;;  %v856_v33 = vadd.f32 %v2475_v0, %v855_v51  ;;  %2480 = vpow2.f32 %v1421_v54  ;;  %v1197_v27 = vpack.c.bf16 %v1165_v52, %v1165_v52  ;;  %vm859_vm2 = vmor %vm857_vm1, %vm858_vm0  ;;  %v864_v21 = vor.u32 1.1754944e-38, %v863_v60 }
 0x1a4   : > { %2482 = vpow2.f32 %v589_v44  ;;  %v1391_v32 = vmul.f32 1.442695, %v1345_v36  ;;  %v1999_v3 = vpack.c.bf16 %v1967_v1, %v1967_v1  ;;  %vm862_vm5 = vcmp.eq.f32.partialorder %v861_v4, 8.507059e+37 }
 0x1a5   : > { %v2479_v29 = vpop.eup %2478  ;;  %v860_v24 = vsel %vm859_vm2, %v2475_v0, %v856_v33  ;;  %2484 = vrcp.f32 %v3873_v45  ;;  %1230 = vst.msk [vmem:[%s2752_s14 + $0x70] sm:$0xf] %vm1201_vm6, %v1197_v27  ;;  %v1663_v17 = vand.u32 2147483647, %v3837_v7  ;;  %v1665_v36 = vand.u32 2147483648, %v3837_v7 }
 0x1a6   : > { %v865_v12 = vsel %vm862_vm5, %v864_v21, %v860_v24  ;;  %v1655_v25 = vmul.f32 %v2479_v29, %v3837_v7  ;;  %2031 = vst.msk [vmem:[%s2764_s17 + $0x70] sm:$0xf] %vm1201_vm6, %v1999_v3  ;;  %2486 = vpow2.f32 %v1391_v32  ;;  %v621_v15 = vmul.f32 1.442695, %v559_v62 }
 0x1a7   : > { %v1150_v59 = vmul.f32 %v865_v12, %v3732_v19  ;;  %vm1659_vm3 = vweird.f32 %v3837_v7  ;;  %v1101_v37 = vand.u32 2147483647, %v3873_v45  ;;  %v1103_v46 = vand.u32 2147483648, %v3873_v45 }
 0x1a8   : > { %v1656_v49 = vsub.f32 1.0, %v1655_v25  ;;  %2488 = vpow2.f32 %v621_v15  ;;  %v3891_v2 = vadd.f32 %v3709_v8, %v1326_v39  ;;  %v3894_v19 = vadd.f32 %v3693_v48, %v486_v38 }
 0x1a9   : > { %v2481_v16 = vpop.eup %2480  ;;  %v1182_v6 = vpack.c.bf16 %v1150_v59, %v1150_v59  ;;  %vm1660_vm4 = vweird.f32 %v2479_v29  ;;  %v3899_v42 = vadd.f32 %v3709_v8, %v1288_v22  ;;  %vm3903_vm7 = vcmp.eq.f32.partialorder %v1663_v17, 8.507059e+37 }
 0x1aa   : > { %v2483_v20 = vpop.eup %2482  ;;  %v1657_v4 = vmul.f32 %v2479_v29, %v1656_v49  ;;  %v3896_v13 = vadd.f32 1.0, %v2481_v16  ;;  %v1666_v56 = vor.u32 1.1754944e-38, %v1665_v36  ;;  %vm1097_vm8 = vweird.f32 %v3873_v45  ;;  %vm1661_vm10 = vmor %vm1659_vm3, %vm1660_vm4 }
 0x1ab   : > { %v2485_v0 = vpop.eup %2484  ;;  %1215 = vst.msk [vmem:[%s2752_s14 + $0x34] sm:$0xf] %vm1201_vm6, %v1182_v6  ;;  %v3908_v60 = vadd.f32 1.0, %v2483_v20  ;;  %vm3911_vm9 = vcmp.eq.f32.partialorder %v1101_v37, 8.507059e+37  ;;  %v1104_v18 = vor.u32 1.1754944e-38, %v1103_v46  ;;  %v1361_v35 = vsub.f32 0.0, %v3891_v2 }
 0x1ac   : > { %v1658_v57 = vadd.f32 %v2479_v29, %v1657_v4  ;;  %v1093_v53 = vmul.f32 %v2485_v0, %v3873_v45  ;;  %2490 = vrcp.f32 %v3896_v13  ;;  %v2487_v41 = vpop.eup %2486  ;;  %v544_v54 = vsub.f32 0.0, %v3894_v19 }
 0x1ad   : > { %2492 = vrcp.f32 %v3908_v60  ;;  %v1346_v31 = vsub.f32 0.0, %v3899_v42  ;;  %v3924_v11 = vadd.f32 %v3693_v48, %v526_v50  ;;  %vm1098_vm11 = vweird.f32 %v2485_v0 }
 0x1ae   : > { %v1662_v9 = vsel %vm1661_vm10, %v2479_v29, %v1658_v57  ;;  %v1094_v43 = vsub.f32 1.0, %v1093_v53  ;;  %v2489_v44 = vpop.eup %2488  ;;  %v1903_v5 = vand.u32 2147483647, %v3896_v13  ;;  %v1905_v10 = vand.u32 2147483648, %v3896_v13  ;;  %vm1099_vm14 = vmor %vm1097_vm8, %vm1098_vm11 }
 0x1af   : > { %v1667_v7 = vsel %vm3903_vm7, %v1666_v56, %v1662_v9  ;;  %v876_v51 = vand.u32 2147483647, %v3908_v60  ;;  %v3932_v52 = vadd.f32 1.0, %v2487_v41  ;;  %vm1899_vm12 = vweird.f32 %v3896_v13 }
 0x1b0   : > { %v1952_v55 = vmul.f32 %v1667_v7, %v3738_v40  ;;  %v1095_v61 = vmul.f32 %v2485_v0, %v1094_v43  ;;  %v878_v48 = vand.u32 2147483648, %v3908_v60  ;;  %v3936_v34 = vadd.f32 1.0, %v2489_v44 }
 0x1b1   : > { %v3939_v62 = vadd.f32 %v3709_v8, %v1328_v63  ;;  %vm872_vm13 = vweird.f32 %v3908_v60  ;;  %2494 = vrcp.f32 %v3932_v52  ;;  %vm3947_vm15 = vcmp.eq.f32.partialorder %v1903_v5, 8.507059e+37 }
 0x1b2   : > { %v2491_v1 = vpop.eup %2490  ;;  %v1984_v33 = vpack.c.bf16 %v1952_v55, %v1952_v55  ;;  %v1096_v27 = vadd.f32 %v2485_v0, %v1095_v61  ;;  %v1906_v8 = vor.u32 1.1754944e-38, %v1905_v10  ;;  %v1423_v39 = vmul.f32 1.442695, %v1361_v35 }
 0x1b3   : > { %v2493_v40 = vpop.eup %2492  ;;  %v1895_v21 = vmul.f32 %v2491_v1, %v3896_v13  ;;  %vm3954_vm0 = vcmp.eq.f32.partialorder %v876_v51, 8.507059e+37  ;;  %2496 = vrcp.f32 %v3936_v34  ;;  %v591_v45 = vmul.f32 1.442695, %v544_v54 }
 0x1b4   : > { %2016 = vst.msk [vmem:[%s2764_s17 + $0x34] sm:$0xf] %vm1201_vm6, %v1984_v33  ;;  %v1100_v29 = vsel %vm1099_vm14, %v2485_v0, %v1096_v27  ;;  %v868_v3 = vmul.f32 %v2493_v40, %v3908_v60  ;;  %v879_v17 = vor.u32 1.1754944e-38, %v878_v48  ;;  %v1678_v38 = vand.u32 2147483647, %v3932_v52 }
 0x1b5   : > { %v1105_v12 = vsel %vm3911_vm9, %v1104_v18, %v1100_v29  ;;  %v1896_v25 = vsub.f32 1.0, %v1895_v21  ;;  %vm1900_vm1 = vweird.f32 %v2491_v1  ;;  %vm1674_vm2 = vweird.f32 %v3932_v52 }
 0x1b6   : > { %v1166_v59 = vmul.f32 %v1105_v12, %v3750_v28  ;;  %v869_v36 = vsub.f32 1.0, %v868_v3  ;;  %v1680_v22 = vand.u32 2147483648, %v3932_v52  ;;  %2498 = vpow2.f32 %v1423_v39  ;;  %vm1901_vm4 = vmor %vm1899_vm12, %vm1900_vm1 }
 0x1b7   : > { %v1897_v15 = vmul.f32 %v2491_v1, %v1896_v25  ;;  %v1393_v49 = vmul.f32 1.442695, %v1346_v31  ;;  %v2495_v37 = vpop.eup %2494  ;;  %vm873_vm5 = vweird.f32 %v2493_v40  ;;  %2500 = vpow2.f32 %v591_v45 }
 0x1b8   : > { %v1198_v46 = vpack.c.bf16 %v1166_v59, %v1166_v59  ;;  %v870_v16 = vmul.f32 %v2493_v40, %v869_v36  ;;  %v1670_v20 = vmul.f32 %v2495_v37, %v3932_v52  ;;  %vm3966_vm3 = vcmp.eq.f32.partialorder %v1678_v38, 8.507059e+37  ;;  %vm874_vm8 = vmor %vm872_vm13, %vm873_vm5 }
 0x1b9   : > { %v1898_v6 = vadd.f32 %v2491_v1, %v1897_v15  ;;  %v1116_v4 = vand.u32 2147483647, %v3936_v34  ;;  %v2497_v0 = vpop.eup %2496  ;;  %vm1675_vm7 = vweird.f32 %v2495_v37  ;;  %v1118_v56 = vand.u32 2147483648, %v3936_v34 }
 0x1ba   : > { %1231 = vst.msk [vmem:[%s2752_s14 + $0x74] sm:$0xf] %vm1201_vm6, %v1198_v46  ;;  %v871_v30 = vadd.f32 %v2493_v40, %v870_v16  ;;  %v560_v50 = vsub.f32 0.0, %v3924_v11  ;;  %v1671_v53 = vsub.f32 1.0, %v1670_v20  ;;  %v1108_v23 = vmul.f32 %v2497_v0, %v3936_v34  ;;  %vm1676_vm10 = vmor %vm1674_vm2, %vm1675_vm7 }
 0x1bb   : > { %v1902_v57 = vsel %vm1901_vm4, %v2491_v1, %v1898_v6  ;;  %2502 = vpow2.f32 %v1393_v49  ;;  %v1362_v35 = vsub.f32 0.0, %v3939_v62  ;;  %vm1113_vm9 = vweird.f32 %v2497_v0 }
 0x1bc   : > { %v1907_v41 = vsel %vm3947_vm15, %v1906_v8, %v1902_v57  ;;  %v875_v18 = vsel %vm874_vm8, %v2493_v40, %v871_v30  ;;  %v623_v13 = vmul.f32 1.442695, %v560_v50  ;;  %v2499_v54 = vpop.eup %2498  ;;  %v1672_v31 = vmul.f32 %v2495_v37, %v1671_v53 }
 0x1bd   : > { %v1968_v9 = vmul.f32 %v1907_v41, %v3762_v47  ;;  %v880_v43 = vsel %vm3954_vm0, %v879_v17, %v875_v18  ;;  %v1109_v60 = vsub.f32 1.0, %v1108_v23  ;;  %v2501_v63 = vpop.eup %2500  ;;  %v1457_v7 = vadd.f32 1.0, %v2499_v54 }
 0x1be   : > { %v1151_v44 = vmul.f32 %v880_v43, %v3774_v26  ;;  %2504 = vpow2.f32 %v623_v13  ;;  %v1673_v10 = vadd.f32 %v2495_v37, %v1672_v31  ;;  %v3988_v61 = vadd.f32 1.0, %v2501_v63 }
 0x1bf   : > { %v2000_v5 = vpack.c.bf16 %v1968_v9, %v1968_v9  ;;  %v1110_v55 = vmul.f32 %v2497_v0, %v1109_v60  ;;  %v1681_v47 = vor.u32 1.1754944e-38, %v1680_v22  ;;  %2506 = vrcp.f32 %v1457_v7 }
 0x1c0   : > { %v1183_v51 = vpack.c.bf16 %v1151_v44, %v1151_v44  ;;  %v1425_v48 = vmul.f32 1.442695, %v1362_v35  ;;  %v1677_v26 = vsel %vm1676_vm10, %v2495_v37, %v1673_v10  ;;  %vm1112_vm11 = vweird.f32 %v3936_v34 }
 0x1c1   : > { %v2503_v1 = vpop.eup %2502  ;;  %2032 = vst.msk [vmem:[%s2764_s17 + $0x74] sm:$0xf] %vm1201_vm6, %v2000_v5  ;;  %v1111_v33 = vadd.f32 %v2497_v0, %v1110_v55  ;;  %2508 = vrcp.f32 %v3988_v61  ;;  %v1682_v27 = vsel %vm3966_vm3, %v1681_v47, %v1677_v26  ;;  %vm1114_vm12 = vmor %vm1112_vm11, %vm1113_vm9  ;;  %v1119_v52 = vor.u32 1.1754944e-38, %v1118_v56 }
 0x1c2   : > { %1216 = vst.msk [vmem:[%s2752_s14 + $0x38] sm:$0xf] %vm1201_vm6, %v1183_v51  ;;  %v1953_v40 = vmul.f32 %v1682_v27, %v3777_v58  ;;  %vm1117_vm13 = vcmp.eq.f32.partialorder %v1116_v4, 8.507059e+37  ;;  %v4003_v39 = vadd.f32 1.0, %v2503_v1  ;;  %2510 = vpow2.f32 %v1425_v48 }
 0x1c3   : > { %v1115_v21 = vsel %vm1114_vm12, %v2497_v0, %v1111_v33  ;;  %v1918_v25 = vand.u32 2147483647, %v1457_v7  ;;  %v1920_v59 = vand.u32 2147483648, %v1457_v7  ;;  %v891_v15 = vand.u32 2147483647, %v3988_v61 }
 0x1c4   : > { %v2505_v32 = vpop.eup %2504  ;;  %v1120_v8 = vsel %vm1117_vm13, %v1119_v52, %v1115_v21  ;;  %v1985_v34 = vpack.c.bf16 %v1953_v40, %v1953_v40  ;;  %2512 = vrcp.f32 %v4003_v39  ;;  %v893_v22 = vand.u32 2147483648, %v3988_v61 }
 0x1c5   : > { %v1167_v29 = vmul.f32 %v1120_v8, %v3780_v14  ;;  %v4006_v3 = vadd.f32 1.0, %v2505_v32  ;;  %v2507_v24 = vpop.eup %2506  ;;  %vm1914_vm14 = vweird.f32 %v1457_v7  ;;  %vm4019_vm0 = vcmp.eq.f32.partialorder %v1918_v25, 8.507059e+37 }
 0x1c6   : > { %2017 = vst.msk [vmem:[%s2764_s17 + $0x38] sm:$0xf] %vm1201_vm6, %v1985_v34  ;;  %v1910_v12 = vmul.f32 %v2507_v24, %v1457_v7  ;;  %vm1915_vm15 = vweird.f32 %v2507_v24  ;;  %vm887_vm1 = vweird.f32 %v3988_v61  ;;  %v1921_v4 = vor.u32 1.1754944e-38, %v1920_v59 }
 0x1c7   : > { %v2509_v45 = vpop.eup %2508  ;;  %v1199_v58 = vpack.c.bf16 %v1167_v29, %v1167_v29  ;;  %2514 = vrcp.f32 %v4006_v3  ;;  %vm1916_vm5 = vmor %vm1914_vm14, %vm1915_vm15  ;;  %vm892_vm3 = vcmp.eq.f32.partialorder %v891_v15, 8.507059e+37  ;;  %v894_v56 = vor.u32 1.1754944e-38, %v893_v22 }
 0x1c8   : > { %v883_v17 = vmul.f32 %v2509_v45, %v3988_v61  ;;  %v1911_v38 = vsub.f32 1.0, %v1910_v12  ;;  %v2511_v14 = vpop.eup %2510  ;;  %vm888_vm2 = vweird.f32 %v2509_v45  ;;  %v1693_v23 = vand.u32 2147483647, %v4003_v39 }
 0x1c9   : > { %1232 = vst.msk [vmem:[%s2752_s14 + $0x78] sm:$0xf] %vm1201_vm6, %v1199_v58  ;;  %v4017_v37 = vadd.f32 1.0, %v2511_v14  ;;  %vm889_vm4 = vmor %vm887_vm1, %vm888_vm2  ;;  %v1695_v41 = vand.u32 2147483648, %v4003_v39  ;;  %v1133_v54 = vand.u32 2147483648, %v4006_v3  ;;  %vm1689_vm9 = vweird.f32 %v4003_v39 }
 0x1ca   : > { %v884_v36 = vsub.f32 1.0, %v883_v17  ;;  %v1912_v49 = vmul.f32 %v2507_v24, %v1911_v38  ;;  %v2513_v46 = vpop.eup %2512  ;;  %v1131_v44 = vand.u32 2147483647, %v4006_v3  ;;  %vm1127_vm11 = vweird.f32 %v4006_v3 }
 0x1cb   : > { %v1685_v0 = vmul.f32 %v2513_v46, %v4003_v39  ;;  %2516 = vrcp.f32 %v4017_v37  ;;  %vm1690_vm7 = vweird.f32 %v2513_v46  ;;  %v1696_v55 = vor.u32 1.1754944e-38, %v1695_v41 }
 0x1cc   : > { %v885_v6 = vmul.f32 %v2509_v45, %v884_v36  ;;  %v1913_v28 = vadd.f32 %v2507_v24, %v1912_v49  ;;  %vm1691_vm10 = vmor %vm1689_vm9, %vm1690_vm7  ;;  %vm1694_vm12 = vcmp.eq.f32.partialorder %v1693_v23, 8.507059e+37  ;;  %v1134_v47 = vor.u32 1.1754944e-38, %v1133_v54 }
 0x1cd   : > { %v2515_v20 = vpop.eup %2514  ;;  %v1686_v53 = vsub.f32 1.0, %v1685_v0  ;;  %vm1132_vm14 = vcmp.eq.f32.partialorder %v1131_v44, 8.507059e+37  ;;  %v1935_v52 = vand.u32 2147483648, %v4017_v37  ;;  %v1933_v32 = vand.u32 2147483647, %v4017_v37 }
 0x1ce   : > { %v886_v30 = vadd.f32 %v2509_v45, %v885_v6  ;;  %v1123_v50 = vmul.f32 %v2515_v20, %v4006_v3  ;;  %v1917_v57 = vsel %vm1916_vm5, %v2507_v24, %v1913_v28  ;;  %vm1128_vm8 = vweird.f32 %v2515_v20 }
 0x1cf   : > { %v1922_v18 = vsel %vm4019_vm0, %v1921_v4, %v1917_v57  ;;  %v1687_v31 = vmul.f32 %v2513_v46, %v1686_v53  ;;  %vm1129_vm13 = vmor %vm1127_vm11, %vm1128_vm8  ;;  %vm1929_vm0 = vweird.f32 %v4017_v37  ;;  %v1936_v29 = vor.u32 1.1754944e-38, %v1935_v52 }
 0x1d0   : > { %v890_v13 = vsel %vm889_vm4, %v2509_v45, %v886_v30  ;;  %v1124_v35 = vsub.f32 1.0, %v1123_v50  ;;  %v1969_v9 = vmul.f32 %v1922_v18, %v3891_v2  ;;  %vm1934_vm2 = vcmp.eq.f32.partialorder %v1933_v32, 8.507059e+37 }
 0x1d1   : > { %v895_v43 = vsel %vm892_vm3, %v894_v56, %v890_v13  ;;  %v2517_v7 = vpop.eup %2516  ;;  %v1688_v10 = vadd.f32 %v2513_v46, %v1687_v31 }
 0x1d2   : > { %v1152_v60 = vmul.f32 %v895_v43, %v3894_v19  ;;  %v1125_v63 = vmul.f32 %v2515_v20, %v1124_v35  ;;  %v2001_v5 = vpack.c.bf16 %v1969_v9, %v1969_v9  ;;  %v1925_v51 = vmul.f32 %v2517_v7, %v4017_v37 }
 0x1d3   : > { %v1692_v19 = vsel %vm1691_vm10, %v2513_v46, %v1688_v10  ;;  %vm1930_vm15 = vweird.f32 %v2517_v7 }
 0x1d4   : > { %v1184_v61 = vpack.c.bf16 %v1152_v60, %v1152_v60  ;;  %v1126_v2 = vadd.f32 %v2515_v20, %v1125_v63  ;;  %2033 = vst.msk [vmem:[%s2764_s17 + $0x78] sm:$0xf] %vm1201_vm6, %v2001_v5  ;;  %v1697_v48 = vsel %vm1694_vm12, %v1696_v55, %v1692_v19  ;;  %v1926_v26 = vsub.f32 1.0, %v1925_v51  ;;  %vm1931_vm1 = vmor %vm1929_vm0, %vm1930_vm15 }
 0x1d5   : > { %v1954_v33 = vmul.f32 %v1697_v48, %v3899_v42 }
 0x1d6   : > { %1217 = vst.msk [vmem:[%s2752_s14 + $0x3c] sm:$0xf] %vm1201_vm6, %v1184_v61  ;;  %v1130_v1 = vsel %vm1129_vm13, %v2515_v20, %v1126_v2  ;;  %v1927_v21 = vmul.f32 %v2517_v7, %v1926_v26 }
 0x1d7   : > { %v1135_v27 = vsel %vm1132_vm14, %v1134_v47, %v1130_v1  ;;  %v1986_v8 = vpack.c.bf16 %v1954_v33, %v1954_v33 }
 0x1d8   : > { %v1168_v40 = vmul.f32 %v1135_v27, %v3924_v11  ;;  %v1928_v34 = vadd.f32 %v2517_v7, %v1927_v21 }
 0x1d9   : > { %2018 = vst.msk [vmem:[%s2764_s17 + $0x3c] sm:$0xf] %vm1201_vm6, %v1986_v8 }
 0x1da   : > { %v1200_v39 = vpack.c.bf16 %v1168_v40, %v1168_v40  ;;  %v1932_v42 = vsel %vm1931_vm1, %v2517_v7, %v1928_v34 }
 0x1db   : > { %v1937_v3 = vsel %vm1934_vm2, %v1936_v29, %v1932_v42 }
 0x1dc   : > { %1233 = vst.msk [vmem:[%s2752_s14 + $0x7c] sm:$0xf] %vm1201_vm6, %v1200_v39  ;;  %v1970_v11 = vmul.f32 %v1937_v3, %v3939_v62 }
 0x1de   : > { %v2002_v24 = vpack.c.bf16 %v1970_v11, %v1970_v11 }
 0x1e0   : > { %2034 = vst.msk [vmem:[%s2764_s17 + $0x7c] sm:$0xf] %vm1201_vm6, %v2002_v24 }
 0x1e1 PF: > { %s17_s21 = sadd.s32 1, %s2528_s21  }
 0x1e2   : > { %p14_p4 = scmp.ge.s32.totalorder %s17_s21, 4  }
 0x1e4   :  { %16 = sbr.rel (!%p14_p4) target bundleno = 1 (0x1), region = 82 }

// kernel: c2f_nchw.4
= control target key start
LH: loop header
LB: loop body
LE: loop exit
PB: predicated region body
PF: predicated region fallthrough
CT: control target
= control target key end

     0   :  { %s8800_s24 = smov 0   ;;  %s12282_s0 = inlined_call_operand.vmem [shape: bf16[2,256,4], index: 0, kind: input, shape index: {}]   ;;  %s12283_s1 = inlined_call_operand.vmem [shape: bf16[9,4,4], index: 1, kind: input, shape index: {}]   ;;  %s12284_s2 = inlined_call_operand.vmem [shape: f32[1,4], index: 2, kind: input, shape index: {}]   ;;  %s12285_s3 = inlined_call_operand.vmem [shape: bf16[9,4,4], index: 3, kind: input, shape index: {}]   ;;  %s12286_s4 = inlined_call_operand.vmem [shape: f32[1,4], index: 4, kind: input, shape index: {}]   ;;  %s12287_s5 = inlined_call_operand.vmem [shape: f32[256,1], index: 5, kind: input, shape index: {}]   ;;  %s12288_s6 = inlined_call_operand.vmem [shape: f32[256,1], index: 6, kind: input, shape index: {}]   ;;  %s12289_s7 = inlined_call_operand.vmem [shape: bf16[2,256,4], index: 7, kind: output, shape index: {}]  }
   0x1 LB: > { %s7447_s25 = sadd.s32 4294967295, %s8757_s24   ;;  %p7451_p0 = scmp.ge.s32.totalorder %s8757_s24, 1  ;;  %s8757_s24 = sphi %s8800_s24, %s17_s24  }
   0x2   : > { %p237_p1 = scmp.lt.s32.totalorder %s8757_s24, 3 }
   0x4   : > { %p238_p2 = pnand %p7451_p0, %p237_p1 }
   0x6   : > { %241 = sbr.rel (%p238_p2) target bundleno = 1659 (0x67b), region = 48 }
   0xb   : > { %v7456_v0 = vld [vmem:[%s12283_s1 + $0x6] sm:$0x3]  ;;  %vm947_vm0 = vcmask 1041408   ;;  %v813_v1 = vld [vmem:[%s12283_s1] sm:$0x3]  ;;  %p269_p3 = scmp.lt.s32.totalorder %s7447_s25, 1 }
   0xc   : > { %v949_v2 = vsel %vm947_vm0, %v7456_v0, 0  ;;  %v1049_v3 = vsel %vm947_vm0, %v813_v1, 0  ;;  %vm376_vm1 = vcmask 27648   ;;  %v12291_v4 = vmov 0   ;;  %v7557_v28 = vld [vmem:[%s12283_s1 + $0xc] sm:$0x3] }
   0xd   : > { %958 = vmatpush.bf16.msra.mxu0 %v949_v2  ;;  %8432 = vmatpush.bf16.msra.mxu2 %v949_v2  ;;  %s12737_s25 = smov (!%p269_p3, %s7447_s25), 1  ;;  %379 = vst.msk [vmem:[#allocation2 + $0x8] sm:$0xf] %vm376_vm1, %v12291_v4  ;;  %vm415_vm2 = vsmask.f32 256  ;;  %v12374_v11 = vmov 0 }
   0xe   : > { %1058 = vmatpush.bf16.msra.mxu1 %v1049_v3  ;;  %8433 = vmatpush.bf16.msra.mxu3 %v1049_v3  ;;  %380 = vst.msk [vmem:[#allocation2 + $0xc] sm:$0xf] %vm376_vm1, %v12291_v4  ;;  %s8266_s30 = sshll.u32 %s12737_s25, 7  ;;  %vm416_vm3 = vsmask.f32 4368  ;;  %v12377_v14 = vmov 0 }
   0xf   : > { %377 = vst.msk [vmem:[#allocation2] sm:$0xf] %vm376_vm1, %v12291_v4  ;;  %8443 = vset.pattern.permute.xlu0 %v12291_v4  ;;  %8444 = vset.pattern.permute.xlu1 %v12291_v4  ;;  %s8832_s10 = scalar_lea.vmem %s12282_s0, %s8266_s30  ;;  %vm739_vm4 = vsmask.f32 7938  ;;  %vm8846_vm5 = vmor %vm415_vm2, %vm416_vm3  ;;  %vm898_vm7 = vcmask 31744   ;;  %v1303_v30 = vsel %vm947_vm0, %v7557_v28, 0  ;;  %s11970_s21 = scalar_lea.vmem %s12289_s7, %s8266_s30 }
  0x10   : > { %378 = vst.msk [vmem:[#allocation2 + $0x4] sm:$0xf] %vm376_vm1, %v12291_v4  ;;  %8445 = vset.pattern.permute.xlu2 %v12291_v4  ;;  %v344_v5 = vld [vmem:[%s8832_s10] sm:$0xf]  ;;  %v345_v6 = vld [vmem:[%s8832_s10 + $0x4] sm:$0xf]  ;;  %vm8856_vm6 = vmand %vm376_vm1, %vm739_vm4 }
  0x11   : > { %381 = vst.msk [vmem:[#allocation2 + $0x10] sm:$0xf] %vm376_vm1, %v12291_v4  ;;  %v419_v7 = vshrl.u32 %v344_v5, 16  ;;  %v422_v8 = vshll.u32 %v344_v5, 16  ;;  %v427_v9 = vshrl.u32 %v345_v6, 16  ;;  %v430_v10 = vshll.u32 %v345_v6, 16  ;;  %1312 = vmatpush.bf16.msrb.mxu2 %v1303_v30 }
  0x12   : > { %382 = vst.msk [vmem:[#allocation2 + $0x14] sm:$0xf] %vm376_vm1, %v12291_v4  ;;  %v12375_v11 = vsel %vm8846_vm5, 4294967295, %v12374_v11  ;;  %v12378_v14 = vsel %vm8856_vm6, 4294967295, %v12377_v14  ;;  %v359_v21 = vld [vmem:[%s8832_s10 + $0x3c] sm:$0xf] }
  0x13   : > { %383 = vst.msk [vmem:[#allocation2 + $0x18] sm:$0xf] %vm376_vm1, %v12291_v4  ;;  %v421_v12 = vrot.slane %v419_v7, 7  ;;  %v8850_v13 = vrot.slane %v427_v9, 7  ;;  %v360_v23 = vld [vmem:[%s8832_s10 + $0x40] sm:$0xf] }
  0x14   : > { %12376 = vst [vmem:[#allocation3_spill] sm:$0xff] %v12375_v11  ;;  %v741_v15 = vld [vmem:[#allocation2 + $0x8] sm:$0xf]  ;;  %v361_v24 = vld [vmem:[%s8832_s10 + $0x44] sm:$0xf]  ;;  %v553_v25 = vshrl.u32 %v359_v21, 16 }
  0x15   : > { %384 = vst.msk [vmem:[#allocation2 + $0x1c] sm:$0xf] %vm376_vm1, %v12291_v4  ;;  %v424_v16 = vor.u32 %v422_v8, %v421_v12  ;;  %v425_v17 = vrot.slane %v421_v12, 4  ;;  %v432_v18 = vor.u32 %v430_v10, %v8850_v13  ;;  %v8887_v26 = vld [vmem:[%s8832_s10 + $0x34] sm:$0xf]  ;;  %v562_v34 = vshrl.u32 %v360_v23, 16 }
  0x16   : > { %12379 = vst [vmem:[#allocation4_spill] sm:$0xff] %v12378_v14  ;;  %v358_v27 = vld [vmem:[%s8832_s10 + $0x38] sm:$0xf]  ;;  %v7639_v29 = vld [vmem:[%s12283_s1 + $0x8] sm:$0x3]  ;;  %v571_v36 = vshrl.u32 %v361_v24, 16 }
  0x17   : > { %385 = vst.msk [vmem:[#allocation2 + $0x20] sm:$0xf] %vm376_vm1, %v12291_v4  ;;  %v433_v19 = vsel %vm8846_vm5, %v425_v17, %v432_v18  ;;  %v742_v20 = vsel %vm8856_vm6, %v424_v16, %v741_v15  ;;  %v8268_v22 = vld [vmem:[#allocation2] sm:$0xff]  ;;  %v1955_v31 = vsel %vm947_vm0, %v7639_v29, 0  ;;  %v535_v37 = vshrl.u32 %v8887_v26, 16 }
  0x18   : > { %386 = vst.msk [vmem:[#allocation2 + $0x24] sm:$0xf] %vm376_vm1, %v12291_v4  ;;  %7541 = vmatmul.msk.bf16.vlgmr.msra.gmra.mxu1 %vm898_vm7, %v8268_v22  ;;  %v7638_v32 = vld [vmem:[%s12283_s1 + $0x2] sm:$0x3]  ;;  %1964 = vmatpush.bf16.msrb.mxu3 %v1955_v31  ;;  %v544_v38 = vshrl.u32 %v358_v27, 16  ;;  %v555_v40 = vrot.slane %v553_v25, 7 }
  0x19   : > { %387 = vst.msk [vmem:[#allocation2 + $0x28] sm:$0xf] %vm376_vm1, %v12291_v4  ;;  %v2074_v35 = vsel %vm947_vm0, %v7638_v32, 0  ;;  %v346_v39 = vld [vmem:[%s8832_s10 + $0x8] sm:$0xf]  ;;  %v565_v41 = vshll.u32 %v360_v23, 16 }
  0x1a   : > { %388 = vst.msk [vmem:[#allocation2 + $0x2c] sm:$0xf] %vm376_vm1, %v12291_v4  ;;  %2083 = vmatpush.bf16.msrb.mxu0 %v2074_v35  ;;  %v564_v42 = vrot.slane %v562_v34, 7  ;;  %v574_v43 = vshll.u32 %v361_v24, 16  ;;  %v347_v44 = vld [vmem:[%s8832_s10 + $0xc] sm:$0xf] }
  0x1b   : > { %743 = vst [vmem:[#allocation2 + $0x8] sm:$0xf] %v742_v20  ;;  %v556_v45 = vshll.u32 %v359_v21, 16  ;;  %v436_v46 = vshrl.u32 %v346_v39, 16  ;;  %v362_v47 = vld [vmem:[%s8832_s10 + $0x48] sm:$0xf] }
  0x1c   : > { %744 = vst.msk [vmem:[#allocation2 + $0xc] sm:$0xf] %vm376_vm1, %v433_v19  ;;  %v8925_v48 = vrot.slane %v571_v36, 7  ;;  %v8927_v49 = vrot.slane %v535_v37, 7  ;;  %v546_v50 = vrot.slane %v544_v38, 7  ;;  %v547_v51 = vshll.u32 %v358_v27, 16 }
  0x1d   : > { %389 = vst.msk [vmem:[#allocation2 + $0x30] sm:$0xf] %vm376_vm1, %v12291_v4  ;;  %v363_v52 = vld [vmem:[%s8832_s10 + $0x4c] sm:$0xf]  ;;  %v560_v53 = vrot.slane %v555_v40, 4  ;;  %v567_v54 = vor.u32 %v565_v41, %v564_v42  ;;  %v445_v55 = vshrl.u32 %v347_v44, 16  ;;  %v558_v58 = vor.u32 %v556_v45, %v555_v40 }
  0x1e   : > { %390 = vst.msk [vmem:[#allocation2 + $0x34] sm:$0xf] %vm376_vm1, %v12291_v4  ;;  %v580_v56 = vshrl.u32 %v362_v47, 16  ;;  %v569_v57 = vrot.slane %v564_v42, 4  ;;  %v438_v59 = vrot.slane %v436_v46, 7  ;;  %v439_v60 = vshll.u32 %v346_v39, 16 }
  0x1f   : > { %391 = vst.msk [vmem:[#allocation2 + $0x38] sm:$0xf] %vm376_vm1, %v12291_v4  ;;  %v576_v61 = vor.u32 %v574_v43, %v8925_v48  ;;  %v542_v62 = vrot.slane %v8927_v49, 4  ;;  %v549_v63 = vor.u32 %v547_v51, %v546_v50  ;;  %v589_v0 = vshrl.u32 %v363_v52, 16  ;;  %v349_v15 = vld [vmem:[%s8832_s10 + $0x14] sm:$0xf] }
  0x20   : > { %392 = vst.msk [vmem:[#allocation2 + $0x3c] sm:$0xf] %vm376_vm1, %v12291_v4  ;;  %v551_v1 = vrot.slane %v546_v50, 4  ;;  %v434_v2 = vrot.slane %v8850_v13, 4  ;;  %v448_v3 = vshll.u32 %v347_v44, 16  ;;  %v578_v5 = vrot.slane %v8925_v48, 4 }
  0x21   : > { %393 = vst.msk [vmem:[#allocation2 + $0x40] sm:$0xf] %vm376_vm1, %v12291_v4  ;;  %v447_v6 = vrot.slane %v445_v55, 7  ;;  %v582_v7 = vrot.slane %v580_v56, 7  ;;  %v583_v8 = vshll.u32 %v362_v47, 16  ;;  %v592_v9 = vshll.u32 %v363_v52, 16 }
  0x22   : > { %394 = vst.msk [vmem:[#allocation2 + $0x44] sm:$0xf] %vm376_vm1, %v12291_v4  ;;  %v568_v10 = vsel %vm8846_vm5, %v560_v53, %v567_v54  ;;  %v441_v12 = vor.u32 %v439_v60, %v438_v59  ;;  %v348_v13 = vld [vmem:[%s8832_s10 + $0x10] sm:$0xf]  ;;  %v443_v16 = vrot.slane %v438_v59, 4  ;;  %v591_v17 = vrot.slane %v589_v0, 7 }
  0x23   : > { %v8269_v33 = vld [vmem:[#allocation2 + $0x8] sm:$0xff]  ;;  %395 = vst.msk [vmem:[#allocation2 + $0x48] sm:$0xf] %vm376_vm1, %v12291_v4  ;;  %v454_v18 = vshrl.u32 %v348_v13, 16  ;;  %v463_v19 = vshrl.u32 %v349_v15, 16  ;;  %v577_v20 = vsel %vm8846_vm5, %v569_v57, %v576_v61  ;;  %v550_v21 = vsel %vm8846_vm5, %v542_v62, %v549_v63 }
  0x24   : > { %396 = vst.msk [vmem:[#allocation2 + $0x4c] sm:$0xf] %vm376_vm1, %v12291_v4  ;;  %7521 = vmatmul.msk.bf16.vlgmr.msra.gmra.mxu0 %vm898_vm7, %v8269_v33  ;;  %v457_v22 = vshll.u32 %v348_v13, 16  ;;  %v466_v23 = vshll.u32 %v349_v15, 16  ;;  %v364_v24 = vld [vmem:[%s8832_s10 + $0x50] sm:$0xf]  ;;  %v559_v25 = vsel %vm8846_vm5, %v551_v1, %v558_v58  ;;  %v450_v27 = vor.u32 %v448_v3, %v447_v6 }
  0x25   : > { %397 = vst.msk [vmem:[#allocation2 + $0x50] sm:$0xf] %vm376_vm1, %v12291_v4  ;;  %v456_v28 = vrot.slane %v454_v18, 7  ;;  %v8966_v29 = vrot.slane %v463_v19, 7  ;;  %v365_v30 = vld [vmem:[%s8832_s10 + $0x54] sm:$0xf]  ;;  %v585_v31 = vor.u32 %v583_v8, %v582_v7  ;;  %v442_v35 = vsel %vm8846_vm5, %v434_v2, %v441_v12 }
  0x26   : > { %398 = vst.msk [vmem:[#allocation2 + $0x54] sm:$0xf] %vm376_vm1, %v12291_v4  ;;  %v598_v32 = vshrl.u32 %v364_v24, 16  ;;  %v607_v34 = vshrl.u32 %v365_v30, 16  ;;  %v587_v36 = vrot.slane %v582_v7, 4  ;;  %v594_v37 = vor.u32 %v592_v9, %v591_v17 }
  0x27   : > { %399 = vst.msk [vmem:[#allocation2 + $0x58] sm:$0xf] %vm376_vm1, %v12291_v4  ;;  %v610_v38 = vshll.u32 %v365_v30, 16  ;;  %v452_v39 = vrot.slane %v447_v6, 4  ;;  %v459_v40 = vor.u32 %v457_v22, %v456_v28  ;;  %v451_v43 = vsel %vm8846_vm5, %v443_v16, %v450_v27  ;;  %v350_v59 = vld [vmem:[%s8832_s10 + $0x18] sm:$0xf] }
  0x28   : > { %400 = vst.msk [vmem:[#allocation2 + $0x5c] sm:$0xf] %vm376_vm1, %v12291_v4  ;;  %7542 = vmatmul.msk.bf16.gmra.mxu1 %vm898_vm7, %v8269_v33  ;;  %v601_v33 = vshll.u32 %v364_v24, 16  ;;  %v600_v41 = vrot.slane %v598_v32, 7  ;;  %v609_v42 = vrot.slane %v607_v34, 7  ;;  %v461_v44 = vrot.slane %v456_v28, 4 }
  0x29   : > { %401 = vst.msk [vmem:[#allocation2 + $0x60] sm:$0xf] %vm376_vm1, %v12291_v4  ;;  %v468_v45 = vor.u32 %v466_v23, %v8966_v29  ;;  %v586_v46 = vsel %vm8846_vm5, %v578_v5, %v585_v31  ;;  %v596_v47 = vrot.slane %v591_v17, 4  ;;  %v595_v50 = vsel %vm8846_vm5, %v587_v36, %v594_v37  ;;  %v351_v60 = vld [vmem:[%s8832_s10 + $0x1c] sm:$0xf] }
  0x2a   : > { %402 = vst.msk [vmem:[#allocation2 + $0x64] sm:$0xf] %vm376_vm1, %v12291_v4  ;;  %v603_v48 = vor.u32 %v601_v33, %v600_v41  ;;  %v605_v51 = vrot.slane %v600_v41, 4  ;;  %v612_v52 = vor.u32 %v610_v38, %v609_v42  ;;  %v460_v53 = vsel %vm8846_vm5, %v452_v39, %v459_v40  ;;  %v366_v2 = vld [vmem:[%s8832_s10 + $0x58] sm:$0xf] }
  0x2b   : > { %403 = vst.msk [vmem:[#allocation2 + $0x68] sm:$0xf] %vm376_vm1, %v12291_v4  ;;  %v469_v54 = vsel %vm8846_vm5, %v461_v44, %v468_v45  ;;  %v472_v62 = vshrl.u32 %v350_v59, 16  ;;  %v475_v63 = vshll.u32 %v350_v59, 16  ;;  %v481_v0 = vshrl.u32 %v351_v60, 16 }
  0x2c   : > { %404 = vst.msk [vmem:[#allocation2 + $0x6c] sm:$0xf] %vm376_vm1, %v12291_v4  ;;  %v604_v55 = vsel %vm8846_vm5, %v596_v47, %v603_v48  ;;  %v613_v57 = vsel %vm8846_vm5, %v605_v51, %v612_v52  ;;  %v484_v1 = vshll.u32 %v351_v60, 16  ;;  %v367_v3 = vld [vmem:[%s8832_s10 + $0x5c] sm:$0xf]  ;;  %v470_v5 = vrot.slane %v8966_v29, 4 }
  0x2d   : > { %405 = vst.msk [vmem:[#allocation2 + $0x70] sm:$0xf] %vm376_vm1, %v12291_v4  ;;  %v474_v6 = vrot.slane %v472_v62, 7  ;;  %v483_v7 = vrot.slane %v481_v0, 7  ;;  %v616_v8 = vshrl.u32 %v366_v2, 16  ;;  %v614_v9 = vrot.slane %v609_v42, 4 }
  0x2e   : > { %406 = vst.msk [vmem:[#allocation2 + $0x74] sm:$0xf] %vm376_vm1, %v12291_v4  ;;  %v625_v12 = vshrl.u32 %v367_v3, 16  ;;  %v628_v13 = vshll.u32 %v367_v3, 16  ;;  %v352_v30 = vld [vmem:[%s8832_s10 + $0x20] sm:$0xf] }
  0x2f   : > { %407 = vst.msk [vmem:[#allocation2 + $0x78] sm:$0xf] %vm376_vm1, %v12291_v4  ;;  %v477_v15 = vor.u32 %v475_v63, %v474_v6  ;;  %v479_v16 = vrot.slane %v474_v6, 4  ;;  %v486_v17 = vor.u32 %v484_v1, %v483_v7  ;;  %v618_v18 = vrot.slane %v616_v8, 7  ;;  %v353_v31 = vld [vmem:[%s8832_s10 + $0x24] sm:$0xf] }
  0x30   : > { %408 = vst.msk [vmem:[#allocation2 + $0x7c] sm:$0xf] %vm376_vm1, %v12291_v4  ;;  %v627_v19 = vrot.slane %v625_v12, 7  ;;  %v490_v32 = vshrl.u32 %v352_v30, 16  ;;  %v493_v33 = vshll.u32 %v352_v30, 16  ;;  %v499_v34 = vshrl.u32 %v353_v31, 16 }
  0x31   : > { %409 = vst.msk [vmem:[#allocation2 + $0x80] sm:$0xf] %vm376_vm1, %v12291_v4  ;;  %v623_v23 = vrot.slane %v618_v18, 4  ;;  %v502_v36 = vshll.u32 %v353_v31, 16  ;;  %v369_v37 = vld [vmem:[%s8832_s10 + $0x64] sm:$0xf] }
  0x32   : > { %410 = vst.msk [vmem:[#allocation2 + $0x84] sm:$0xf] %vm376_vm1, %v12291_v4  ;;  %v630_v24 = vor.u32 %v628_v13, %v627_v19  ;;  %v488_v39 = vrot.slane %v483_v7, 4  ;;  %v492_v40 = vrot.slane %v490_v32, 7  ;;  %v501_v41 = vrot.slane %v499_v34, 7 }
  0x33   : > { %411 = vst.msk [vmem:[#allocation2 + $0x88] sm:$0xf] %vm376_vm1, %v12291_v4  ;;  %v643_v45 = vshrl.u32 %v369_v37, 16  ;;  %v354_v62 = vld [vmem:[%s8832_s10 + $0x28] sm:$0xf]  ;;  %vm413_vm9 = vcmask 24576  }
  0x34   : > { %412 = vst.msk [vmem:[#allocation2 + $0x8c] sm:$0xf] %vm376_vm1, %v12291_v4  ;;  %v631_v27 = vsel %vm8846_vm5, %v623_v23, %v630_v24  ;;  %v495_v47 = vor.u32 %v493_v33, %v492_v40  ;;  %v497_v48 = vrot.slane %v492_v40, 4  ;;  %v355_v63 = vld [vmem:[%s8832_s10 + $0x2c] sm:$0xf]  ;;  %v508_v0 = vshrl.u32 %v354_v62, 16  ;;  %vm9560_vm10 = vmand %vm413_vm9, %vm415_vm2 }
  0x35   : > { %759 = vst.msk [vmem:[#allocation2 + $0x48] sm:$0xf] %vm376_vm1, %v568_v10  ;;  %v619_v10 = vshll.u32 %v366_v2, 16  ;;  %v511_v1 = vshll.u32 %v354_v62, 16  ;;  %v517_v2 = vshrl.u32 %v355_v63, 16  ;;  %v506_v8 = vrot.slane %v501_v41, 4 }
  0x36   : > { %760 = vst.msk [vmem:[#allocation2 + $0x4c] sm:$0xf] %vm376_vm1, %v577_v20  ;;  %v478_v20 = vsel %vm8846_vm5, %v470_v5, %v477_v15  ;;  %v370_v3 = vld [vmem:[%s8832_s10 + $0x68] sm:$0xf]  ;;  %v520_v5 = vshll.u32 %v355_v63, 16  ;;  %vm2628_vm11 = vcmask 1046528  }
  0x37   : > { %757 = vst.msk [vmem:[#allocation2 + $0x40] sm:$0xf] %vm376_vm1, %v550_v21  ;;  %v487_v21 = vsel %vm8846_vm5, %v479_v16, %v486_v17  ;;  %v621_v22 = vor.u32 %v619_v10, %v618_v18  ;;  %v371_v6 = vld [vmem:[%s8832_s10 + $0x6c] sm:$0xf]  ;;  %v652_v7 = vshrl.u32 %v370_v3, 16  ;;  %v519_v10 = vrot.slane %v517_v2, 7 }
  0x38   : > { %758 = vst.msk [vmem:[#allocation2 + $0x44] sm:$0xf] %vm376_vm1, %v559_v25  ;;  %v655_v12 = vshll.u32 %v370_v3, 16  ;;  %v661_v16 = vshrl.u32 %v371_v6, 16  ;;  %v664_v17 = vshll.u32 %v371_v6, 16 }
  0x39   : > { %745 = vst.msk [vmem:[#allocation2 + $0x10] sm:$0xf] %vm376_vm1, %v442_v35  ;;  %v622_v25 = vsel %vm8846_vm5, %v614_v9, %v621_v22  ;;  %v368_v35 = vld [vmem:[%s8832_s10 + $0x60] sm:$0xf]  ;;  %v510_v9 = vrot.slane %v508_v0, 7  ;;  %v654_v15 = vrot.slane %v652_v7, 7 }
  0x3a   : > { %746 = vst.msk [vmem:[#allocation2 + $0x14] sm:$0xf] %vm376_vm1, %v451_v43  ;;  %v634_v38 = vshrl.u32 %v368_v35, 16  ;;  %v637_v42 = vshll.u32 %v368_v35, 16  ;;  %v632_v43 = vrot.slane %v627_v19, 4  ;;  %v663_v23 = vrot.slane %v661_v16, 7 }
  0x3b   : > { %761 = vst.msk [vmem:[#allocation2 + $0x50] sm:$0xf] %vm376_vm1, %v586_v46  ;;  %v646_v46 = vshll.u32 %v369_v37, 16  ;;  %v513_v18 = vor.u32 %v511_v1, %v510_v9  ;;  %v515_v19 = vrot.slane %v510_v9, 4  ;;  %v659_v22 = vrot.slane %v654_v15, 4 }
  0x3c   : > { %762 = vst.msk [vmem:[#allocation2 + $0x54] sm:$0xf] %vm376_vm1, %v595_v50  ;;  %v636_v44 = vrot.slane %v634_v38, 7  ;;  %v504_v50 = vor.u32 %v502_v36, %v501_v41  ;;  %v356_v32 = vld [vmem:[%s8832_s10 + $0x30] sm:$0xf]  ;;  %v538_v36 = vshll.u32 %v8887_v26, 16 }
  0x3d   : > { %v8277_v56 = vld [vmem:[#allocation2 + $0x48] sm:$0xff]  ;;  %747 = vst.msk [vmem:[#allocation2 + $0x18] sm:$0xf] %vm376_vm1, %v460_v53  ;;  %v645_v53 = vrot.slane %v643_v45, 7  ;;  %v514_v24 = vsel %vm8846_vm5, %v506_v8, %v513_v18  ;;  %v372_v33 = vld [vmem:[%s8832_s10 + $0x70] sm:$0xf] }
  0x3e   : > { %748 = vst.msk [vmem:[#allocation2 + $0x1c] sm:$0xf] %vm376_vm1, %v469_v54  ;;  %7529 = vmatmul.msk.bf16.vlgmr.msra.gmra.mxu2 %vm898_vm7, %v8277_v56  ;;  %v639_v51 = vor.u32 %v637_v42, %v636_v44  ;;  %v641_v52 = vrot.slane %v636_v44, 4  ;;  %v496_v54 = vsel %vm8846_vm5, %v488_v39, %v495_v47  ;;  %v526_v34 = vshrl.u32 %v356_v32, 16  ;;  %v373_v37 = vld [vmem:[%s8832_s10 + $0x74] sm:$0xf] }
  0x3f   : > { %v8999_v58 = vld [vmem:[#allocation2 + $0x40] sm:$0xff]  ;;  %763 = vst.msk [vmem:[#allocation2 + $0x58] sm:$0xf] %vm376_vm1, %v604_v55  ;;  %v505_v55 = vsel %vm8846_vm5, %v497_v48, %v504_v50  ;;  %v650_v13 = vrot.slane %v645_v53, 4  ;;  %v529_v35 = vshll.u32 %v356_v32, 16  ;;  %v670_v38 = vshrl.u32 %v372_v33, 16 }
  0x40   : > { %764 = vst.msk [vmem:[#allocation2 + $0x5c] sm:$0xf] %vm376_vm1, %v613_v57  ;;  %7549 = vmatmul.msk.bf16.vlgmr.msra.gmra.mxu3 %vm898_vm7, %v8999_v58  ;;  %v648_v57 = vor.u32 %v646_v46, %v645_v53  ;;  %v679_v39 = vshrl.u32 %v373_v37, 16  ;;  %v524_v40 = vrot.slane %v519_v10, 4  ;;  %v528_v41 = vrot.slane %v526_v34, 7  ;;  %v8395_v18 = vld [vmem:[#allocation2] sm:$0xff]  }
  0x41   : > { %v8270_v61 = vld [vmem:[#allocation2 + $0x10] sm:$0xff]  ;;  %749 = vst.msk [vmem:[#allocation2 + $0x20] sm:$0xf] %vm376_vm1, %v478_v20  ;;  %v522_v20 = vor.u32 %v520_v5, %v519_v10  ;;  %v540_v42 = vor.u32 %v538_v36, %v8927_v49  ;;  %v668_v44 = vrot.slane %v663_v23, 4  ;;  %v672_v45 = vrot.slane %v670_v38, 7 }
  0x42   : > { %7522 = vmatmul.msk.bf16.gmra.mxu0 %vm898_vm7, %v8270_v61  ;;  %7543 = vmatmul.msk.bf16.gmra.mxu1 %vm898_vm7, %v8270_v61  ;;  %750 = vst.msk [vmem:[#allocation2 + $0x24] sm:$0xf] %vm376_vm1, %v487_v21  ;;  %v649_v59 = vsel %vm8846_vm5, %v641_v52, %v648_v57  ;;  %v657_v21 = vor.u32 %v655_v12, %v654_v15  ;;  %v681_v46 = vrot.slane %v679_v39, 7  ;;  %v682_v47 = vshll.u32 %v373_v37, 16  ;;  %v1652_v16 = vld [vmem:[#allocation2 + $0x8] sm:$0xf] }
  0x43   : > { %765 = vst.msk [vmem:[#allocation2 + $0x60] sm:$0xf] %vm376_vm1, %v622_v25  ;;  %v8278_v28 = vld [vmem:[#allocation2 + $0x50] sm:$0xff]  ;;  %v523_v25 = vsel %vm8846_vm5, %v515_v19, %v522_v20  ;;  %v531_v48 = vor.u32 %v529_v35, %v528_v41  ;;  %v533_v50 = vrot.slane %v528_v41, 4  ;;  %v1723_v19 = vunpack.c.l.b16 %v1652_v16  ;;  %v7810_v20 = vld [vmem:[%s12283_s1 + $0xa] sm:$0x3] }
  0x44   : > { %766 = vst.msk [vmem:[#allocation2 + $0x64] sm:$0xf] %vm376_vm1, %v631_v27  ;;  %v658_v27 = vsel %vm8846_vm5, %v650_v13, %v657_v21  ;;  %v684_v52 = vor.u32 %v682_v47, %v681_v46  ;;  %v686_v63 = vrot.slane %v681_v46, 4  ;;  %v7809_v21 = vld [vmem:[%s12283_s1 + $0x4] sm:$0x3] }
  0x45   : > { %v8271_v29 = vld [vmem:[#allocation2 + $0x18] sm:$0xff]  ;;  %751 = vst.msk [vmem:[#allocation2 + $0x28] sm:$0xf] %vm376_vm1, %v496_v54  ;;  %v532_v53 = vsel %vm8846_vm5, %v524_v40, %v531_v48  ;;  %v541_v54 = vsel %vm8846_vm5, %v533_v50, %v540_v42  ;;  %v7732_v32 = vld [vmem:[%s12283_s1 + $0xe] sm:$0x3]  ;;  %v2055_v42 = vshrl.u32 %v8395_v18, 16 }
  0x46   : > { %752 = vst.msk [vmem:[#allocation2 + $0x2c] sm:$0xf] %vm376_vm1, %v505_v55  ;;  %v2464_v37 = vsel %vm947_vm0, %v7732_v32, 0  ;;  %vm1773_vm8 = vsmask.f32 7424 }
  0x47   : > { %v8279_v60 = vld [vmem:[#allocation2 + $0x58] sm:$0xff]  ;;  %768 = vst.msk [vmem:[#allocation2 + $0x6c] sm:$0xf] %vm376_vm1, %v649_v59  ;;  %2473 = vmatpush.bf16.msrb.mxu1 %v2464_v37 }
  0x48   : > { %753 = vst.msk [vmem:[#allocation2 + $0x30] sm:$0xf] %vm376_vm1, %v514_v24  ;;  %v374_v59 = vld [vmem:[%s8832_s10 + $0x78] sm:$0xf] }
  0x49   : > { %v8272_v61 = vld [vmem:[#allocation2 + $0x20] sm:$0xff]  ;;  %754 = vst.msk [vmem:[#allocation2 + $0x34] sm:$0xf] %vm376_vm1, %v523_v25  ;;  %v691_v1 = vshll.u32 %v374_v59, 16  ;;  %v2711_v25 = vsel %vm947_vm0, %v7810_v20, 0 }
  0x4a   : > { %769 = vst.msk [vmem:[#allocation2 + $0x70] sm:$0xf] %vm376_vm1, %v658_v27  ;;  %v2821_v27 = vsel %vm947_vm0, %v7809_v21, 0  ;;  %2720 = vmatpush.bf16.msra.mxu2 %v2711_v25 }
  0x4b   : > { %v8280_v30 = vld [vmem:[#allocation2 + $0x60] sm:$0xff]  ;;  %755 = vst.msk [vmem:[#allocation2 + $0x38] sm:$0xf] %vm376_vm1, %v532_v53  ;;  %2830 = vmatpush.bf16.msra.mxu3 %v2821_v27 }
  0x4c   : > { %756 = vst.msk [vmem:[#allocation2 + $0x3c] sm:$0xf] %vm376_vm1, %v541_v54  ;;  %v8317_v53 = vld [vmem:[#allocation2 + $0x20] sm:$0xff] }
  0x4d   : > { %v8273_v31 = vld [vmem:[#allocation2 + $0x28] sm:$0xff] }
  0x4e   : > { %7530 = vmatmul.msk.bf16.gmra.mxu2 %vm898_vm7, %v8278_v28 }
  0x50   : > { %7550 = vmatmul.msk.bf16.gmra.mxu3 %vm898_vm7, %v8277_v56  ;;  %v640_v56 = vsel %vm8846_vm5, %v632_v43, %v639_v51  ;;  %v673_v43 = vshll.u32 %v372_v33, 16  ;;  %v677_v51 = vrot.slane %v672_v45, 4  ;;  %v8274_v57 = vld [vmem:[#allocation2 + $0x30] sm:$0xff] }
  0x51   : > { %767 = vst.msk [vmem:[#allocation2 + $0x68] sm:$0xf] %vm376_vm1, %v640_v56 }
  0x52   : > { %7523 = vmatmul.msk.bf16.gmra.mxu0 %vm898_vm7, %v8271_v29  ;;  %7544 = vmatmul.msk.bf16.gmra.mxu1 %vm898_vm7, %v8271_v29  ;;  %v675_v26 = vor.u32 %v673_v43, %v672_v45  ;;  %v685_v55 = vsel %vm8846_vm5, %v677_v51, %v684_v52  ;;  %v280_v51 = vld [vmem:[%s12287_s5] sm:$0xff]  ;;  %v8301_v52 = vld [vmem:[#allocation2 + $0x10] sm:$0xff] }
  0x53   : > { %772 = vst.msk [vmem:[#allocation2 + $0x7c] sm:$0xf] %vm376_vm1, %v685_v55  ;;  %v8275_v12 = vld [vmem:[#allocation2 + $0x38] sm:$0xff]  ;;  %1428 = vperm.xlu0 %8443, %v280_v51   ;;  %v1786_v20 = vshrl.u32 %v8301_v52, 16  ;;  %v282_v51 = vld [vmem:[%s12287_s5 + $0x10] sm:$0xff] }
  0x54   : > { %v676_v49 = vsel %vm8846_vm5, %v668_v44, %v675_v26  ;;  %1438 = vperm.xlu2 %8445, %v282_v51  }
  0x55   : > { %771 = vst.msk [vmem:[#allocation2 + $0x78] sm:$0xf] %vm376_vm1, %v676_v49  ;;  %v2299_v49 = vshll.u32 %v8317_v53, 16 }
  0x58   : > { %v8281_v56 = vld [vmem:[#allocation2 + $0x68] sm:$0xff] }
  0x5c   : > { %v8283_v13 = vld [vmem:[#allocation2 + $0x78] sm:$0xff] }
  0x5e   : > { %7531 = vmatmul.msk.bf16.gmra.mxu2 %vm898_vm7, %v8279_v60 }
  0x60   : > { %7551 = vmatmul.msk.bf16.gmra.mxu3 %vm898_vm7, %v8278_v28  ;;  %v666_v28 = vor.u32 %v664_v17, %v663_v23  ;;  %v9105_v17 = vld [vmem:[#allocation2 + $0xc] sm:$0xf] }
  0x61   : > { %v12290_v24 = vunpack.c.l.b16 %v9105_v17 }
  0x62   : > { %7524 = vmatmul.msk.bf16.gmra.mxu0 %vm898_vm7, %v8272_v61  ;;  %7545 = vmatmul.msk.bf16.gmra.mxu1 %vm898_vm7, %v8272_v61  ;;  %v667_v29 = vsel %vm8846_vm5, %v659_v22, %v666_v28  ;;  %v688_v61 = vshrl.u32 %v374_v59, 16  ;;  %v8414_v22 = vld [vmem:[#allocation2 + $0x10] sm:$0xff]   ;;  %v8316_v28 = vld [vmem:[#allocation2 + $0x18] sm:$0xff] }
  0x63   : > { %770 = vst.msk [vmem:[#allocation2 + $0x74] sm:$0xf] %vm376_vm1, %v667_v29  ;;  %v2286_v29 = vshll.u32 %v8414_v22, 16  ;;  %v2284_v33 = vshrl.u32 %v8414_v22, 16  ;;  %v2291_v35 = vshll.u32 %v8316_v28, 16  ;;  %v9132_v38 = vpack.c.b16 %v12290_v24, %v1723_v19  ;;  %v312_v19 = vld [vmem:[%s12288_s6] sm:$0xff] }
  0x64   : > { %v690_v0 = vrot.slane %v688_v61, 7  ;;  %v2295_v54 = vshrl.u32 %v8316_v28, 16  ;;  %v2301_v61 = vrot.slane %v2299_v49, 1  ;;  %3125 = vperm.xlu1 %8444, %v312_v19  }
  0x65   : > { %v2288_v34 = vrot.slane %v2286_v29, 1  ;;  %v2293_v40 = vrot.slane %v2291_v35, 1  ;;  %v1777_v45 = vshll.u32 %v9132_v38, 16  ;;  %v1775_v55 = vshrl.u32 %v9132_v38, 16 }
  0x66   : > { %v693_v5 = vor.u32 %v691_v1, %v690_v0  ;;  %v695_v6 = vrot.slane %v690_v0, 4 }
  0x67   : > { %v2289_v39 = vor.u32 %v2288_v34, %v2284_v33  ;;  %v1779_v50 = vrot.slane %v1777_v45, 1  ;;  %v8286_v34 = vld [vmem:[#allocation2 + $0x18] sm:$0xff]  ;;  %v9181_v45 = vld [vmem:[#allocation2 + $0x20] sm:$0xff] }
  0x68   : > { %v694_v8 = vsel %vm8846_vm5, %v686_v63, %v693_v5 }
  0x69   : > { %773 = vst.msk [vmem:[#allocation2 + $0x80] sm:$0xf] %vm376_vm1, %v694_v8  ;;  %v2294_v44 = vsel %vm1773_vm8, %v2289_v39, %v2293_v40  ;;  %v1780_v0 = vor.u32 %v1779_v50, %v1775_v55  ;;  %v315_v55 = vld [vmem:[%s12288_s6 + $0x18] sm:$0xff] }
  0x6a   : > { %v8282_v10 = vld [vmem:[#allocation2 + $0x70] sm:$0xff] }
  0x6e   : > { %7532 = vmatmul.msk.bf16.gmra.mxu2 %vm898_vm7, %v8280_v30 }
  0x70   : > { %7552 = vmatmul.msk.bf16.gmra.mxu3 %vm898_vm7, %v8279_v60  ;;  %v375_v60 = vld [vmem:[%s8832_s10 + $0x7c] sm:$0xf] }
  0x71   : > { %v697_v62 = vshrl.u32 %v375_v60, 16  ;;  %v700_v3 = vshll.u32 %v375_v60, 16  ;;  %v2297_v60 = vor.u32 %v2295_v54, %v2293_v40 }
  0x72   : > { %7525 = vmatmul.msk.bf16.gmra.mxu0 %vm898_vm7, %v8273_v31  ;;  %7546 = vmatmul.msk.bf16.gmra.mxu1 %vm898_vm7, %v8273_v31  ;;  %v2057_v31 = vshll.u32 %v8395_v18, 16 }
  0x73   : > { %v9091_v2 = vrot.slane %v697_v62, 7  ;;  %v281_v62 = vld [vmem:[%s12287_s5 + $0x8] sm:$0xff]  ;;  %v2302_v63 = vsel %vm1773_vm8, %v2297_v60, %v2301_v61 }
  0x74   : > { %v2059_v43 = vrot.slane %v2057_v31, 1  ;;  %1433 = vperm.xlu0 %8443, %v281_v62  }
  0x75   : > { %v702_v7 = vor.u32 %v700_v3, %v9091_v2  ;;  %v8285_v3 = vld [vmem:[#allocation2 + $0x10] sm:$0xff] }
  0x76   : > { %v2060_v47 = vor.u32 %v2059_v43, %v2055_v42  ;;  %v313_v42 = vld [vmem:[%s12288_s6 + $0x8] sm:$0xff]  ;;  %v314_v43 = vld [vmem:[%s12288_s6 + $0x10] sm:$0xff] }
  0x77   : > { %v703_v9 = vsel %vm8846_vm5, %v695_v6, %v702_v7  ;;  %3130 = vperm.xlu1 %8444, %v313_v42  }
  0x78   : > { %774 = vst.msk [vmem:[#allocation2 + $0x84] sm:$0xf] %vm376_vm1, %v703_v9  ;;  %v2061_v26 = vsel %vm1773_vm8, %v2060_v47, %v1779_v50 }
  0x7c   : > { %3135 = vperm.xlu0 %8443, %v314_v43  }
  0x7e   : > { %7533 = vmatmul.msk.bf16.gmra.mxu2 %vm898_vm7, %v8281_v56 }
  0x7f   : > { %v8284_v46 = vld [vmem:[#allocation2 + $0x80] sm:$0xff]  ;;  %3140 = vperm.xlu1 %8444, %v315_v55   ;;  %v8305_v55 = vld [vmem:[#allocation2 + $0x30] sm:$0xff] }
  0x80   : > { %7553 = vmatmul.msk.bf16.gmra.mxu3 %vm898_vm7, %v8280_v30 }
  0x82   : > { %7526 = vmatmul.msk.bf16.gmra.mxu0 %vm898_vm7, %v8274_v57  ;;  %7547 = vmatmul.msk.bf16.gmra.mxu1 %vm898_vm7, %v8274_v57 }
  0x8e   : > { %7534 = vmatmul.msk.bf16.gmra.mxu2 %vm898_vm7, %v8282_v10 }
  0x90   : > { %7554 = vmatmul.msk.bf16.gmra.mxu3 %vm898_vm7, %v8281_v56  ;;  %v1782_v56 = vshll.u32 %v8301_v52, 16 }
  0x92   : > { %7527 = vmatmul.msk.bf16.gmra.mxu0 %vm898_vm7, %v8275_v12  ;;  %7548 = vmatmul.msk.bf16.gmra.mxu1 %vm898_vm7, %v8275_v12  ;;  %v1784_v1 = vrot.slane %v1782_v56, 1  ;;  %v8318_v12 = vld [vmem:[#allocation2 + $0x28] sm:$0xff] }
  0x93   : > { %v2307_v16 = vshll.u32 %v8318_v12, 16  ;;  %v285_v56 = vld [vmem:[%s12287_s5 + $0x28] sm:$0xff] }
  0x94   : > { %v1785_v5 = vsel %vm1773_vm8, %v1780_v0, %v1784_v1  ;;  %v1788_v32 = vor.u32 %v1786_v20, %v1784_v1  ;;  %1453 = vperm.xlu0 %8443, %v285_v56   ;;  %v8304_v20 = vld [vmem:[#allocation2 + $0x28] sm:$0xff]  ;;  %v8321_v56 = vld [vmem:[#allocation2 + $0x40] sm:$0xff] }
  0x95   : > { %v1060_v15 = vpop.f32.mrf.mxu1 }
  0x9d   : > { %v9124_v36 = vpop.f32.mrf.mxu1 }
  0x9e   : > { %7535 = vmatmul.msk.bf16.gmra.mxu2 %vm898_vm7, %v8283_v13 }
  0xa0   : > { %7555 = vmatmul.msk.bf16.gmra.mxu3 %vm898_vm7, %v8282_v10  ;;  %v8302_v10 = vld [vmem:[#allocation2 + $0x18] sm:$0xff] }
  0xa1   : > { %v960_v23 = vpop.f32.mrf.mxu0  ;;  %v1790_v21 = vshll.u32 %v8302_v10, 16  ;;  %v1794_v52 = vshrl.u32 %v8302_v10, 16 }
  0xa2   : > { %7528 = vmatmul.msk.bf16.gmra.mxu0 %vm898_vm7, %v8999_v58  ;;  %v9119_v30 = vadd.f32 %v1060_v15, %v960_v23  ;;  %v7843_v58 = vld [vmem:[%s12283_s1 + $0x10] sm:$0x3]  ;;  %7793 = vmatmul.msk.bf16.vlgmr.msrb.gmra.mxu1 %vm898_vm7, %v2294_v44  ;;  %v2303_v15 = vshrl.u32 %v8317_v53, 16  ;;  %v2309_v23 = vrot.slane %v2307_v16, 1  ;;  %v1798_v53 = vshll.u32 %v9181_v45, 16 }
  0xa3   : > { %v3000_v41 = vsel %vm947_vm0, %v7843_v58, 0  ;;  %v1792_v33 = vrot.slane %v1790_v21, 1  ;;  %v286_v16 = vld [vmem:[%s12287_s5 + $0x30] sm:$0xff]  ;;  %v8320_v21 = vld [vmem:[#allocation2 + $0x38] sm:$0xff] }
  0xa4   : > { %3009 = vmatpush.bf16.msra.mxu0 %v3000_v41  ;;  %v2305_v22 = vor.u32 %v2303_v15, %v2301_v61  ;;  %v1800_v1 = vrot.slane %v1798_v53, 1  ;;  %v283_v15 = vld [vmem:[%s12287_s5 + $0x18] sm:$0xff]  ;;  %1458 = vperm.xlu0 %8443, %v286_v16  }
  0xa5   : > { %v1065_v48 = vpop.f32.mrf.mxu1  ;;  %v1793_v58 = vsel %vm1773_vm8, %v1788_v32, %v1792_v33  ;;  %v1796_v0 = vor.u32 %v1794_v52, %v1792_v33  ;;  %1443 = vperm.xlu2 %8445, %v283_v15  }
  0xa6   : > { %v2310_v28 = vsel %vm1773_vm8, %v2305_v22, %v2309_v23 }
  0xa9   : > { %v9146_v57 = vpop.f32.mrf.mxu0 }
  0xad   : > { %v1067_v59 = vpop.f32.mrf.mxu1 }
  0xae   : > { %7536 = vmatmul.msk.bf16.gmra.mxu2 %vm898_vm7, %v8284_v46  ;;  %v8319_v46 = vld [vmem:[#allocation2 + $0x30] sm:$0xff] }
  0xaf   : > { %v2315_v50 = vshll.u32 %v8319_v46, 16 }
  0xb0   : > { %7556 = vmatmul.msk.bf16.gmra.mxu3 %vm898_vm7, %v8283_v13 }
  0xb1   : > { %v2317_v49 = vrot.slane %v2315_v50, 1 }
  0xb2   : > { %7716 = vmatmul.msk.bf16.vlgmr.msrb.gmra.mxu0 %vm898_vm7, %v2061_v26  ;;  %7794 = vmatmul.msk.bf16.gmra.mxu1 %vm898_vm7, %v2302_v63 }
  0xbe   : > { %7622 = vmatmul.msk.bf16.vlgmr.msrb.gmra.mxu2 %vm898_vm7, %v8285_v3  ;;  %v8287_v3 = vld [vmem:[#allocation2 + $0x20] sm:$0xff] }
  0xbf   : > { %v965_v6 = vpop.f32.mrf.mxu0  ;;  %v1070_v7 = vpop.f32.mrf.mxu1 }
  0xc0   : > { %7700 = vmatmul.msk.bf16.vlgmr.msrb.gmra.mxu3 %vm898_vm7, %v1785_v5  ;;  %v9156_v8 = vadd.f32 %v1065_v48, %v965_v6  ;;  %v2311_v48 = vshrl.u32 %v8318_v12, 16 }
  0xc1   : > { %v1000_v9 = vpop.f32.mrf.mxu2 }
  0xc2   : > { %7717 = vmatmul.msk.bf16.gmra.mxu0 %vm898_vm7, %v1785_v5  ;;  %7795 = vmatmul.msk.bf16.gmra.mxu1 %vm898_vm7, %v2310_v28  ;;  %v2313_v54 = vor.u32 %v2311_v48, %v2309_v23  ;;  %v2319_v23 = vshrl.u32 %v8319_v46, 16  ;;  %v1802_v28 = vshrl.u32 %v9181_v45, 16  ;;  %v8288_v46 = vld [vmem:[#allocation2 + $0x28] sm:$0xff] }
  0xc3   : > { %v1100_v13 = vpop.f32.mrf.mxu3 }
  0xc4   : > { %v9159_v18 = vadd.f32 %v1100_v13, %v1000_v9  ;;  %v2318_v61 = vsel %vm1773_vm8, %v2313_v54, %v2317_v49  ;;  %v316_v13 = vld [vmem:[%s12288_s6 + $0x20] sm:$0xff]  ;;  %v2321_v32 = vor.u32 %v2319_v23, %v2317_v49 }
  0xc5   : > { %3145 = vperm.xlu1 %8444, %v316_v13   ;;  %v288_v54 = vld [vmem:[%s12287_s5 + $0x40] sm:$0xff] }
  0xc7   : > { %v967_v25 = vpop.f32.mrf.mxu0  ;;  %v1072_v27 = vpop.f32.mrf.mxu1 }
  0xc8   : > { %v9165_v29 = vadd.f32 %v1067_v59, %v967_v25  ;;  %v2323_v25 = vshll.u32 %v8320_v21, 16 }
  0xc9   : > { %v1002_v31 = vpop.f32.mrf.mxu2 }
  0xca   : > { %v2325_v33 = vrot.slane %v2323_v25, 1 }
  0xcb   : > { %v1102_v35 = vpop.f32.mrf.mxu3 }
  0xcc   : > { %v9168_v37 = vadd.f32 %v1102_v35, %v1002_v31  ;;  %v1806_v31 = vshll.u32 %v8304_v20, 16  ;;  %v284_v35 = vld [vmem:[%s12287_s5 + $0x20] sm:$0xff] }
  0xcd   : > { %1448 = vperm.xlu2 %8445, %v284_v35  }
  0xce   : > { %7623 = vmatmul.msk.bf16.gmra.mxu2 %vm898_vm7, %v8286_v34  ;;  %v287_v34 = vld [vmem:[%s12287_s5 + $0x38] sm:$0xff]  ;;  %v1808_v45 = vrot.slane %v1806_v31, 1 }
  0xcf   : > { %v970_v39 = vpop.f32.mrf.mxu0  ;;  %v1075_v40 = vpop.f32.mrf.mxu1  ;;  %1463 = vperm.xlu1 %8444, %v287_v34   ;;  %v320_v34 = vld [vmem:[%s12288_s6 + $0x40] sm:$0xff] }
  0xd0   : > { %7701 = vmatmul.msk.bf16.gmra.mxu3 %vm898_vm7, %v1793_v58  ;;  %v9173_v41 = vadd.f32 %v1070_v7, %v970_v39  ;;  %v1801_v7 = vsel %vm1773_vm8, %v1796_v0, %v1800_v1  ;;  %v319_v0 = vld [vmem:[%s12288_s6 + $0x38] sm:$0xff] }
  0xd1   : > { %v1005_v44 = vpop.f32.mrf.mxu2  ;;  %3160 = vperm.xlu0 %8443, %v319_v0  }
  0xd2   : > { %7718 = vmatmul.msk.bf16.gmra.mxu0 %vm898_vm7, %v1793_v58  ;;  %7796 = vmatmul.msk.bf16.gmra.mxu1 %vm898_vm7, %v2318_v61  ;;  %v2331_v61 = vshll.u32 %v8321_v56, 16 }
  0xd3   : > { %v1105_v47 = vpop.f32.mrf.mxu3 }
  0xd4   : > { %v9184_v26 = vadd.f32 %v1105_v47, %v1005_v44  ;;  %v1804_v44 = vor.u32 %v1802_v28, %v1800_v1  ;;  %v1810_v1 = vshrl.u32 %v8304_v20, 16 }
  0xd6   : > { %v1809_v50 = vsel %vm1773_vm8, %v1804_v44, %v1808_v45 }
  0xd7   : > { %v972_v59 = vpop.f32.mrf.mxu0  ;;  %v1077_v60 = vpop.f32.mrf.mxu1  ;;  %1468 = vperm.xlu1 %8444, %v288_v54   ;;  %v318_v54 = vld [vmem:[%s12288_s6 + $0x30] sm:$0xff] }
  0xd8   : > { %v9197_v62 = vadd.f32 %v1072_v27, %v972_v59 }
  0xd9   : > { %v1007_v63 = vpop.f32.mrf.mxu2  ;;  %3165 = vperm.xlu0 %8443, %v320_v34  }
  0xdb   : > { %v1107_v5 = vpop.f32.mrf.mxu3 }
  0xdc   : > { %v9200_v6 = vadd.f32 %v1107_v5, %v1007_v63 }
  0xde   : > { %7624 = vmatmul.msk.bf16.gmra.mxu2 %vm898_vm7, %v8287_v3  ;;  %v1814_v3 = vshll.u32 %v8305_v55, 16 }
  0xdf   : > { %v975_v9 = vpop.f32.mrf.mxu0  ;;  %v1080_v10 = vpop.f32.mrf.mxu1 }
  0xe0   : > { %7702 = vmatmul.msk.bf16.gmra.mxu3 %vm898_vm7, %v1801_v7  ;;  %v9205_v12 = vadd.f32 %v1075_v40, %v975_v9  ;;  %v2326_v40 = vsel %vm1773_vm8, %v2321_v32, %v2325_v33 }
  0xe1   : > { %v1010_v19 = vpop.f32.mrf.mxu2 }
  0xe2   : > { %7719 = vmatmul.msk.bf16.gmra.mxu0 %vm898_vm7, %v1801_v7  ;;  %7797 = vmatmul.msk.bf16.gmra.mxu1 %vm898_vm7, %v2326_v40  ;;  %v2333_v7 = vrot.slane %v2331_v61, 1 }
  0xe3   : > { %v1110_v22 = vpop.f32.mrf.mxu3 }
  0xe4   : > { %v9217_v27 = vadd.f32 %v1110_v22, %v1010_v19  ;;  %v1812_v19 = vor.u32 %v1810_v1, %v1808_v45  ;;  %v8289_v22 = vld [vmem:[#allocation2 + $0x30] sm:$0xff] }
  0xe7   : > { %v977_v58 = vpop.f32.mrf.mxu0  ;;  %v1082_v39 = vpop.f32.mrf.mxu1 }
  0xe8   : > { %v9227_v42 = vadd.f32 %v1077_v60, %v977_v58  ;;  %v2327_v60 = vshrl.u32 %v8320_v21, 16  ;;  %v1816_v21 = vrot.slane %v1814_v3, 1  ;;  %v8306_v58 = vld [vmem:[#allocation2 + $0x38] sm:$0xff] }
  0xe9   : > { %v1012_v43 = vpop.f32.mrf.mxu2  ;;  %v8290_v3 = vld [vmem:[#allocation2 + $0x38] sm:$0xff] }
  0xea   : > { %v2329_v5 = vor.u32 %v2327_v60, %v2325_v33  ;;  %v1817_v20 = vsel %vm1773_vm8, %v1812_v19, %v1816_v21  ;;  %v317_v33 = vld [vmem:[%s12288_s6 + $0x28] sm:$0xff] }
  0xeb   : > { %v1112_v47 = vpop.f32.mrf.mxu3  ;;  %3150 = vperm.xlu2 %8445, %v317_v33   ;;  %v289_v19 = vld [vmem:[%s12287_s5 + $0x48] sm:$0xff] }
  0xec   : > { %v9230_v48 = vadd.f32 %v1112_v47, %v1012_v43  ;;  %v2334_v13 = vsel %vm1773_vm8, %v2329_v5, %v2333_v7  ;;  %v2335_v43 = vshrl.u32 %v8321_v56, 16  ;;  %v1818_v47 = vshrl.u32 %v8305_v55, 16 }
  0xee   : > { %7625 = vmatmul.msk.bf16.gmra.mxu2 %vm898_vm7, %v8288_v46  ;;  %v321_v46 = vld [vmem:[%s12288_s6 + $0x48] sm:$0xff]  ;;  %v1820_v61 = vor.u32 %v1818_v47, %v1816_v21  ;;  %v292_v21 = vld [vmem:[%s12287_s5 + $0x60] sm:$0xff] }
  0xef   : > { %v980_v51 = vpop.f32.mrf.mxu0  ;;  %v1085_v52 = vpop.f32.mrf.mxu1  ;;  %3170 = vperm.xlu1 %8444, %v321_v46   ;;  %v293_v47 = vld [vmem:[%s12287_s5 + $0x68] sm:$0xff] }
  0xf0   : > { %7703 = vmatmul.msk.bf16.gmra.mxu3 %vm898_vm7, %v1809_v50  ;;  %v9235_v53 = vadd.f32 %v1080_v10, %v980_v51  ;;  %v2337_v51 = vor.u32 %v2335_v43, %v2333_v7 }
  0xf1   : > { %v1015_v49 = vpop.f32.mrf.mxu2 }
  0xf2   : > { %7720 = vmatmul.msk.bf16.gmra.mxu0 %vm898_vm7, %v1809_v50  ;;  %7798 = vmatmul.msk.bf16.gmra.mxu1 %vm898_vm7, %v2334_v13  ;;  %v1822_v50 = vshll.u32 %v8306_v58, 16 }
  0xf3   : > { %v1115_v59 = vpop.f32.mrf.mxu3  ;;  %3155 = vperm.xlu2 %8445, %v318_v54  }
  0xf4   : > { %v9241_v63 = vadd.f32 %v1115_v59, %v1015_v49  ;;  %v291_v49 = vld [vmem:[%s12287_s5 + $0x58] sm:$0xff]  ;;  %v1824_v0 = vrot.slane %v1822_v50, 1  ;;  %v290_v50 = vld [vmem:[%s12287_s5 + $0x50] sm:$0xff] }
  0xf5   : > { %1483 = vperm.xlu0 %8443, %v291_v49  }
  0xf7   : > { %v982_v9 = vpop.f32.mrf.mxu0  ;;  %v1087_v10 = vpop.f32.mrf.mxu1 }
  0xf8   : > { %v9247_v15 = vadd.f32 %v1082_v39, %v982_v9  ;;  %v8322_v39 = vld [vmem:[#allocation2 + $0x48] sm:$0xff]  ;;  %v1825_v9 = vsel %vm1773_vm8, %v1820_v61, %v1824_v0 }
  0xf9   : > { %v1017_v16 = vpop.f32.mrf.mxu2  ;;  %v2339_v44 = vshll.u32 %v8322_v39, 16  ;;  %v2343_v33 = vshrl.u32 %v8322_v39, 16 }
  0xfb   : > { %v1117_v23 = vpop.f32.mrf.mxu3  ;;  %1473 = vperm.xlu2 %8445, %v289_v19  }
  0xfc   : > { %v9250_v25 = vadd.f32 %v1117_v23, %v1017_v16  ;;  %v322_v16 = vld [vmem:[%s12288_s6 + $0x50] sm:$0xff]  ;;  %v8307_v23 = vld [vmem:[#allocation2 + $0x40] sm:$0xff] }
  0xfd   : > { %3175 = vperm.xlu1 %8444, %v322_v16   ;;  %1488 = vperm.xlu0 %8443, %v292_v21   ;;  %v1830_v43 = vshll.u32 %v8307_v23, 16  ;;  %v8324_v16 = vld [vmem:[#allocation2 + $0x58] sm:$0xff] }
  0xfe   : > { %7626 = vmatmul.msk.bf16.gmra.mxu2 %vm898_vm7, %v8289_v22 }
  0xff   : > { %v985_v28 = vpop.f32.mrf.mxu0  ;;  %v1090_v31 = vpop.f32.mrf.mxu1 }
 0x100   : > { %7704 = vmatmul.msk.bf16.gmra.mxu3 %vm898_vm7, %v1817_v20  ;;  %v9255_v32 = vadd.f32 %v1085_v52, %v985_v28  ;;  %v2341_v52 = vrot.slane %v2339_v44, 1 }
 0x101   : > { %v1020_v35 = vpop.f32.mrf.mxu2 }
 0x102   : > { %7721 = vmatmul.msk.bf16.gmra.mxu0 %vm898_vm7, %v1817_v20  ;;  %v2342_v59 = vsel %vm1773_vm8, %v2337_v51, %v2341_v52  ;;  %v8323_v20 = vld [vmem:[#allocation2 + $0x50] sm:$0xff]  ;;  %v2345_v44 = vor.u32 %v2343_v33, %v2341_v52  ;;  %v8291_v52 = vld [vmem:[#allocation2 + $0x40] sm:$0xff]  ;;  %v1834_v33 = vshrl.u32 %v8307_v23, 16  ;;  %v8292_v23 = vld [vmem:[#allocation2 + $0x48] sm:$0xff] }
 0x103   : > { %v1120_v40 = vpop.f32.mrf.mxu3  ;;  %7799 = vmatmul.msk.bf16.gmra.mxu1 %vm898_vm7, %v2342_v59  ;;  %v2347_v34 = vshll.u32 %v8323_v20, 16  ;;  %1478 = vperm.xlu2 %8445, %v290_v50   ;;  %v2351_v21 = vshrl.u32 %v8323_v20, 16  ;;  %v325_v20 = vld [vmem:[%s12288_s6 + $0x68] sm:$0xff] }
 0x104   : > { %v9264_v45 = vadd.f32 %v1120_v40, %v1020_v35  ;;  %v1826_v40 = vshrl.u32 %v8306_v58, 16 }
 0x105   : > { %v2349_v46 = vrot.slane %v2347_v34, 1  ;;  %1493 = vperm.xlu1 %8444, %v293_v47   ;;  %3190 = vperm.xlu0 %8443, %v325_v20  }
 0x106   : > { %v1828_v58 = vor.u32 %v1826_v40, %v1824_v0  ;;  %v294_v0 = vld [vmem:[%s12287_s5 + $0x70] sm:$0xff] }
 0x107   : > { %v987_v56 = vpop.f32.mrf.mxu0  ;;  %v1092_v1 = vpop.f32.mrf.mxu1  ;;  %v2350_v54 = vsel %vm1773_vm8, %v2345_v44, %v2349_v46 }
 0x108   : > { %v9276_v60 = vadd.f32 %v1087_v10, %v987_v56  ;;  %v1832_v56 = vrot.slane %v1830_v43, 1 }
 0x109   : > { %v1022_v55 = vpop.f32.mrf.mxu2 }
 0x10a   : > { %v1833_v61 = vsel %vm1773_vm8, %v1828_v58, %v1832_v56 }
 0x10b   : > { %v1122_v5 = vpop.f32.mrf.mxu3 }
 0x10c   : > { %v9279_v7 = vadd.f32 %v1122_v5, %v1022_v55 }
 0x10d   : > { %1498 = vperm.xlu1 %8444, %v294_v0   ;;  %v9343_v0 = vld [vmem:[#allocation2 + $0x50] sm:$0xff] }
 0x10e   : > { %7627 = vmatmul.msk.bf16.gmra.mxu2 %vm898_vm7, %v8290_v3  ;;  %v1850_v4 = vshrl.u32 %v9343_v0, 16 }
 0x10f   : > { %v990_v13 = vpop.f32.mrf.mxu0 }
 0x110   : > { %7705 = vmatmul.msk.bf16.gmra.mxu3 %vm898_vm7, %v1825_v9  ;;  %v9284_v10 = vadd.f32 %v1090_v31, %v990_v13  ;;  %v1095_v31 = vpop.f32.mrf.mxu1  ;;  %v8308_v13 = vld [vmem:[#allocation2 + $0x48] sm:$0xff] }
 0x111   : > { %v1025_v22 = vpop.f32.mrf.mxu2  ;;  %v1838_v34 = vshll.u32 %v8308_v13, 16 }
 0x112   : > { %7722 = vmatmul.msk.bf16.gmra.mxu0 %vm898_vm7, %v1825_v9 }
 0x113   : > { %v1125_v28 = vpop.f32.mrf.mxu3  ;;  %7800 = vmatmul.msk.bf16.gmra.mxu1 %vm898_vm7, %v2350_v54  ;;  %v1836_v54 = vor.u32 %v1834_v33, %v1832_v56  ;;  %v326_v56 = vld [vmem:[%s12288_s6 + $0x70] sm:$0xff] }
 0x114   : > { %v9296_v35 = vadd.f32 %v1125_v28, %v1025_v22  ;;  %v2355_v22 = vshll.u32 %v8324_v16, 16  ;;  %3195 = vperm.xlu0 %8443, %v326_v56  }
 0x116   : > { %v2357_v43 = vrot.slane %v2355_v22, 1 }
 0x117   : > { %v992_v51 = vpop.f32.mrf.mxu0 }
 0x118   : > { %v9305_v49 = vadd.f32 %v1092_v1, %v992_v51  ;;  %v1097_v3 = vpop.f32.mrf.mxu1 }
 0x119   : > { %v1027_v39 = vpop.f32.mrf.mxu2 }
 0x11b   : > { %v1127_v59 = vpop.f32.mrf.mxu3 }
 0x11c   : > { %v9308_v55 = vadd.f32 %v1127_v59, %v1027_v39  ;;  %v1840_v39 = vrot.slane %v1838_v34, 1  ;;  %v1842_v34 = vshrl.u32 %v8308_v13, 16  ;;  %v297_v13 = vld [vmem:[%s12287_s5 + $0x88] sm:$0xff] }
 0x11d   : > { %1513 = vperm.xlu0 %8443, %v297_v13  }
 0x11e   : > { %7628 = vmatmul.msk.bf16.gmra.mxu2 %vm898_vm7, %v8291_v52 }
 0x11f   : > { %v995_v5 = vpop.f32.mrf.mxu0 }
 0x120   : > { %7706 = vmatmul.msk.bf16.gmra.mxu3 %vm898_vm7, %v1833_v61  ;;  %v9313_v1 = vadd.f32 %v1095_v31, %v995_v5  ;;  %v9321_v40 = vpop.f32.mrf.mxu1  ;;  %v2353_v31 = vor.u32 %v2351_v21, %v2349_v46  ;;  %v1841_v46 = vsel %vm1773_vm8, %v1836_v54, %v1840_v39  ;;  %v2359_v21 = vshrl.u32 %v8324_v16, 16  ;;  %v324_v16 = vld [vmem:[%s12288_s6 + $0x60] sm:$0xff] }
 0x121   : > { %v1030_v9 = vpop.f32.mrf.mxu2 }
 0x122   : > { %7723 = vmatmul.msk.bf16.gmra.mxu0 %vm898_vm7, %v1833_v61  ;;  %v2358_v47 = vsel %vm1773_vm8, %v2353_v31, %v2357_v43  ;;  %v1846_v31 = vshll.u32 %v9343_v0, 16  ;;  %v296_v0 = vld [vmem:[%s12287_s5 + $0x80] sm:$0xff] }
 0x123   : > { %v1130_v19 = vpop.f32.mrf.mxu3  ;;  %7801 = vmatmul.msk.bf16.gmra.mxu1 %vm898_vm7, %v2358_v47  ;;  %v2361_v47 = vor.u32 %v2359_v21, %v2357_v43  ;;  %v1844_v43 = vor.u32 %v1842_v34, %v1840_v39  ;;  %v328_v39 = vld [vmem:[%s12288_s6 + $0x80] sm:$0xff]  ;;  %v295_v34 = vld [vmem:[%s12287_s5 + $0x78] sm:$0xff] }
 0x124   : > { %v9319_v28 = vadd.f32 %v1130_v19, %v1030_v9  ;;  %v8325_v9 = vld [vmem:[#allocation2 + $0x60] sm:$0xff] }
 0x125   : > { %v2363_v22 = vshll.u32 %v8325_v9, 16 }
 0x127   : > { %v997_v44 = vpop.f32.mrf.mxu0  ;;  %v2365_v20 = vrot.slane %v2363_v22, 1  ;;  %v9368_v22 = vpop.permute.xlu0 %1428 }
 0x128   : > { %v9324_v50 = vadd.f32 %v1097_v3, %v997_v44  ;;  %v9333_v59 = vpop.f32.mrf.mxu1  ;;  %v323_v3 = vld [vmem:[%s12288_s6 + $0x58] sm:$0xff]  ;;  %12381 = vst [vmem:[#allocation6_spill] sm:$0xff] %v9368_v22 }
 0x129   : > { %v1032_v51 = vpop.f32.mrf.mxu2  ;;  %3180 = vperm.xlu2 %8445, %v323_v3   ;;  %v2366_v54 = vsel %vm1773_vm8, %v2361_v47, %v2365_v20  ;;  %v8293_v3 = vld [vmem:[#allocation2 + $0x50] sm:$0xff] }
 0x12b   : > { %v1132_v58 = vpop.f32.mrf.mxu3 }
 0x12c   : > { %v9330_v52 = vadd.f32 %v1132_v58, %v1032_v51 }
 0x12e   : > { %7629 = vmatmul.msk.bf16.gmra.mxu2 %vm898_vm7, %v8292_v23  ;;  %v327_v23 = vld [vmem:[%s12288_s6 + $0x78] sm:$0xff] }
 0x12f   : > { %v2085_v61 = vpop.f32.mrf.mxu0  ;;  %3200 = vperm.xlu1 %8444, %v327_v23   ;;  %v9380_v23 = vld [vmem:[#allocation2 + $0x58] sm:$0xff] }
 0x130   : > { %7707 = vmatmul.msk.bf16.gmra.mxu3 %vm898_vm7, %v1841_v46  ;;  %v9349_v44 = vpop.f32.mrf.mxu1  ;;  %v1854_v11 = vshll.u32 %v9380_v23, 16 }
 0x131   : > { %v1035_v5 = vpop.f32.mrf.mxu2  ;;  %3185 = vperm.xlu2 %8445, %v324_v16   ;;  %v8326_v16 = vld [vmem:[#allocation2 + $0x68] sm:$0xff] }
 0x132   : > { %7724 = vmatmul.msk.bf16.gmra.mxu0 %vm898_vm7, %v1841_v46  ;;  %v1848_v46 = vrot.slane %v1846_v31, 1  ;;  %v298_v31 = vld [vmem:[%s12287_s5 + $0x90] sm:$0xff] }
 0x133   : > { %v1135_v19 = vpop.f32.mrf.mxu3  ;;  %7802 = vmatmul.msk.bf16.gmra.mxu1 %vm898_vm7, %v2366_v54  ;;  %1518 = vperm.xlu0 %8443, %v298_v31  }
 0x134   : > { %v9346_v33 = vadd.f32 %v1135_v19, %v1035_v5  ;;  %v1849_v19 = vsel %vm1773_vm8, %v1844_v43, %v1848_v46  ;;  %v2367_v43 = vshrl.u32 %v8325_v9, 16  ;;  %v1063_v9 = vadd.f32 %v9124_v36, %v9146_v57 }
 0x137   : > { %v2087_v51 = vpop.f32.mrf.mxu0  ;;  %3205 = vperm.xlu1 %8444, %v328_v39   ;;  %v2369_v39 = vor.u32 %v2367_v43, %v2365_v20 }
 0x138   : > { %v9365_v21 = vpop.f32.mrf.mxu1 }
 0x139   : > { %v1037_v58 = vpop.f32.mrf.mxu2  ;;  %1503 = vperm.xlu2 %8445, %v295_v34  }
 0x13b   : > { %v1137_v56 = vpop.f32.mrf.mxu3 }
 0x13c   : > { %v9362_v5 = vadd.f32 %v1137_v56, %v1037_v58 }
 0x13e   : > { %12380 = vst [vmem:[#allocation5_spill] sm:$0xff] %v9362_v5  ;;  %7630 = vmatmul.msk.bf16.gmra.mxu2 %vm898_vm7, %v8293_v3  ;;  %v2371_v3 = vshll.u32 %v8326_v16, 16 }
 0x13f   : > { %v2090_v47 = vpop.f32.mrf.mxu0 }
 0x140   : > { %7708 = vmatmul.msk.bf16.gmra.mxu3 %vm898_vm7, %v1849_v19  ;;  %v9387_v14 = vpop.f32.mrf.mxu1  ;;  %v2373_v34 = vrot.slane %v2371_v3, 1  ;;  %v9406_v3 = vpop.permute.xlu2 %1438 }
 0x141   : > { %v1314_v54 = vpop.f32.mrf.mxu2  ;;  %1508 = vperm.xlu2 %8445, %v296_v0   ;;  %12383 = vst [vmem:[#allocation8_spill] sm:$0xff] %v9406_v3 }
 0x142   : > { %v1394_v13 = vadd.f32 %v1314_v54, %v9119_v30  ;;  %7725 = vmatmul.msk.bf16.gmra.mxu0 %vm898_vm7, %v1849_v19  ;;  %v2374_v19 = vsel %vm1773_vm8, %v2369_v39, %v2373_v34  ;;  %v1852_v54 = vor.u32 %v1850_v4, %v1848_v46  ;;  %v9412_v4 = vpop.permute.xlu1 %3125 }
 0x143   : > { %v1966_v58 = vpop.f32.mrf.mxu3  ;;  %7803 = vmatmul.msk.bf16.gmra.mxu1 %vm898_vm7, %v2374_v19  ;;  %12384 = vst [vmem:[#allocation9_spill] sm:$0xff] %v9412_v4 }
 0x144   : > { %v2086_v56 = vadd.f32 %v2085_v61, %v1966_v58  ;;  %v1586_v24 = vmul.f32 %v9368_v22, %v1394_v13  ;;  %v299_v61 = vld [vmem:[%s12287_s5 + $0x98] sm:$0xff]  ;;  %v1856_v13 = vrot.slane %v1854_v11, 1 }
 0x145   : > { %1523 = vperm.xlu1 %8444, %v299_v61   ;;  %v8327_v61 = vld [vmem:[#allocation2 + $0x70] sm:$0xff] }
 0x146   : > { %v2555_v5 = vadd.f32 %v9321_v40, %v2086_v56  ;;  %v9402_v40 = vpop.permute.xlu0 %1433  ;;  %v1857_v43 = vsel %vm1773_vm8, %v1852_v54, %v1856_v13  ;;  %v2379_v54 = vshll.u32 %v8327_v61, 16 }
 0x147   : > { %v2092_v30 = vpop.f32.mrf.mxu0  ;;  %12382 = vst [vmem:[#allocation7_spill] sm:$0xff] %v9402_v40 }
 0x148   : > { %v9393_v31 = vadd.f32 %v2555_v5, %v1586_v24  ;;  %v8294_v24 = vld [vmem:[#allocation2 + $0x58] sm:$0xff]  ;;  %v9408_v56 = vpop.f32.mrf.mxu1  ;;  %v9430_v22 = vpop.permute.xlu2 %1443 }
 0x149   : > { %v1316_v20 = vpop.f32.mrf.mxu2  ;;  %12385 = vst [vmem:[#allocation10_spill] sm:$0xff] %v9430_v22 }
 0x14a   : > { %v1395_v36 = vadd.f32 %v1316_v20, %v1063_v9  ;;  %v9420_v9 = vld [vmem:[#allocation2 + $0x60] sm:$0xff]  ;;  %v2375_v20 = vshrl.u32 %v8326_v16, 16 }
 0x14b   : > { %v1968_v57 = vpop.f32.mrf.mxu3 }
 0x14c   : > { %v2088_v5 = vadd.f32 %v2087_v51, %v1968_v57  ;;  %v1587_v58 = vmul.f32 %v9402_v40, %v1395_v36  ;;  %v300_v51 = vld [vmem:[%s12287_s5 + $0xa0] sm:$0xff]  ;;  %v1858_v57 = vshrl.u32 %v9380_v23, 16  ;;  %v2381_v40 = vrot.slane %v2379_v54, 1 }
 0x14d   : > { %1528 = vperm.xlu1 %8444, %v300_v51  }
 0x14e   : > { %v2556_v39 = vadd.f32 %v9333_v59, %v2088_v5  ;;  %7631 = vmatmul.msk.bf16.gmra.mxu2 %vm898_vm7, %v8294_v24  ;;  %v1862_v5 = vshll.u32 %v9420_v9, 16 }
 0x14f   : > { %v2095_v11 = vpop.f32.mrf.mxu0 }
 0x150   : > { %v9414_v46 = vadd.f32 %v2556_v39, %v1587_v58  ;;  %7709 = vmatmul.msk.bf16.gmra.mxu3 %vm898_vm7, %v1857_v43  ;;  %v9427_v58 = vpop.f32.mrf.mxu1  ;;  %v2377_v39 = vor.u32 %v2375_v20, %v2373_v34  ;;  %v1864_v34 = vrot.slane %v1862_v5, 1 }
 0x151   : > { %v1319_v19 = vpop.f32.mrf.mxu2 }
 0x152   : > { %v1396_v59 = vadd.f32 %v1319_v19, %v9156_v8  ;;  %7726 = vmatmul.msk.bf16.gmra.mxu0 %vm898_vm7, %v1857_v43  ;;  %v2382_v16 = vsel %vm1773_vm8, %v2377_v39, %v2381_v40  ;;  %v1860_v19 = vor.u32 %v1858_v57, %v1856_v13  ;;  %v9446_v39 = vpop.permute.xlu0 %3135 }
 0x153   : > { %v1971_v0 = vpop.f32.mrf.mxu3  ;;  %7804 = vmatmul.msk.bf16.gmra.mxu1 %vm898_vm7, %v2382_v16  ;;  %12387 = vst [vmem:[#allocation12_spill] sm:$0xff] %v9446_v39 }
 0x154   : > { %v2091_v36 = vadd.f32 %v2090_v47, %v1971_v0  ;;  %v1588_v24 = vmul.f32 %v9406_v3, %v1396_v59  ;;  %v331_v47 = vld [vmem:[%s12288_s6 + $0x98] sm:$0xff]  ;;  %v9441_v59 = vpop.permute.xlu1 %3130  ;;  %v8295_v0 = vld [vmem:[#allocation2 + $0x60] sm:$0xff] }
 0x155   : > { %12386 = vst [vmem:[#allocation11_spill] sm:$0xff] %v9441_v59  ;;  %3220 = vperm.xlu0 %8443, %v331_v47   ;;  %v9463_v47 = vpop.permute.xlu2 %1448 }
 0x156   : > { %v2557_v51 = vadd.f32 %v9349_v44, %v2091_v36  ;;  %12389 = vst [vmem:[#allocation14_spill] sm:$0xff] %v9463_v47 }
 0x157   : > { %v9432_v8 = vpop.f32.mrf.mxu0 }
 0x158   : > { %v9435_v43 = vadd.f32 %v2557_v51, %v1588_v24  ;;  %v1865_v24 = vsel %vm1773_vm8, %v1860_v19, %v1864_v34  ;;  %v9448_v51 = vpop.f32.mrf.mxu1 }
 0x159   : > { %v1321_v23 = vpop.f32.mrf.mxu2 }
 0x15a   : > { %v1397_v44 = vadd.f32 %v1321_v23, %v9165_v29  ;;  %v329_v29 = vld [vmem:[%s12288_s6 + $0x88] sm:$0xff]  ;;  %v9467_v23 = vld [vmem:[#allocation2 + $0x78] sm:$0xff] }
 0x15b   : > { %v1973_v20 = vpop.f32.mrf.mxu3  ;;  %3210 = vperm.xlu2 %8445, %v329_v29  }
 0x15c   : > { %v2093_v54 = vadd.f32 %v2092_v30, %v1973_v20  ;;  %v1589_v36 = vmul.f32 %v9430_v22, %v1397_v44  ;;  %v332_v30 = vld [vmem:[%s12288_s6 + $0xa0] sm:$0xff]  ;;  %v2383_v20 = vshrl.u32 %v8327_v61, 16  ;;  %v1866_v22 = vshrl.u32 %v9420_v9, 16 }
 0x15d   : > { %3225 = vperm.xlu0 %8443, %v332_v30  }
 0x15e   : > { %v2558_v16 = vadd.f32 %v9365_v21, %v2093_v54  ;;  %7632 = vmatmul.msk.bf16.gmra.mxu2 %vm898_vm7, %v8295_v0  ;;  %v9465_v21 = vld [vmem:[#allocation2 + $0x68] sm:$0xff]  ;;  %v9471_v0 = vpop.permute.xlu1 %3140  ;;  %v2387_v54 = vshll.u32 %v9467_v23, 16  ;;  %v2385_v3 = vor.u32 %v2383_v20, %v2381_v40  ;;  %v303_v20 = vld [vmem:[%s12287_s5 + $0xb8] sm:$0xff] }
 0x15f   : > { %v9452_v13 = vpop.f32.mrf.mxu0  ;;  %12390 = vst [vmem:[#allocation15_spill] sm:$0xff] %v9471_v0  ;;  %v1870_v29 = vshll.u32 %v9465_v21, 16  ;;  %v333_v40 = vld [vmem:[%s12288_s6 + $0xa8] sm:$0xff] }
 0x160   : > { %v9454_v57 = vadd.f32 %v2558_v16, %v1589_v36  ;;  %7710 = vmatmul.msk.bf16.gmra.mxu3 %vm898_vm7, %v1865_v24  ;;  %v9477_v30 = vpop.f32.mrf.mxu1  ;;  %3230 = vperm.xlu1 %8444, %v333_v40  }
 0x161   : > { %v1324_v5 = vpop.f32.mrf.mxu2 }
 0x162   : > { %12388 = vst [vmem:[#allocation13_spill] sm:$0xff] %v9454_v57  ;;  %v1398_v19 = vadd.f32 %v1324_v5, %v9173_v41  ;;  %7727 = vmatmul.msk.bf16.gmra.mxu0 %vm898_vm7, %v1865_v24  ;;  %v2389_v57 = vrot.slane %v2387_v54, 1  ;;  %v9480_v24 = vpop.permute.xlu0 %1453 }
 0x163   : > { %v1976_v44 = vpop.f32.mrf.mxu3  ;;  %12391 = vst [vmem:[#allocation16_spill] sm:$0xff] %v9480_v24 }
 0x164   : > { %v2096_v36 = vadd.f32 %v2095_v11, %v1976_v44  ;;  %v1590_v16 = vmul.f32 %v9463_v47, %v1398_v19  ;;  %v2390_v61 = vsel %vm1773_vm8, %v2385_v3, %v2389_v57  ;;  %v7860_v11 = vld [vmem:[%s12285_s3 + $0x6] sm:$0x3]  ;;  %v1868_v19 = vor.u32 %v1866_v22, %v1864_v34 }
 0x165   : > { %7805 = vmatmul.msk.bf16.gmra.mxu1 %vm898_vm7, %v2390_v61  ;;  %v1872_v44 = vrot.slane %v1870_v29, 1  ;;  %v4577_v3 = vsel %vm947_vm0, %v7860_v11, 0  ;;  %1543 = vperm.xlu0 %8443, %v303_v20   ;;  %v9529_v20 = vld [vmem:[#allocation2 + $0x80] sm:$0xff] }
 0x166   : > { %v2559_v41 = vadd.f32 %v9387_v14, %v2096_v36  ;;  %v330_v14 = vld [vmem:[%s12288_s6 + $0x90] sm:$0xff]  ;;  %v8296_v36 = vld [vmem:[#allocation2 + $0x68] sm:$0xff]  ;;  %4586 = vmatpush.bf16.msra.mxu1 %v4577_v3  ;;  %v9505_v34 = vpop.permute.xlu1 %3145 }
 0x167   : > { %v9482_v5 = vpop.f32.mrf.mxu0  ;;  %3215 = vperm.xlu2 %8445, %v330_v14   ;;  %v1873_v22 = vsel %vm1773_vm8, %v1868_v19, %v1872_v44  ;;  %12392 = vst [vmem:[#allocation17_spill] sm:$0xff] %v9505_v34  ;;  %v301_v14 = vld [vmem:[%s12287_s5 + $0xa8] sm:$0xff]  ;;  %v9527_v3 = vld [vmem:[#allocation2 + $0x70] sm:$0xff] }
 0x168   : > { %v9485_v0 = vadd.f32 %v2559_v41, %v1590_v16  ;;  %v9507_v29 = vpop.f32.mrf.mxu1 }
 0x169   : > { %v1326_v9 = vpop.f32.mrf.mxu2 }
 0x16a   : > { %v1399_v54 = vadd.f32 %v1326_v9, %v9197_v62  ;;  %v9525_v19 = vpop.permute.xlu0 %1458 }
 0x16b   : > { %v1978_v16 = vpop.f32.mrf.mxu3  ;;  %12394 = vst [vmem:[#allocation19_spill] sm:$0xff] %v9525_v19 }
 0x16c   : > { %v2098_v41 = vadd.f32 %v9432_v8, %v1978_v16  ;;  %v1591_v61 = vmul.f32 %v9480_v24, %v1399_v54  ;;  %v334_v8 = vld [vmem:[%s12288_s6 + $0xb0] sm:$0xff]  ;;  %v9533_v16 = vpop.permute.xlu2 %3150 }
 0x16d   : > { %3235 = vperm.xlu1 %8444, %v334_v8   ;;  %12395 = vst [vmem:[#allocation20_spill] sm:$0xff] %v9533_v16  ;;  %v1874_v8 = vshrl.u32 %v9465_v21, 16  ;;  %v12401_v21 = vmov 0  }
 0x16e   : > { %v2560_v11 = vadd.f32 %v9408_v56, %v2098_v41  ;;  %7633 = vmatmul.msk.bf16.gmra.mxu2 %vm898_vm7, %v8296_v36  ;;  %v304_v56 = vld [vmem:[%s12287_s5 + $0xc0] sm:$0xff]  ;;  %v2391_v41 = vshrl.u32 %v9467_v23, 16  ;;  %414 = vst.msk [vmem:[#allocation2 + $0x90] sm:$0x1] %vm413_vm9, %v12401_v21 }
 0x16f   : > { %v9511_v40 = vpop.f32.mrf.mxu0  ;;  %1533 = vperm.xlu2 %8445, %v301_v14   ;;  %1548 = vperm.xlu0 %8443, %v304_v56   ;;  %v1878_v14 = vshll.u32 %v9527_v3, 16  ;;  %v704_v56 = vrot.slane %v9091_v2, 4  ;;  %v302_v2 = vld [vmem:[%s12287_s5 + $0xb0] sm:$0xff] }
 0x170   : > { %v9513_v62 = vadd.f32 %v2560_v11, %v1591_v61  ;;  %7711 = vmatmul.msk.bf16.gmra.mxu3 %vm898_vm7, %v1873_v22  ;;  %v2395_v61 = vshll.u32 %v9529_v20, 16  ;;  %v9541_v47 = vpop.f32.mrf.mxu1 }
 0x171   : > { %v1329_v9 = vpop.f32.mrf.mxu2 }
 0x172   : > { %12393 = vst [vmem:[#allocation18_spill] sm:$0xff] %v9513_v62  ;;  %v1400_v54 = vadd.f32 %v1329_v9, %v9205_v12  ;;  %7728 = vmatmul.msk.bf16.gmra.mxu0 %vm898_vm7, %v1873_v22  ;;  %v2393_v12 = vor.u32 %v2391_v41, %v2389_v57  ;;  %v2397_v22 = vrot.slane %v2395_v61, 1  ;;  %v9545_v62 = vpop.permute.xlu1 %1463  ;;  %v305_v57 = vld [vmem:[%s12287_s5 + $0xc8] sm:$0xff]  ;;  %v1880_v41 = vrot.slane %v1878_v14, 1 }
 0x173   : > { %v1981_v36 = vpop.f32.mrf.mxu3  ;;  %12396 = vst [vmem:[#allocation21_spill] sm:$0xff] %v9545_v62  ;;  %v777_v61 = vld [vmem:[#allocation2 + $0x88] sm:$0x1] }
 0x174   : > { %v2101_v11 = vadd.f32 %v9452_v13, %v1981_v36  ;;  %v1592_v24 = vmul.f32 %v9525_v19, %v1400_v54  ;;  %v2398_v13 = vsel %vm1773_vm8, %v2393_v12, %v2397_v22  ;;  %v8297_v12 = vld [vmem:[#allocation2 + $0x70] sm:$0xff]  ;;  %v9571_v16 = vpop.permute.xlu2 %3155 }
 0x175   : > { %7806 = vmatmul.msk.bf16.gmra.mxu1 %vm898_vm7, %v2398_v13  ;;  %1553 = vperm.xlu1 %8444, %v305_v57   ;;  %12402 = vst [vmem:[#allocation24_spill] sm:$0xff] %v9571_v16 }
 0x176   : > { %v2561_v9 = vadd.f32 %v9427_v58, %v2101_v11  ;;  %v12398_v58 = vmov 0 }
 0x177   : > { %v9547_v23 = vpop.f32.mrf.mxu0  ;;  %v12399_v58 = vsel %vm9560_vm10, 4294967295, %v12398_v58  ;;  %1538 = vperm.xlu2 %8445, %v302_v2   ;;  %v9587_v2 = vld [vmem:[#allocation2 + $0x78] sm:$0xff] }
 0x178   : > { %v9550_v54 = vadd.f32 %v2561_v9, %v1592_v24  ;;  %12400 = vst [vmem:[#allocation23_spill] sm:$0xff] %v12399_v58  ;;  %v1876_v24 = vor.u32 %v1874_v8, %v1872_v44  ;;  %v778_v9 = vsel %vm9560_vm10, %v704_v56, %v777_v61  ;;  %v9573_v44 = vpop.f32.mrf.mxu1 }
 0x179   : > { %v1331_v36 = vpop.f32.mrf.mxu2  ;;  %779 = vst [vmem:[#allocation2 + $0x88] sm:$0x1] %v778_v9  ;;  %v1882_v9 = vshrl.u32 %v9527_v3, 16  ;;  %v337_v3 = vld [vmem:[%s12288_s6 + $0xc8] sm:$0xff] }
 0x17a   : > { %12397 = vst [vmem:[#allocation22_spill] sm:$0xff] %v9550_v54  ;;  %v1401_v11 = vadd.f32 %v1331_v36, %v9227_v42  ;;  %v1881_v21 = vsel %vm1773_vm8, %v1876_v24, %v1880_v41  ;;  %v9585_v57 = vpop.permute.xlu1 %1468  ;;  %v2399_v24 = vshrl.u32 %v9529_v20, 16  ;;  %3250 = vperm.xlu0 %8443, %v337_v3  }
 0x17b   : > { %v1983_v13 = vpop.f32.mrf.mxu3  ;;  %12403 = vst [vmem:[#allocation25_spill] sm:$0xff] %v9585_v57 }
 0x17c   : > { %v2103_v19 = vadd.f32 %v9482_v5, %v1983_v13  ;;  %v1593_v54 = vmul.f32 %v9545_v62, %v1401_v11  ;;  %v306_v5 = vld [vmem:[%s12287_s5 + $0xd0] sm:$0xff]  ;;  %v1886_v13 = vshll.u32 %v9587_v2, 16 }
 0x17d   : > { %1558 = vperm.xlu1 %8444, %v306_v5  }
 0x17e   : > { %v2562_v8 = vadd.f32 %v9448_v51, %v2103_v19  ;;  %7634 = vmatmul.msk.bf16.gmra.mxu2 %vm898_vm7, %v8297_v12 }
 0x17f   : > { %v9577_v42 = vpop.f32.mrf.mxu0 }
 0x180   : > { %v9579_v14 = vadd.f32 %v2562_v8, %v1593_v54  ;;  %7712 = vmatmul.msk.bf16.gmra.mxu3 %vm898_vm7, %v1881_v21  ;;  %v8330_v19 = vld [vmem:[#allocation2 + $0x88] sm:$0xff]  ;;  %v9591_v54 = vpop.permute.xlu0 %3160  ;;  %v9598_v8 = vpop.f32.mrf.mxu1 }
 0x181   : > { %v1334_v56 = vpop.f32.mrf.mxu2  ;;  %12404 = vst [vmem:[#allocation26_spill] sm:$0xff] %v9591_v54  ;;  %v2403_v12 = vshll.u32 %v8330_v19, 16 }
 0x182   : > { %v1402_v51 = vadd.f32 %v1334_v56, %v9235_v53  ;;  %7729 = vmatmul.msk.bf16.gmra.mxu0 %vm898_vm7, %v1881_v21  ;;  %v2401_v53 = vor.u32 %v2399_v24, %v2397_v22  ;;  %v9601_v56 = vpop.permute.xlu2 %1473  ;;  %v8298_v22 = vld [vmem:[#allocation2 + $0x78] sm:$0xff] }
 0x183   : > { %v1986_v36 = vpop.f32.mrf.mxu3  ;;  %v2405_v5 = vrot.slane %v2403_v12, 1  ;;  %12405 = vst [vmem:[#allocation27_spill] sm:$0xff] %v9601_v56  ;;  %v1682_v12 = vld [vmem:[#allocation2 + $0x80] sm:$0x1] }
 0x184   : > { %v2106_v61 = vadd.f32 %v9511_v40, %v1986_v36  ;;  %v1594_v11 = vmul.f32 %v9585_v57, %v1402_v51  ;;  %v1884_v36 = vor.u32 %v1882_v9, %v1880_v41  ;;  %v1888_v57 = vrot.slane %v1886_v13, 1  ;;  %v2197_v9 = vld [vmem:[#allocation2 + $0x90] sm:$0x1] }
 0x185   : > { %v2406_v40 = vsel %vm1773_vm8, %v2401_v53, %v2405_v5 }
 0x186   : > { %v2563_v21 = vadd.f32 %v9477_v30, %v2106_v61  ;;  %7807 = vmatmul.msk.bf16.gmra.mxu1 %vm898_vm7, %v2406_v40  ;;  %v1889_v53 = vsel %vm1773_vm8, %v1884_v36, %v1888_v57  ;;  %v2265_v40 = vunpack.c.l.b16 %v2197_v9 }
 0x187   : > { %v9603_v62 = vpop.f32.mrf.mxu0 }
 0x188   : > { %v9605_v20 = vadd.f32 %v2563_v21, %v1594_v11  ;;  %v9616_v21 = vpop.permute.xlu0 %3165  ;;  %v9618_v58 = vpop.f32.mrf.mxu1 }
 0x189   : > { %v1336_v51 = vpop.f32.mrf.mxu2  ;;  %12406 = vst [vmem:[#allocation28_spill] sm:$0xff] %v9616_v21 }
 0x18a   : > { %v1403_v30 = vadd.f32 %v1336_v51, %v9247_v15  ;;  %v2051_v15 = vunpack.c.l.b16 %v1682_v12  ;;  %v338_v51 = vld [vmem:[%s12288_s6 + $0xd0] sm:$0xff]  ;;  %v9633_v36 = vpop.permute.xlu2 %1478 }
 0x18b   : > { %v1988_v24 = vpop.f32.mrf.mxu3  ;;  %12408 = vst [vmem:[#allocation30_spill] sm:$0xff] %v9633_v36  ;;  %3255 = vperm.xlu0 %8443, %v338_v51  }
 0x18c   : > { %v2108_v61 = vadd.f32 %v9547_v23, %v1988_v24  ;;  %v1595_v11 = vmul.f32 %v9601_v56, %v1403_v30  ;;  %v335_v23 = vld [vmem:[%s12288_s6 + $0xb8] sm:$0xff]  ;;  %v9635_v30 = vld [vmem:[#allocation2 + $0x80] sm:$0xff]  ;;  %v9643_v12 = vpack.c.b16 %v2051_v15, %v2051_v15 }
 0x18d   : > { %3240 = vperm.xlu2 %8445, %v335_v23   ;;  %v1890_v23 = vshrl.u32 %v9587_v2, 16  ;;  %v339_v2 = vld [vmem:[%s12288_s6 + $0xd8] sm:$0xff] }
 0x18e   : > { %v2564_v41 = vadd.f32 %v9507_v29, %v2108_v61  ;;  %7635 = vmatmul.msk.bf16.gmra.mxu2 %vm898_vm7, %v8298_v22  ;;  %v9637_v22 = vpack.c.b16 %v2265_v40, %v2265_v40  ;;  %12411 = vst [vmem:[#allocation33_spill] sm:$0xff] %v9643_v12  ;;  %v1894_v40 = vshll.u32 %v9635_v30, 16  ;;  %3260 = vperm.xlu1 %8444, %v339_v2   ;;  %v307_v2 = vld [vmem:[%s12287_s5 + $0xd8] sm:$0xff] }
 0x18f   : > { %v9622_v13 = vpop.f32.mrf.mxu0 }
 0x190   : > { %v9624_v3 = vadd.f32 %v2564_v41, %v1595_v11  ;;  %7713 = vmatmul.msk.bf16.gmra.mxu3 %vm898_vm7, %v1889_v53  ;;  %12409 = vst [vmem:[#allocation31_spill] sm:$0xff] %v9637_v22  ;;  %v9641_v11 = vpop.permute.xlu1 %3170  ;;  %v2407_v41 = vshrl.u32 %v8330_v19, 16  ;;  %v2411_v9 = vshll.u32 %v9637_v22, 16  ;;  %v9650_v51 = vpop.f32.mrf.mxu1  ;;  %v2063_v19 = vshll.u32 %v9643_v12, 16 }
 0x191   : > { %v1339_v29 = vpop.f32.mrf.mxu2  ;;  %12410 = vst [vmem:[#allocation32_spill] sm:$0xff] %v9641_v11  ;;  %v9653_v11 = vpop.permute.xlu0 %1483 }
 0x192   : > { %12407 = vst [vmem:[#allocation29_spill] sm:$0xff] %v9624_v3  ;;  %v1404_v24 = vadd.f32 %v1339_v29, %v9255_v32  ;;  %7730 = vmatmul.msk.bf16.gmra.mxu0 %vm898_vm7, %v1889_v53  ;;  %v2409_v32 = vor.u32 %v2407_v41, %v2405_v5  ;;  %v2413_v53 = vrot.slane %v2411_v9, 1  ;;  %v336_v5 = vld [vmem:[%s12288_s6 + $0xc0] sm:$0xff]  ;;  %v1896_v41 = vrot.slane %v1894_v40, 1 }
 0x193   : > { %v1991_v61 = vpop.f32.mrf.mxu3  ;;  %12412 = vst [vmem:[#allocation34_spill] sm:$0xff] %v9653_v11  ;;  %v8299_v9 = vld [vmem:[#allocation2 + $0x80] sm:$0xff] }
 0x194   : > { %v2111_v56 = vadd.f32 %v9577_v42, %v1991_v61  ;;  %v1596_v3 = vmul.f32 %v9633_v36, %v1404_v24  ;;  %v2414_v42 = vsel %vm1773_vm8, %v2409_v32, %v2413_v53  ;;  %v1892_v24 = vor.u32 %v1890_v23, %v1888_v57  ;;  %v1687_v32 = vld [vmem:[#allocation2 + $0x88] sm:$0x1] }
 0x195   : > { %3245 = vperm.xlu2 %8445, %v336_v5   ;;  %v1755_v57 = vunpack.c.l.b16 %v1687_v32  ;;  %v8419_v32 = vld [vmem:[#allocation2 + $0x10] sm:$0xe] }
 0x196   : > { %v2565_v29 = vadd.f32 %v9541_v47, %v2111_v56  ;;  %v309_v47 = vld [vmem:[%s12287_s5 + $0xe8] sm:$0xff]  ;;  %7808 = vmatmul.msk.bf16.gmra.mxu1 %vm898_vm7, %v2414_v42  ;;  %v1897_v12 = vsel %vm1773_vm8, %v1892_v24, %v1896_v41 }
 0x197   : > { %v9655_v15 = vpop.f32.mrf.mxu0  ;;  %1573 = vperm.xlu0 %8443, %v309_v47   ;;  %v9698_v47 = vpack.c.b16 %v1755_v57, %v1755_v57 }
 0x198   : > { %v9659_v61 = vadd.f32 %v2565_v29, %v1596_v3  ;;  %v2065_v29 = vrot.slane %v2063_v19, 1  ;;  %v9677_v23 = vpop.f32.mrf.mxu1 }
 0x199   : > { %v1341_v56 = vpop.f32.mrf.mxu2  ;;  %v9696_v5 = vpop.permute.xlu0 %1488  ;;  %12416 = vst [vmem:[#allocation38_spill] sm:$0xff] %v9698_v47 }
 0x19a   : > { %12413 = vst [vmem:[#allocation35_spill] sm:$0xff] %v9659_v61  ;;  %v1405_v3 = vadd.f32 %v1341_v56, %v9276_v60  ;;  %v9675_v61 = vpop.permute.xlu1 %3175  ;;  %v2066_v42 = vsel %vm1773_vm8, %v1892_v24, %v2065_v29  ;;  %v9702_v56 = vpop.permute.xlu2 %3180  ;;  %v1902_v29 = vshll.u32 %v9698_v47, 16 }
 0x19b   : > { %v1993_v53 = vpop.f32.mrf.mxu3  ;;  %12414 = vst [vmem:[#allocation36_spill] sm:$0xff] %v9675_v61 }
 0x19c   : > { %v2113_v36 = vadd.f32 %v9603_v62, %v1993_v53  ;;  %v1597_v22 = vmul.f32 %v9653_v11, %v1405_v3  ;;  %v340_v62 = vld [vmem:[%s12288_s6 + $0xe0] sm:$0xff]  ;;  %12415 = vst [vmem:[#allocation37_spill] sm:$0xff] %v9696_v5  ;;  %v1898_v53 = vshrl.u32 %v9635_v30, 16  ;;  %v2622_v11 = vld [vmem:[#allocation2 + $0x8] sm:$0xe] }
 0x19d   : > { %3265 = vperm.xlu1 %8444, %v340_v62   ;;  %1563 = vperm.xlu2 %8445, %v307_v2   ;;  %12417 = vst [vmem:[#allocation39_spill] sm:$0xff] %v9702_v56  ;;  %v308_v30 = vld [vmem:[%s12287_s5 + $0xe0] sm:$0xff] }
 0x19e   : > { %v2566_v40 = vadd.f32 %v9573_v44, %v2113_v36  ;;  %7636 = vmatmul.msk.bf16.gmra.mxu2 %vm898_vm7, %v8299_v9  ;;  %v310_v44 = vld [vmem:[%s12287_s5 + $0xf0] sm:$0xff] }
 0x19f   : > { %v9681_v60 = vpop.f32.mrf.mxu0  ;;  %1578 = vperm.xlu0 %8443, %v310_v44   ;;  %v8418_v9 = vld [vmem:[#allocation2 + $0x10] sm:$0xf0] }
 0x1a0   : > { %v9684_v19 = vadd.f32 %v2566_v40, %v1597_v22  ;;  %7714 = vmatmul.msk.bf16.gmra.mxu3 %vm898_vm7, %v1897_v12  ;;  %v9708_v57 = vpop.f32.mrf.mxu1  ;;  %v8420_v62 = vor.u32 %v8419_v32, %v8418_v9 }
 0x1a1   : > { %v1344_v36 = vpop.f32.mrf.mxu2 }
 0x1a2   : > { %v1406_v22 = vadd.f32 %v1344_v36, %v9284_v10  ;;  %7731 = vmatmul.msk.bf16.gmra.mxu0 %vm898_vm7, %v2066_v42  ;;  %v9711_v40 = vpop.permute.xlu1 %1493  ;;  %v1900_v36 = vor.u32 %v1898_v53, %v1896_v41  ;;  %v2918_v9 = vrot.slane %v8420_v62, 1  ;;  %v9725_v47 = vpop.permute.xlu2 %3185  ;;  %v2626_v53 = vunpack.c.l.b16 %v2622_v11  ;;  %v8416_v11 = vld [vmem:[#allocation2] sm:$0xe] }
 0x1a3   : > { %v1996_v12 = vpop.f32.mrf.mxu3  ;;  %12418 = vst [vmem:[#allocation40_spill] sm:$0xff] %v9711_v40 }
 0x1a4   : > { %v2116_v24 = vadd.f32 %v9622_v13, %v1996_v12  ;;  %v1598_v3 = vmul.f32 %v9696_v5, %v1406_v22  ;;  %v311_v13 = vld [vmem:[%s12287_s5 + $0xf8] sm:$0xff]  ;;  %v1904_v22 = vrot.slane %v1902_v29, 1  ;;  %v8300_v12 = vld [vmem:[#allocation2 + $0x88] sm:$0xff]  ;;  %12420 = vst [vmem:[#allocation42_spill] sm:$0xff] %v9725_v47 }
 0x1a5   : > { %1583 = vperm.xlu1 %8444, %v311_v13   ;;  %1568 = vperm.xlu2 %8445, %v308_v30  }
 0x1a6   : > { %v2567_v10 = vadd.f32 %v9598_v8, %v2116_v24 }
 0x1a7   : > { %v2122_v42 = vpop.f32.mrf.mxu0 }
 0x1a8   : > { %v9713_v2 = vadd.f32 %v2567_v10, %v1598_v3  ;;  %v8704_v3 = vld [vmem:[#allocation2 + $0x18] sm:$0xff]  ;;  %v9730_v62 = vpop.f32.mrf.mxu1 }
 0x1a9   : > { %v1346_v44 = vpop.f32.mrf.mxu2  ;;  %v2919_v32 = vrot.slane %v8704_v3, 1 }
 0x1aa   : > { %12419 = vst [vmem:[#allocation41_spill] sm:$0xff] %v9713_v2  ;;  %v1407_v8 = vadd.f32 %v1346_v44, %v9305_v49  ;;  %v1905_v2 = vsel %vm1773_vm8, %v1900_v36, %v1904_v22  ;;  %v9738_v44 = vpop.permute.xlu1 %1498  ;;  %v8415_v36 = vld [vmem:[#allocation2] sm:$0xf0] }
 0x1ab   : > { %v1998_v24 = vpop.f32.mrf.mxu3  ;;  %v2920_v29 = vsel %vm2628_vm11, %v2918_v9, %v2919_v32  ;;  %12422 = vst [vmem:[#allocation44_spill] sm:$0xff] %v9738_v44  ;;  %v8417_v9 = vor.u32 %v8416_v11, %v8415_v36  ;;  %v8706_v36 = vld [vmem:[#allocation2 + $0x20] sm:$0xff] }
 0x1ac   : > { %v2118_v10 = vadd.f32 %v9655_v15, %v1998_v24  ;;  %v1599_v5 = vmul.f32 %v9711_v40, %v1407_v8  ;;  %v343_v15 = vld [vmem:[%s12288_s6 + $0xf8] sm:$0xff]  ;;  %v9742_v8 = vpop.permute.xlu0 %3190 }
 0x1ad   : > { %3280 = vperm.xlu0 %8443, %v343_v15   ;;  %12423 = vst [vmem:[#allocation45_spill] sm:$0xff] %v9742_v8 }
 0x1ae   : > { %v2568_v41 = vadd.f32 %v9618_v58, %v2118_v10  ;;  %7637 = vmatmul.msk.bf16.gmra.mxu2 %vm898_vm7, %v8300_v12  ;;  %v9749_v10 = vpop.permute.xlu2 %1503 }
 0x1af   : > { %v2125_v49 = vpop.f32.mrf.mxu0  ;;  %12425 = vst [vmem:[#allocation46_spill] sm:$0xff] %v9749_v10 }
 0x1b0   : > { %v9732_v13 = vadd.f32 %v2568_v41, %v1599_v5  ;;  %7715 = vmatmul.msk.bf16.gmra.mxu3 %vm898_vm7, %v1905_v2  ;;  %v12424_v5 = vunpack.c.l.b16 %v9105_v17  ;;  %v8705_v41 = vld [vmem:[#allocation2 + $0x10] sm:$0xff]  ;;  %v2806_v17 = vrot.slane %v9132_v38, 1 }
 0x1b1   : > { %v1349_v30 = vpop.f32.mrf.mxu2  ;;  %v2630_v15 = vrot.slane %v8705_v41, 1 }
 0x1b2   : > { %12421 = vst [vmem:[#allocation43_spill] sm:$0xff] %v9732_v13  ;;  %v1408_v58 = vadd.f32 %v1349_v30, %v9313_v1  ;;  %7844 = vmatmul.msk.bf16.vlgmr.msra.gmra.mxu0 %vm898_vm7, %v2920_v29  ;;  %v2627_v2 = vpack.c.b16 %v12424_v5, %v2626_v53  ;;  %v2805_v13 = vrot.slane %v8417_v9, 1  ;;  %v2520_v53 = vpop.f32.mrf.mxu1 }
 0x1b3   : > { %v2001_v22 = vpop.f32.mrf.mxu3 }
 0x1b4   : > { %v2121_v12 = vadd.f32 %v9681_v60, %v2001_v22  ;;  %v1600_v24 = vmul.f32 %v9738_v44, %v1408_v58  ;;  %v2629_v1 = vrot.slane %v2627_v2, 1  ;;  %v2807_v2 = vsel %vm2628_vm11, %v2805_v13, %v2806_v17 }
 0x1b6   : > { %v2569_v3 = vadd.f32 %v9650_v51, %v2121_v12  ;;  %v2631_v58 = vsel %vm2628_vm11, %v2629_v1, %v2630_v15  ;;  %v2921_v51 = vrot.slane %v8706_v36, 1  ;;  %v9758_v12 = vpop.permute.xlu0 %3195  ;;  %v9769_v1 = vpop.permute.xlu1 %3200 }
 0x1b7   : > { %v2127_v30 = vpop.f32.mrf.mxu0  ;;  %12426 = vst [vmem:[#allocation47_spill] sm:$0xff] %v9758_v12 }
 0x1b8   : > { %v9751_v29 = vadd.f32 %v2569_v3, %v1600_v24  ;;  %v2922_v9 = vsel %vm2628_vm11, %v2919_v32, %v2921_v51  ;;  %v9766_v3 = vpop.permute.xlu2 %1508  ;;  %12428 = vst [vmem:[#allocation49_spill] sm:$0xff] %v9769_v1 }
 0x1b9   : > { %v1351_v40 = vpop.f32.mrf.mxu2  ;;  %12427 = vst [vmem:[#allocation48_spill] sm:$0xff] %v9766_v3 }
 0x1ba   : > { %v1409_v60 = vadd.f32 %v1351_v40, %v9324_v50 }
 0x1bb   : > { %v2003_v22 = vpop.f32.mrf.mxu3 }
 0x1bc   : > { %v2123_v11 = vadd.f32 %v2122_v42, %v2003_v22  ;;  %v1601_v5 = vmul.f32 %v9749_v10, %v1409_v60 }
 0x1be   : > { %v2570_v24 = vadd.f32 %v9677_v23, %v2123_v11  ;;  %7811 = vmatmul.msk.bf16.vlgmr.msra.gmra.mxu2 %vm898_vm7, %v2631_v58  ;;  %v2522_v23 = vpop.f32.mrf.mxu1  ;;  %v9774_v22 = vpop.permute.xlu0 %1513  ;;  %v8707_v58 = vld [vmem:[#allocation2 + $0x18] sm:$0xff] }
 0x1bf   : > { %v2130_v38 = vpop.f32.mrf.mxu0  ;;  %12429 = vst [vmem:[#allocation50_spill] sm:$0xff] %v9774_v22  ;;  %v2632_v36 = vrot.slane %v8707_v58, 1 }
 0x1c0   : > { %v9763_v50 = vadd.f32 %v2570_v24, %v1601_v5  ;;  %7827 = vmatmul.msk.bf16.vlgmr.msra.gmra.mxu3 %vm898_vm7, %v2807_v2 }
 0x1c1   : > { %v1354_v40 = vpop.f32.mrf.mxu2 }
 0x1c2   : > { %v1410_v42 = vadd.f32 %v1354_v40, %v9159_v18  ;;  %7845 = vmatmul.msk.bf16.gmra.mxu0 %vm898_vm7, %v2922_v9  ;;  %v2633_v9 = vsel %vm2628_vm11, %v2630_v15, %v2632_v36  ;;  %v8708_v40 = vld [vmem:[#allocation2 + $0x28] sm:$0xff] }
 0x1c3   : > { %v2006_v13 = vpop.f32.mrf.mxu3  ;;  %v2923_v10 = vrot.slane %v8708_v40, 1 }
 0x1c4   : > { %v2126_v41 = vadd.f32 %v2125_v49, %v2006_v13  ;;  %v1602_v60 = vmul.f32 %v9766_v3, %v1410_v42  ;;  %v9781_v13 = vpop.permute.xlu1 %3205 }
 0x1c5   : > { %12430 = vst [vmem:[#allocation51_spill] sm:$0xff] %v9781_v13 }
 0x1c6   : > { %v2571_v32 = vadd.f32 %v9708_v57, %v2126_v41  ;;  %v2808_v57 = vsel %vm2628_vm11, %v2806_v17, %v2630_v15  ;;  %v2525_v41 = vpop.f32.mrf.mxu1  ;;  %v9797_v17 = vpop.permute.xlu2 %3210 }
 0x1c7   : > { %v2132_v11 = vpop.f32.mrf.mxu0  ;;  %12432 = vst [vmem:[#allocation53_spill] sm:$0xff] %v9797_v17 }
 0x1c8   : > { %v9776_v5 = vadd.f32 %v2571_v32, %v1602_v60 }
 0x1c9   : > { %v1356_v2 = vpop.f32.mrf.mxu2 }
 0x1ca   : > { %v1411_v18 = vadd.f32 %v1356_v2, %v9168_v37  ;;  %v2924_v37 = vsel %vm2628_vm11, %v2921_v51, %v2923_v10 }
 0x1cb   : > { %v2008_v24 = vpop.f32.mrf.mxu3 }
 0x1cc   : > { %v2128_v49 = vadd.f32 %v2127_v30, %v2008_v24  ;;  %v1603_v42 = vmul.f32 %v9774_v22, %v1411_v18  ;;  %v341_v30 = vld [vmem:[%s12288_s6 + $0xe8] sm:$0xff]  ;;  %v9793_v18 = vpop.permute.xlu0 %1518 }
 0x1cd   : > { %12431 = vst [vmem:[#allocation52_spill] sm:$0xff] %v9793_v18  ;;  %3270 = vperm.xlu2 %8445, %v341_v30  }
 0x1ce   : > { %v2572_v58 = vadd.f32 %v9730_v62, %v2128_v49  ;;  %7812 = vmatmul.msk.bf16.gmra.mxu2 %vm898_vm7, %v2633_v9  ;;  %v9800_v49 = vpop.permute.xlu1 %1523  ;;  %v2527_v22 = vpop.f32.mrf.mxu1 }
 0x1cf   : > { %v2135_v60 = vpop.f32.mrf.mxu0  ;;  %12433 = vst [vmem:[#allocation54_spill] sm:$0xff] %v9800_v49 }
 0x1d0   : > { %v9787_v32 = vadd.f32 %v2572_v58, %v1603_v42  ;;  %7828 = vmatmul.msk.bf16.gmra.mxu3 %vm898_vm7, %v2808_v57  ;;  %v8709_v42 = vld [vmem:[#allocation2 + $0x20] sm:$0xff] }
 0x1d1   : > { %v1359_v2 = vpop.f32.mrf.mxu2  ;;  %v2634_v57 = vrot.slane %v8709_v42, 1  ;;  %v9810_v42 = vpop.permute.xlu2 %3215 }
 0x1d2   : > { %v1412_v15 = vadd.f32 %v1359_v2, %v9184_v26  ;;  %7846 = vmatmul.msk.bf16.gmra.mxu0 %vm898_vm7, %v2924_v37  ;;  %v342_v26 = vld [vmem:[%s12288_s6 + $0xf0] sm:$0xff]  ;;  %12435 = vst [vmem:[#allocation56_spill] sm:$0xff] %v9810_v42 }
 0x1d3   : > { %v2011_v62 = vpop.f32.mrf.mxu3  ;;  %v2635_v2 = vsel %vm2628_vm11, %v2632_v36, %v2634_v57 }
 0x1d4   : > { %v2131_v51 = vadd.f32 %v2130_v38, %v2011_v62  ;;  %v1604_v24 = vmul.f32 %v9793_v18, %v1412_v15 }
 0x1d5   : > { %3275 = vperm.xlu2 %8445, %v342_v26  }
 0x1d6   : > { %v2573_v40 = vadd.f32 %v2520_v53, %v2131_v51  ;;  %v8710_v53 = vld [vmem:[#allocation2 + $0x30] sm:$0xff]  ;;  %v2530_v26 = vpop.f32.mrf.mxu1 }
 0x1d7   : > { %v2137_v58 = vpop.f32.mrf.mxu0  ;;  %v2925_v15 = vrot.slane %v8710_v53, 1 }
 0x1d8   : > { %v9802_v3 = vadd.f32 %v2573_v40, %v1604_v24 }
 0x1d9   : > { %v1361_v37 = vpop.f32.mrf.mxu2  ;;  %v2926_v18 = vsel %vm2628_vm11, %v2923_v10, %v2925_v15  ;;  %v9824_v10 = vpop.permute.xlu2 %1533 }
 0x1da   : > { %12434 = vst [vmem:[#allocation55_spill] sm:$0xff] %v9802_v3  ;;  %v1413_v30 = vadd.f32 %v1361_v37, %v9200_v6  ;;  %v9817_v6 = vpop.permute.xlu1 %1528  ;;  %v8712_v3 = vld [vmem:[#allocation2 + $0x38] sm:$0xff] }
 0x1db   : > { %v2013_v38 = vpop.f32.mrf.mxu3  ;;  %12437 = vst [vmem:[#allocation58_spill] sm:$0xff] %v9817_v6 }
 0x1dc   : > { %v2133_v62 = vadd.f32 %v2132_v11, %v2013_v38  ;;  %v1605_v51 = vmul.f32 %v9800_v49, %v1413_v30  ;;  %v9821_v30 = vpop.permute.xlu0 %3220  ;;  %12439 = vst [vmem:[#allocation60_spill] sm:$0xff] %v9824_v10 }
 0x1dd   : > { %12438 = vst [vmem:[#allocation59_spill] sm:$0xff] %v9821_v30  ;;  %v2927_v30 = vrot.slane %v8712_v3, 1 }
 0x1de   : > { %v2574_v24 = vadd.f32 %v2522_v23, %v2133_v62  ;;  %7813 = vmatmul.msk.bf16.gmra.mxu2 %vm898_vm7, %v2635_v2  ;;  %v8711_v62 = vld [vmem:[#allocation2 + $0x28] sm:$0xff] }
 0x1df   : > { %v2140_v40 = vpop.f32.mrf.mxu0 }
 0x1e0   : > { %v9814_v44 = vadd.f32 %v2574_v24, %v1605_v51  ;;  %7829 = vmatmul.msk.bf16.gmra.mxu3 %vm898_vm7, %v2633_v9  ;;  %v2636_v51 = vrot.slane %v8711_v62, 1 }
 0x1e1   : > { %v1364_v36 = vpop.f32.mrf.mxu2 }
 0x1e2   : > { %12436 = vst [vmem:[#allocation57_spill] sm:$0xff] %v9814_v44  ;;  %v1414_v11 = vadd.f32 %v1364_v36, %v9217_v27  ;;  %7847 = vmatmul.msk.bf16.gmra.mxu0 %vm898_vm7, %v2926_v18  ;;  %v2637_v18 = vsel %vm2628_vm11, %v2634_v57, %v2636_v51  ;;  %v2532_v36 = vpop.f32.mrf.mxu1  ;;  %v9842_v57 = vpop.permute.xlu1 %3230 }
 0x1e3   : > { %v2016_v37 = vpop.f32.mrf.mxu3  ;;  %12443 = vst [vmem:[#allocation64_spill] sm:$0xff] %v9842_v57 }
 0x1e4   : > { %v2136_v23 = vadd.f32 %v2135_v60, %v2016_v37  ;;  %v1606_v38 = vmul.f32 %v9817_v6, %v1414_v11  ;;  %v8714_v6 = vld [vmem:[#allocation2 + $0x40] sm:$0xff] }
 0x1e6   : > { %v2575_v53 = vadd.f32 %v2525_v41, %v2136_v23  ;;  %v9831_v41 = vpop.permute.xlu0 %3225 }
 0x1e7   : > { %v2142_v9 = vpop.f32.mrf.mxu0  ;;  %12440 = vst [vmem:[#allocation61_spill] sm:$0xff] %v9831_v41 }
 0x1e8   : > { %v9826_v24 = vadd.f32 %v2575_v53, %v1606_v38  ;;  %v2928_v38 = vsel %vm2628_vm11, %v2925_v15, %v2927_v30 }
 0x1e9   : > { %v1366_v49 = vpop.f32.mrf.mxu2 }
 0x1ea   : > { %v1415_v44 = vadd.f32 %v1366_v49, %v9230_v48  ;;  %v9838_v49 = vpop.permute.xlu2 %1538  ;;  %v2535_v62 = vpop.f32.mrf.mxu1 }
 0x1eb   : > { %v2018_v27 = vpop.f32.mrf.mxu3  ;;  %12442 = vst [vmem:[#allocation63_spill] sm:$0xff] %v9838_v49 }
 0x1ec   : > { %v2138_v60 = vadd.f32 %v2137_v58, %v2018_v27  ;;  %v1607_v11 = vmul.f32 %v9824_v10, %v1415_v44 }
 0x1ee   : > { %v2576_v37 = vadd.f32 %v2527_v22, %v2138_v60  ;;  %7814 = vmatmul.msk.bf16.gmra.mxu2 %vm898_vm7, %v2637_v18  ;;  %v9845_v15 = vpop.permute.xlu0 %1543  ;;  %v8713_v60 = vld [vmem:[#allocation2 + $0x30] sm:$0xff] }
 0x1ef   : > { %v2145_v23 = vpop.f32.mrf.mxu0  ;;  %12444 = vst [vmem:[#allocation65_spill] sm:$0xff] %v9845_v15 }
 0x1f0   : > { %v9835_v53 = vadd.f32 %v2576_v37, %v1607_v11  ;;  %7830 = vmatmul.msk.bf16.gmra.mxu3 %vm898_vm7, %v2635_v2  ;;  %v2638_v11 = vrot.slane %v8713_v60, 1 }
 0x1f1   : > { %v1369_v48 = vpop.f32.mrf.mxu2 }
 0x1f2   : > { %12441 = vst [vmem:[#allocation62_spill] sm:$0xff] %v9835_v53  ;;  %v1416_v3 = vadd.f32 %v1369_v48, %v9241_v63  ;;  %7848 = vmatmul.msk.bf16.gmra.mxu0 %vm898_vm7, %v2928_v38  ;;  %v2639_v38 = vsel %vm2628_vm11, %v2636_v51, %v2638_v11  ;;  %v2929_v53 = vrot.slane %v8714_v6, 1  ;;  %v2537_v60 = vpop.f32.mrf.mxu1 }
 0x1f3   : > { %v2021_v44 = vpop.f32.mrf.mxu3 }
 0x1f4   : > { %v2141_v22 = vadd.f32 %v2140_v40, %v2021_v44  ;;  %v1608_v58 = vmul.f32 %v9838_v49, %v1416_v3  ;;  %v9852_v44 = vpop.permute.xlu1 %3235 }
 0x1f5   : > { %12445 = vst [vmem:[#allocation66_spill] sm:$0xff] %v9852_v44 }
 0x1f6   : > { %v2577_v27 = vadd.f32 %v2530_v26, %v2141_v22 }
 0x1f7   : > { %v2147_v2 = vpop.f32.mrf.mxu0 }
 0x1f8   : > { %v9847_v37 = vadd.f32 %v2577_v27, %v1608_v58  ;;  %v2930_v58 = vsel %vm2628_vm11, %v2927_v30, %v2929_v53  ;;  %v8715_v30 = vld [vmem:[#allocation2 + $0x38] sm:$0xff] }
 0x1f9   : > { %v1371_v10 = vpop.f32.mrf.mxu2 }
 0x1fa   : > { %v1417_v63 = vadd.f32 %v1371_v10, %v9250_v25  ;;  %v9859_v10 = vpop.permute.xlu0 %1548  ;;  %v2540_v49 = vpop.f32.mrf.mxu1 }
 0x1fb   : > { %v2023_v48 = vpop.f32.mrf.mxu3  ;;  %12447 = vst [vmem:[#allocation68_spill] sm:$0xff] %v9859_v10 }
 0x1fc   : > { %v2143_v40 = vadd.f32 %v2142_v9, %v2023_v48  ;;  %v1609_v3 = vmul.f32 %v9845_v15, %v1417_v63  ;;  %v9863_v9 = vpop.permute.xlu2 %3240 }
 0x1fd   : > { %12448 = vst [vmem:[#allocation69_spill] sm:$0xff] %v9863_v9 }
 0x1fe   : > { %v2578_v26 = vadd.f32 %v2532_v36, %v2143_v40  ;;  %7815 = vmatmul.msk.bf16.gmra.mxu2 %vm898_vm7, %v2639_v38  ;;  %v9866_v40 = vpop.permute.xlu1 %1553 }
 0x1ff   : > { %v2150_v22 = vpop.f32.mrf.mxu0  ;;  %12449 = vst [vmem:[#allocation70_spill] sm:$0xff] %v9866_v40 }
 0x200   : > { %v9856_v27 = vadd.f32 %v2578_v26, %v1609_v3  ;;  %7831 = vmatmul.msk.bf16.gmra.mxu3 %vm898_vm7, %v2637_v18  ;;  %v2640_v3 = vrot.slane %v8715_v30, 1 }
 0x201   : > { %v1374_v25 = vpop.f32.mrf.mxu2 }
 0x202   : > { %12446 = vst [vmem:[#allocation67_spill] sm:$0xff] %v9856_v27  ;;  %v1418_v6 = vadd.f32 %v1374_v25, %v9264_v45  ;;  %7849 = vmatmul.msk.bf16.gmra.mxu0 %vm898_vm7, %v2930_v58  ;;  %v2641_v58 = vsel %vm2628_vm11, %v2638_v11, %v2640_v3  ;;  %v8716_v27 = vld [vmem:[#allocation2 + $0x48] sm:$0xff] }
 0x203   : > { %v2026_v51 = vpop.f32.mrf.mxu3  ;;  %v2931_v9 = vrot.slane %v8716_v27, 1 }
 0x204   : > { %v2146_v36 = vadd.f32 %v2145_v23, %v2026_v51  ;;  %v1610_v63 = vmul.f32 %v9859_v10, %v1418_v6 }
 0x206   : > { %v2579_v48 = vadd.f32 %v2535_v62, %v2146_v36  ;;  %v9873_v62 = vpop.permute.xlu2 %3245 }
 0x207   : > { %v2152_v26 = vpop.f32.mrf.mxu0  ;;  %12451 = vst [vmem:[#allocation72_spill] sm:$0xff] %v9873_v62 }
 0x208   : > { %v9868_v18 = vadd.f32 %v2579_v48, %v1610_v63  ;;  %v2932_v63 = vsel %vm2628_vm11, %v2929_v53, %v2931_v9 }
 0x209   : > { %v1376_v15 = vpop.f32.mrf.mxu2 }
 0x20a   : > { %12450 = vst [vmem:[#allocation71_spill] sm:$0xff] %v9868_v18  ;;  %v1419_v45 = vadd.f32 %v1376_v15, %v9279_v7  ;;  %v9880_v15 = vpop.permute.xlu1 %1558 }
 0x20b   : > { %v2028_v25 = vpop.f32.mrf.mxu3  ;;  %12453 = vst [vmem:[#allocation74_spill] sm:$0xff] %v9880_v15 }
 0x20c   : > { %v2148_v23 = vadd.f32 %v2147_v2, %v2028_v25  ;;  %v1611_v6 = vmul.f32 %v9866_v40, %v1419_v45  ;;  %v9883_v2 = vpop.permute.xlu0 %3250 }
 0x20d   : > { %12454 = vst [vmem:[#allocation75_spill] sm:$0xff] %v9883_v2 }
 0x20e   : > { %v2580_v51 = vadd.f32 %v2537_v60, %v2148_v23  ;;  %7816 = vmatmul.msk.bf16.gmra.mxu2 %vm898_vm7, %v2641_v58  ;;  %v2542_v60 = vpop.f32.mrf.mxu1  ;;  %v9887_v53 = vpop.permute.xlu2 %1563  ;;  %v8717_v23 = vld [vmem:[#allocation2 + $0x40] sm:$0xff] }
 0x20f   : > { %v2155_v36 = vpop.f32.mrf.mxu0  ;;  %12455 = vst [vmem:[#allocation76_spill] sm:$0xff] %v9887_v53 }
 0x210   : > { %v9877_v48 = vadd.f32 %v2580_v51, %v1611_v6  ;;  %7832 = vmatmul.msk.bf16.gmra.mxu3 %vm898_vm7, %v2639_v38  ;;  %v2642_v6 = vrot.slane %v8717_v23, 1 }
 0x211   : > { %v1379_v7 = vpop.f32.mrf.mxu2 }
 0x212   : > { %12452 = vst [vmem:[#allocation73_spill] sm:$0xff] %v9877_v48  ;;  %v1420_v11 = vadd.f32 %v1379_v7, %v9296_v35  ;;  %7850 = vmatmul.msk.bf16.gmra.mxu0 %vm898_vm7, %v2932_v63  ;;  %v2643_v10 = vsel %vm2628_vm11, %v2640_v3, %v2642_v6  ;;  %v8718_v63 = vld [vmem:[#allocation2 + $0x50] sm:$0xff] }
 0x213   : > { %v2031_v27 = vpop.f32.mrf.mxu3  ;;  %v2933_v48 = vrot.slane %v8718_v63, 1  ;;  %v8719_v63 = vld [vmem:[#allocation2 + $0x48] sm:$0xff] }
 0x214   : > { %v2151_v30 = vadd.f32 %v2150_v22, %v2031_v27  ;;  %v1612_v45 = vmul.f32 %v9880_v15, %v1420_v11  ;;  %v9894_v11 = vpop.permute.xlu0 %3255  ;;  %v12468_v15 = vld [vmem:[#allocation5_spill] sm:$0xff] }
 0x215   : > { %12457 = vst [vmem:[#allocation78_spill] sm:$0xff] %v9894_v11 }
 0x216   : > { %v2581_v25 = vadd.f32 %v2540_v49, %v2151_v30  ;;  %v2545_v49 = vpop.f32.mrf.mxu1 }
 0x217   : > { %v2157_v38 = vpop.f32.mrf.mxu0 }
 0x218   : > { %v9889_v51 = vadd.f32 %v2581_v25, %v1612_v45  ;;  %v2934_v45 = vsel %vm2628_vm11, %v2931_v9, %v2933_v48 }
 0x219   : > { %v1381_v40 = vpop.f32.mrf.mxu2 }
 0x21a   : > { %12456 = vst [vmem:[#allocation77_spill] sm:$0xff] %v9889_v51  ;;  %v1421_v35 = vadd.f32 %v1381_v40, %v9308_v55  ;;  %v9901_v40 = vpop.permute.xlu2 %1568 }
 0x21b   : > { %v2033_v7 = vpop.f32.mrf.mxu3  ;;  %12459 = vst [vmem:[#allocation80_spill] sm:$0xff] %v9901_v40 }
 0x21c   : > { %v2153_v2 = vadd.f32 %v2152_v26, %v2033_v7  ;;  %v1613_v22 = vmul.f32 %v9887_v53, %v1421_v35  ;;  %v9908_v7 = vpop.permute.xlu0 %1573 }
 0x21d   : > { %12461 = vst [vmem:[#allocation82_spill] sm:$0xff] %v9908_v7 }
 0x21e   : > { %v2582_v27 = vadd.f32 %v2542_v60, %v2153_v2  ;;  %7817 = vmatmul.msk.bf16.gmra.mxu2 %vm898_vm7, %v2643_v10  ;;  %v9906_v60 = vpop.permute.xlu1 %3260  ;;  %v2547_v9 = vpop.f32.mrf.mxu1 }
 0x21f   : > { %v2160_v30 = vpop.f32.mrf.mxu0  ;;  %12460 = vst [vmem:[#allocation81_spill] sm:$0xff] %v9906_v60 }
 0x220   : > { %v9898_v25 = vadd.f32 %v2582_v27, %v1613_v22  ;;  %7833 = vmatmul.msk.bf16.gmra.mxu3 %vm898_vm7, %v2641_v58  ;;  %v2644_v22 = vrot.slane %v8719_v63, 1 }
 0x221   : > { %v1384_v55 = vpop.f32.mrf.mxu2 }
 0x222   : > { %12458 = vst [vmem:[#allocation79_spill] sm:$0xff] %v9898_v25  ;;  %v1422_v3 = vadd.f32 %v1384_v55, %v9319_v28  ;;  %7851 = vmatmul.msk.bf16.gmra.mxu0 %vm898_vm7, %v2934_v45  ;;  %v2645_v45 = vsel %vm2628_vm11, %v2642_v6, %v2644_v22 }
 0x223   : > { %v2036_v26 = vpop.f32.mrf.mxu3 }
 0x224   : > { %v2156_v23 = vadd.f32 %v2155_v36, %v2036_v26  ;;  %v1614_v2 = vmul.f32 %v9901_v40, %v1422_v3  ;;  %v8720_v36 = vld [vmem:[#allocation2 + $0x58] sm:$0xff] }
 0x225   : > { %v2935_v26 = vrot.slane %v8720_v36, 1 }
 0x226   : > { %v2583_v35 = vadd.f32 %v2545_v49, %v2156_v23  ;;  %v9916_v23 = vpop.permute.xlu1 %3265  ;;  %v2550_v6 = vpop.f32.mrf.mxu1 }
 0x227   : > { %v2162_v58 = vpop.f32.mrf.mxu0  ;;  %12463 = vst [vmem:[#allocation84_spill] sm:$0xff] %v9916_v23 }
 0x228   : > { %v9910_v27 = vadd.f32 %v2583_v35, %v1614_v2  ;;  %v2936_v2 = vsel %vm2628_vm11, %v2933_v48, %v2935_v26 }
 0x229   : > { %v1386_v53 = vpop.f32.mrf.mxu2 }
 0x22a   : > { %12462 = vst [vmem:[#allocation83_spill] sm:$0xff] %v9910_v27  ;;  %v1423_v28 = vadd.f32 %v1386_v53, %v9330_v52  ;;  %v9922_v52 = vpop.permute.xlu0 %1578 }
 0x22b   : > { %v2038_v55 = vpop.f32.mrf.mxu3  ;;  %12465 = vst [vmem:[#allocation86_spill] sm:$0xff] %v9922_v52 }
 0x22c   : > { %v2158_v3 = vadd.f32 %v2157_v38, %v2038_v55  ;;  %v1615_v40 = vmul.f32 %v9908_v7, %v1423_v28 }
 0x22e   : > { %v2584_v49 = vadd.f32 %v2547_v9, %v2158_v3  ;;  %7818 = vmatmul.msk.bf16.gmra.mxu2 %vm898_vm7, %v2645_v45  ;;  %v8721_v3 = vld [vmem:[#allocation2 + $0x50] sm:$0xff]  ;;  %v2552_v23 = vpop.f32.mrf.mxu1 }
 0x22f   : > { %v3011_v63 = vpop.f32.mrf.mxu0  ;;  %v2646_v7 = vrot.slane %v8721_v3, 1 }
 0x230   : > { %v9919_v35 = vadd.f32 %v2584_v49, %v1615_v40  ;;  %7834 = vmatmul.msk.bf16.gmra.mxu3 %vm898_vm7, %v2643_v10  ;;  %v9929_v10 = vpop.permute.xlu1 %1583 }
 0x231   : > { %v1389_v53 = vpop.f32.mrf.mxu2  ;;  %12467 = vst [vmem:[#allocation88_spill] sm:$0xff] %v9929_v10 }
 0x232   : > { %12464 = vst [vmem:[#allocation85_spill] sm:$0xff] %v9919_v35  ;;  %v1424_v38 = vadd.f32 %v1389_v53, %v9346_v33  ;;  %7852 = vmatmul.msk.bf16.gmra.mxu0 %vm898_vm7, %v2936_v2  ;;  %v2647_v33 = vsel %vm2628_vm11, %v2644_v22, %v2646_v7  ;;  %v8722_v2 = vld [vmem:[#allocation2 + $0x60] sm:$0xff] }
 0x233   : > { %v2041_v9 = vpop.f32.mrf.mxu3  ;;  %v2937_v53 = vrot.slane %v8722_v2, 1 }
 0x234   : > { %v2161_v28 = vadd.f32 %v2160_v30, %v2041_v9  ;;  %v1616_v55 = vmul.f32 %v9922_v52, %v1424_v38 }
 0x236   : > { %v2585_v36 = vadd.f32 %v2550_v6, %v2161_v28  ;;  %v2938_v28 = vsel %vm2628_vm11, %v2935_v26, %v2937_v53 }
 0x237   : > { %v3013_v48 = vpop.f32.mrf.mxu0 }
 0x238   : > { %v9927_v40 = vadd.f32 %v2585_v36, %v1616_v55 }
 0x239   : > { %v1391_v49 = vpop.f32.mrf.mxu2 }
 0x23a   : > { %12466 = vst [vmem:[#allocation87_spill] sm:$0xff] %v9927_v40  ;;  %v1425_v35 = vadd.f32 %v1391_v49, %v12468_v15  ;;  %v8723_v49 = vld [vmem:[#allocation2 + $0x58] sm:$0xff] }
 0x23b   : > { %v2043_v27 = vpop.f32.mrf.mxu3 }
 0x23c   : > { %v2163_v30 = vadd.f32 %v2162_v58, %v2043_v27  ;;  %v1617_v38 = vmul.f32 %v9929_v10, %v1425_v35  ;;  %v2648_v58 = vrot.slane %v8723_v49, 1  ;;  %v9944_v35 = vld [vmem:[%s12284_s2] ss:$0 sm:$0xff] }
 0x23e   : > { %v2586_v6 = vadd.f32 %v2552_v23, %v2163_v30  ;;  %7819 = vmatmul.msk.bf16.gmra.mxu2 %vm898_vm7, %v2647_v33  ;;  %v2649_v30 = vsel %vm2628_vm11, %v2646_v7, %v2648_v58 }
 0x23f   : > { %v3016_v9 = vpop.f32.mrf.mxu0 }
 0x240   : > { %v9936_v55 = vadd.f32 %v2586_v6, %v1617_v38  ;;  %7835 = vmatmul.msk.bf16.gmra.mxu3 %vm898_vm7, %v2645_v45  ;;  %v8724_v38 = vld [vmem:[#allocation2 + $0x68] sm:$0xff] }
 0x241   : > { %v2722_v15 = vpop.f32.mrf.mxu2  ;;  %v2939_v6 = vrot.slane %v8724_v38, 1 }
 0x242   : > { %12469 = vst [vmem:[#allocation5_spill] sm:$0xff] %v9936_v55  ;;  %7853 = vmatmul.msk.bf16.gmra.mxu0 %vm898_vm7, %v2938_v28 }
 0x243   : > { %v2832_v36 = vpop.f32.mrf.mxu3 }
 0x244   : > { %v2833_v22 = vadd.f32 %v2832_v36, %v2722_v15 }
 0x246   : > { %v3091_v3 = vadd.f32 %v3011_v63, %v2833_v22 }
 0x247   : > { %v3018_v27 = vpop.f32.mrf.mxu0 }
 0x248   : > { %v3283_v23 = vmul.f32 %v9412_v4, %v3091_v3  ;;  %v2940_v3 = vsel %vm2628_vm11, %v2937_v53, %v2939_v6  ;;  %v9962_v53 = vld [vmem:[#allocation2 + $0x60] sm:$0xff]  ;;  %v9996_v4 = vld [vmem:[#allocation2 + $0x68] sm:$0xff] }
 0x249   : > { %v2724_v26 = vpop.f32.mrf.mxu2 }
 0x24a   : > { %v3315_v2 = vadd.f32 %v3283_v23, %v9393_v31 }
 0x24b   : > { %v2834_v45 = vpop.f32.mrf.mxu3 }
 0x24c   : > { %v9949_v63 = vadd.f32 %v9944_v35, %v3315_v2  ;;  %v2835_v28 = vadd.f32 %v2834_v45, %v2724_v26 }
 0x24e   : > { %v3382_v15 = vsub.f32 0.0, %v9949_v63  ;;  %v3092_v36 = vadd.f32 %v3013_v48, %v2835_v28  ;;  %7820 = vmatmul.msk.bf16.gmra.mxu2 %vm898_vm7, %v2649_v30  ;;  %v12336_v28 = vrot.slane %v9962_v53, 1 }
 0x24f   : > { %v3021_v22 = vpop.f32.mrf.mxu0 }
 0x250   : > { %v3414_v49 = vmul.f32 1.442695, %v3382_v15  ;;  %v3284_v31 = vmul.f32 %v9441_v59, %v3092_v36  ;;  %7836 = vmatmul.msk.bf16.gmra.mxu3 %vm898_vm7, %v2647_v33 }
 0x251   : > { %v2727_v7 = vpop.f32.mrf.mxu2 }
 0x252   : > { %8448 = vpow2.f32 %v3414_v49  ;;  %v3316_v23 = vadd.f32 %v3284_v31, %v9414_v46  ;;  %7854 = vmatmul.msk.bf16.gmra.mxu0 %vm898_vm7, %v2940_v3 }
 0x253   : > { %v2837_v26 = vpop.f32.mrf.mxu3 }
 0x254   : > { %v9959_v2 = vadd.f32 %v9944_v35, %v3316_v23  ;;  %v2838_v48 = vadd.f32 %v2837_v26, %v2727_v7  ;;  %v9974_v23 = vld [vmem:[#allocation2 + $0x70] sm:$0xff] }
 0x255   : > { %v12341_v26 = vrot.slane %v9974_v23, 1 }
 0x256   : > { %v3383_v45 = vsub.f32 0.0, %v9959_v2  ;;  %v3093_v38 = vadd.f32 %v3016_v9, %v2838_v48  ;;  %v9972_v9 = vsel %vm2628_vm11, %v2648_v58, %v12336_v28  ;;  %v12470_v28 = vld [vmem:[#allocation15_spill] sm:$0xff] }
 0x257   : > { %v9965_v15 = vpop.f32.mrf.mxu0  ;;  %v2942_v58 = vsel %vm2628_vm11, %v2939_v6, %v12341_v26 }
 0x258   : > { %v8449_v33 = vpop.eup %8448  ;;  %v3416_v36 = vmul.f32 1.442695, %v3383_v45  ;;  %v3285_v46 = vmul.f32 %v9446_v39, %v3093_v38 }
 0x259   : > { %v3478_v49 = vadd.f32 1.0, %v8449_v33  ;;  %v2729_v3 = vpop.f32.mrf.mxu2 }
 0x25a   : > { %8450 = vpow2.f32 %v3416_v36  ;;  %v3317_v31 = vadd.f32 %v3285_v46, %v9435_v43 }
 0x25b   : > { %8452 = vrcp.f32 %v3478_v49  ;;  %v2839_v7 = vpop.f32.mrf.mxu3  ;;  %v3519_v26 = vand.u32 2147483647, %v3478_v49  ;;  %vm3515_vm13 = vweird.f32 %v3478_v49 }
 0x25c   : > { %v9978_v48 = vadd.f32 %v9944_v35, %v3317_v31  ;;  %v2840_v45 = vadd.f32 %v2839_v7, %v2729_v3 }
 0x25d   : > { %vm3520_vm15 = vcmp.eq.f32.partialorder %v3519_v26, 8.507059e+37 }
 0x25e   : > { %v3384_v38 = vsub.f32 0.0, %v9978_v48  ;;  %v3094_v33 = vadd.f32 %v3018_v27, %v2840_v45  ;;  %7821 = vmatmul.msk.bf16.gmra.mxu2 %vm898_vm7, %v9972_v9  ;;  %v12471_v27 = vld [vmem:[#allocation13_spill] sm:$0xff] }
 0x25f   : > { %v9983_v43 = vpop.f32.mrf.mxu0 }
 0x260   : > { %v8451_v36 = vpop.eup %8450  ;;  %v3418_v46 = vmul.f32 1.442695, %v3384_v38  ;;  %v3286_v10 = vmul.f32 %v12470_v28, %v3094_v33  ;;  %7837 = vmatmul.msk.bf16.gmra.mxu3 %vm898_vm7, %v2649_v30  ;;  %v3521_v33 = vand.u32 2147483648, %v3478_v49 }
 0x261   : > { %v8453_v31 = vpop.eup %8452  ;;  %v3479_v3 = vadd.f32 1.0, %v8451_v36  ;;  %v2732_v7 = vpop.f32.mrf.mxu2 }
 0x262   : > { %v3511_v52 = vmul.f32 %v8453_v31, %v3478_v49  ;;  %8454 = vpow2.f32 %v3418_v46  ;;  %v3318_v45 = vadd.f32 %v3286_v10, %v12471_v27  ;;  %7855 = vmatmul.msk.bf16.gmra.mxu0 %vm898_vm7, %v2942_v58  ;;  %vm3516_vm12 = vweird.f32 %v8453_v31 }
 0x263   : > { %8456 = vrcp.f32 %v3479_v3  ;;  %v2842_v39 = vpop.f32.mrf.mxu3  ;;  %vm3517_vm14 = vmor %vm3515_vm13, %vm3516_vm12  ;;  %v12473_v49 = vrot.slane %v9962_v53, 1  ;;  %vm3530_vm3 = vweird.f32 %v3479_v3 }
 0x264   : > { %v3512_v59 = vsub.f32 1.0, %v3511_v52  ;;  %v9993_v6 = vadd.f32 %v9944_v35, %v3318_v45  ;;  %v2843_v38 = vadd.f32 %v2842_v39, %v2732_v7  ;;  %v3522_v7 = vor.u32 1.1754944e-38, %v3521_v33 }
 0x266   : > { %v3513_v28 = vmul.f32 %v8453_v31, %v3512_v59  ;;  %v3385_v30 = vsub.f32 0.0, %v9993_v6  ;;  %v3095_v36 = vadd.f32 %v3021_v22, %v2843_v38 }
 0x267   : > { %v9999_v46 = vpop.f32.mrf.mxu0 }
 0x268   : > { %v8455_v58 = vpop.eup %8454  ;;  %v3514_v27 = vadd.f32 %v8453_v31, %v3513_v28  ;;  %v3420_v52 = vmul.f32 1.442695, %v3385_v30  ;;  %v3287_v45 = vmul.f32 %v9505_v34, %v3095_v36  ;;  %v12472_v28 = vrot.slane %v9996_v4, 1  ;;  %v10012_v36 = vld [vmem:[#allocation2 + $0x78] sm:$0xff] }
 0x269   : > { %v8457_v39 = vpop.eup %8456  ;;  %v10002_v59 = vadd.f32 1.0, %v8455_v58  ;;  %v2734_v55 = vpop.f32.mrf.mxu2  ;;  %v12344_v33 = vrot.slane %v10012_v36, 1  ;;  %v3534_v58 = vand.u32 2147483647, %v3479_v3 }
 0x26a   : > { %v3518_v40 = vsel %vm3517_vm14, %v8453_v31, %v3514_v27  ;;  %v3526_v22 = vmul.f32 %v8457_v39, %v3479_v3  ;;  %8458 = vpow2.f32 %v3420_v52  ;;  %v10010_v30 = vsel %vm2628_vm11, %v12473_v49, %v12472_v28 }
 0x26b   : > { %v3523_v38 = vsel %vm3520_vm15, %v3522_v7, %v3518_v40  ;;  %8460 = vrcp.f32 %v10002_v59  ;;  %v2844_v10 = vpop.f32.mrf.mxu3  ;;  %v3319_v40 = vadd.f32 %v3287_v45, %v9485_v0  ;;  %v3536_v27 = vand.u32 2147483648, %v3479_v3 }
 0x26c   : > { %v3990_v31 = vmul.f32 %v3523_v38, %v9949_v63  ;;  %v3527_v26 = vsub.f32 1.0, %v3526_v22  ;;  %v2845_v52 = vadd.f32 %v2844_v10, %v2734_v55  ;;  %vm3531_vm2 = vweird.f32 %v8457_v39 }
 0x26d   : > { %v10018_v53 = vadd.f32 %v9944_v35, %v3319_v40  ;;  %v12474_v63 = vrot.slane %v9974_v23, 1  ;;  %vm3535_vm4 = vcmp.eq.f32.partialorder %v3534_v58, 8.507059e+37  ;;  %vm3532_vm9 = vmor %vm3530_vm3, %vm3531_vm2  ;;  %v3537_v38 = vor.u32 1.1754944e-38, %v3536_v27  ;;  %v10039_v58 = vld [vmem:[#allocation2 + $0x70] sm:$0xff] }
 0x26e   : > { %v4022_v7 = vpack.c.bf16 %v3990_v31, %v3990_v31  ;;  %v3528_v34 = vmul.f32 %v8457_v39, %v3527_v26  ;;  %7822 = vmatmul.msk.bf16.gmra.mxu2 %vm898_vm7, %v10010_v30  ;;  %v3096_v28 = vadd.f32 %v9965_v15, %v2845_v52  ;;  %v12475_v26 = vld [vmem:[#allocation20_spill] sm:$0xff]  ;;  %v12347_v27 = vrot.slane %v10039_v58, 1 }
 0x26f   : > { %v10023_v49 = vpop.f32.mrf.mxu0  ;;  %v2944_v0 = vsel %vm2628_vm11, %v12474_v63, %v12344_v33  ;;  %v3386_v31 = vsub.f32 0.0, %v10018_v53  ;;  %vm3545_vm13 = vweird.f32 %v10002_v59 }
 0x270   : > { %v8459_v55 = vpop.eup %8458  ;;  %v4055_v10 = vshrl.u32 %v4022_v7, 16  ;;  %v3529_v45 = vadd.f32 %v8457_v39, %v3528_v34  ;;  %7838 = vmatmul.msk.bf16.gmra.mxu3 %vm898_vm7, %v9972_v9  ;;  %v3288_v40 = vmul.f32 %v12475_v26, %v3096_v28  ;;  %v4058_v63 = vshll.u32 %v4022_v7, 16 }
 0x271   : > { %v8461_v22 = vpop.eup %8460  ;;  %v10032_v15 = vadd.f32 1.0, %v8459_v55  ;;  %v2737_v23 = vpop.f32.mrf.mxu2  ;;  %v3422_v7 = vmul.f32 1.442695, %v3386_v31  ;;  %v12478_v31 = vrot.slane %v9996_v4, 1 }
 0x272   : > { %v4057_v52 = vrot.slane %v4055_v10, 7  ;;  %v3533_v33 = vsel %vm3532_vm9, %v8457_v39, %v3529_v45  ;;  %v3541_v34 = vmul.f32 %v8461_v22, %v10002_v59  ;;  %7856 = vmatmul.msk.bf16.gmra.mxu0 %vm898_vm7, %v2944_v0  ;;  %v3549_v10 = vand.u32 2147483647, %v10002_v59  ;;  %v12476_v45 = vld [vmem:[#allocation18_spill] sm:$0xff] }
 0x273   : > { %v3538_v3 = vsel %vm3535_vm4, %v3537_v38, %v3533_v33  ;;  %8462 = vrcp.f32 %v10032_v15  ;;  %v2847_v9 = vpop.f32.mrf.mxu3  ;;  %vm3546_vm12 = vweird.f32 %v8461_v22  ;;  %v3551_v39 = vand.u32 2147483648, %v10002_v59  ;;  %v8730_v33 = vld [vmem:[#allocation2 + $0x8] sm:$0xf] }
 0x274   : > { %v4060_v55 = vor.u32 %v4058_v63, %v4057_v52  ;;  %v3991_v25 = vmul.f32 %v3538_v3, %v9959_v2  ;;  %v3542_v28 = vsub.f32 1.0, %v3541_v34  ;;  %v3320_v0 = vadd.f32 %v3288_v40, %v12476_v45  ;;  %vm3547_vm14 = vmor %vm3545_vm13, %vm3546_vm12 }
 0x275   : > { %v2848_v11 = vadd.f32 %v2847_v9, %v2737_v23  ;;  %8464 = vpow2.f32 %v3422_v7  ;;  %v10057_v40 = vsel %vm2628_vm11, %v12478_v31, %v12347_v27  ;;  %v4061_v59 = vrot.slane %v4057_v52, 4 }
 0x276   : > { %v4374_v26 = vsel %vm8856_vm6, %v4060_v55, %v8730_v33  ;;  %v4023_v60 = vpack.c.bf16 %v3991_v25, %v3991_v25  ;;  %v3543_v51 = vmul.f32 %v8461_v22, %v3542_v28  ;;  %v10050_v2 = vadd.f32 %v9944_v35, %v3320_v0 }
 0x277   : > { %4375 = vst [vmem:[#allocation2 + $0x8] sm:$0xf] %v4374_v26  ;;  %v10059_v63 = vpop.f32.mrf.mxu0  ;;  %vm3550_vm6 = vcmp.eq.f32.partialorder %v3549_v10, 8.507059e+37  ;;  %v3097_v26 = vadd.f32 %v9983_v43, %v2848_v11  ;;  %v3552_v3 = vor.u32 1.1754944e-38, %v3551_v39  ;;  %v3564_v9 = vand.u32 2147483647, %v10032_v15 }
 0x278   : > { %v4063_v34 = vshrl.u32 %v4023_v60, 16  ;;  %v3544_v25 = vadd.f32 %v8461_v22, %v3543_v51  ;;  %v3387_v55 = vsub.f32 0.0, %v10050_v2  ;;  %v4066_v7 = vshll.u32 %v4023_v60, 16  ;;  %v10067_v43 = vld [vmem:[#allocation2 + $0x80] sm:$0xff]  ;;  %v12479_v60 = vld [vmem:[#allocation22_spill] sm:$0xff] }
 0x279   : > { %v8463_v23 = vpop.eup %8462  ;;  %v2739_v4 = vpop.f32.mrf.mxu2  ;;  %v3289_v10 = vmul.f32 %v9571_v16, %v3097_v26  ;;  %v2945_v52 = vrot.slane %v10067_v43, 1  ;;  %v3566_v27 = vand.u32 2147483648, %v10032_v15  ;;  %vm3560_vm2 = vweird.f32 %v10032_v15 }
 0x27a   : > { %v4065_v28 = vrot.slane %v4063_v34, 7  ;;  %v3548_v45 = vsel %vm3547_vm14, %v8461_v22, %v3544_v25  ;;  %v3556_v0 = vmul.f32 %v8463_v23, %v10032_v15  ;;  %v3424_v51 = vmul.f32 1.442695, %v3387_v55 }
 0x27b   : > { %v3553_v33 = vsel %vm3550_vm6, %v3552_v3, %v3548_v45  ;;  %v2849_v11 = vpop.f32.mrf.mxu3  ;;  %v8465_v34 = vpop.eup %8464  ;;  %vm3561_vm15 = vweird.f32 %v8463_v23  ;;  %v3321_v22 = vadd.f32 %v3289_v10, %v12479_v60  ;;  %vm3565_vm4 = vcmp.eq.f32.partialorder %v3564_v9, 8.507059e+37 }
 0x27c   : > { %v4068_v39 = vor.u32 %v4066_v7, %v4065_v28  ;;  %v3992_v38 = vmul.f32 %v3553_v33, %v9978_v48  ;;  %v3557_v31 = vsub.f32 1.0, %v3556_v0  ;;  %8466 = vpow2.f32 %v3424_v51  ;;  %vm3562_vm3 = vmor %vm3560_vm2, %vm3561_vm15 }
 0x27d   : > { %v2850_v25 = vadd.f32 %v2849_v11, %v2739_v4  ;;  %v10075_v16 = vadd.f32 1.0, %v8465_v34  ;;  %v10081_v48 = vadd.f32 %v9944_v35, %v3321_v22 }
 0x27e   : > { %v4069_v26 = vsel %vm8846_vm5, %v4061_v59, %v4068_v39  ;;  %v4024_v55 = vpack.c.bf16 %v3992_v38, %v3992_v38  ;;  %v3558_v45 = vmul.f32 %v8463_v23, %v3557_v31  ;;  %7823 = vmatmul.msk.bf16.gmra.mxu2 %vm898_vm7, %v10057_v40  ;;  %v12481_v59 = vrot.slane %v10012_v36, 1 }
 0x27f   : > { %4376 = vst.msk [vmem:[#allocation2 + $0xc] sm:$0xf] %vm376_vm1, %v4069_v26  ;;  %v3098_v7 = vadd.f32 %v9999_v46, %v2850_v25  ;;  %v10084_v0 = vpop.f32.mrf.mxu0  ;;  %8468 = vrcp.f32 %v10075_v16  ;;  %v3567_v46 = vor.u32 1.1754944e-38, %v3566_v27  ;;  %v3388_v10 = vsub.f32 0.0, %v10081_v48 }
 0x280   : > { %v2946_v4 = vsel %vm2628_vm11, %v12481_v59, %v2945_v52  ;;  %v4072_v33 = vshrl.u32 %v4024_v55, 16  ;;  %v3559_v51 = vadd.f32 %v8463_v23, %v3558_v45  ;;  %7839 = vmatmul.msk.bf16.gmra.mxu3 %vm898_vm7, %v10010_v30  ;;  %v4075_v36 = vshll.u32 %v4024_v55, 16  ;;  %v8732_v55 = vld [vmem:[#allocation2 + $0x78] sm:$0xff] }
 0x281   : > { %v2742_v11 = vpop.f32.mrf.mxu2  ;;  %v3290_v31 = vmul.f32 %v9591_v54, %v3098_v7  ;;  %v3426_v60 = vmul.f32 1.442695, %v3388_v10  ;;  %v4070_v25 = vrot.slane %v4065_v28, 4  ;;  %vm3575_vm9 = vweird.f32 %v10075_v16 }
 0x282   : > { %v4074_v39 = vrot.slane %v4072_v33, 7  ;;  %v3563_v38 = vsel %vm3562_vm3, %v8463_v23, %v3559_v51  ;;  %7857 = vmatmul.msk.bf16.gmra.mxu0 %vm898_vm7, %v2946_v4  ;;  %v8467_v15 = vpop.eup %8466  ;;  %v10103_v23 = vrot.slane %v8732_v55, 1  ;;  %v3579_v33 = vand.u32 2147483647, %v10075_v16 }
 0x283   : > { %v3568_v34 = vsel %vm3565_vm4, %v3567_v46, %v3563_v38  ;;  %v2852_v22 = vpop.f32.mrf.mxu3  ;;  %v10100_v9 = vadd.f32 1.0, %v8467_v15  ;;  %8470 = vpow2.f32 %v3426_v60  ;;  %v3322_v27 = vadd.f32 %v3290_v31, %v9579_v14 }
 0x284   : > { %v4077_v30 = vor.u32 %v4075_v36, %v4074_v39  ;;  %v3993_v26 = vmul.f32 %v3568_v34, %v9993_v6  ;;  %v2853_v45 = vadd.f32 %v2852_v22, %v2742_v11  ;;  %v3581_v36 = vand.u32 2147483648, %v10075_v16 }
 0x285   : > { %v8469_v7 = vpop.eup %8468  ;;  %8472 = vrcp.f32 %v10100_v9  ;;  %v10116_v46 = vadd.f32 %v9944_v35, %v3322_v27  ;;  %v12482_v31 = vrot.slane %v10039_v58, 1  ;;  %vm10133_vm13 = vcmp.eq.f32.partialorder %v3579_v33, 8.507059e+37 }
 0x286   : > { %v4078_v59 = vsel %vm8846_vm5, %v4070_v25, %v4077_v30  ;;  %v4025_v4 = vpack.c.bf16 %v3993_v26, %v3993_v26  ;;  %v10108_v28 = vld [vmem:[#allocation2 + $0x8] sm:$0xff]  ;;  %v3571_v6 = vmul.f32 %v8469_v7, %v10075_v16  ;;  %v3099_v10 = vadd.f32 %v10023_v49, %v2853_v45 }
 0x287   : > { %4377 = vst.msk [vmem:[#allocation2 + $0x10] sm:$0xf] %vm376_vm1, %v4078_v59  ;;  %v10113_v14 = vpop.f32.mrf.mxu0  ;;  %7925 = vmatmul.msk.bf16.vlgmr.msra.gmra.mxu1 %vm898_vm7, %v10108_v28  ;;  %v10127_v15 = vsel %vm2628_vm11, %v12482_v31, %v10103_v23  ;;  %v3389_v49 = vsub.f32 0.0, %v10116_v46  ;;  %v4079_v30 = vrot.slane %v4074_v39, 4  ;;  %vm3576_vm12 = vweird.f32 %v8469_v7 }
 0x288   : > { %v4081_v51 = vshrl.u32 %v4025_v4, 16  ;;  %v3572_v11 = vsub.f32 1.0, %v3571_v6  ;;  %v4084_v60 = vshll.u32 %v4025_v4, 16  ;;  %v3291_v22 = vmul.f32 %v9616_v21, %v3099_v10  ;;  %vm3577_vm6 = vmor %vm3575_vm9, %vm3576_vm12 }
 0x289   : > { %v2744_v38 = vpop.f32.mrf.mxu2  ;;  %v8471_v25 = vpop.eup %8470  ;;  %v3594_v59 = vand.u32 2147483647, %v10100_v9  ;;  %v3428_v4 = vmul.f32 1.442695, %v3389_v49  ;;  %vm3590_vm14 = vweird.f32 %v10100_v9 }
 0x28a   : > { %v10129_v34 = vrot.slane %v4081_v51, 7  ;;  %v3573_v26 = vmul.f32 %v8469_v7, %v3572_v11  ;;  %v10139_v6 = vadd.f32 1.0, %v8471_v25  ;;  %v3323_v39 = vadd.f32 %v3291_v22, %v9605_v20  ;;  %v10143_v11 = vld [vmem:[#allocation2 + $0x88] sm:$0xff] }
 0x28b   : > { %v2854_v45 = vpop.f32.mrf.mxu3  ;;  %v8473_v58 = vpop.eup %8472  ;;  %v12349_v33 = vrot.slane %v10143_v11, 1  ;;  %v3596_v25 = vand.u32 2147483648, %v10100_v9  ;;  %vm10160_vm15 = vcmp.eq.f32.partialorder %v3594_v59, 8.507059e+37 }
 0x28c   : > { %v4086_v55 = vor.u32 %v4084_v60, %v10129_v34  ;;  %v3574_v51 = vadd.f32 %v8469_v7, %v3573_v26  ;;  %v3586_v10 = vmul.f32 %v8473_v58, %v10100_v9  ;;  %v3582_v60 = vor.u32 1.1754944e-38, %v3581_v36 }
 0x28d   : > { %8474 = vrcp.f32 %v10139_v6  ;;  %v2855_v26 = vadd.f32 %v2854_v45, %v2744_v38  ;;  %vm3591_vm2 = vweird.f32 %v8473_v58  ;;  %v2948_v27 = vsel %vm2628_vm11, %v2945_v52, %v12349_v33  ;;  %v10179_v45 = vld [vmem:[#allocation2 + $0x80] sm:$0xff] }
 0x28e   : > { %v4087_v31 = vsel %vm8846_vm5, %v4079_v30, %v4086_v55  ;;  %7824 = vmatmul.msk.bf16.gmra.mxu2 %vm898_vm7, %v10127_v15  ;;  %v3578_v20 = vsel %vm3577_vm6, %v8469_v7, %v3574_v51  ;;  %v3587_v49 = vsub.f32 1.0, %v3586_v10  ;;  %8476 = vpow2.f32 %v3428_v4  ;;  %v10169_v7 = vld [vmem:[#allocation2 + $0x8] sm:$0xff]   ;;  %vm3592_vm3 = vmor %vm3590_vm14, %vm3591_vm2 }
 0x28f   : > { %4378 = vst.msk [vmem:[#allocation2 + $0x14] sm:$0xf] %vm376_vm1, %v4087_v31  ;;  %v10156_v22 = vpop.f32.mrf.mxu0  ;;  %v3583_v16 = vsel %vm10133_vm13, %v3582_v60, %v3578_v20  ;;  %v10165_v30 = vadd.f32 %v9944_v35, %v3323_v39  ;;  %v3597_v59 = vor.u32 1.1754944e-38, %v3596_v25  ;;  %v3100_v38 = vadd.f32 %v10059_v63, %v2855_v26  ;;  %v7961_v25 = vld [vmem:[%s12285_s3 + $0xc] sm:$0x3] }
 0x290   : > { %7840 = vmatmul.msk.bf16.gmra.mxu3 %vm898_vm7, %v10057_v40  ;;  %v3994_v55 = vmul.f32 %v3583_v16, %v10018_v53  ;;  %v3588_v4 = vmul.f32 %v8473_v58, %v3587_v49  ;;  %v3609_v31 = vand.u32 2147483647, %v10139_v6  ;;  %v4088_v52 = vrot.slane %v10129_v34, 4  ;;  %v12487_v16 = vld [vmem:[#allocation32_spill] sm:$0xff] }
 0x291   : > { %v2747_v51 = vpop.f32.mrf.mxu2  ;;  %v3390_v10 = vsub.f32 0.0, %v10165_v30  ;;  %v3611_v63 = vand.u32 2147483648, %v10139_v6  ;;  %v3292_v26 = vmul.f32 %v12487_v16, %v3100_v38  ;;  %v4931_v21 = vsel %vm947_vm0, %v7961_v25, 0 }
 0x292   : > { %7858 = vmatmul.msk.bf16.gmra.mxu0 %vm898_vm7, %v2948_v27  ;;  %v4026_v53 = vpack.c.bf16 %v3994_v55, %v3994_v55  ;;  %v3589_v39 = vadd.f32 %v8473_v58, %v3588_v4  ;;  %4940 = vmatpush.bf16.msrb.mxu3 %v4931_v21  ;;  %vm3605_vm4 = vweird.f32 %v10139_v6  ;;  %vm10204_vm9 = vcmp.eq.f32.partialorder %v3609_v31, 8.507059e+37  ;;  %v12490_v31 = vld [vmem:[#allocation29_spill] sm:$0xff] }
 0x293   : > { %v2857_v60 = vpop.f32.mrf.mxu3  ;;  %v8475_v20 = vpop.eup %8474  ;;  %v3430_v49 = vmul.f32 1.442695, %v3390_v10  ;;  %v3612_v36 = vor.u32 1.1754944e-38, %v3611_v63 }
 0x294   : > { %v8477_v55 = vpop.eup %8476  ;;  %v4090_v4 = vshrl.u32 %v4026_v53, 16  ;;  %v3593_v27 = vsel %vm3592_vm3, %v8473_v58, %v3589_v39  ;;  %v3601_v33 = vmul.f32 %v8475_v20, %v10139_v6  ;;  %v2858_v43 = vadd.f32 %v2857_v60, %v2747_v51 }
 0x295   : > { %v4093_v34 = vshll.u32 %v4026_v53, 16  ;;  %v3598_v9 = vsel %vm10160_vm15, %v3597_v59, %v3593_v27  ;;  %v10197_v40 = vadd.f32 1.0, %v8477_v55  ;;  %8478 = vpow2.f32 %v3430_v49 }
 0x296   : > { %v10200_v54 = vld [vmem:[#allocation2 + $0x10] sm:$0xff]  ;;  %v4092_v18 = vrot.slane %v4090_v4, 7  ;;  %v3995_v10 = vmul.f32 %v3598_v9, %v10050_v2  ;;  %v3602_v38 = vsub.f32 1.0, %v3601_v33  ;;  %vm3606_vm12 = vweird.f32 %v8475_v20 }
 0x297   : > { %8480 = vrcp.f32 %v10197_v40  ;;  %7926 = vmatmul.msk.bf16.gmra.mxu1 %vm898_vm7, %v10200_v54  ;;  %v10211_v51 = vpop.f32.mrf.mxu0  ;;  %v3624_v33 = vand.u32 2147483647, %v10197_v40  ;;  %v3626_v39 = vand.u32 2147483648, %v10197_v40  ;;  %v3324_v60 = vadd.f32 %v3292_v26, %v12490_v31  ;;  %vm3607_vm13 = vmor %vm3605_vm4, %vm3606_vm12  ;;  %v8042_v31 = vld [vmem:[%s12285_s3 + $0x2] sm:$0x3] }
 0x298   : > { %v4095_v59 = vor.u32 %v4093_v34, %v4092_v18  ;;  %v4027_v53 = vpack.c.bf16 %v3995_v10, %v3995_v10  ;;  %v3603_v2 = vmul.f32 %v8475_v20, %v3602_v38  ;;  %v3101_v63 = vadd.f32 %v10084_v0, %v2858_v43  ;;  %v4443_v34 = vld [vmem:[%s12285_s3] sm:$0x3]  ;;  %v8043_v0 = vld [vmem:[%s12285_s3 + $0x8] sm:$0x3] }
 0x299   : > { %v2749_v21 = vpop.f32.mrf.mxu2  ;;  %v10229_v43 = vadd.f32 %v9944_v35, %v3324_v60  ;;  %v12491_v9 = vrot.slane %v10179_v45, 1  ;;  %vm3620_vm6 = vweird.f32 %v10197_v40  ;;  %v5242_v58 = vshrl.u32 %v10169_v7, 16 }
 0x29a   : > { %v4096_v25 = vsel %vm8846_vm5, %v4088_v52, %v4095_v59  ;;  %v4099_v49 = vshrl.u32 %v4027_v53, 16  ;;  %v4102_v55 = vshll.u32 %v4027_v53, 16  ;;  %v3604_v4 = vadd.f32 %v8475_v20, %v3603_v2 }
 0x29b   : > { %v2859_v27 = vpop.f32.mrf.mxu3  ;;  %4379 = vst.msk [vmem:[#allocation2 + $0x18] sm:$0xf] %vm376_vm1, %v4096_v25  ;;  %v3293_v52 = vmul.f32 %v9675_v61, %v3101_v63  ;;  %v2659_v6 = vsel %vm2628_vm11, %v10103_v23, %v12491_v9  ;;  %v8479_v10 = vpop.eup %8478  ;;  %v4677_v53 = vsel %vm947_vm0, %v4443_v34, 0  ;;  %v5422_v2 = vsel %vm947_vm0, %v8043_v0, 0 }
 0x29c   : > { %v2860_v26 = vadd.f32 %v2859_v27, %v2749_v21  ;;  %v10236_v38 = vrot.slane %v4099_v49, 7  ;;  %v3608_v59 = vsel %vm3607_vm13, %v8475_v20, %v3604_v4  ;;  %v10245_v63 = vadd.f32 1.0, %v8479_v10  ;;  %4686 = vmatpush.bf16.msrb.mxu2 %v4677_v53  ;;  %5431 = vmatpush.bf16.msrb.mxu0 %v5422_v2 }
 0x29d   : > { %v8481_v60 = vpop.eup %8480  ;;  %v3613_v21 = vsel %vm10204_vm9, %v3612_v36, %v3608_v59  ;;  %v5541_v25 = vsel %vm947_vm0, %v8042_v31, 0  ;;  %v3391_v20 = vsub.f32 0.0, %v10229_v43  ;;  %v4097_v49 = vrot.slane %v4092_v18, 4  ;;  %v12495_v59 = vld [vmem:[#allocation35_spill] sm:$0xff] }
 0x29e   : > { %v4104_v4 = vor.u32 %v4102_v55, %v10236_v38  ;;  %v3996_v27 = vmul.f32 %v3613_v21, %v10081_v48  ;;  %v3616_v34 = vmul.f32 %v8481_v60, %v10197_v40  ;;  %5550 = vmatpush.bf16.msrb.mxu1 %v5541_v25  ;;  %7825 = vmatmul.msk.bf16.gmra.mxu2 %vm898_vm7, %v2659_v6  ;;  %8482 = vrcp.f32 %v10245_v63 }
 0x29f   : > { %v12492_v18 = vshll.u32 %v10169_v7, 16  ;;  %vm10264_vm14 = vcmp.eq.f32.partialorder %v3624_v33, 8.507059e+37  ;;  %v3627_v10 = vor.u32 1.1754944e-38, %v3626_v39  ;;  %v3325_v53 = vadd.f32 %v3293_v52, %v12495_v59  ;;  %v10271_v31 = vpop.f32.mrf.mxu0 }
 0x2a0   : > { %7841 = vmatmul.msk.bf16.gmra.mxu3 %vm898_vm7, %v10127_v15  ;;  %v4105_v48 = vsel %vm8846_vm5, %v4097_v49, %v4104_v4  ;;  %v4028_v55 = vpack.c.bf16 %v3996_v27, %v3996_v27  ;;  %v3617_v0 = vsub.f32 1.0, %v3616_v34  ;;  %v3432_v15 = vmul.f32 1.442695, %v3391_v20 }
 0x2a1   : > { %v10260_v36 = vrot.slane %v12492_v18, 1  ;;  %v2752_v6 = vpop.f32.mrf.mxu2  ;;  %4380 = vst.msk [vmem:[#allocation2 + $0x1c] sm:$0xf] %vm376_vm1, %v4105_v48  ;;  %v3102_v2 = vadd.f32 %v10113_v14, %v2860_v26  ;;  %v4106_v21 = vrot.slane %v10236_v38, 4  ;;  %vm3621_vm15 = vweird.f32 %v8481_v60 }
 0x2a2   : > { %v4108_v25 = vshrl.u32 %v4028_v55, 16  ;;  %v3618_v49 = vmul.f32 %v8481_v60, %v3617_v0  ;;  %8484 = vpow2.f32 %v3432_v15  ;;  %v10275_v4 = vadd.f32 %v9944_v35, %v3325_v53  ;;  %vm3622_vm3 = vmor %vm3620_vm6, %vm3621_vm15  ;;  %v12496_v0 = vld [vmem:[#allocation38_spill] sm:$0xff]  ;;  %v12497_v53 = vld [vmem:[#allocation33_spill] sm:$0xff] }
 0x2a3   : > { %v2862_v33 = vpop.f32.mrf.mxu3  ;;  %v3294_v27 = vmul.f32 %v9702_v56, %v3102_v2  ;;  %v4111_v52 = vshll.u32 %v4028_v55, 16  ;;  %vm3635_vm2 = vweird.f32 %v10245_v63  ;;  %v3639_v14 = vand.u32 2147483647, %v10245_v63 }
 0x2a4   : > { %v2863_v39 = vadd.f32 %v2862_v33, %v2752_v6  ;;  %v10278_v20 = vrot.slane %v4108_v25, 7  ;;  %v3619_v34 = vadd.f32 %v8481_v60, %v3618_v49  ;;  %v8483_v26 = vpop.eup %8482  ;;  %v3392_v38 = vsub.f32 0.0, %v10275_v4  ;;  %v12498_v33 = vld [vmem:[#allocation31_spill] sm:$0xff] }
 0x2a5   : > { %v3326_v18 = vadd.f32 %v3294_v27, %v9684_v19  ;;  %v2660_v6 = vrot.slane %v12496_v0, 1  ;;  %v3631_v59 = vmul.f32 %v8483_v26, %v10245_v63  ;;  %v2809_v2 = vrot.slane %v12497_v53, 1 }
 0x2a6   : > { %v3103_v48 = vadd.f32 %v10156_v22, %v2863_v39  ;;  %v4113_v15 = vor.u32 %v4111_v52, %v10278_v20  ;;  %v3623_v55 = vsel %vm3622_vm3, %v8481_v60, %v3619_v34  ;;  %v3434_v40 = vmul.f32 1.442695, %v3392_v38 }
 0x2a7   : > { %v3628_v25 = vsel %vm10264_vm14, %v3627_v10, %v3623_v55  ;;  %v10294_v49 = vadd.f32 %v9944_v35, %v3326_v18  ;;  %v2949_v19 = vrot.slane %v12498_v33, 1  ;;  %v3632_v39 = vsub.f32 1.0, %v3631_v59 }
 0x2a8   : > { %v4114_v22 = vsel %vm8846_vm5, %v4106_v21, %v4113_v15  ;;  %v3997_v27 = vmul.f32 %v3628_v25, %v10116_v46  ;;  %v3295_v60 = vmul.f32 %v9725_v47, %v3103_v48  ;;  %v10301_v52 = vld [vmem:[#allocation2 + $0x18] sm:$0xff]  ;;  %v8485_v0 = vpop.eup %8484  ;;  %vm3636_vm4 = vweird.f32 %v8483_v26  ;;  %v12499_v46 = vld [vmem:[#allocation41_spill] sm:$0xff] }
 0x2a9   : > { %v2754_v34 = vpop.f32.mrf.mxu2  ;;  %4381 = vst.msk [vmem:[#allocation2 + $0x20] sm:$0xf] %vm376_vm1, %v4114_v22  ;;  %v3641_v9 = vand.u32 2147483648, %v10245_v63  ;;  %8486 = vpow2.f32 %v3434_v40  ;;  %v3393_v10 = vsub.f32 0.0, %v10294_v49  ;;  %v3633_v18 = vmul.f32 %v8483_v26, %v3632_v39  ;;  %7927 = vmatmul.msk.bf16.gmra.mxu1 %vm898_vm7, %v10301_v52  ;;  %v10317_v22 = vpop.f32.mrf.mxu0  ;;  %vm3637_vm9 = vmor %vm3635_vm2, %vm3636_vm4 }
 0x2aa   : > { %v4029_v38 = vpack.c.bf16 %v3997_v27, %v3997_v27  ;;  %v10306_v21 = vadd.f32 1.0, %v8485_v0  ;;  %v3327_v15 = vadd.f32 %v3295_v60, %v12499_v46  ;;  %v12500_v53 = vrot.slane %v10179_v45, 1 }
 0x2ab   : > { %v2864_v48 = vpop.f32.mrf.mxu3  ;;  %v3436_v55 = vmul.f32 1.442695, %v3393_v10  ;;  %v12501_v40 = vrot.slane %v10143_v11, 1  ;;  %v3634_v39 = vadd.f32 %v8483_v26, %v3633_v18  ;;  %v2810_v60 = vsel %vm2628_vm11, %v10103_v23, %v2809_v2 }
 0x2ac   : > { %v2865_v59 = vadd.f32 %v2864_v48, %v2754_v34  ;;  %v2661_v25 = vsel %vm2628_vm11, %v12500_v53, %v2660_v6  ;;  %v4117_v27 = vshrl.u32 %v4029_v38, 16  ;;  %8488 = vrcp.f32 %v10306_v21  ;;  %v10323_v34 = vld [vmem:[#allocation2 + $0x10] sm:$0xff] }
 0x2ad   : > { %v2950_v33 = vsel %vm2628_vm11, %v12501_v40, %v2949_v19  ;;  %v4120_v45 = vshll.u32 %v4029_v38, 16  ;;  %vm3640_vm12 = vcmp.eq.f32.partialorder %v3639_v14, 8.507059e+37  ;;  %v3642_v11 = vor.u32 1.1754944e-38, %v3641_v9 }
 0x2ae   : > { %7859 = vmatmul.msk.bf16.gmra.mxu0 %vm898_vm7, %v2950_v33  ;;  %8490 = vpow2.f32 %v3436_v55  ;;  %v4119_v6 = vrot.slane %v4117_v27, 7  ;;  %v3638_v19 = vsel %vm3637_vm9, %v8483_v26, %v3634_v39  ;;  %v10329_v0 = vadd.f32 %v9944_v35, %v3327_v15  ;;  %7826 = vmatmul.msk.bf16.gmra.mxu2 %vm898_vm7, %v2661_v25 }
 0x2af   : > { %v3104_v10 = vadd.f32 %v10211_v51, %v2865_v59  ;;  %v8487_v23 = vpop.eup %8486  ;;  %v4115_v2 = vrot.slane %v10278_v20, 4  ;;  %v3643_v38 = vsel %vm3640_vm12, %v3642_v11, %v3638_v19  ;;  %v3654_v18 = vand.u32 2147483647, %v10306_v21 }
 0x2b0   : > { %v3656_v63 = vand.u32 2147483648, %v10306_v21  ;;  %7842 = vmatmul.msk.bf16.gmra.mxu3 %vm898_vm7, %v2810_v60  ;;  %v4122_v14 = vor.u32 %v4120_v45, %v4119_v6  ;;  %v3998_v26 = vmul.f32 %v3643_v38, %v10165_v30  ;;  %v10338_v9 = vadd.f32 1.0, %v8487_v23 }
 0x2b1   : > { %v2757_v46 = vpop.f32.mrf.mxu2  ;;  %v5249_v51 = vshll.u32 %v10323_v34, 16  ;;  %v3394_v15 = vsub.f32 0.0, %v10329_v0  ;;  %v3296_v48 = vmul.f32 %v9742_v8, %v3104_v10  ;;  %v5247_v30 = vor.u32 %v10260_v36, %v5242_v58  ;;  %v12504_v10 = vld [vmem:[#allocation43_spill] sm:$0xff] }
 0x2b2   : > { %v8489_v20 = vpop.eup %8488  ;;  %v4123_v55 = vsel %vm8846_vm5, %v4115_v2, %v4122_v14  ;;  %v4030_v59 = vpack.c.bf16 %v3998_v26, %v3998_v26  ;;  %8492 = vrcp.f32 %v10338_v9  ;;  %vm3650_vm13 = vweird.f32 %v10306_v21  ;;  %v10362_v2 = vpop.f32.mrf.mxu0 }
 0x2b3   : > { %v2867_v53 = vpop.f32.mrf.mxu3  ;;  %4382 = vst.msk [vmem:[#allocation2 + $0x24] sm:$0xf] %vm376_vm1, %v4123_v55  ;;  %v3646_v40 = vmul.f32 %v8489_v20, %v10306_v21  ;;  %vm10352_vm6 = vcmp.eq.f32.partialorder %v3654_v18, 8.507059e+37  ;;  %v3657_v27 = vor.u32 1.1754944e-38, %v3656_v63  ;;  %v3438_v45 = vmul.f32 1.442695, %v3394_v15 }
 0x2b4   : > { %v8491_v25 = vpop.eup %8490  ;;  %v4126_v39 = vshrl.u32 %v4030_v59, 16  ;;  %v10358_v11 = vrot.slane %v5249_v51, 1  ;;  %v4124_v7 = vrot.slane %v4119_v6, 4  ;;  %v3669_v19 = vand.u32 2147483647, %v10338_v9 }
 0x2b5   : > { %v10356_v60 = vadd.f32 1.0, %v8491_v25  ;;  %v3647_v58 = vsub.f32 1.0, %v3646_v40  ;;  %v3328_v23 = vadd.f32 %v3296_v48, %v12504_v10  ;;  %v4129_v18 = vshll.u32 %v4030_v59, 16 }
 0x2b6   : > { %v10364_v38 = vrot.slane %v4126_v39, 7  ;;  %v3671_v14 = vand.u32 2147483648, %v10338_v9  ;;  %vm3651_vm14 = vweird.f32 %v8489_v20  ;;  %v2868_v15 = vadd.f32 %v2867_v53, %v2757_v46 }
 0x2b7   : > { %8494 = vrcp.f32 %v10356_v60  ;;  %v3648_v63 = vmul.f32 %v8489_v20, %v3647_v58  ;;  %v10369_v26 = vadd.f32 %v9944_v35, %v3328_v23  ;;  %v10374_v55 = vsel %vm1773_vm8, %v5247_v30, %v10358_v11  ;;  %vm3652_vm3 = vmor %vm3650_vm13, %vm3651_vm14  ;;  %v8331_v58 = vld [vmem:[#allocation2] sm:$0xff] }
 0x2b8   : > { %8496 = vpow2.f32 %v3438_v45  ;;  %v8493_v6 = vpop.eup %8492  ;;  %v4131_v51 = vor.u32 %v4129_v18, %v10364_v38  ;;  %v5253_v59 = vshrl.u32 %v10323_v34, 16  ;;  %vm3665_vm15 = vweird.f32 %v10338_v9 }
 0x2b9   : > { %v2759_v48 = vpop.f32.mrf.mxu2  ;;  %v3649_v25 = vadd.f32 %v8489_v20, %v3648_v63  ;;  %v3661_v40 = vmul.f32 %v8493_v6, %v10338_v9  ;;  %vm10379_vm2 = vcmp.eq.f32.partialorder %v3669_v19, 8.507059e+37  ;;  %v3672_v46 = vor.u32 1.1754944e-38, %v3671_v14  ;;  %v10428_v9 = vld [vmem:[%s12284_s2] ss:$0 sm:$0xff] }
 0x2ba   : > { %v4132_v35 = vsel %vm8846_vm5, %v4124_v7, %v4131_v51  ;;  %v3395_v53 = vsub.f32 0.0, %v10369_v26  ;;  %v3105_v34 = vadd.f32 %v10271_v31, %v2868_v15  ;;  %v10389_v30 = vld [vmem:[#allocation2 + $0x20] sm:$0xff]  ;;  %vm3680_vm4 = vweird.f32 %v10356_v60 }
 0x2bb   : > { %v2869_v45 = vpop.f32.mrf.mxu3  ;;  %4383 = vst.msk [vmem:[#allocation2 + $0x28] sm:$0xf] %vm376_vm1, %v4132_v35  ;;  %v3653_v19 = vsel %vm3652_vm3, %v8489_v20, %v3649_v25  ;;  %v3662_v10 = vsub.f32 1.0, %v3661_v40  ;;  %v3684_v7 = vand.u32 2147483647, %v10356_v60  ;;  %v3686_v14 = vand.u32 2147483648, %v10356_v60  ;;  %7928 = vmatmul.msk.bf16.gmra.mxu1 %vm898_vm7, %v10389_v30 }
 0x2bc   : > { %v2870_v23 = vadd.f32 %v2869_v45, %v2759_v48  ;;  %v3658_v18 = vsel %vm10352_vm6, %v3657_v27, %v3653_v19  ;;  %v3440_v31 = vmul.f32 1.442695, %v3395_v53  ;;  %v3297_v63 = vmul.f32 %v9758_v12, %v3105_v34  ;;  %v10402_v20 = vld [vmem:[#allocation2 + $0x18] sm:$0xff]  ;;  %v8348_v27 = vld [vmem:[#allocation2 + $0x10] sm:$0xff] }
 0x2bd   : > { %v8495_v21 = vpop.eup %8494  ;;  %v3999_v15 = vmul.f32 %v3658_v18, %v10229_v43  ;;  %v3663_v48 = vmul.f32 %v8493_v6, %v3662_v10  ;;  %vm3666_vm9 = vweird.f32 %v8493_v6  ;;  %v4133_v25 = vrot.slane %v10364_v38, 4  ;;  %v10413_v43 = vpop.f32.mrf.mxu0 }
 0x2be   : > { %8104 = vmatmul.msk.bf16.vlgmr.msrb.gmra.mxu0 %vm898_vm7, %v10374_v55  ;;  %v8497_v51 = vpop.eup %8496  ;;  %v3676_v33 = vmul.f32 %v8495_v21, %v10356_v60  ;;  %8498 = vpow2.f32 %v3440_v31  ;;  %v3329_v35 = vadd.f32 %v3297_v63, %v9751_v29  ;;  %7945 = vmatmul.msk.bf16.vlgmr.msrb.gmra.mxu2 %vm898_vm7, %v8331_v58  ;;  %v3106_v19 = vadd.f32 %v10317_v22, %v2870_v23  ;;  %vm3667_vm12 = vmor %vm3665_vm15, %vm3666_vm9 }
 0x2bf   : > { %v10407_v40 = vadd.f32 1.0, %v8497_v51  ;;  %v4031_v53 = vpack.c.bf16 %v3999_v15, %v3999_v15  ;;  %v3664_v34 = vadd.f32 %v8493_v6, %v3663_v48  ;;  %vm10417_vm13 = vcmp.eq.f32.partialorder %v3684_v7, 8.507059e+37 }
 0x2c0   : > { %v3677_v45 = vsub.f32 1.0, %v3676_v33  ;;  %8026 = vmatmul.msk.bf16.vlgmr.msrb.gmra.mxu3 %vm898_vm7, %v8348_v27  ;;  %v3687_v10 = vor.u32 1.1754944e-38, %v3686_v14  ;;  %v5257_v58 = vshll.u32 %v10402_v20, 16  ;;  %vm3681_vm6 = vweird.f32 %v8495_v21 }
 0x2c1   : > { %8500 = vrcp.f32 %v10407_v40  ;;  %v2762_v29 = vpop.f32.mrf.mxu2  ;;  %v4135_v18 = vshrl.u32 %v4031_v53, 16  ;;  %v3668_v31 = vsel %vm3667_vm12, %v8493_v6, %v3664_v34  ;;  %v4138_v23 = vshll.u32 %v4031_v53, 16  ;;  %vm3682_vm14 = vmor %vm3680_vm4, %vm3681_vm6 }
 0x2c2   : > { %v3678_v22 = vmul.f32 %v8495_v21, %v3677_v45  ;;  %v3673_v63 = vsel %vm10379_vm2, %v3672_v46, %v3668_v31  ;;  %v10431_v7 = vadd.f32 %v10428_v9, %v3329_v35  ;;  %v5255_v51 = vor.u32 %v5253_v59, %v10358_v11 }
 0x2c3   : > { %v2872_v14 = vpop.f32.mrf.mxu3  ;;  %v4137_v15 = vrot.slane %v4135_v18, 7  ;;  %v4000_v6 = vmul.f32 %v3673_v63, %v10275_v4  ;;  %v3298_v33 = vmul.f32 %v9769_v1, %v3106_v19  ;;  %v3699_v39 = vand.u32 2147483647, %v10407_v40 }
 0x2c4   : > { %v3679_v48 = vadd.f32 %v8495_v21, %v3678_v22  ;;  %v8499_v27 = vpop.eup %8498  ;;  %v3396_v46 = vsub.f32 0.0, %v10431_v7  ;;  %v10440_v53 = vrot.slane %v5257_v58, 1  ;;  %v5261_v35 = vshrl.u32 %v10402_v20, 16 }
 0x2c5   : > { %v4140_v34 = vor.u32 %v4138_v23, %v4137_v15  ;;  %v4032_v11 = vpack.c.bf16 %v4000_v6, %v4000_v6  ;;  %v2873_v45 = vadd.f32 %v2872_v14, %v2762_v29  ;;  %v10445_v18 = vadd.f32 1.0, %v8499_v27  ;;  %v10460_v14 = vpop.f32.mrf.mxu0 }
 0x2c6   : > { %v3683_v59 = vsel %vm3682_vm14, %v8495_v21, %v3679_v48  ;;  %v3442_v60 = vmul.f32 1.442695, %v3396_v46  ;;  %v3330_v31 = vadd.f32 %v3298_v33, %v9763_v50  ;;  %vm3695_vm15 = vweird.f32 %v10407_v40 }
 0x2c7   : > { %v8501_v4 = vpop.eup %8500  ;;  %v3688_v19 = vsel %vm10417_vm13, %v3687_v10, %v3683_v59  ;;  %v4141_v22 = vsel %vm8846_vm5, %v4133_v25, %v4140_v34  ;;  %v4144_v58 = vshrl.u32 %v4032_v11, 16  ;;  %vm10454_vm2 = vcmp.eq.f32.partialorder %v3699_v39, 8.507059e+37 }
 0x2c8   : > { %v4001_v63 = vmul.f32 %v3688_v19, %v10294_v49  ;;  %4384 = vst.msk [vmem:[#allocation2 + $0x2c] sm:$0xf] %vm376_vm1, %v4141_v22  ;;  %v3691_v21 = vmul.f32 %v8501_v4, %v10407_v40  ;;  %v3701_v10 = vand.u32 2147483648, %v10407_v40  ;;  %8502 = vrcp.f32 %v10445_v18 }
 0x2c9   : > { %v2764_v50 = vpop.f32.mrf.mxu2  ;;  %v4146_v29 = vrot.slane %v4144_v58, 7  ;;  %v4147_v25 = vshll.u32 %v4032_v11, 16  ;;  %v10464_v49 = vsel %vm1773_vm8, %v5255_v51, %v10440_v53  ;;  %8504 = vpow2.f32 %v3442_v60  ;;  %v10470_v11 = vld [vmem:[#allocation2 + $0x20] sm:$0xff] }
 0x2ca   : > { %v4033_v23 = vpack.c.bf16 %v4001_v63, %v4001_v63  ;;  %v3692_v6 = vsub.f32 1.0, %v3691_v21  ;;  %v10467_v48 = vadd.f32 %v10428_v9, %v3330_v31  ;;  %v3107_v33 = vadd.f32 %v10362_v2, %v2873_v45  ;;  %v8349_v31 = vld [vmem:[#allocation2 + $0x18] sm:$0xff] }
 0x2cb   : > { %v2874_v27 = vpop.f32.mrf.mxu3  ;;  %v4142_v39 = vrot.slane %v4137_v15, 4  ;;  %v4149_v46 = vor.u32 %v4147_v25, %v4146_v29  ;;  %vm3696_vm3 = vweird.f32 %v8501_v4  ;;  %v3714_v22 = vand.u32 2147483647, %v10445_v18 }
 0x2cc   : > { %v4153_v34 = vshrl.u32 %v4033_v23, 16  ;;  %v4156_v59 = vshll.u32 %v4033_v23, 16  ;;  %v3693_v19 = vmul.f32 %v8501_v4, %v3692_v6  ;;  %v3397_v51 = vsub.f32 0.0, %v10467_v48  ;;  %vm3697_vm4 = vmor %vm3695_vm15, %vm3696_vm3 }
 0x2cd   : > { %v4150_v60 = vsel %vm8846_vm5, %v4142_v39, %v4149_v46  ;;  %v3299_v15 = vmul.f32 %v9781_v13, %v3107_v33  ;;  %v2875_v45 = vadd.f32 %v2874_v27, %v2764_v50  ;;  %v3702_v21 = vor.u32 1.1754944e-38, %v3701_v10 }
 0x2ce   : > { %8105 = vmatmul.msk.bf16.gmra.mxu0 %vm898_vm7, %v10464_v49  ;;  %v10478_v2 = vrot.slane %v4153_v34, 7  ;;  %v8503_v58 = vpop.eup %8502  ;;  %4385 = vst.msk [vmem:[#allocation2 + $0x30] sm:$0xf] %vm376_vm1, %v4150_v60  ;;  %v3694_v63 = vadd.f32 %v8501_v4, %v3693_v19  ;;  %v3716_v25 = vand.u32 2147483648, %v10445_v18  ;;  %v3444_v23 = vmul.f32 1.442695, %v3397_v51  ;;  %7946 = vmatmul.msk.bf16.gmra.mxu2 %vm898_vm7, %v10108_v28 }
 0x2cf   : > { %v4151_v6 = vrot.slane %v4146_v29, 4  ;;  %v3706_v50 = vmul.f32 %v8503_v58, %v10445_v18  ;;  %v10490_v33 = vld [vmem:[#allocation2 + $0x28] sm:$0xff]  ;;  %v5265_v10 = vshll.u32 %v10470_v11, 16  ;;  %v8505_v27 = vpop.eup %8504  ;;  %v3331_v28 = vadd.f32 %v3299_v15, %v9776_v5 }
 0x2d0   : > { %v4158_v39 = vor.u32 %v4156_v59, %v10478_v2  ;;  %8027 = vmatmul.msk.bf16.gmra.mxu3 %vm898_vm7, %v8349_v31  ;;  %v3698_v46 = vsel %vm3697_vm4, %v8501_v4, %v3694_v63  ;;  %8506 = vpow2.f32 %v3444_v23  ;;  %v3108_v29 = vadd.f32 %v10413_v43, %v2875_v45  ;;  %7929 = vmatmul.msk.bf16.gmra.mxu1 %vm898_vm7, %v10490_v33  ;;  %v3058_v45 = vpop.f32.mrf.mxu0 }
 0x2d1   : > { %v3703_v40 = vsel %vm10454_vm2, %v3702_v21, %v3698_v46  ;;  %v3707_v59 = vsub.f32 1.0, %v3706_v50  ;;  %v10500_v19 = vadd.f32 1.0, %v8505_v27  ;;  %v2767_v51 = vpop.f32.mrf.mxu2  ;;  %v10507_v5 = vadd.f32 %v10428_v9, %v3331_v28 }
 0x2d2   : > { %v4159_v34 = vsel %vm8846_vm5, %v4151_v6, %v4158_v39  ;;  %v4002_v4 = vmul.f32 %v3703_v40, %v10329_v0  ;;  %v3300_v43 = vmul.f32 %v9797_v17, %v3108_v29  ;;  %v5263_v38 = vor.u32 %v5261_v35, %v10440_v53 }
 0x2d3   : > { %4386 = vst.msk [vmem:[#allocation2 + $0x34] sm:$0xf] %vm376_vm1, %v4159_v34  ;;  %v2877_v60 = vpop.f32.mrf.mxu3  ;;  %v3708_v15 = vmul.f32 %v8503_v58, %v3707_v59  ;;  %vm3710_vm9 = vweird.f32 %v10445_v18  ;;  %vm3711_vm12 = vweird.f32 %v8503_v58  ;;  %8508 = vrcp.f32 %v10500_v19 }
 0x2d4   : > { %v4034_v31 = vpack.c.bf16 %v4002_v4, %v4002_v4  ;;  %vm10515_vm13 = vcmp.eq.f32.partialorder %v3714_v22, 8.507059e+37  ;;  %v3398_v63 = vsub.f32 0.0, %v10507_v5  ;;  %v3332_v21 = vadd.f32 %v3300_v43, %v9787_v32  ;;  %vm3712_vm6 = vmor %vm3710_vm9, %vm3711_vm12 }
 0x2d5   : > { %v3709_v23 = vadd.f32 %v8503_v58, %v3708_v15  ;;  %v3717_v6 = vor.u32 1.1754944e-38, %v3716_v25  ;;  %v2878_v20 = vadd.f32 %v2877_v60, %v2767_v51  ;;  %v5267_v53 = vrot.slane %v5265_v10, 1 }
 0x2d6   : > { %v8507_v35 = vpop.eup %8506  ;;  %v4162_v39 = vshrl.u32 %v4034_v31, 16  ;;  %v3729_v18 = vand.u32 2147483647, %v10500_v19  ;;  %v3731_v50 = vand.u32 2147483648, %v10500_v19  ;;  %v3446_v27 = vmul.f32 1.442695, %v3398_v63 }
 0x2d7   : > { %v4165_v22 = vshll.u32 %v4034_v31, 16  ;;  %v3713_v46 = vsel %vm3712_vm6, %v8503_v58, %v3709_v23  ;;  %v10523_v28 = vadd.f32 1.0, %v8507_v35  ;;  %v10526_v29 = vadd.f32 %v10428_v9, %v3332_v21 }
 0x2d8   : > { %v10528_v32 = vrot.slane %v4162_v39, 7  ;;  %v3718_v25 = vsel %vm10515_vm13, %v3717_v6, %v3713_v46  ;;  %8510 = vpow2.f32 %v3446_v27  ;;  %v3109_v10 = vadd.f32 %v10460_v14, %v2878_v20  ;;  %v10545_v31 = vpop.f32.mrf.mxu0  ;;  %v8350_v6 = vld [vmem:[#allocation2 + $0x20] sm:$0xff]  ;;  %v10555_v20 = vld [vmem:[#allocation2 + $0x28] sm:$0xff] }
 0x2d9   : > { %v8509_v34 = vpop.eup %8508  ;;  %v4160_v40 = vrot.slane %v10478_v2, 4  ;;  %v4003_v59 = vmul.f32 %v3718_v25, %v10369_v26  ;;  %8512 = vrcp.f32 %v10523_v28  ;;  %v2769_v58 = vpop.f32.mrf.mxu2  ;;  %v5269_v51 = vshrl.u32 %v10470_v11, 16 }
 0x2da   : > { %v4167_v4 = vor.u32 %v4165_v22, %v10528_v32  ;;  %v3721_v43 = vmul.f32 %v8509_v34, %v10500_v19  ;;  %vm3725_vm14 = vweird.f32 %v10500_v19  ;;  %vm10540_vm15 = vcmp.eq.f32.partialorder %v3729_v18, 8.507059e+37  ;;  %v10559_v39 = vld [vmem:[#allocation2 + $0x30] sm:$0xff] }
 0x2db   : > { %v2879_v14 = vpop.f32.mrf.mxu3  ;;  %v4035_v15 = vpack.c.bf16 %v4003_v59, %v4003_v59  ;;  %v3732_v2 = vor.u32 1.1754944e-38, %v3731_v50  ;;  %v3399_v26 = vsub.f32 0.0, %v10526_v29  ;;  %v10548_v0 = vsel %vm1773_vm8, %v5263_v38, %v5267_v53 }
 0x2dc   : > { %v4168_v11 = vsel %vm8846_vm5, %v4160_v40, %v4167_v4  ;;  %v3722_v63 = vsub.f32 1.0, %v3721_v43  ;;  %v3301_v21 = vmul.f32 %v9810_v42, %v3109_v10  ;;  %v2880_v23 = vadd.f32 %v2879_v14, %v2769_v58  ;;  %v12515_v58 = vld [vmem:[#allocation55_spill] sm:$0xff] }
 0x2dd   : > { %4387 = vst.msk [vmem:[#allocation2 + $0x38] sm:$0xf] %vm376_vm1, %v4168_v11  ;;  %v4171_v35 = vshrl.u32 %v4035_v15, 16  ;;  %vm3726_vm2 = vweird.f32 %v8509_v34  ;;  %v3744_v38 = vand.u32 2147483647, %v10523_v28  ;;  %v10561_v18 = vor.u32 %v5269_v51, %v5267_v53 }
 0x2de   : > { %8106 = vmatmul.msk.bf16.gmra.mxu0 %vm898_vm7, %v10548_v0  ;;  %v8511_v50 = vpop.eup %8510  ;;  %v4174_v27 = vshll.u32 %v4035_v15, 16  ;;  %v3723_v22 = vmul.f32 %v8509_v34, %v3722_v63  ;;  %v3746_v46 = vand.u32 2147483648, %v10523_v28  ;;  %v3448_v25 = vmul.f32 1.442695, %v3399_v26  ;;  %7947 = vmatmul.msk.bf16.gmra.mxu2 %vm898_vm7, %v10200_v54  ;;  %vm3727_vm3 = vmor %vm3725_vm14, %vm3726_vm2 }
 0x2df   : > { %v8513_v10 = vpop.eup %8512  ;;  %v10566_v40 = vrot.slane %v4171_v35, 7  ;;  %v10568_v59 = vadd.f32 1.0, %v8511_v50  ;;  %v3333_v4 = vadd.f32 %v3301_v21, %v12515_v58  ;;  %v3110_v43 = vadd.f32 %v3058_v45, %v2880_v23  ;;  %v12518_v35 = vld [vmem:[#allocation59_spill] sm:$0xff] }
 0x2e0   : > { %8028 = vmatmul.msk.bf16.gmra.mxu3 %vm898_vm7, %v8350_v6  ;;  %v3724_v53 = vadd.f32 %v8509_v34, %v3723_v22  ;;  %v3736_v51 = vmul.f32 %v8513_v10, %v10523_v28  ;;  %8514 = vpow2.f32 %v3448_v25  ;;  %v5273_v14 = vshll.u32 %v10555_v20, 16  ;;  %7930 = vmatmul.msk.bf16.gmra.mxu1 %vm898_vm7, %v10559_v39  ;;  %v12519_v25 = vld [vmem:[#allocation57_spill] sm:$0xff] }
 0x2e1   : > { %v4169_v15 = vrot.slane %v10528_v32, 4  ;;  %v4176_v54 = vor.u32 %v4174_v27, %v10566_v40  ;;  %vm3740_vm4 = vweird.f32 %v10523_v28  ;;  %8516 = vrcp.f32 %v10568_v59  ;;  %v2772_v45 = vpop.f32.mrf.mxu2 }
 0x2e2   : > { %v3728_v26 = vsel %vm3727_vm3, %v8509_v34, %v3724_v53  ;;  %v3737_v11 = vsub.f32 1.0, %v3736_v51  ;;  %vm10583_vm9 = vcmp.eq.f32.partialorder %v3744_v38, 8.507059e+37  ;;  %v3747_v32 = vor.u32 1.1754944e-38, %v3746_v46 }
 0x2e3   : > { %v2882_v21 = vpop.f32.mrf.mxu3  ;;  %v4177_v19 = vsel %vm8846_vm5, %v4169_v15, %v4176_v54  ;;  %v3733_v23 = vsel %vm10540_vm15, %v3732_v2, %v3728_v26  ;;  %v10592_v6 = vadd.f32 %v10428_v9, %v3333_v4  ;;  %v3302_v50 = vmul.f32 %v12518_v35, %v3110_v43  ;;  %v10600_v2 = vpop.f32.mrf.mxu0 }
 0x2e4   : > { %4388 = vst.msk [vmem:[#allocation2 + $0x3c] sm:$0xf] %vm376_vm1, %v4177_v19  ;;  %v4004_v34 = vmul.f32 %v3733_v23, %v10431_v7  ;;  %v3738_v38 = vmul.f32 %v8513_v10, %v3737_v11  ;;  %vm3741_vm12 = vweird.f32 %v8513_v10  ;;  %v5275_v27 = vrot.slane %v5273_v14, 1 }
 0x2e5   : > { %v3759_v22 = vand.u32 2147483647, %v10568_v59  ;;  %v3400_v46 = vsub.f32 0.0, %v10592_v6  ;;  %v3334_v58 = vadd.f32 %v3302_v50, %v12519_v25  ;;  %v2883_v60 = vadd.f32 %v2882_v21, %v2772_v45  ;;  %vm3742_vm13 = vmor %vm3740_vm4, %vm3741_vm12 }
 0x2e6   : > { %v8515_v4 = vpop.eup %8514  ;;  %v4178_v53 = vrot.slane %v10566_v40, 4  ;;  %v4036_v43 = vpack.c.bf16 %v4004_v34, %v4004_v34  ;;  %v3739_v51 = vadd.f32 %v8513_v10, %v3738_v38  ;;  %v5277_v15 = vshrl.u32 %v10555_v20, 16 }
 0x2e7   : > { %v8517_v7 = vpop.eup %8516  ;;  %v10606_v14 = vadd.f32 1.0, %v8515_v4  ;;  %v3450_v54 = vmul.f32 1.442695, %v3400_v46  ;;  %v10609_v26 = vadd.f32 %v10428_v9, %v3334_v58  ;;  %v3111_v45 = vadd.f32 %v10545_v31, %v2883_v60  ;;  %v10623_v46 = vld [vmem:[#allocation2 + $0x30] sm:$0xff] }
 0x2e8   : > { %v4180_v11 = vshrl.u32 %v4036_v43, 16  ;;  %v3743_v21 = vsel %vm3742_vm13, %v8513_v10, %v3739_v51  ;;  %v3751_v40 = vmul.f32 %v8517_v7, %v10568_v59  ;;  %vm3755_vm6 = vweird.f32 %v10568_v59 }
 0x2e9   : > { %v3748_v20 = vsel %vm10583_vm9, %v3747_v32, %v3743_v21  ;;  %vm10616_vm14 = vcmp.eq.f32.partialorder %v3759_v22, 8.507059e+37  ;;  %v3761_v19 = vand.u32 2147483648, %v10568_v59  ;;  %8518 = vrcp.f32 %v10606_v14  ;;  %v2774_v23 = vpop.f32.mrf.mxu2 }
 0x2ea   : > { %v4182_v50 = vrot.slane %v4180_v11, 7  ;;  %v4183_v31 = vshll.u32 %v4036_v43, 16  ;;  %v4005_v10 = vmul.f32 %v3748_v20, %v10467_v48  ;;  %v3752_v34 = vsub.f32 1.0, %v3751_v40 }
 0x2eb   : > { %v2884_v38 = vpop.f32.mrf.mxu3  ;;  %8520 = vpow2.f32 %v3450_v54  ;;  %v3401_v63 = vsub.f32 0.0, %v10609_v26  ;;  %v3303_v32 = vmul.f32 %v9831_v41, %v3111_v45  ;;  %v10629_v22 = vsel %vm1773_vm8, %v10561_v18, %v5275_v27  ;;  %v10634_v51 = vld [vmem:[#allocation2 + $0x38] sm:$0xff]  ;;  %v8351_v54 = vld [vmem:[#allocation2 + $0x28] sm:$0xff] }
 0x2ec   : > { %v4185_v25 = vor.u32 %v4183_v31, %v4182_v50  ;;  %v4037_v58 = vpack.c.bf16 %v4005_v10, %v4005_v10  ;;  %v3753_v60 = vmul.f32 %v8517_v7, %v3752_v34  ;;  %vm3756_vm15 = vweird.f32 %v8517_v7 }
 0x2ed   : > { %v3762_v48 = vor.u32 1.1754944e-38, %v3761_v19  ;;  %v3452_v4 = vmul.f32 1.442695, %v3401_v63  ;;  %v3335_v43 = vadd.f32 %v3303_v32, %v9826_v24  ;;  %v10636_v11 = vor.u32 %v5277_v15, %v5275_v27  ;;  %vm3757_vm2 = vmor %vm3755_vm6, %vm3756_vm15  ;;  %v3066_v15 = vpop.f32.mrf.mxu0 }
 0x2ee   : > { %8107 = vmatmul.msk.bf16.gmra.mxu0 %vm898_vm7, %v10629_v22  ;;  %v4186_v18 = vsel %vm8846_vm5, %v4178_v53, %v4185_v25  ;;  %v4189_v45 = vshrl.u32 %v4037_v58, 16  ;;  %v3754_v21 = vadd.f32 %v8517_v7, %v3753_v60  ;;  %7948 = vmatmul.msk.bf16.gmra.mxu2 %vm898_vm7, %v10301_v52  ;;  %v5281_v40 = vshll.u32 %v10623_v46, 16 }
 0x2ef   : > { %v8519_v20 = vpop.eup %8518  ;;  %4389 = vst.msk [vmem:[#allocation2 + $0x40] sm:$0xf] %vm376_vm1, %v4186_v18  ;;  %v3774_v24 = vand.u32 2147483647, %v10606_v14  ;;  %8522 = vpow2.f32 %v3452_v4  ;;  %v10649_v27 = vadd.f32 %v10428_v9, %v3335_v43  ;;  %v2885_v53 = vadd.f32 %v2884_v38, %v2774_v23 }
 0x2f0   : > { %8029 = vmatmul.msk.bf16.gmra.mxu3 %vm898_vm7, %v8351_v54  ;;  %v4191_v52 = vrot.slane %v4189_v45, 7  ;;  %v4192_v19 = vshll.u32 %v4037_v58, 16  ;;  %v3758_v31 = vsel %vm3757_vm2, %v8517_v7, %v3754_v21  ;;  %v3766_v10 = vmul.f32 %v8519_v20, %v10606_v14  ;;  %7931 = vmatmul.msk.bf16.gmra.mxu1 %vm898_vm7, %v10634_v51 }
 0x2f1   : > { %v8521_v34 = vpop.eup %8520  ;;  %v3763_v59 = vsel %vm10616_vm14, %v3762_v48, %v3758_v31  ;;  %v3776_v63 = vand.u32 2147483648, %v10606_v14  ;;  %v3402_v32 = vsub.f32 0.0, %v10649_v27  ;;  %v3112_v23 = vadd.f32 %v10600_v2, %v2885_v53  ;;  %v2777_v38 = vpop.f32.mrf.mxu2 }
 0x2f2   : > { %v4187_v25 = vrot.slane %v4182_v50, 4  ;;  %v4194_v60 = vor.u32 %v4192_v19, %v4191_v52  ;;  %v4006_v7 = vmul.f32 %v3763_v59, %v10507_v5  ;;  %v3767_v58 = vsub.f32 1.0, %v3766_v10  ;;  %v12524_v59 = vld [vmem:[#allocation62_spill] sm:$0xff] }
 0x2f3   : > { %v2887_v4 = vpop.f32.mrf.mxu3  ;;  %vm3770_vm3 = vweird.f32 %v10606_v14  ;;  %v10662_v28 = vadd.f32 1.0, %v8521_v34  ;;  %v3454_v48 = vmul.f32 1.442695, %v3402_v32  ;;  %v3304_v43 = vmul.f32 %v9842_v57, %v3112_v23 }
 0x2f4   : > { %v4195_v54 = vsel %vm8846_vm5, %v4187_v25, %v4194_v60  ;;  %v4038_v18 = vpack.c.bf16 %v4006_v7, %v4006_v7  ;;  %v3768_v45 = vmul.f32 %v8519_v20, %v3767_v58  ;;  %vm3771_vm4 = vweird.f32 %v8519_v20 }
 0x2f5   : > { %v8523_v2 = vpop.eup %8522  ;;  %4390 = vst.msk [vmem:[#allocation2 + $0x44] sm:$0xf] %vm376_vm1, %v4195_v54  ;;  %vm10668_vm9 = vcmp.eq.f32.partialorder %v3774_v24, 8.507059e+37  ;;  %v3777_v50 = vor.u32 1.1754944e-38, %v3776_v63  ;;  %8524 = vrcp.f32 %v10662_v28  ;;  %v10673_v21 = vrot.slane %v5281_v40, 1  ;;  %vm3772_vm12 = vmor %vm3770_vm3, %vm3771_vm4  ;;  %v3068_v14 = vpop.f32.mrf.mxu0 }
 0x2f6   : > { %v4198_v53 = vshrl.u32 %v4038_v18, 16  ;;  %v3769_v19 = vadd.f32 %v8519_v20, %v3768_v45  ;;  %v10675_v31 = vadd.f32 1.0, %v8523_v2  ;;  %v2888_v10 = vadd.f32 %v2887_v4, %v2777_v38 }
 0x2f7   : > { %v3789_v34 = vand.u32 2147483647, %v10662_v28  ;;  %v3791_v24 = vand.u32 2147483648, %v10662_v28  ;;  %8526 = vpow2.f32 %v3454_v48  ;;  %v3336_v32 = vadd.f32 %v3304_v43, %v12524_v59 }
 0x2f8   : > { %v10682_v63 = vrot.slane %v4198_v53, 7  ;;  %v4201_v23 = vshll.u32 %v4038_v18, 16  ;;  %v3773_v40 = vsel %vm3772_vm12, %v8519_v20, %v3769_v19  ;;  %8528 = vrcp.f32 %v10675_v31 }
 0x2f9   : > { %v3778_v25 = vsel %vm10668_vm9, %v3777_v50, %v3773_v40  ;;  %v10688_v38 = vadd.f32 %v10428_v9, %v3336_v32  ;;  %v2779_v60 = vpop.f32.mrf.mxu2  ;;  %v10693_v7 = vsel %vm1773_vm8, %v10636_v11, %v10673_v21  ;;  %v4196_v58 = vrot.slane %v4191_v52, 4  ;;  %v10759_v52 = vld [vmem:[#allocation2 + $0x38] sm:$0xff] }
 0x2fa   : > { %v4203_v4 = vor.u32 %v4201_v23, %v10682_v63  ;;  %v4007_v20 = vmul.f32 %v3778_v25, %v10526_v29  ;;  %v3113_v48 = vadd.f32 %v3066_v15, %v2888_v10  ;;  %v3792_v18 = vor.u32 1.1754944e-38, %v3791_v24  ;;  %v8352_v15 = vld [vmem:[#allocation2 + $0x30] sm:$0xff] }
 0x2fb   : > { %v2889_v43 = vpop.f32.mrf.mxu3  ;;  %v8525_v54 = vpop.eup %8524  ;;  %v3403_v45 = vsub.f32 0.0, %v10688_v38  ;;  %vm10702_vm13 = vcmp.eq.f32.partialorder %v3789_v34, 8.507059e+37  ;;  %v3804_v29 = vand.u32 2147483647, %v10675_v31  ;;  %vm3785_vm6 = vweird.f32 %v10662_v28 }
 0x2fc   : > { %v2890_v2 = vadd.f32 %v2889_v43, %v2779_v60  ;;  %v4204_v50 = vsel %vm8846_vm5, %v4196_v58, %v4203_v4  ;;  %v4039_v53 = vpack.c.bf16 %v4007_v20, %v4007_v20  ;;  %v3781_v11 = vmul.f32 %v8525_v54, %v10662_v28  ;;  %v10713_v34 = vld [vmem:[#allocation2 + $0x40] sm:$0xff] }
 0x2fd   : > { %v8527_v19 = vpop.eup %8526  ;;  %4391 = vst.msk [vmem:[#allocation2 + $0x48] sm:$0xf] %vm376_vm1, %v4204_v50  ;;  %v3806_v10 = vand.u32 2147483648, %v10675_v31  ;;  %v3456_v24 = vmul.f32 1.442695, %v3403_v45  ;;  %v3305_v59 = vmul.f32 %v9852_v44, %v3113_v48  ;;  %vm3786_vm14 = vweird.f32 %v8525_v54 }
 0x2fe   : > { %8108 = vmatmul.msk.bf16.gmra.mxu0 %vm898_vm7, %v10693_v7  ;;  %v8529_v32 = vpop.eup %8528  ;;  %v4207_v23 = vshrl.u32 %v4039_v53, 16  ;;  %v3782_v40 = vsub.f32 1.0, %v3781_v11  ;;  %v10715_v25 = vadd.f32 1.0, %v8527_v19  ;;  %v3114_v60 = vadd.f32 %v3068_v14, %v2890_v2  ;;  %7949 = vmatmul.msk.bf16.gmra.mxu2 %vm898_vm7, %v10389_v30  ;;  %v12529_v11 = vld [vmem:[#allocation69_spill] sm:$0xff]  ;;  %vm3787_vm3 = vmor %vm3785_vm6, %vm3786_vm14 }
 0x2ff   : > { %v3796_v58 = vmul.f32 %v8529_v32, %v10675_v31  ;;  %8530 = vpow2.f32 %v3456_v24  ;;  %v3337_v4 = vadd.f32 %v3305_v59, %v9847_v37  ;;  %v4210_v48 = vshll.u32 %v4039_v53, 16 }
 0x300   : > { %8030 = vmatmul.msk.bf16.gmra.mxu3 %vm898_vm7, %v8352_v15  ;;  %v10722_v20 = vrot.slane %v4207_v23, 7  ;;  %v3783_v43 = vmul.f32 %v8525_v54, %v3782_v40  ;;  %8532 = vrcp.f32 %v10715_v25  ;;  %v4205_v45 = vrot.slane %v10682_v63, 4  ;;  %7932 = vmatmul.msk.bf16.gmra.mxu1 %vm898_vm7, %v10713_v34  ;;  %v3071_v23 = vpop.f32.mrf.mxu0 }
 0x301   : > { %v3797_v14 = vsub.f32 1.0, %v3796_v58  ;;  %vm3800_vm15 = vweird.f32 %v10675_v31  ;;  %v10728_v30 = vadd.f32 %v10428_v9, %v3337_v4  ;;  %v2782_v37 = vpop.f32.mrf.mxu2  ;;  %vm10733_vm2 = vcmp.eq.f32.partialorder %v3804_v29, 8.507059e+37  ;;  %v12530_v58 = vld [vmem:[#allocation67_spill] sm:$0xff] }
 0x302   : > { %v4212_v2 = vor.u32 %v4210_v48, %v10722_v20  ;;  %v3784_v50 = vadd.f32 %v8525_v54, %v3783_v43  ;;  %v3306_v15 = vmul.f32 %v12529_v11, %v3114_v60  ;;  %vm3801_vm4 = vweird.f32 %v8529_v32 }
 0x303   : > { %v2892_v63 = vpop.f32.mrf.mxu3  ;;  %v3798_v19 = vmul.f32 %v8529_v32, %v3797_v14  ;;  %v3807_v24 = vor.u32 1.1754944e-38, %v3806_v10  ;;  %v3404_v59 = vsub.f32 0.0, %v10728_v30  ;;  %v3819_v14 = vand.u32 2147483647, %v10715_v25  ;;  %vm3802_vm9 = vmor %vm3800_vm15, %vm3801_vm4 }
 0x304   : > { %v4213_v40 = vsel %vm8846_vm5, %v4205_v45, %v4212_v2  ;;  %v3788_v29 = vsel %vm3787_vm3, %v8525_v54, %v3784_v50  ;;  %v3338_v4 = vadd.f32 %v3306_v15, %v12530_v58  ;;  %v2893_v48 = vadd.f32 %v2892_v63, %v2782_v37 }
 0x305   : > { %v8531_v43 = vpop.eup %8530  ;;  %4392 = vst.msk [vmem:[#allocation2 + $0x4c] sm:$0xf] %vm376_vm1, %v4213_v40  ;;  %v3793_v28 = vsel %vm10702_vm13, %v3792_v18, %v3788_v29  ;;  %v3799_v60 = vadd.f32 %v8529_v32, %v3798_v19  ;;  %v3458_v10 = vmul.f32 1.442695, %v3404_v59  ;;  %v12531_v50 = vshrl.u32 %v10623_v46, 16 }
 0x306   : > { %v8533_v5 = vpop.eup %8532  ;;  %v4008_v11 = vmul.f32 %v3793_v28, %v10592_v6  ;;  %v10753_v54 = vadd.f32 1.0, %v8531_v43  ;;  %v10756_v45 = vadd.f32 %v10428_v9, %v3338_v4  ;;  %v3115_v37 = vadd.f32 %v3071_v23, %v2893_v48 }
 0x307   : > { %v3803_v2 = vsel %vm3802_vm9, %v8529_v32, %v3799_v60  ;;  %v3811_v18 = vmul.f32 %v8533_v5, %v10715_v25  ;;  %8534 = vpow2.f32 %v3458_v10  ;;  %v5287_v6 = vor.u32 %v12531_v50, %v10673_v21 }
 0x308   : > { %v4040_v15 = vpack.c.bf16 %v4008_v11, %v4008_v11  ;;  %v3808_v31 = vsel %vm10733_vm2, %v3807_v24, %v3803_v2  ;;  %v3821_v63 = vand.u32 2147483648, %v10715_v25  ;;  %8536 = vrcp.f32 %v10753_v54  ;;  %v3073_v2 = vpop.f32.mrf.mxu0 }
 0x309   : > { %v4214_v19 = vrot.slane %v10722_v20, 4  ;;  %v4009_v32 = vmul.f32 %v3808_v31, %v10609_v26  ;;  %v3812_v59 = vsub.f32 1.0, %v3811_v18  ;;  %vm3815_vm12 = vweird.f32 %v10715_v25  ;;  %v2784_v53 = vpop.f32.mrf.mxu2  ;;  %v10779_v18 = vpop.f32.mrf.mxu1  ;;  %v8353_v31 = vld [vmem:[#allocation2 + $0x38] sm:$0xff] }
 0x30a   : > { %v4216_v23 = vshrl.u32 %v4040_v15, 16  ;;  %vm10771_vm13 = vcmp.eq.f32.partialorder %v3819_v14, 8.507059e+37  ;;  %v3405_v46 = vsub.f32 0.0, %v10756_v45  ;;  %v3307_v21 = vmul.f32 %v9873_v62, %v3115_v37  ;;  %v12534_v14 = vld [vmem:[#allocation71_spill] sm:$0xff] }
 0x30b   : > { %v2894_v11 = vpop.f32.mrf.mxu3  ;;  %v4041_v24 = vpack.c.bf16 %v4009_v32, %v4009_v32  ;;  %v3813_v29 = vmul.f32 %v8533_v5, %v3812_v59  ;;  %vm3816_vm6 = vweird.f32 %v8533_v5  ;;  %v5289_v20 = vshll.u32 %v10759_v52, 16 }
 0x30c   : > { %v4218_v26 = vrot.slane %v4216_v23, 7  ;;  %v4219_v58 = vshll.u32 %v4040_v15, 16  ;;  %v3822_v4 = vor.u32 1.1754944e-38, %v3821_v63  ;;  %v3460_v48 = vmul.f32 1.442695, %v3405_v46  ;;  %v10781_v37 = vld [vmem:[#allocation2 + $0x48] sm:$0xff]  ;;  %vm3817_vm14 = vmor %vm3815_vm12, %vm3816_vm6 }
 0x30d   : > { %v8535_v43 = vpop.eup %8534  ;;  %v4225_v28 = vshrl.u32 %v4041_v24, 16  ;;  %v3814_v60 = vadd.f32 %v8533_v5, %v3813_v29  ;;  %v3339_v10 = vadd.f32 %v3307_v21, %v12534_v14  ;;  %v2895_v50 = vadd.f32 %v2894_v11, %v2784_v53 }
 0x30e   : > { %v8537_v32 = vpop.eup %8536  ;;  %v4221_v59 = vor.u32 %v4219_v58, %v4218_v26  ;;  %v4228_v62 = vshll.u32 %v4041_v24, 16  ;;  %v10786_v15 = vadd.f32 1.0, %v8535_v43  ;;  %8538 = vpow2.f32 %v3460_v48  ;;  %7950 = vmatmul.msk.bf16.gmra.mxu2 %vm898_vm7, %v10490_v33  ;;  %v12535_v43 = vld [vmem:[#allocation75_spill] sm:$0xff] }
 0x30f   : > { %v4227_v63 = vrot.slane %v4225_v28, 7  ;;  %v3818_v23 = vsel %vm3817_vm14, %v8533_v5, %v3814_v60  ;;  %v3826_v46 = vmul.f32 %v8537_v32, %v10753_v54  ;;  %v10792_v21 = vrot.slane %v5289_v20, 1 }
 0x310   : > { %8031 = vmatmul.msk.bf16.gmra.mxu3 %vm898_vm7, %v8353_v31  ;;  %v4222_v53 = vsel %vm8846_vm5, %v4214_v19, %v4221_v59  ;;  %v3823_v25 = vsel %vm10771_vm13, %v3822_v4, %v3818_v23  ;;  %v3834_v11 = vand.u32 2147483647, %v10753_v54  ;;  %8540 = vrcp.f32 %v10786_v15  ;;  %7933 = vmatmul.msk.bf16.gmra.mxu1 %vm898_vm7, %v10781_v37  ;;  %v12536_v31 = vld [vmem:[#allocation73_spill] sm:$0xff] }
 0x311   : > { %v4223_v24 = vrot.slane %v4218_v26, 4  ;;  %4393 = vst.msk [vmem:[#allocation2 + $0x50] sm:$0xf] %vm376_vm1, %v4222_v53  ;;  %v4230_v33 = vor.u32 %v4228_v62, %v4227_v63  ;;  %v4010_v5 = vmul.f32 %v3823_v25, %v10649_v27  ;;  %v3827_v29 = vsub.f32 1.0, %v3826_v46  ;;  %v10824_v23 = vld [vmem:[#allocation2 + $0x40] sm:$0xff] }
 0x312   : > { %vm3831_vm15 = vweird.f32 %v8537_v32  ;;  %v3836_v19 = vand.u32 2147483648, %v10753_v54  ;;  %v10806_v40 = vadd.f32 %v10428_v9, %v3339_v10  ;;  %v3116_v20 = vadd.f32 %v3073_v2, %v2895_v50 }
 0x313   : > { %v4231_v58 = vsel %vm8846_vm5, %v4223_v24, %v4230_v33  ;;  %v4042_v26 = vpack.c.bf16 %v4010_v5, %v4010_v5  ;;  %v3828_v4 = vmul.f32 %v8537_v32, %v3827_v29  ;;  %v10812_v62 = vsel %vm1773_vm8, %v5287_v6, %v10792_v21  ;;  %v3076_v33 = vpop.f32.mrf.mxu0 }
 0x314   : > { %v8539_v27 = vpop.eup %8538  ;;  %4394 = vst.msk [vmem:[#allocation2 + $0x54] sm:$0xf] %vm376_vm1, %v4231_v58  ;;  %v3406_v48 = vsub.f32 0.0, %v10806_v40  ;;  %v3308_v28 = vmul.f32 %v12535_v43, %v3116_v20  ;;  %8109 = vmatmul.msk.bf16.gmra.mxu0 %vm898_vm7, %v10812_v62  ;;  %vm3830_vm2 = vweird.f32 %v10753_v54  ;;  %vm3835_vm4 = vcmp.eq.f32.partialorder %v3834_v11, 8.507059e+37  ;;  %v10829_v54 = vpop.f32.mrf.mxu1 }
 0x315   : > { %v4234_v60 = vshrl.u32 %v4042_v26, 16  ;;  %v3829_v14 = vadd.f32 %v8537_v32, %v3828_v4  ;;  %v10820_v10 = vadd.f32 1.0, %v8539_v27  ;;  %vm3832_vm3 = vmor %vm3830_vm2, %vm3831_vm15  ;;  %v3837_v6 = vor.u32 1.1754944e-38, %v3836_v19  ;;  %v2897_v27 = vpop.f32.mrf.mxu3 }
 0x316   : > { %v8541_v2 = vpop.eup %8540  ;;  %v3462_v50 = vmul.f32 1.442695, %v3406_v48  ;;  %v3340_v59 = vadd.f32 %v3308_v28, %v12536_v31  ;;  %v4237_v53 = vshll.u32 %v4042_v26, 16  ;;  %v3849_v29 = vand.u32 2147483647, %v10786_v15  ;;  %v2787_v26 = vpop.f32.mrf.mxu2 }
 0x317   : > { %v10826_v46 = vrot.slane %v4234_v60, 7  ;;  %v3833_v25 = vsel %vm3832_vm3, %v8537_v32, %v3829_v14  ;;  %v3841_v24 = vmul.f32 %v8541_v2, %v10786_v15  ;;  %v3851_v11 = vand.u32 2147483648, %v10786_v15 }
 0x318   : > { %v3838_v5 = vsel %vm3835_vm4, %v3837_v6, %v3833_v25  ;;  %8542 = vrcp.f32 %v10820_v10  ;;  %v4232_v19 = vrot.slane %v4227_v63, 4  ;;  %vm3846_vm9 = vweird.f32 %v8541_v2  ;;  %v8354_v25 = vld [vmem:[#allocation2 + $0x40] sm:$0xff] }
 0x319   : > { %v4239_v20 = vor.u32 %v4237_v53, %v10826_v46  ;;  %v4011_v58 = vmul.f32 %v3838_v5, %v10688_v38  ;;  %v3842_v4 = vsub.f32 1.0, %v3841_v24  ;;  %8544 = vpow2.f32 %v3462_v50 }
 0x31a   : > { %v10837_v32 = vadd.f32 %v10428_v9, %v3340_v59  ;;  %v5297_v48 = vshll.u32 %v10824_v23, 16  ;;  %v2898_v63 = vadd.f32 %v2897_v27, %v2787_v26  ;;  %vm3845_vm12 = vweird.f32 %v10786_v15  ;;  %v12539_v26 = vld [vmem:[#allocation78_spill] sm:$0xff] }
 0x31b   : > { %v4240_v28 = vsel %vm8846_vm5, %v4232_v19, %v4239_v20  ;;  %v4043_v60 = vpack.c.bf16 %v4011_v58, %v4011_v58  ;;  %v3843_v14 = vmul.f32 %v8541_v2, %v3842_v4  ;;  %vm10844_vm13 = vcmp.eq.f32.partialorder %v3849_v29, 8.507059e+37  ;;  %v10849_v53 = vld [vmem:[#allocation2 + $0x50] sm:$0xff]  ;;  %vm3847_vm6 = vmor %vm3845_vm12, %vm3846_vm9 }
 0x31c   : > { %4395 = vst.msk [vmem:[#allocation2 + $0x58] sm:$0xf] %vm376_vm1, %v4240_v28  ;;  %v3852_v9 = vor.u32 1.1754944e-38, %v3851_v11  ;;  %v3407_v6 = vsub.f32 0.0, %v10837_v32  ;;  %v3117_v59 = vadd.f32 %v3076_v33, %v2898_v63  ;;  %v5293_v24 = vshrl.u32 %v10759_v52, 16  ;;  %v10867_v63 = vpop.f32.mrf.mxu1 }
 0x31d   : > { %v4243_v50 = vshrl.u32 %v4043_v60, 16  ;;  %v3844_v31 = vadd.f32 %v8541_v2, %v3843_v14  ;;  %v4241_v19 = vrot.slane %v10826_v46, 4  ;;  %v3864_v15 = vand.u32 2147483647, %v10820_v10 }
 0x31e   : > { %v8543_v5 = vpop.eup %8542  ;;  %v3464_v29 = vmul.f32 1.442695, %v3407_v6  ;;  %7951 = vmatmul.msk.bf16.gmra.mxu2 %vm898_vm7, %v10559_v39  ;;  %v10857_v11 = vrot.slane %v5297_v48, 1  ;;  %v4246_v33 = vshll.u32 %v4043_v60, 16  ;;  %v3309_v27 = vmul.f32 %v12539_v26, %v3117_v59 }
 0x31f   : > { %v4245_v20 = vrot.slane %v4243_v50, 7  ;;  %v3848_v58 = vsel %vm3847_vm6, %v8541_v2, %v3844_v31  ;;  %v3856_v4 = vmul.f32 %v8543_v5, %v10820_v10  ;;  %v8545_v52 = vpop.eup %8544  ;;  %v5295_v28 = vor.u32 %v5293_v24, %v10792_v21  ;;  %v3078_v2 = vpop.f32.mrf.mxu0 }
 0x320   : > { %8032 = vmatmul.msk.bf16.gmra.mxu3 %vm898_vm7, %v8354_v25  ;;  %v3853_v46 = vsel %vm10844_vm13, %v3852_v9, %v3848_v58  ;;  %8546 = vpow2.f32 %v3464_v29  ;;  %v3866_v60 = vand.u32 2147483648, %v10820_v10  ;;  %7934 = vmatmul.msk.bf16.gmra.mxu1 %vm898_vm7, %v10849_v53  ;;  %vm3861_vm14 = vweird.f32 %v8543_v5  ;;  %v12540_v9 = vld [vmem:[#allocation77_spill] sm:$0xff]  ;;  %v2789_v50 = vpop.f32.mrf.mxu2  ;;  %v2899_v31 = vpop.f32.mrf.mxu3 }
 0x321   : > { %v4248_v14 = vor.u32 %v4246_v33, %v4245_v20  ;;  %v4012_v39 = vmul.f32 %v3853_v46, %v10728_v30  ;;  %v3857_v48 = vsub.f32 1.0, %v3856_v4  ;;  %v10871_v38 = vadd.f32 1.0, %v8545_v52  ;;  %v10884_v29 = vld [vmem:[#allocation2 + $0x48] sm:$0xff] }
 0x322   : > { %v3341_v6 = vadd.f32 %v3309_v27, %v12540_v9  ;;  %v10876_v21 = vsel %vm1773_vm8, %v5295_v28, %v10857_v11  ;;  %v2900_v24 = vadd.f32 %v2899_v31, %v2789_v50  ;;  %vm3860_vm15 = vweird.f32 %v10820_v10  ;;  %v12541_v50 = vld [vmem:[#allocation81_spill] sm:$0xff] }
 0x323   : > { %v4249_v30 = vsel %vm8846_vm5, %v4241_v19, %v4248_v14  ;;  %v4044_v59 = vpack.c.bf16 %v4012_v39, %v4012_v39  ;;  %v3858_v25 = vmul.f32 %v8543_v5, %v3857_v48  ;;  %8548 = vrcp.f32 %v10871_v38  ;;  %v10890_v19 = vld [vmem:[%s12284_s2] ss:$0 sm:$0xff]  ;;  %vm3862_vm2 = vmor %vm3860_vm15, %vm3861_vm14 }
 0x324   : > { %4396 = vst.msk [vmem:[#allocation2 + $0x5c] sm:$0xf] %vm376_vm1, %v4249_v30  ;;  %8110 = vmatmul.msk.bf16.gmra.mxu0 %vm898_vm7, %v10876_v21  ;;  %v10893_v4 = vadd.f32 %v10890_v19, %v3341_v6  ;;  %vm3865_vm3 = vcmp.eq.f32.partialorder %v3864_v15, 8.507059e+37  ;;  %v3867_v27 = vor.u32 1.1754944e-38, %v3866_v60  ;;  %v3118_v28 = vadd.f32 %v3078_v2, %v2900_v24 }
 0x325   : > { %v4252_v33 = vshrl.u32 %v4044_v59, 16  ;;  %v3859_v58 = vadd.f32 %v8543_v5, %v3858_v25  ;;  %v4255_v46 = vshll.u32 %v4044_v59, 16  ;;  %v5305_v30 = vshll.u32 %v10884_v29, 16 }
 0x326   : > { %v8547_v52 = vpop.eup %8546  ;;  %v3408_v10 = vsub.f32 0.0, %v10893_v4  ;;  %v3310_v31 = vmul.f32 %v12541_v50, %v3118_v28  ;;  %v4250_v6 = vrot.slane %v4245_v20, 4  ;;  %v3879_v20 = vand.u32 2147483647, %v10871_v38 }
 0x327   : > { %v4254_v14 = vrot.slane %v4252_v33, 7  ;;  %v3863_v39 = vsel %vm3862_vm2, %v8543_v5, %v3859_v58  ;;  %v10896_v48 = vadd.f32 1.0, %v8547_v52  ;;  %v3081_v33 = vpop.f32.mrf.mxu0  ;;  %v10906_v58 = vpop.f32.mrf.mxu1  ;;  %v5301_v52 = vshrl.u32 %v10824_v23, 16 }
 0x328   : > { %v3868_v9 = vsel %vm3865_vm3, %v3867_v27, %v3863_v39  ;;  %v3466_v60 = vmul.f32 1.442695, %v3408_v10  ;;  %v8355_v10 = vld [vmem:[#allocation2 + $0x48] sm:$0xff]  ;;  %vm3875_vm4 = vweird.f32 %v10871_v38  ;;  %vm10925_vm12 = vcmp.eq.f32.partialorder %v3879_v20, 8.507059e+37 }
 0x329   : > { %v4257_v25 = vor.u32 %v4255_v46, %v4254_v14  ;;  %v4013_v59 = vmul.f32 %v3868_v9, %v10756_v45  ;;  %8550 = vrcp.f32 %v10896_v48  ;;  %v8549_v15 = vpop.eup %8548  ;;  %v3881_v45 = vand.u32 2147483648, %v10871_v38  ;;  %v12542_v46 = vld [vmem:[#allocation79_spill] sm:$0xff] }
 0x32a   : > { %v3871_v24 = vmul.f32 %v8549_v15, %v10871_v38  ;;  %8552 = vpow2.f32 %v3466_v60  ;;  %v3342_v27 = vadd.f32 %v3310_v31, %v12542_v46  ;;  %v10913_v9 = vrot.slane %v5305_v30, 1  ;;  %v10956_v30 = vld [vmem:[#allocation2 + $0x50] sm:$0xff] }
 0x32b   : > { %v4258_v5 = vsel %vm8846_vm5, %v4250_v6, %v4257_v25  ;;  %v4045_v2 = vpack.c.bf16 %v4013_v59, %v4013_v59  ;;  %v5303_v23 = vor.u32 %v5301_v52, %v10857_v11  ;;  %vm3876_vm9 = vweird.f32 %v8549_v15 }
 0x32c   : > { %4397 = vst.msk [vmem:[#allocation2 + $0x60] sm:$0xf] %vm376_vm1, %v4258_v5  ;;  %v3872_v39 = vsub.f32 1.0, %v3871_v24  ;;  %v10917_v6 = vadd.f32 %v10890_v19, %v3342_v27  ;;  %v3882_v5 = vor.u32 1.1754944e-38, %v3881_v45  ;;  %vm3877_vm13 = vmor %vm3875_vm4, %vm3876_vm9  ;;  %v3896_v45 = vand.u32 2147483648, %v10896_v48 }
 0x32d   : > { %v4261_v28 = vshrl.u32 %v4045_v2, 16  ;;  %v4264_v60 = vshll.u32 %v4045_v2, 16  ;;  %v10934_v2 = vsel %vm1773_vm8, %v5303_v23, %v10913_v9  ;;  %v2902_v23 = vpop.f32.mrf.mxu3  ;;  %vm3890_vm14 = vweird.f32 %v10896_v48 }
 0x32e   : > { %7952 = vmatmul.msk.bf16.gmra.mxu2 %vm898_vm7, %v10634_v51  ;;  %v3873_v31 = vmul.f32 %v8549_v15, %v3872_v39  ;;  %v3409_v46 = vsub.f32 0.0, %v10917_v6  ;;  %v4259_v51 = vrot.slane %v4254_v14, 4 }
 0x32f   : > { %v8551_v25 = vpop.eup %8550  ;;  %v10922_v59 = vrot.slane %v4261_v28, 7  ;;  %v3894_v28 = vand.u32 2147483647, %v10896_v48 }
 0x330   : > { %8033 = vmatmul.msk.bf16.gmra.mxu3 %vm898_vm7, %v8355_v10  ;;  %v3886_v24 = vmul.f32 %v8551_v25, %v10896_v48  ;;  %v3874_v52 = vadd.f32 %v8549_v15, %v3873_v31  ;;  %v8553_v27 = vpop.eup %8552  ;;  %v3468_v39 = vmul.f32 1.442695, %v3409_v46  ;;  %vm3891_vm6 = vweird.f32 %v8551_v25  ;;  %v2792_v31 = vpop.f32.mrf.mxu2 }
 0x331   : > { %v4266_v11 = vor.u32 %v4264_v60, %v10922_v59  ;;  %v10942_v60 = vadd.f32 1.0, %v8553_v27  ;;  %v2903_v50 = vadd.f32 %v2902_v23, %v2792_v31  ;;  %v10954_v27 = vld [vmem:[#allocation2 + $0x58] sm:$0xff]  ;;  %vm3892_vm15 = vmor %vm3890_vm14, %vm3891_vm6  ;;  %vm3895_vm2 = vcmp.eq.f32.partialorder %v3894_v28, 8.507059e+37 }
 0x332   : > { %v3887_v20 = vsub.f32 1.0, %v3886_v24  ;;  %v3878_v10 = vsel %vm3877_vm13, %v8549_v15, %v3874_v52  ;;  %8554 = vpow2.f32 %v3468_v39  ;;  %v3083_v15 = vpop.f32.mrf.mxu0  ;;  %7935 = vmatmul.msk.bf16.gmra.mxu1 %vm898_vm7, %v10954_v27 }
 0x333   : > { %v4267_v14 = vsel %vm8846_vm5, %v4259_v51, %v4266_v11  ;;  %v3883_v38 = vsel %vm10925_vm12, %v3882_v5, %v3878_v10  ;;  %8556 = vrcp.f32 %v10942_v60  ;;  %v10951_v51 = vpop.f32.mrf.mxu1  ;;  %v3119_v52 = vadd.f32 %v3081_v33, %v2903_v50  ;;  %v12546_v50 = vld [vmem:[#allocation83_spill] sm:$0xff] }
 0x334   : > { %4398 = vst.msk [vmem:[#allocation2 + $0x64] sm:$0xf] %vm376_vm1, %v4267_v14  ;;  %v3888_v24 = vmul.f32 %v8551_v25, %v3887_v20  ;;  %8111 = vmatmul.msk.bf16.gmra.mxu0 %vm898_vm7, %v10934_v2  ;;  %v4014_v46 = vmul.f32 %v3883_v38, %v10806_v40  ;;  %v3897_v20 = vor.u32 1.1754944e-38, %v3896_v45  ;;  %v12545_v40 = vld [vmem:[#allocation84_spill] sm:$0xff]  ;;  %v5313_v38 = vshll.u32 %v10956_v30, 16 }
 0x335   : > { %v3311_v14 = vmul.f32 %v12545_v40, %v3119_v52  ;;  %v2904_v28 = vpop.f32.mrf.mxu3  ;;  %vm3905_vm4 = vweird.f32 %v10942_v60 }
 0x336   : > { %v3889_v11 = vadd.f32 %v8551_v25, %v3888_v24  ;;  %v4046_v5 = vpack.c.bf16 %v4014_v46, %v4014_v46 }
 0x337   : > { %v3343_v33 = vadd.f32 %v3311_v14, %v12546_v50  ;;  %v3909_v50 = vand.u32 2147483647, %v10942_v60 }
 0x338   : > { %v3893_v39 = vsel %vm3892_vm15, %v8551_v25, %v3889_v11  ;;  %v4270_v10 = vshrl.u32 %v4046_v5, 16  ;;  %v8555_v23 = vpop.eup %8554  ;;  %v4273_v26 = vshll.u32 %v4046_v5, 16  ;;  %v2794_v25 = vpop.f32.mrf.mxu2  ;;  %v5309_v5 = vshrl.u32 %v10884_v29, 16 }
 0x339   : > { %v3898_v31 = vsel %vm3895_vm2, %v3897_v20, %v3893_v39  ;;  %v8557_v24 = vpop.eup %8556  ;;  %v10965_v45 = vadd.f32 1.0, %v8555_v23  ;;  %v10969_v40 = vadd.f32 %v10890_v19, %v3343_v33  ;;  %v4268_v20 = vrot.slane %v10922_v59, 4 }
 0x33a   : > { %v4015_v48 = vmul.f32 %v3898_v31, %v10837_v32  ;;  %v4272_v46 = vrot.slane %v4270_v10, 7  ;;  %v3901_v52 = vmul.f32 %v8557_v24, %v10942_v60  ;;  %v3086_v39 = vpop.f32.mrf.mxu0  ;;  %v8356_v10 = vld [vmem:[#allocation2 + $0x50] sm:$0xff]  ;;  %v10976_v31 = vpop.permute.xlu2 %3270  ;;  %v10981_v33 = vrot.slane %v5313_v38, 1 }
 0x33b   : > { %8558 = vrcp.f32 %v10965_v45  ;;  %v10973_v14 = vpop.f32.mrf.mxu1  ;;  %12547 = vst [vmem:[#allocation13_spill] sm:$0xff] %v10976_v31  ;;  %v3911_v59 = vand.u32 2147483648, %v10942_v60  ;;  %v3410_v43 = vsub.f32 0.0, %v10969_v40  ;;  %v2905_v44 = vadd.f32 %v2904_v28, %v2794_v25 }
 0x33c   : > { %v4047_v11 = vpack.c.bf16 %v4015_v48, %v4015_v48  ;;  %v4275_v32 = vor.u32 %v4273_v26, %v4272_v46  ;;  %v3902_v48 = vsub.f32 1.0, %v3901_v52  ;;  %vm3906_vm3 = vweird.f32 %v8557_v24 }
 0x33d   : > { %v3120_v38 = vadd.f32 %v3083_v15, %v2905_v44  ;;  %v5311_v41 = vor.u32 %v5309_v5, %v10913_v9  ;;  %v4277_v35 = vrot.slane %v4272_v46, 4  ;;  %vm3907_vm9 = vmor %vm3905_vm4, %vm3906_vm3  ;;  %v3912_v28 = vor.u32 1.1754944e-38, %v3911_v59  ;;  %v12548_v15 = vld [vmem:[#allocation85_spill] sm:$0xff] }
 0x33e   : > { %v4279_v23 = vshrl.u32 %v4047_v11, 16  ;;  %7953 = vmatmul.msk.bf16.gmra.mxu2 %vm898_vm7, %v10713_v34  ;;  %v4276_v26 = vsel %vm8846_vm5, %v4268_v20, %v4275_v32  ;;  %v4282_v52 = vshll.u32 %v4047_v11, 16  ;;  %v3903_v57 = vmul.f32 %v8557_v24, %v3902_v48  ;;  %v2907_v11 = vpop.f32.mrf.mxu3 }
 0x33f   : > { %4399 = vst.msk [vmem:[#allocation2 + $0x68] sm:$0xf] %vm376_vm1, %v4276_v26  ;;  %v3470_v34 = vmul.f32 1.442695, %v3410_v43  ;;  %v10997_v43 = vsel %vm1773_vm8, %v5311_v41, %v10981_v33  ;;  %vm3910_vm12 = vcmp.eq.f32.partialorder %v3909_v50, 8.507059e+37  ;;  %v11008_v41 = vld [vmem:[#allocation2 + $0x58] sm:$0xff]  ;;  %vm3920_vm6 = vweird.f32 %v10965_v45 }
 0x340   : > { %8034 = vmatmul.msk.bf16.gmra.mxu3 %vm898_vm7, %v8356_v10  ;;  %v10989_v29 = vrot.slane %v4279_v23, 7  ;;  %v3904_v32 = vadd.f32 %v8557_v24, %v3903_v57  ;;  %v3312_v10 = vmul.f32 %v10976_v31, %v3120_v38  ;;  %v2797_v23 = vpop.f32.mrf.mxu2  ;;  %v11011_v50 = vld [vmem:[#allocation2 + $0x60] sm:$0xff]  ;;  %v3924_v59 = vand.u32 2147483647, %v10965_v45 }
 0x341   : > { %v8559_v25 = vpop.eup %8558  ;;  %8560 = vpow2.f32 %v3470_v34  ;;  %v2908_v5 = vadd.f32 %v2907_v11, %v2797_v23  ;;  %v5321_v11 = vshll.u32 %v11008_v41, 16 }
 0x342   : > { %v4284_v20 = vor.u32 %v4282_v52, %v10989_v29  ;;  %v3908_v9 = vsel %vm3907_vm9, %v8557_v24, %v3904_v32  ;;  %v3916_v57 = vmul.f32 %v8559_v25, %v10965_v45  ;;  %v3344_v46 = vadd.f32 %v3312_v10, %v12548_v15  ;;  %v3088_v48 = vpop.f32.mrf.mxu0  ;;  %7936 = vmatmul.msk.bf16.gmra.mxu1 %vm898_vm7, %v11011_v50  ;;  %v12550_v15 = vld [vmem:[#allocation87_spill] sm:$0xff] }
 0x343   : > { %v3913_v60 = vsel %vm3910_vm12, %v3912_v28, %v3908_v9  ;;  %v11006_v26 = vpop.f32.mrf.mxu1  ;;  %v3926_v52 = vand.u32 2147483648, %v10965_v45  ;;  %v3121_v38 = vadd.f32 %v3086_v39, %v2908_v5  ;;  %vm3921_vm13 = vweird.f32 %v8559_v25 }
 0x344   : > { %v4285_v44 = vsel %vm8846_vm5, %v4277_v35, %v4284_v20  ;;  %8112 = vmatmul.msk.bf16.gmra.mxu0 %vm898_vm7, %v10997_v43  ;;  %v4016_v35 = vmul.f32 %v3913_v60, %v10893_v4  ;;  %v3917_v24 = vsub.f32 1.0, %v3916_v57  ;;  %v11016_v34 = vadd.f32 %v10890_v19, %v3344_v46  ;;  %v11018_v20 = vpop.permute.xlu2 %3275  ;;  %vm3922_vm14 = vmor %vm3920_vm6, %vm3921_vm13 }
 0x345   : > { %4400 = vst.msk [vmem:[#allocation2 + $0x6c] sm:$0xf] %vm376_vm1, %v4285_v44  ;;  %v3313_v23 = vmul.f32 %v11018_v20, %v3121_v38  ;;  %vm3925_vm15 = vcmp.eq.f32.partialorder %v3924_v59, 8.507059e+37  ;;  %v3927_v57 = vor.u32 1.1754944e-38, %v3926_v52  ;;  %v4286_v59 = vrot.slane %v10989_v29, 4 }
 0x346   : > { %12549 = vst [vmem:[#allocation18_spill] sm:$0xff] %v11018_v20  ;;  %v4048_v32 = vpack.c.bf16 %v4016_v35, %v4016_v35  ;;  %v3918_v28 = vmul.f32 %v8559_v25, %v3917_v24  ;;  %v3411_v10 = vsub.f32 0.0, %v11016_v34  ;;  %v2909_v35 = vpop.f32.mrf.mxu3 }
 0x347   : > { %v8561_v4 = vpop.eup %8560  ;;  %v3345_v46 = vadd.f32 %v3313_v23, %v12550_v15 }
 0x348   : > { %v4288_v44 = vshrl.u32 %v4048_v32, 16  ;;  %v3919_v9 = vadd.f32 %v8559_v25, %v3918_v28  ;;  %v11026_v39 = vadd.f32 1.0, %v8561_v4  ;;  %v3472_v60 = vmul.f32 1.442695, %v3411_v10  ;;  %v2799_v5 = vpop.f32.mrf.mxu2  ;;  %v8357_v4 = vld [vmem:[#allocation2 + $0x58] sm:$0xff] }
 0x349   : > { %v4291_v31 = vshll.u32 %v4048_v32, 16  ;;  %v11037_v23 = vadd.f32 %v10890_v19, %v3345_v46  ;;  %v11043_v32 = vrot.slane %v5321_v11, 1 }
 0x34a   : > { %v4290_v24 = vrot.slane %v4288_v44, 7  ;;  %v3923_v42 = vsel %vm3922_vm14, %v8559_v25, %v3919_v9  ;;  %8562 = vrcp.f32 %v11026_v39  ;;  %v11030_v28 = vpop.f32.mrf.mxu0  ;;  %v2910_v25 = vadd.f32 %v2909_v35, %v2799_v5 }
 0x34b   : > { %v3928_v38 = vsel %vm3925_vm15, %v3927_v57, %v3923_v42  ;;  %8564 = vpow2.f32 %v3472_v60  ;;  %v11032_v45 = vpop.f32.mrf.mxu1  ;;  %v5317_v42 = vshrl.u32 %v10956_v30, 16  ;;  %vm3935_vm3 = vweird.f32 %v11026_v39 }
 0x34c   : > { %v4293_v52 = vor.u32 %v4291_v31, %v4290_v24  ;;  %v4017_v10 = vmul.f32 %v3928_v38, %v10917_v6  ;;  %v3412_v31 = vsub.f32 0.0, %v11037_v23  ;;  %v3122_v6 = vadd.f32 %v3088_v48, %v2910_v25  ;;  %v8359_v61 = vld [vmem:[#allocation2 + $0x68] sm:$0xff] }
 0x34d   : > { %v5319_v9 = vor.u32 %v5317_v42, %v10981_v33 }
 0x34e   : > { %7954 = vmatmul.msk.bf16.gmra.mxu2 %vm898_vm7, %v10781_v37  ;;  %v4294_v44 = vsel %vm8846_vm5, %v4286_v59, %v4293_v52  ;;  %v4049_v29 = vpack.c.bf16 %v4017_v10, %v4017_v10  ;;  %v11050_v37 = vpop.permute.xlu0 %3280  ;;  %v3474_v15 = vmul.f32 1.442695, %v3412_v31  ;;  %v4942_v38 = vpop.f32.mrf.mxu3  ;;  %v12552_v10 = vld [vmem:[#allocation5_spill] sm:$0xff] }
 0x34f   : > { %4401 = vst.msk [vmem:[#allocation2 + $0x70] sm:$0xf] %vm376_vm1, %v4294_v44  ;;  %v3314_v5 = vmul.f32 %v11050_v37, %v3122_v6  ;;  %v3941_v6 = vand.u32 2147483648, %v11026_v39 }
 0x350   : > { %8035 = vmatmul.msk.bf16.gmra.mxu3 %vm898_vm7, %v8357_v4  ;;  %v8563_v57 = vpop.eup %8562  ;;  %12551 = vst [vmem:[#allocation4_spill] sm:$0xff] %v11050_v37  ;;  %v4297_v60 = vshrl.u32 %v4049_v29, 16  ;;  %v4300_v30 = vshll.u32 %v4049_v29, 16  ;;  %v4688_v35 = vpop.f32.mrf.mxu2  ;;  %v11056_v4 = vsel %vm1773_vm8, %v5319_v9, %v11043_v32  ;;  %8566 = vpow2.f32 %v3474_v15  ;;  %v11073_v9 = vld [vmem:[#allocation2 + $0x68] sm:$0xff] }
 0x351   : > { %v8565_v46 = vpop.eup %8564  ;;  %v3931_v11 = vmul.f32 %v8563_v57, %v11026_v39  ;;  %v4689_v59 = vadd.f32 %v4688_v35, %v10779_v18  ;;  %v3346_v25 = vadd.f32 %v3314_v5, %v12552_v10  ;;  %v4295_v29 = vrot.slane %v4290_v24, 4  ;;  %v11075_v18 = vld [vmem:[#allocation2 + $0x60] sm:$0xff] }
 0x352   : > { %v11058_v48 = vrot.slane %v4297_v60, 7  ;;  %v11060_v33 = vadd.f32 1.0, %v8565_v46  ;;  %v11066_v42 = vpop.f32.mrf.mxu0  ;;  %vm3936_vm2 = vweird.f32 %v8563_v57  ;;  %v3939_v15 = vand.u32 2147483647, %v11026_v39  ;;  %7937 = vmatmul.msk.bf16.gmra.mxu1 %vm898_vm7, %v11073_v9  ;;  %v11096_v39 = vld [vmem:[#allocation2 + $0x20] sm:$0xff] }
 0x353   : > { %v3932_v52 = vsub.f32 1.0, %v3931_v11  ;;  %v11068_v44 = vpop.f32.mrf.mxu1  ;;  %v11079_v46 = vadd.f32 %v10890_v19, %v3346_v25  ;;  %v11083_v11 = vadd.f32 %v4942_v38, %v4689_v59  ;;  %vm3937_vm4 = vmor %vm3935_vm3, %vm3936_vm2  ;;  %v5329_v19 = vshll.u32 %v11075_v18, 16 }
 0x354   : > { %8113 = vmatmul.msk.bf16.gmra.mxu0 %vm898_vm7, %v11056_v4  ;;  %v4302_v31 = vor.u32 %v4300_v30, %v11058_v48  ;;  %8568 = vrcp.f32 %v11060_v33  ;;  %vm3940_vm9 = vcmp.eq.f32.partialorder %v3939_v15, 8.507059e+37  ;;  %vm3950_vm13 = vweird.f32 %v11060_v33 }
 0x355   : > { %v3933_v60 = vmul.f32 %v8563_v57, %v3932_v52  ;;  %v3413_v5 = vsub.f32 0.0, %v11079_v46  ;;  %v3942_v52 = vor.u32 1.1754944e-38, %v3941_v6 }
 0x356   : > { %v4303_v24 = vsel %vm8846_vm5, %v4295_v29, %v4302_v31  ;;  %v8567_v35 = vpop.eup %8566  ;;  %v4944_v29 = vpop.f32.mrf.mxu3 }
 0x357   : > { %4402 = vst.msk [vmem:[#allocation2 + $0x74] sm:$0xf] %vm376_vm1, %v4303_v24  ;;  %v3934_v30 = vadd.f32 %v8563_v57, %v3933_v60  ;;  %v11091_v25 = vadd.f32 1.0, %v8567_v35  ;;  %v3476_v38 = vmul.f32 1.442695, %v3413_v5  ;;  %v11094_v24 = vld [vmem:[#allocation2 + $0x18] sm:$0xff] }
 0x358   : > { %v4690_v59 = vpop.f32.mrf.mxu2  ;;  %v11108_v5 = vrot.slane %v5329_v19, 1 }
 0x359   : > { %v3938_v10 = vsel %vm3937_vm4, %v8563_v57, %v3934_v30  ;;  %v4691_v60 = vadd.f32 %v4690_v59, %v10829_v54  ;;  %8570 = vrcp.f32 %v11091_v25  ;;  %v8358_v30 = vld [vmem:[#allocation2 + $0x60] sm:$0xff]  ;;  %v5325_v54 = vshrl.u32 %v11008_v41, 16 }
 0x35a   : > { %v8569_v31 = vpop.eup %8568  ;;  %v3943_v37 = vsel %vm3940_vm9, %v3942_v52, %v3938_v10  ;;  %v11101_v57 = vpop.f32.mrf.mxu0  ;;  %8572 = vpow2.f32 %v3476_v38  ;;  %v12364_v59 = vrot.slane %v11094_v24, 1  ;;  %v12365_v38 = vrot.slane %v11096_v39, 1 }
 0x35b   : > { %v4018_v20 = vmul.f32 %v3943_v37, %v10969_v40  ;;  %v3946_v6 = vmul.f32 %v8569_v31, %v11060_v33  ;;  %v11103_v15 = vpop.f32.mrf.mxu1  ;;  %v11110_v40 = vadd.f32 %v4944_v29, %v4691_v60  ;;  %v3956_v37 = vand.u32 2147483648, %v11060_v33 }
 0x35c   : > { %v5327_v10 = vor.u32 %v5325_v54, %v11043_v32  ;;  %vm3951_vm12 = vweird.f32 %v8569_v31  ;;  %v3954_v41 = vand.u32 2147483647, %v11060_v33  ;;  %v11127_v19 = vsel %vm2628_vm11, %v12364_v59, %v12365_v38 }
 0x35d   : > { %v4050_v35 = vpack.c.bf16 %v4018_v20, %v4018_v20  ;;  %v3947_v52 = vsub.f32 1.0, %v3946_v6  ;;  %12553 = vst [vmem:[#allocation22_spill] sm:$0xff] %v11127_v19  ;;  %vm3952_vm6 = vmor %vm3950_vm13, %vm3951_vm12  ;;  %v3957_v13 = vor.u32 1.1754944e-38, %v3956_v37  ;;  %v3971_v47 = vand.u32 2147483648, %v11091_v25 }
 0x35e   : > { %7955 = vmatmul.msk.bf16.gmra.mxu2 %vm898_vm7, %v10849_v53  ;;  %v11120_v20 = vsel %vm1773_vm8, %v5327_v10, %v11108_v5  ;;  %v4947_v54 = vpop.f32.mrf.mxu3  ;;  %v4304_v10 = vrot.slane %v11058_v48, 4  ;;  %v11135_v59 = vld [vmem:[#allocation2 + $0x70] sm:$0xff]  ;;  %vm3955_vm14 = vcmp.eq.f32.partialorder %v3954_v41, 8.507059e+37  ;;  %vm3965_vm2 = vweird.f32 %v11091_v25 }
 0x35f   : > { %v4306_v17 = vshrl.u32 %v4050_v35, 16  ;;  %v3948_v53 = vmul.f32 %v8569_v31, %v3947_v52  ;;  %v8571_v32 = vpop.eup %8570  ;;  %v4309_v60 = vshll.u32 %v4050_v35, 16 }
 0x360   : > { %8036 = vmatmul.msk.bf16.gmra.mxu3 %vm898_vm7, %v8358_v30  ;;  %v4693_v30 = vpop.f32.mrf.mxu2  ;;  %v8573_v52 = vpop.eup %8572  ;;  %v3961_v1 = vmul.f32 %v8571_v32, %v11091_v25  ;;  %vm3966_vm15 = vweird.f32 %v8571_v32 }
 0x361   : > { %v11129_v29 = vrot.slane %v4306_v17, 7  ;;  %v3949_v6 = vadd.f32 %v8569_v31, %v3948_v53  ;;  %v4694_v12 = vadd.f32 %v4693_v30, %v10867_v63  ;;  %v11140_v33 = vadd.f32 1.0, %v8573_v52  ;;  %vm3967_vm3 = vmor %vm3965_vm2, %vm3966_vm15 }
 0x362   : > { %v11142_v53 = vpop.f32.mrf.mxu0  ;;  %v3962_v38 = vsub.f32 1.0, %v3961_v1  ;;  %7938 = vmatmul.msk.bf16.gmra.mxu1 %vm898_vm7, %v11135_v59 }
 0x363   : > { %v4311_v17 = vor.u32 %v4309_v60, %v11129_v29  ;;  %v3953_v35 = vsel %vm3952_vm6, %v8569_v31, %v3949_v6  ;;  %v11144_v48 = vpop.f32.mrf.mxu1  ;;  %v11146_v8 = vadd.f32 %v4947_v54, %v4694_v12  ;;  %8574 = vrcp.f32 %v11140_v33  ;;  %v11153_v31 = vld [vmem:[#allocation2 + $0x68] sm:$0xff] }
 0x364   : > { %8114 = vmatmul.msk.bf16.gmra.mxu0 %vm898_vm7, %v11120_v20  ;;  %v3958_v37 = vsel %vm3955_vm14, %v3957_v13, %v3953_v35  ;;  %v3963_v41 = vmul.f32 %v8571_v32, %v3962_v38  ;;  %v3969_v13 = vand.u32 2147483647, %v11091_v25  ;;  %v11159_v12 = vld [vmem:[#allocation2 + $0x28] sm:$0xff]  ;;  %v3972_v6 = vor.u32 1.1754944e-38, %v3971_v47 }
 0x365   : > { %v4312_v63 = vsel %vm8846_vm5, %v4304_v10, %v4311_v17  ;;  %v4019_v30 = vmul.f32 %v3958_v37, %v11016_v34  ;;  %v5337_v10 = vshll.u32 %v11153_v31, 16  ;;  %v6389_v35 = vrot.slane %v11159_v12, 1 }
 0x366   : > { %4403 = vst.msk [vmem:[#allocation2 + $0x78] sm:$0xf] %vm376_vm1, %v4312_v63  ;;  %v3964_v60 = vadd.f32 %v8571_v32, %v3963_v41  ;;  %v4949_v52 = vpop.f32.mrf.mxu3  ;;  %vm3970_vm4 = vcmp.eq.f32.partialorder %v3969_v13, 8.507059e+37  ;;  %vm3980_vm12 = vweird.f32 %v11140_v33 }
 0x367   : > { %v4051_v1 = vpack.c.bf16 %v4019_v30, %v4019_v30 }
 0x368   : > { %v4695_v54 = vpop.f32.mrf.mxu2  ;;  %v3968_v38 = vsel %vm3967_vm3, %v8571_v32, %v3964_v60  ;;  %v4313_v32 = vrot.slane %v11129_v29, 4  ;;  %v3986_v29 = vand.u32 2147483648, %v11140_v33 }
 0x369   : > { %v4315_v34 = vshrl.u32 %v4051_v1, 16  ;;  %v4696_v17 = vadd.f32 %v4695_v54, %v10906_v58  ;;  %v8575_v37 = vpop.eup %8574  ;;  %v4318_v56 = vshll.u32 %v4051_v1, 16  ;;  %v3973_v30 = vsel %vm3970_vm4, %v3972_v6, %v3968_v38 }
 0x36a   : > { %v11165_v41 = vpop.f32.mrf.mxu0  ;;  %v4020_v47 = vmul.f32 %v3973_v30, %v11037_v23  ;;  %v3976_v16 = vmul.f32 %v8575_v37, %v11140_v33  ;;  %v5333_v58 = vshrl.u32 %v11075_v18, 16  ;;  %v11178_v1 = vrot.slane %v5337_v10, 1  ;;  %v8214_v18 = vld [vmem:[%s12285_s3 + $0xa] sm:$0x3] }
 0x36b   : > { %v4317_v63 = vrot.slane %v4315_v34, 7  ;;  %v11167_v25 = vpop.f32.mrf.mxu1  ;;  %v11171_v19 = vadd.f32 %v4949_v52, %v4696_v17  ;;  %v12554_v23 = vrot.slane %v11096_v39, 1  ;;  %v6177_v54 = vsel %vm947_vm0, %v8214_v18, 0 }
 0x36c   : > { %v4052_v34 = vpack.c.bf16 %v4020_v47, %v4020_v47  ;;  %v3977_v6 = vsub.f32 1.0, %v3976_v16  ;;  %vm3981_vm9 = vweird.f32 %v8575_v37  ;;  %6186 = vmatpush.bf16.msra.mxu3 %v6177_v54  ;;  %v11213_v54 = vld [vmem:[#allocation2 + $0x70] sm:$0xff] }
 0x36d   : > { %v4320_v13 = vor.u32 %v4318_v56, %v4317_v63  ;;  %v11185_v60 = vsel %vm2628_vm11, %v12554_v23, %v6389_v35  ;;  %v3984_v56 = vand.u32 2147483647, %v11140_v33  ;;  %vm3982_vm13 = vmor %vm3980_vm12, %vm3981_vm9  ;;  %v4322_v23 = vrot.slane %v4317_v63, 4 }
 0x36e   : > { %7956 = vmatmul.msk.bf16.gmra.mxu2 %vm898_vm7, %v10954_v27  ;;  %12555 = vst [vmem:[#allocation3_spill] sm:$0xff] %v11185_v60  ;;  %v5335_v27 = vor.u32 %v5333_v58, %v11108_v5  ;;  %v4324_v52 = vshrl.u32 %v4052_v34, 16  ;;  %v3978_v10 = vmul.f32 %v8575_v37, %v3977_v6  ;;  %v4952_v5 = vpop.f32.mrf.mxu3  ;;  %v4327_v30 = vshll.u32 %v4052_v34, 16 }
 0x36f   : > { %vm3985_vm6 = vcmp.eq.f32.partialorder %v3984_v56, 8.507059e+37 }
 0x370   : > { %8037 = vmatmul.msk.bf16.gmra.mxu3 %vm898_vm7, %v8359_v61  ;;  %v4321_v61 = vsel %vm8846_vm5, %v4313_v32, %v4320_v13  ;;  %v4698_v16 = vpop.f32.mrf.mxu2  ;;  %v11200_v38 = vsel %vm1773_vm8, %v5335_v27, %v11178_v1  ;;  %v4326_v17 = vrot.slane %v4324_v52, 7  ;;  %v3979_v47 = vadd.f32 %v8575_v37, %v3978_v10 }
 0x371   : > { %4404 = vst.msk [vmem:[#allocation2 + $0x7c] sm:$0xf] %vm376_vm1, %v4321_v61  ;;  %v4699_v58 = vadd.f32 %v4698_v16, %v10951_v51  ;;  %v3987_v32 = vor.u32 1.1754944e-38, %v3986_v29  ;;  %v11211_v61 = vld [vmem:[#allocation2 + $0x30] sm:$0xff]  ;;  %v8136_v29 = vld [vmem:[%s12285_s3 + $0xe] sm:$0x3] }
 0x372   : > { %v11205_v13 = vpop.f32.mrf.mxu0  ;;  %v4329_v6 = vor.u32 %v4327_v30, %v4326_v17  ;;  %v3983_v18 = vsel %vm3982_vm13, %v8575_v37, %v3979_v47  ;;  %v8213_v37 = vld [vmem:[%s12285_s3 + $0x4] sm:$0x3]  ;;  %v5931_v52 = vsel %vm947_vm0, %v8136_v29, 0  ;;  %v5345_v47 = vshll.u32 %v11213_v54, 16 }
 0x373   : > { %v11207_v33 = vpop.f32.mrf.mxu1  ;;  %v11209_v27 = vadd.f32 %v4952_v5, %v4699_v58  ;;  %v3988_v34 = vsel %vm3985_vm6, %v3987_v32, %v3983_v18  ;;  %v6287_v10 = vsel %vm947_vm0, %v8213_v37, 0  ;;  %5940 = vmatpush.bf16.msra.mxu2 %v5931_v52 }
 0x374   : > { %8115 = vmatmul.msk.bf16.gmra.mxu0 %vm898_vm7, %v11200_v38  ;;  %v4330_v51 = vsel %vm8846_vm5, %v4322_v23, %v4329_v6  ;;  %v4021_v56 = vmul.f32 %v3988_v34, %v11079_v46  ;;  %v6391_v46 = vrot.slane %v11211_v61, 1  ;;  %v8247_v23 = vld [vmem:[%s12285_s3 + $0x10] sm:$0x3] }
 0x375   : > { %4405 = vst.msk [vmem:[#allocation2 + $0x80] sm:$0xf] %vm376_vm1, %v4330_v51  ;;  %6296 = vmatpush.bf16.msra.mxu0 %v6287_v10  ;;  %v8360_v34 = vld [vmem:[#allocation2 + $0x70] sm:$0xff]  ;;  %v6466_v51 = vsel %vm947_vm0, %v8247_v23, 0  ;;  %v5341_v10 = vshrl.u32 %v11153_v31, 16  ;;  %v4331_v23 = vrot.slane %v4326_v17, 4 }
 0x376   : > { %v4053_v16 = vpack.c.bf16 %v4021_v56, %v4021_v56  ;;  %v4954_v30 = vpop.f32.mrf.mxu3  ;;  %v11245_v56 = vsel %vm2628_vm11, %v6389_v35, %v6391_v46  ;;  %6475 = vmatpush.bf16.msra.mxu1 %v6466_v51  ;;  %v11271_v17 = vld [vmem:[#allocation2 + $0x38] sm:$0xff] }
 0x377   : > { %12557 = vst [vmem:[#allocation35_spill] sm:$0xff] %v11245_v56  ;;  %v5343_v35 = vor.u32 %v5341_v10, %v11178_v1 }
 0x378   : > { %v11225_v63 = vld [vmem:[#allocation2 + $0x78] sm:$0xff]  ;;  %v4700_v5 = vpop.f32.mrf.mxu2  ;;  %v4333_v58 = vshrl.u32 %v4053_v16, 16  ;;  %v4336_v37 = vshll.u32 %v4053_v16, 16 }
 0x379   : > { %7939 = vmatmul.msk.bf16.gmra.mxu1 %vm898_vm7, %v11225_v63  ;;  %v4701_v32 = vadd.f32 %v4700_v5, %v10973_v14  ;;  %v4407_v14 = vld [vmem:[#allocation2 + $0x88] sm:$0x1]  ;;  %v5347_v5 = vrot.slane %v5345_v47, 1  ;;  %v11273_v47 = vld [vmem:[#allocation2 + $0x78] sm:$0xff] }
 0x37a   : > { %v11237_v6 = vpop.f32.mrf.mxu0  ;;  %v4335_v29 = vrot.slane %v4333_v58, 7  ;;  %12561 = vst [vmem:[#allocation31_spill] sm:$0xff] %v11273_v47 }
 0x37b   : > { %12556 = vst [vmem:[#allocation29_spill] sm:$0xff] %v11237_v6  ;;  %v11239_v18 = vpop.f32.mrf.mxu1  ;;  %v11247_v52 = vadd.f32 %v4954_v30, %v4701_v32  ;;  %v8361_v30 = vld [vmem:[#allocation2 + $0x78] sm:$0xff] }
 0x37c   : > { %v4338_v60 = vor.u32 %v4336_v37, %v4335_v29  ;;  %v4340_v6 = vrot.slane %v4335_v29, 4 }
 0x37e   : > { %7957 = vmatmul.msk.bf16.gmra.mxu2 %vm898_vm7, %v11011_v50  ;;  %v4339_v16 = vsel %vm8846_vm5, %v4331_v23, %v4338_v60  ;;  %v4408_v58 = vsel %vm9560_vm10, %v4340_v6, %v4407_v14  ;;  %v4957_v32 = vpop.f32.mrf.mxu3  ;;  %v6393_v6 = vrot.slane %v11271_v17, 1  ;;  %v8403_v23 = vld [vmem:[#allocation2] sm:$0xff]  }
 0x37f   : > { %4406 = vst.msk [vmem:[#allocation2 + $0x84] sm:$0xf] %vm376_vm1, %v4339_v16 }
 0x380   : > { %8038 = vmatmul.msk.bf16.gmra.mxu3 %vm898_vm7, %v8360_v34  ;;  %v4703_v50 = vpop.f32.mrf.mxu2  ;;  %v11260_v34 = vsel %vm1773_vm8, %v5343_v35, %v5347_v5  ;;  %4409 = vst [vmem:[#allocation2 + $0x88] sm:$0x1] %v4408_v58  ;;  %v11278_v14 = vsel %vm2628_vm11, %v6391_v46, %v6393_v6  ;;  %v5349_v46 = vshrl.u32 %v11213_v54, 16 }
 0x381   : > { %v4704_v31 = vadd.f32 %v4703_v50, %v11006_v26  ;;  %v5353_v26 = vshll.u32 %v11273_v47, 16  ;;  %12562 = vst [vmem:[#allocation41_spill] sm:$0xff] %v11278_v14  ;;  %v5524_v50 = vshll.u32 %v8403_v23, 16 }
 0x382   : > { %v11265_v1 = vpop.f32.mrf.mxu0 }
 0x383   : > { %12559 = vst [vmem:[#allocation38_spill] sm:$0xff] %v11265_v1  ;;  %v11267_v3 = vpop.f32.mrf.mxu1  ;;  %v11269_v60 = vadd.f32 %v4957_v32, %v4704_v31  ;;  %v5355_v32 = vrot.slane %v5353_v26, 1  ;;  %v5351_v31 = vor.u32 %v5349_v46, %v5347_v5  ;;  %v5526_v14 = vrot.slane %v5524_v50, 1  ;;  %v11304_v26 = vld [vmem:[#allocation2 + $0x40] sm:$0xff] }
 0x384   : > { %8116 = vmatmul.msk.bf16.gmra.mxu0 %vm898_vm7, %v11260_v34 }
 0x385   : > { %12560 = vst [vmem:[#allocation33_spill] sm:$0xff] %v11269_v60  ;;  %v11293_v56 = vsel %vm1773_vm8, %v5351_v31, %v5355_v32 }
 0x386   : > { %v8347_v51 = vld [vmem:[#allocation2 + $0x80] sm:$0xff]  ;;  %v4959_v37 = vpop.f32.mrf.mxu3 }
 0x387   : > { %v11306_v46 = vld [vmem:[#allocation2 + $0x80] sm:$0xff] }
 0x388   : > { %v4705_v29 = vpop.f32.mrf.mxu2  ;;  %12567 = vst [vmem:[#allocation67_spill] sm:$0xff] %v11306_v46 }
 0x389   : > { %7940 = vmatmul.msk.bf16.gmra.mxu1 %vm898_vm7, %v8347_v51  ;;  %v4706_v10 = vadd.f32 %v4705_v29, %v11032_v45  ;;  %v5522_v29 = vshrl.u32 %v8403_v23, 16  ;;  %v6395_v23 = vrot.slane %v11304_v26, 1 }
 0x38a   : > { %v11282_v35 = vpop.f32.mrf.mxu0 }
 0x38b   : > { %12563 = vst [vmem:[#allocation43_spill] sm:$0xff] %v11282_v35  ;;  %v11284_v16 = vpop.f32.mrf.mxu1  ;;  %v11286_v58 = vadd.f32 %v4959_v37, %v4706_v10  ;;  %v5527_v5 = vor.u32 %v5526_v14, %v5522_v29  ;;  %v8362_v29 = vld [vmem:[#allocation2 + $0x80] sm:$0xff] }
 0x38d   : > { %12564 = vst [vmem:[#allocation55_spill] sm:$0xff] %v11286_v58  ;;  %v5528_v50 = vsel %vm1773_vm8, %v5527_v5, %v10260_v36  ;;  %v5357_v36 = vshrl.u32 %v11273_v47, 16  ;;  %v5155_v5 = vld [vmem:[#allocation2 + $0x88] sm:$0x1] }
 0x38e   : > { %7958 = vmatmul.msk.bf16.gmra.mxu2 %vm898_vm7, %v11073_v9  ;;  %v4962_v45 = vpop.f32.mrf.mxu3 }
 0x390   : > { %8039 = vmatmul.msk.bf16.gmra.mxu3 %vm898_vm7, %v8361_v30  ;;  %v4708_v51 = vpop.f32.mrf.mxu2 }
 0x391   : > { %v4709_v37 = vadd.f32 %v4708_v51, %v11068_v44  ;;  %v5361_v51 = vshll.u32 %v11306_v46, 16 }
 0x392   : > { %v11298_v9 = vpop.f32.mrf.mxu0 }
 0x393   : > { %12565 = vst [vmem:[#allocation57_spill] sm:$0xff] %v11298_v9  ;;  %v11300_v10 = vpop.f32.mrf.mxu1  ;;  %v11302_v30 = vadd.f32 %v4962_v45, %v4709_v37  ;;  %v11313_v9 = vsel %vm2628_vm11, %v6393_v6, %v6395_v23  ;;  %v5363_v6 = vrot.slane %v5361_v51, 1  ;;  %v11339_v51 = vld [vmem:[#allocation2 + $0x48] sm:$0xff] }
 0x394   : > { %8117 = vmatmul.msk.bf16.gmra.mxu0 %vm898_vm7, %v11293_v56  ;;  %12568 = vst [vmem:[#allocation71_spill] sm:$0xff] %v11313_v9  ;;  %v11327_v9 = vor.u32 %v5357_v36, %v5355_v32  ;;  %v6397_v36 = vrot.slane %v11339_v51, 1 }
 0x395   : > { %12566 = vst [vmem:[#allocation62_spill] sm:$0xff] %v11302_v30 }
 0x396   : > { %v4964_v31 = vpop.f32.mrf.mxu3  ;;  %12571 = vst [vmem:[#allocation79_spill] sm:$0xff] %v11327_v9 }
 0x398   : > { %v4710_v44 = vpop.f32.mrf.mxu2 }
 0x399   : > { %8120 = vmatmul.msk.bf16.vlgmr.msrb.gmra.mxu1 %vm898_vm7, %v5528_v50  ;;  %v4711_v45 = vadd.f32 %v4710_v44, %v11103_v15  ;;  %v5364_v44 = vsel %vm1773_vm8, %v11327_v9, %v5363_v6 }
 0x39a   : > { %v11317_v37 = vpop.f32.mrf.mxu0 }
 0x39b   : > { %12569 = vst [vmem:[#allocation73_spill] sm:$0xff] %v11317_v37  ;;  %v11319_v14 = vpop.f32.mrf.mxu1  ;;  %v11321_v30 = vadd.f32 %v4964_v31, %v4711_v45  ;;  %v5223_v37 = vunpack.c.l.b16 %v5155_v5 }
 0x39d   : > { %12570 = vst [vmem:[#allocation77_spill] sm:$0xff] %v11321_v30  ;;  %v11341_v32 = vpack.c.b16 %v5223_v37, %v5223_v37  ;;  %v8363_v37 = vld [vmem:[#allocation2 + $0x88] sm:$0xff] }
 0x39e   : > { %7959 = vmatmul.msk.bf16.gmra.mxu2 %vm898_vm7, %v11135_v59  ;;  %v4967_v15 = vpop.f32.mrf.mxu3 }
 0x39f   : > { %12574 = vst [vmem:[#allocation87_spill] sm:$0xff] %v11341_v32  ;;  %v5369_v5 = vshll.u32 %v11341_v32, 16  ;;  %v8422_v32 = vld [vmem:[#allocation2 + $0x10] sm:$0xff]  }
 0x3a0   : > { %8040 = vmatmul.msk.bf16.gmra.mxu3 %vm898_vm7, %v8362_v29  ;;  %v4713_v50 = vpop.f32.mrf.mxu2  ;;  %v5751_v58 = vshrl.u32 %v8422_v32, 16 }
 0x3a1   : > { %v4714_v31 = vadd.f32 %v4713_v50, %v11144_v48  ;;  %v11346_v48 = vsel %vm2628_vm11, %v6395_v23, %v6397_v36 }
 0x3a2   : > { %v11333_v45 = vpop.f32.mrf.mxu0  ;;  %12575 = vst [vmem:[#allocation5_spill] sm:$0xff] %v11346_v48  ;;  %v5371_v48 = vrot.slane %v5369_v5, 1 }
 0x3a3   : > { %12572 = vst [vmem:[#allocation83_spill] sm:$0xff] %v11333_v45  ;;  %v11335_v59 = vpop.f32.mrf.mxu1  ;;  %v11337_v29 = vadd.f32 %v4967_v15, %v4714_v31  ;;  %v5365_v31 = vshrl.u32 %v11306_v46, 16 }
 0x3a4   : > { %8118 = vmatmul.msk.bf16.gmra.mxu0 %vm898_vm7, %v5364_v44 }
 0x3a5   : > { %12573 = vst [vmem:[#allocation85_spill] sm:$0xff] %v11337_v29  ;;  %v5367_v23 = vor.u32 %v5365_v31, %v5363_v6  ;;  %v11371_v6 = vld [vmem:[#allocation2 + $0x50] sm:$0xff]  ;;  %v8424_v31 = vld [vmem:[#allocation2 + $0x8] sm:$0xe] }
 0x3a6   : > { %v4969_v35 = vpop.f32.mrf.mxu3 }
 0x3a8   : > { %v4715_v30 = vpop.f32.mrf.mxu2 }
 0x3a9   : > { %8121 = vmatmul.msk.bf16.gmra.mxu1 %vm898_vm7, %v10374_v55  ;;  %v4716_v50 = vadd.f32 %v4715_v30, %v11167_v25  ;;  %v5372_v25 = vsel %vm1773_vm8, %v5367_v23, %v5371_v48  ;;  %v5753_v30 = vshll.u32 %v8422_v32, 16  ;;  %v8426_v48 = vld [vmem:[#allocation2] sm:$0xf0]  ;;  %v8427_v23 = vld [vmem:[#allocation2] sm:$0xe] }
 0x3aa   : > { %v11351_v15 = vpop.f32.mrf.mxu0  ;;  %v8428_v60 = vor.u32 %v8427_v23, %v8426_v48  ;;  %v5766_v23 = vshll.u32 %v11096_v39, 16 }
 0x3ab   : > { %12576 = vst [vmem:[#allocation23_spill] sm:$0xff] %v11351_v15  ;;  %v11353_v44 = vpop.f32.mrf.mxu1  ;;  %v11356_v45 = vadd.f32 %v4969_v35, %v4716_v50  ;;  %v8423_v50 = vld [vmem:[#allocation2 + $0x8] sm:$0xf0]  ;;  %v5755_v5 = vrot.slane %v5753_v30, 1 }
 0x3ad   : > { %12577 = vst [vmem:[#allocation89_spill] sm:$0xff] %v11356_v45  ;;  %v8425_v45 = vor.u32 %v8424_v31, %v8423_v50  ;;  %v5756_v1 = vor.u32 %v5755_v5, %v5751_v58  ;;  %v8738_v5 = vld [vmem:[#allocation2 + $0x8] sm:$0xff]  }
 0x3ae   : > { %7960 = vmatmul.msk.bf16.gmra.mxu2 %vm898_vm7, %v11225_v63  ;;  %v4972_v29 = vpop.f32.mrf.mxu3  ;;  %v5758_v63 = vshll.u32 %v11094_v24, 16 }
 0x3af   : > { %v6095_v30 = vrot.slane %v8425_v45, 1 }
 0x3b0   : > { %8041 = vmatmul.msk.bf16.gmra.mxu3 %vm898_vm7, %v8363_v37  ;;  %v4718_v55 = vpop.f32.mrf.mxu2 }
 0x3b1   : > { %v4719_v15 = vadd.f32 %v4718_v55, %v11207_v33  ;;  %v5760_v33 = vrot.slane %v5758_v63, 1  ;;  %v6399_v55 = vrot.slane %v11371_v6, 1 }
 0x3b2   : > { %v11364_v46 = vpop.f32.mrf.mxu0 }
 0x3b3   : > { %12578 = vst [vmem:[#allocation90_spill] sm:$0xff] %v11364_v46  ;;  %v11366_v35 = vpop.f32.mrf.mxu1  ;;  %v11369_v37 = vadd.f32 %v4972_v29, %v4719_v15  ;;  %v11375_v29 = vsel %vm2628_vm11, %v6397_v36, %v6399_v55  ;;  %v5761_v63 = vsel %vm1773_vm8, %v5756_v1, %v5760_v33  ;;  %v6271_v36 = vrot.slane %v8428_v60, 1 }
 0x3b4   : > { %8119 = vmatmul.msk.bf16.gmra.mxu0 %vm898_vm7, %v5372_v25  ;;  %v8737_v25 = vld [vmem:[#allocation2 + $0x10] sm:$0xff]  ;;  %12579 = vst [vmem:[#allocation91_spill] sm:$0xff] %v11375_v29  ;;  %v5762_v60 = vshrl.u32 %v11094_v24, 16 }
 0x3b5   : > { %v6096_v46 = vrot.slane %v8737_v25, 1 }
 0x3b6   : > { %v4974_v47 = vpop.f32.mrf.mxu3 }
 0x3b7   : > { %v6097_v58 = vsel %vm2628_vm11, %v6095_v30, %v6096_v46  ;;  %v5768_v30 = vrot.slane %v5766_v23, 1 }
 0x3b8   : > { %v4720_v9 = vpop.f32.mrf.mxu2 }
 0x3b9   : > { %8122 = vmatmul.msk.bf16.gmra.mxu1 %vm898_vm7, %v10464_v49  ;;  %v4721_v15 = vadd.f32 %v4720_v9, %v11239_v18  ;;  %v6272_v49 = vrot.slane %v8738_v5, 1 }
 0x3ba   : > { %v11380_v50 = vpop.f32.mrf.mxu0 }
 0x3bb   : > { %v11382_v32 = vpop.f32.mrf.mxu1  ;;  %v11385_v31 = vadd.f32 %v4974_v47, %v4721_v15  ;;  %v6273_v9 = vsel %vm2628_vm11, %v6271_v36, %v6272_v49  ;;  %v11400_v15 = vld [vmem:[#allocation2 + $0x58] sm:$0xff] }
 0x3be   : > { %8197 = vmatmul.msk.bf16.vlgmr.msra.gmra.mxu2 %vm898_vm7, %v5761_v63  ;;  %v4977_v18 = vpop.f32.mrf.mxu3  ;;  %v6401_v63 = vrot.slane %v11400_v15, 1 }
 0x3c0   : > { %8215 = vmatmul.msk.bf16.vlgmr.msra.gmra.mxu3 %vm898_vm7, %v6097_v58  ;;  %v4723_v48 = vpop.f32.mrf.mxu2  ;;  %v8739_v58 = vld [vmem:[#allocation2 + $0x18] sm:$0xff] }
 0x3c1   : > { %v4724_v45 = vadd.f32 %v4723_v48, %v11267_v3  ;;  %v6098_v36 = vrot.slane %v8739_v58, 1  ;;  %v5764_v48 = vor.u32 %v5762_v60, %v5760_v33 }
 0x3c2   : > { %v11393_v1 = vpop.f32.mrf.mxu0 }
 0x3c3   : > { %12580 = vst [vmem:[#allocation92_spill] sm:$0xff] %v11393_v1  ;;  %v11395_v47 = vpop.f32.mrf.mxu1  ;;  %v11398_v25 = vadd.f32 %v4977_v18, %v4724_v45  ;;  %v5769_v23 = vsel %vm1773_vm8, %v5764_v48, %v5768_v30  ;;  %v6099_v33 = vsel %vm2628_vm11, %v6096_v46, %v6098_v36 }
 0x3c4   : > { %8231 = vmatmul.msk.bf16.vlgmr.msra.gmra.mxu0 %vm898_vm7, %v6273_v9  ;;  %v11405_v9 = vsel %vm2628_vm11, %v6399_v55, %v6401_v63 }
 0x3c5   : > { %12581 = vst [vmem:[#allocation93_spill] sm:$0xff] %v11405_v9 }
 0x3c6   : > { %v4979_v5 = vpop.f32.mrf.mxu3 }
 0x3c8   : > { %v4725_v3 = vpop.f32.mrf.mxu2 }
 0x3c9   : > { %8123 = vmatmul.msk.bf16.gmra.mxu1 %vm898_vm7, %v10548_v0  ;;  %v4726_v18 = vadd.f32 %v4725_v3, %v11284_v16  ;;  %v6274_v0 = vsel %vm2628_vm11, %v6272_v49, %v6096_v46  ;;  %v8740_v46 = vld [vmem:[#allocation2 + $0x20] sm:$0xff] }
 0x3ca   : > { %v11410_v45 = vpop.f32.mrf.mxu0  ;;  %v6100_v49 = vrot.slane %v8740_v46, 1 }
 0x3cb   : > { %12582 = vst [vmem:[#allocation94_spill] sm:$0xff] %v11410_v45  ;;  %v11412_v29 = vpop.f32.mrf.mxu1  ;;  %v11415_v1 = vadd.f32 %v4979_v5, %v4726_v18  ;;  %v5774_v5 = vshll.u32 %v11159_v12, 16  ;;  %v11430_v18 = vld [vmem:[#allocation2 + $0x60] sm:$0xff] }
 0x3cc   : > { %v6403_v45 = vrot.slane %v11430_v18, 1 }
 0x3cd   : > { %v5776_v9 = vrot.slane %v5774_v5, 1 }
 0x3ce   : > { %8198 = vmatmul.msk.bf16.gmra.mxu2 %vm898_vm7, %v5769_v23  ;;  %v4982_v60 = vpop.f32.mrf.mxu3  ;;  %v5770_v23 = vshrl.u32 %v11096_v39, 16 }
 0x3d0   : > { %8216 = vmatmul.msk.bf16.gmra.mxu3 %vm898_vm7, %v6099_v33  ;;  %v4728_v55 = vpop.f32.mrf.mxu2 }
 0x3d1   : > { %v4729_v16 = vadd.f32 %v4728_v55, %v11300_v10 }
 0x3d2   : > { %v11423_v58 = vpop.f32.mrf.mxu0 }
 0x3d3   : > { %12583 = vst [vmem:[#allocation95_spill] sm:$0xff] %v11423_v58  ;;  %v11425_v3 = vpop.f32.mrf.mxu1  ;;  %v11428_v48 = vadd.f32 %v4982_v60, %v4729_v16  ;;  %v11435_v58 = vsel %vm2628_vm11, %v6401_v63, %v6403_v45 }
 0x3d4   : > { %8232 = vmatmul.msk.bf16.gmra.mxu0 %vm898_vm7, %v6274_v0  ;;  %v5772_v0 = vor.u32 %v5770_v23, %v5768_v30  ;;  %12585 = vst [vmem:[#allocation97_spill] sm:$0xff] %v11435_v58  ;;  %v6101_v30 = vsel %vm2628_vm11, %v6098_v36, %v6100_v49  ;;  %v5778_v36 = vshrl.u32 %v11159_v12, 16  ;;  %v8741_v58 = vld [vmem:[#allocation2 + $0x28] sm:$0xff] }
 0x3d5   : > { %12584 = vst [vmem:[#allocation96_spill] sm:$0xff] %v11428_v48 }
 0x3d6   : > { %v4984_v55 = vpop.f32.mrf.mxu3  ;;  %v5777_v39 = vsel %vm1773_vm8, %v5772_v0, %v5776_v9  ;;  %v11459_v0 = vld [vmem:[#allocation2 + $0x68] sm:$0xff] }
 0x3d8   : > { %v4730_v10 = vpop.f32.mrf.mxu2 }
 0x3d9   : > { %8124 = vmatmul.msk.bf16.gmra.mxu1 %vm898_vm7, %v10629_v22  ;;  %v4731_v60 = vadd.f32 %v4730_v10, %v11319_v14  ;;  %v5782_v10 = vshll.u32 %v11211_v61, 16 }
 0x3da   : > { %v11440_v16 = vpop.f32.mrf.mxu0 }
 0x3db   : > { %12586 = vst [vmem:[#allocation98_spill] sm:$0xff] %v11440_v16  ;;  %v11442_v48 = vpop.f32.mrf.mxu1  ;;  %v11445_v5 = vadd.f32 %v4984_v55, %v4731_v60  ;;  %v5784_v60 = vrot.slane %v5782_v10, 1  ;;  %v6102_v16 = vrot.slane %v8741_v58, 1 }
 0x3de   : > { %8199 = vmatmul.msk.bf16.gmra.mxu2 %vm898_vm7, %v5777_v39  ;;  %v4987_v23 = vpop.f32.mrf.mxu3  ;;  %v6405_v39 = vrot.slane %v11459_v0, 1 }
 0x3e0   : > { %8217 = vmatmul.msk.bf16.gmra.mxu3 %vm898_vm7, %v6101_v30  ;;  %v4733_v63 = vpop.f32.mrf.mxu2 }
 0x3e1   : > { %v4734_v22 = vadd.f32 %v4733_v63, %v11335_v59 }
 0x3e2   : > { %v11452_v14 = vpop.f32.mrf.mxu0 }
 0x3e3   : > { %12587 = vst [vmem:[#allocation99_spill] sm:$0xff] %v11452_v14  ;;  %v11454_v46 = vpop.f32.mrf.mxu1  ;;  %v11457_v55 = vadd.f32 %v4987_v23, %v4734_v22  ;;  %v11464_v14 = vsel %vm2628_vm11, %v6403_v45, %v6405_v39 }
 0x3e4   : > { %8233 = vmatmul.msk.bf16.gmra.mxu0 %vm898_vm7, %v6099_v33  ;;  %v5780_v33 = vor.u32 %v5778_v36, %v5776_v9  ;;  %12589 = vst [vmem:[#allocation101_spill] sm:$0xff] %v11464_v14  ;;  %v6103_v9 = vsel %vm2628_vm11, %v6100_v49, %v6102_v16  ;;  %v5790_v36 = vshll.u32 %v11271_v17, 16  ;;  %v5786_v49 = vshrl.u32 %v11211_v61, 16  ;;  %v8742_v14 = vld [vmem:[#allocation2 + $0x30] sm:$0xff] }
 0x3e5   : > { %12588 = vst [vmem:[#allocation100_spill] sm:$0xff] %v11457_v55 }
 0x3e6   : > { %v4989_v63 = vpop.f32.mrf.mxu3  ;;  %v5785_v12 = vsel %vm1773_vm8, %v5780_v33, %v5784_v60 }
 0x3e8   : > { %v4735_v59 = vpop.f32.mrf.mxu2 }
 0x3e9   : > { %8125 = vmatmul.msk.bf16.gmra.mxu1 %vm898_vm7, %v10693_v7  ;;  %v4736_v23 = vadd.f32 %v4735_v59, %v11353_v44 }
 0x3ea   : > { %v11469_v22 = vpop.f32.mrf.mxu0 }
 0x3eb   : > { %12590 = vst [vmem:[#allocation102_spill] sm:$0xff] %v11469_v22  ;;  %v11472_v10 = vadd.f32 %v4989_v63, %v4736_v23  ;;  %v11474_v55 = vpop.f32.mrf.mxu1  ;;  %v11486_v63 = vld [vmem:[#allocation2 + $0x70] sm:$0xff]  ;;  %v5792_v23 = vrot.slane %v5790_v36, 1  ;;  %v6104_v22 = vrot.slane %v8742_v14, 1 }
 0x3ed   : > { %12591 = vst [vmem:[#allocation103_spill] sm:$0xff] %v11472_v10  ;;  %v6105_v14 = vsel %vm2628_vm11, %v6102_v16, %v6104_v22  ;;  %v5794_v16 = vshrl.u32 %v11271_v17, 16 }
 0x3ee   : > { %8200 = vmatmul.msk.bf16.gmra.mxu2 %vm898_vm7, %v5785_v12  ;;  %v4992_v58 = vpop.f32.mrf.mxu3  ;;  %v6407_v12 = vrot.slane %v11486_v63, 1 }
 0x3f0   : > { %8218 = vmatmul.msk.bf16.gmra.mxu3 %vm898_vm7, %v6103_v9  ;;  %v4738_v45 = vpop.f32.mrf.mxu2 }
 0x3f1   : > { %v4739_v7 = vadd.f32 %v4738_v45, %v11366_v35 }
 0x3f2   : > { %v11481_v44 = vpop.f32.mrf.mxu0 }
 0x3f3   : > { %12592 = vst [vmem:[#allocation104_spill] sm:$0xff] %v11481_v44  ;;  %v11484_v59 = vadd.f32 %v4992_v58, %v4739_v7  ;;  %v11493_v44 = vsel %vm2628_vm11, %v6405_v39, %v6407_v12 }
 0x3f4   : > { %8234 = vmatmul.msk.bf16.gmra.mxu0 %vm898_vm7, %v6101_v30  ;;  %v5788_v30 = vor.u32 %v5786_v49, %v5784_v60  ;;  %12594 = vst [vmem:[#allocation106_spill] sm:$0xff] %v11493_v44 }
 0x3f5   : > { %12593 = vst [vmem:[#allocation105_spill] sm:$0xff] %v11484_v59 }
 0x3f6   : > { %v11488_v33 = vpop.f32.mrf.mxu1  ;;  %v4994_v45 = vpop.f32.mrf.mxu3  ;;  %v5793_v61 = vsel %vm1773_vm8, %v5788_v30, %v5792_v23  ;;  %v11515_v30 = vld [vmem:[#allocation2 + $0x78] sm:$0xff] }
 0x3f7   : > { %v6409_v44 = vrot.slane %v11515_v30, 1 }
 0x3f8   : > { %v4740_v35 = vpop.f32.mrf.mxu2 }
 0x3f9   : > { %8126 = vmatmul.msk.bf16.gmra.mxu1 %vm898_vm7, %v10812_v62  ;;  %v4741_v58 = vadd.f32 %v4740_v35, %v11382_v32  ;;  %v5798_v35 = vshll.u32 %v11304_v26, 16 }
 0x3fa   : > { %v11498_v7 = vpop.f32.mrf.mxu0 }
 0x3fb   : > { %12595 = vst [vmem:[#allocation107_spill] sm:$0xff] %v11498_v7  ;;  %v11501_v36 = vadd.f32 %v4994_v45, %v4741_v58  ;;  %v8743_v7 = vld [vmem:[#allocation2 + $0x38] sm:$0xff] }
 0x3fd   : > { %12596 = vst [vmem:[#allocation108_spill] sm:$0xff] %v11501_v36  ;;  %v6106_v36 = vrot.slane %v8743_v7, 1 }
 0x3fe   : > { %8201 = vmatmul.msk.bf16.gmra.mxu2 %vm898_vm7, %v5793_v61  ;;  %v11506_v60 = vpop.f32.mrf.mxu1  ;;  %v4997_v49 = vpop.f32.mrf.mxu3  ;;  %v5800_v61 = vrot.slane %v5798_v35, 1 }
 0x3ff   : > { %v6107_v7 = vsel %vm2628_vm11, %v6104_v22, %v6106_v36  ;;  %v11546_v22 = vld [vmem:[#allocation2 + $0x88] sm:$0xff] }
 0x400   : > { %8219 = vmatmul.msk.bf16.gmra.mxu3 %vm898_vm7, %v6105_v14  ;;  %v4743_v39 = vpop.f32.mrf.mxu2 }
 0x401   : > { %v4744_v62 = vadd.f32 %v4743_v39, %v11395_v47 }
 0x402   : > { %v11510_v32 = vpop.f32.mrf.mxu0 }
 0x403   : > { %12597 = vst [vmem:[#allocation109_spill] sm:$0xff] %v11510_v32  ;;  %v11513_v45 = vadd.f32 %v4997_v49, %v4744_v62  ;;  %v11522_v32 = vsel %vm2628_vm11, %v6407_v12, %v6409_v44 }
 0x404   : > { %8235 = vmatmul.msk.bf16.gmra.mxu0 %vm898_vm7, %v6103_v9  ;;  %v5796_v9 = vor.u32 %v5794_v16, %v5792_v23  ;;  %12599 = vst [vmem:[#allocation111_spill] sm:$0xff] %v11522_v32  ;;  %v5664_v32 = vld [vmem:[#allocation2 + $0x90] sm:$0x1] }
 0x405   : > { %12598 = vst [vmem:[#allocation110_spill] sm:$0xff] %v11513_v45 }
 0x406   : > { %v11517_v58 = vpop.f32.mrf.mxu1  ;;  %v4999_v39 = vpop.f32.mrf.mxu3  ;;  %v5801_v17 = vsel %vm1773_vm8, %v5796_v9, %v5800_v61 }
 0x408   : > { %v4745_v47 = vpop.f32.mrf.mxu2 }
 0x409   : > { %8127 = vmatmul.msk.bf16.gmra.mxu1 %vm898_vm7, %v10876_v21  ;;  %v4746_v49 = vadd.f32 %v4745_v47, %v11412_v29  ;;  %v5806_v47 = vshll.u32 %v11339_v51, 16 }
 0x40a   : > { %v11527_v62 = vpop.f32.mrf.mxu0 }
 0x40b   : > { %12600 = vst [vmem:[#allocation112_spill] sm:$0xff] %v11527_v62  ;;  %v11530_v35 = vadd.f32 %v4999_v39, %v4746_v49  ;;  %v5732_v39 = vunpack.c.l.b16 %v5664_v32  ;;  %v11544_v49 = vld [vmem:[#allocation2 + $0x80] sm:$0xff] }
 0x40d   : > { %12601 = vst [vmem:[#allocation113_spill] sm:$0xff] %v11530_v35  ;;  %v5808_v35 = vrot.slane %v5806_v47, 1  ;;  %v11551_v45 = vpack.c.b16 %v5732_v39, %v5732_v39 }
 0x40e   : > { %8202 = vmatmul.msk.bf16.gmra.mxu2 %vm898_vm7, %v5801_v17  ;;  %v11535_v23 = vpop.f32.mrf.mxu1  ;;  %v5002_v16 = vpop.f32.mrf.mxu3  ;;  %v5802_v17 = vshrl.u32 %v11304_v26, 16 }
 0x410   : > { %8220 = vmatmul.msk.bf16.gmra.mxu3 %vm898_vm7, %v6107_v7  ;;  %v4748_v12 = vpop.f32.mrf.mxu2 }
 0x411   : > { %v4749_v21 = vadd.f32 %v4748_v12, %v11425_v3  ;;  %v6411_v3 = vrot.slane %v11544_v49, 1  ;;  %v8744_v12 = vld [vmem:[#allocation2 + $0x40] sm:$0xff] }
 0x412   : > { %v11539_v29 = vpop.f32.mrf.mxu0 }
 0x413   : > { %12602 = vst [vmem:[#allocation114_spill] sm:$0xff] %v11539_v29  ;;  %v11542_v9 = vadd.f32 %v5002_v16, %v4749_v21  ;;  %v6108_v29 = vrot.slane %v8744_v12, 1  ;;  %v5804_v21 = vor.u32 %v5802_v17, %v5800_v61  ;;  %v6415_v12 = vrot.slane %v11551_v45, 1 }
 0x414   : > { %8236 = vmatmul.msk.bf16.gmra.mxu0 %vm898_vm7, %v6105_v14  ;;  %v6413_v14 = vrot.slane %v11546_v22, 1 }
 0x415   : > { %12603 = vst [vmem:[#allocation115_spill] sm:$0xff] %v11542_v9  ;;  %v11556_v9 = vsel %vm2628_vm11, %v6409_v44, %v6411_v3  ;;  %v5809_v39 = vsel %vm1773_vm8, %v5804_v21, %v5808_v35  ;;  %v6109_v44 = vsel %vm2628_vm11, %v6106_v36, %v6108_v29 }
 0x416   : > { %v11549_v62 = vpop.f32.mrf.mxu1  ;;  %v5004_v16 = vpop.f32.mrf.mxu3  ;;  %12604 = vst [vmem:[#allocation116_spill] sm:$0xff] %v11556_v9  ;;  %v11559_v59 = vsel %vm2628_vm11, %v6411_v3, %v6413_v14  ;;  %v11574_v61 = vsel %vm2628_vm11, %v6413_v14, %v6415_v12 }
 0x417   : > { %12605 = vst [vmem:[#allocation117_spill] sm:$0xff] %v11559_v59 }
 0x418   : > { %v4750_v32 = vpop.f32.mrf.mxu2  ;;  %12606 = vst [vmem:[#allocation118_spill] sm:$0xff] %v11574_v61 }
 0x419   : > { %8128 = vmatmul.msk.bf16.gmra.mxu1 %vm898_vm7, %v10934_v2  ;;  %v4751_v26 = vadd.f32 %v4750_v32, %v11442_v48 }
 0x41a   : > { %v11564_v47 = vpop.f32.mrf.mxu0 }
 0x41b   : > { %v11568_v10 = vadd.f32 %v5004_v16, %v4751_v26  ;;  %v5814_v16 = vshll.u32 %v11371_v6, 16  ;;  %v5810_v26 = vshrl.u32 %v11339_v51, 16 }
 0x41d   : > { %v5816_v14 = vrot.slane %v5814_v16, 1  ;;  %v5812_v9 = vor.u32 %v5810_v26, %v5808_v35 }
 0x41e   : > { %8203 = vmatmul.msk.bf16.gmra.mxu2 %vm898_vm7, %v5809_v39  ;;  %v11576_v2 = vpop.f32.mrf.mxu1  ;;  %v5007_v17 = vpop.f32.mrf.mxu3  ;;  %v8745_v39 = vld [vmem:[#allocation2 + $0x48] sm:$0xff] }
 0x41f   : > { %v6110_v12 = vrot.slane %v8745_v39, 1  ;;  %v8746_v39 = vld [vmem:[#allocation2 + $0x50] sm:$0xff] }
 0x420   : > { %8221 = vmatmul.msk.bf16.gmra.mxu3 %vm898_vm7, %v6109_v44  ;;  %v4753_v48 = vpop.f32.mrf.mxu2 }
 0x421   : > { %v4754_v3 = vadd.f32 %v4753_v48, %v11454_v46  ;;  %v5817_v48 = vsel %vm1773_vm8, %v5812_v9, %v5816_v14  ;;  %v6111_v51 = vsel %vm2628_vm11, %v6108_v29, %v6110_v12  ;;  %v5822_v9 = vshll.u32 %v11400_v15, 16 }
 0x422   : > { %v11580_v32 = vpop.f32.mrf.mxu0  ;;  %v5818_v29 = vshrl.u32 %v11371_v6, 16 }
 0x423   : > { %v11583_v21 = vadd.f32 %v5007_v17, %v4754_v3  ;;  %v5824_v26 = vrot.slane %v5822_v9, 1 }
 0x424   : > { %8237 = vmatmul.msk.bf16.gmra.mxu0 %vm898_vm7, %v6107_v7 }
 0x426   : > { %v11585_v36 = vpop.f32.mrf.mxu1  ;;  %v5009_v59 = vpop.f32.mrf.mxu3 }
 0x428   : > { %v4755_v61 = vpop.f32.mrf.mxu2 }
 0x429   : > { %8129 = vmatmul.msk.bf16.gmra.mxu1 %vm898_vm7, %v10997_v43  ;;  %v4756_v46 = vadd.f32 %v4755_v61, %v11474_v55 }
 0x42a   : > { %v11591_v7 = vpop.f32.mrf.mxu0 }
 0x42b   : > { %12607 = vst [vmem:[#allocation119_spill] sm:$0xff] %v11591_v7  ;;  %v11594_v17 = vadd.f32 %v5009_v59, %v4756_v46  ;;  %v6112_v46 = vrot.slane %v8746_v39, 1 }
 0x42d   : > { %12608 = vst [vmem:[#allocation120_spill] sm:$0xff] %v11594_v17  ;;  %v5820_v17 = vor.u32 %v5818_v29, %v5816_v14  ;;  %v6113_v6 = vsel %vm2628_vm11, %v6110_v12, %v6112_v46  ;;  %v5826_v12 = vshrl.u32 %v11400_v15, 16 }
 0x42e   : > { %8204 = vmatmul.msk.bf16.gmra.mxu2 %vm898_vm7, %v5817_v48  ;;  %v11599_v3 = vpop.f32.mrf.mxu1  ;;  %v5012_v16 = vpop.f32.mrf.mxu3 }
 0x430   : > { %8222 = vmatmul.msk.bf16.gmra.mxu3 %vm898_vm7, %v6111_v51  ;;  %v4758_v35 = vpop.f32.mrf.mxu2 }
 0x431   : > { %v4759_v43 = vadd.f32 %v4758_v35, %v11488_v33  ;;  %v5825_v35 = vsel %vm1773_vm8, %v5820_v17, %v5824_v26  ;;  %v5830_v17 = vshll.u32 %v11430_v18, 16 }
 0x432   : > { %v11603_v55 = vpop.f32.mrf.mxu0 }
 0x433   : > { %v11606_v59 = vadd.f32 %v5012_v16, %v4759_v43  ;;  %v5832_v39 = vrot.slane %v5830_v17, 1 }
 0x434   : > { %8238 = vmatmul.msk.bf16.gmra.mxu0 %vm898_vm7, %v6109_v44 }
 0x436   : > { %v11608_v61 = vpop.f32.mrf.mxu1  ;;  %v5014_v7 = vpop.f32.mrf.mxu3 }
 0x438   : > { %v4760_v48 = vpop.f32.mrf.mxu2 }
 0x439   : > { %8130 = vmatmul.msk.bf16.gmra.mxu1 %vm898_vm7, %v11056_v4  ;;  %v4761_v33 = vadd.f32 %v4760_v48, %v11506_v60  ;;  %v8747_v48 = vld [vmem:[#allocation2 + $0x58] sm:$0xff] }
 0x43a   : > { %v11614_v44 = vpop.f32.mrf.mxu0 }
 0x43b   : > { %12609 = vst [vmem:[#allocation121_spill] sm:$0xff] %v11614_v44  ;;  %v11617_v16 = vadd.f32 %v5014_v7, %v4761_v33  ;;  %v6114_v33 = vrot.slane %v8747_v48, 1 }
 0x43d   : > { %12610 = vst [vmem:[#allocation122_spill] sm:$0xff] %v11617_v16  ;;  %v5828_v16 = vor.u32 %v5826_v12, %v5824_v26  ;;  %v6115_v15 = vsel %vm2628_vm11, %v6112_v46, %v6114_v33  ;;  %v5553_v26 = vadd.f32 %v11549_v62, %v11030_v28  ;;  %v12612_v12 = vld [vmem:[#allocation6_spill] sm:$0xff]  ;;  %v5838_v46 = vshll.u32 %v11459_v0, 16 }
 0x43e   : > { %8205 = vmatmul.msk.bf16.gmra.mxu2 %vm898_vm7, %v5825_v35  ;;  %v11622_v43 = vpop.f32.mrf.mxu1  ;;  %v5017_v9 = vpop.f32.mrf.mxu3  ;;  %v5555_v62 = vadd.f32 %v11576_v2, %v11066_v42 }
 0x43f   : > { %v5840_v28 = vrot.slane %v5838_v46, 1 }
 0x440   : > { %8223 = vmatmul.msk.bf16.gmra.mxu3 %vm898_vm7, %v6113_v6  ;;  %v4763_v14 = vpop.f32.mrf.mxu2 }
 0x441   : > { %v4764_v4 = vadd.f32 %v4763_v14, %v11517_v58  ;;  %v5833_v14 = vsel %vm1773_vm8, %v5828_v16, %v5832_v39 }
 0x442   : > { %v11626_v60 = vpop.f32.mrf.mxu0 }
 0x443   : > { %v11629_v7 = vadd.f32 %v5017_v9, %v4764_v4 }
 0x444   : > { %8239 = vmatmul.msk.bf16.gmra.mxu0 %vm898_vm7, %v6111_v51 }
 0x446   : > { %v11631_v29 = vpop.f32.mrf.mxu1  ;;  %v5019_v44 = vpop.f32.mrf.mxu3 }
 0x448   : > { %v4765_v35 = vpop.f32.mrf.mxu2 }
 0x449   : > { %8131 = vmatmul.msk.bf16.gmra.mxu1 %vm898_vm7, %v11120_v20  ;;  %v4766_v58 = vadd.f32 %v4765_v35, %v11535_v23  ;;  %v5054_v23 = vmul.f32 %v11083_v11, %v12612_v12 }
 0x44a   : > { %v6298_v51 = vpop.f32.mrf.mxu0 }
 0x44b   : > { %v11638_v9 = vadd.f32 %v5019_v44, %v4766_v58 }
 0x44d   : > { %12611 = vst [vmem:[#allocation123_spill] sm:$0xff] %v11638_v9  ;;  %v8748_v9 = vld [vmem:[#allocation2 + $0x60] sm:$0xff] }
 0x44e   : > { %8206 = vmatmul.msk.bf16.gmra.mxu2 %vm898_vm7, %v5833_v14  ;;  %v11643_v4 = vpop.f32.mrf.mxu1  ;;  %v6188_v20 = vpop.f32.mrf.mxu3  ;;  %v5834_v14 = vshrl.u32 %v11430_v18, 16  ;;  %v6116_v11 = vrot.slane %v8748_v9, 1  ;;  %v12614_v9 = vld [vmem:[#allocation8_spill] sm:$0xff] }
 0x44f   : > { %v11649_v16 = vadd.f32 %v6298_v51, %v6188_v20  ;;  %v12613_v20 = vld [vmem:[#allocation7_spill] sm:$0xff] }
 0x450   : > { %8224 = vmatmul.msk.bf16.gmra.mxu3 %vm898_vm7, %v6115_v15  ;;  %v5942_v17 = vpop.f32.mrf.mxu2  ;;  %v6117_v42 = vsel %vm2628_vm11, %v6114_v33, %v6116_v11  ;;  %v5846_v33 = vshll.u32 %v11486_v63, 16 }
 0x451   : > { %v6022_v48 = vadd.f32 %v5942_v17, %v5553_v26  ;;  %v5836_v17 = vor.u32 %v5834_v14, %v5832_v39 }
 0x452   : > { %v6300_v44 = vpop.f32.mrf.mxu0 }
 0x453   : > { %v11653_v35 = vadd.f32 %v6022_v48, %v5054_v23  ;;  %v5841_v18 = vsel %vm1773_vm8, %v5836_v17, %v5840_v28 }
 0x454   : > { %8240 = vmatmul.msk.bf16.gmra.mxu0 %vm898_vm7, %v6113_v6  ;;  %v5055_v6 = vmul.f32 %v11110_v40, %v12613_v20  ;;  %v5558_v40 = vadd.f32 %v11585_v36, %v11101_v57  ;;  %v5842_v20 = vshrl.u32 %v11459_v0, 16  ;;  %v5848_v57 = vrot.slane %v5846_v33, 1 }
 0x455   : > { %v5560_v36 = vadd.f32 %v11599_v3, %v11142_v53 }
 0x456   : > { %v11655_v58 = vpop.f32.mrf.mxu1  ;;  %v6190_v51 = vpop.f32.mrf.mxu3 }
 0x457   : > { %v11664_v23 = vadd.f32 %v6300_v44, %v6190_v51  ;;  %v5056_v44 = vmul.f32 %v11146_v8, %v12614_v9 }
 0x458   : > { %v5944_v26 = vpop.f32.mrf.mxu2 }
 0x459   : > { %8132 = vmatmul.msk.bf16.gmra.mxu1 %vm898_vm7, %v11200_v38  ;;  %v6023_v12 = vadd.f32 %v5944_v26, %v5555_v62 }
 0x45a   : > { %v6303_v48 = vpop.f32.mrf.mxu0 }
 0x45b   : > { %v11667_v46 = vadd.f32 %v6023_v12, %v5055_v6  ;;  %v8749_v6 = vld [vmem:[#allocation2 + $0x68] sm:$0xff] }
 0x45c   : > { %v6118_v8 = vrot.slane %v8749_v6, 1 }
 0x45e   : > { %8207 = vmatmul.msk.bf16.gmra.mxu2 %vm898_vm7, %v5841_v18  ;;  %v11672_v2 = vpop.f32.mrf.mxu1  ;;  %v6193_v39 = vpop.f32.mrf.mxu3  ;;  %v5844_v18 = vor.u32 %v5842_v20, %v5840_v28  ;;  %v6119_v53 = vsel %vm2628_vm11, %v6116_v11, %v6118_v8 }
 0x45f   : > { %v11678_v62 = vadd.f32 %v6303_v48, %v6193_v39 }
 0x460   : > { %8225 = vmatmul.msk.bf16.gmra.mxu3 %vm898_vm7, %v6117_v42  ;;  %v5947_v38 = vpop.f32.mrf.mxu2  ;;  %v5849_v0 = vsel %vm1773_vm8, %v5844_v18, %v5848_v57  ;;  %v5565_v18 = vadd.f32 %v11622_v43, %v11205_v13 }
 0x461   : > { %v6024_v14 = vadd.f32 %v5947_v38, %v5558_v40  ;;  %v12615_v40 = vld [vmem:[#allocation10_spill] sm:$0xff] }
 0x462   : > { %v6305_v26 = vpop.f32.mrf.mxu0 }
 0x463   : > { %v11682_v51 = vadd.f32 %v6024_v14, %v5056_v44  ;;  %v12616_v14 = vld [vmem:[#allocation14_spill] sm:$0xff] }
 0x464   : > { %8241 = vmatmul.msk.bf16.gmra.mxu0 %vm898_vm7, %v6115_v15  ;;  %v5057_v15 = vmul.f32 %v11171_v19, %v12615_v40  ;;  %v5563_v19 = vadd.f32 %v11608_v61, %v11165_v41  ;;  %v5850_v41 = vshrl.u32 %v11486_v63, 16 }
 0x466   : > { %v11684_v17 = vpop.f32.mrf.mxu1  ;;  %v6195_v48 = vpop.f32.mrf.mxu3 }
 0x467   : > { %v11693_v39 = vadd.f32 %v6305_v26, %v6195_v48  ;;  %v5058_v26 = vmul.f32 %v11209_v27, %v12616_v14  ;;  %v6120_v27 = vrot.slane %v11213_v54, 1 }
 0x468   : > { %v5949_v12 = vpop.f32.mrf.mxu2 }
 0x469   : > { %8133 = vmatmul.msk.bf16.gmra.mxu1 %vm898_vm7, %v11260_v34  ;;  %v6025_v38 = vadd.f32 %v5949_v12, %v5560_v36  ;;  %v5854_v36 = vshll.u32 %v11515_v30, 16  ;;  %v5150_v12 = vld [vmem:[#allocation2 + $0x80] sm:$0x1]  ;;  %v6121_v13 = vsel %vm2628_vm11, %v6118_v8, %v6120_v27  ;;  %v5862_v8 = vshll.u32 %v11544_v49, 16 }
 0x46a   : > { %v6308_v9 = vpop.f32.mrf.mxu0 }
 0x46b   : > { %v11696_v44 = vadd.f32 %v6025_v38, %v5057_v15  ;;  %v5856_v61 = vrot.slane %v5854_v36, 1  ;;  %v5518_v38 = vunpack.c.l.b16 %v5150_v12  ;;  %v12619_v36 = vld [vmem:[#allocation19_spill] sm:$0xff] }
 0x46d   : > { %v11730_v54 = vpack.c.b16 %v5518_v38, %v5518_v38 }
 0x46e   : > { %8208 = vmatmul.msk.bf16.gmra.mxu2 %vm898_vm7, %v5849_v0  ;;  %v11701_v3 = vpop.f32.mrf.mxu1  ;;  %v6198_v28 = vpop.f32.mrf.mxu3 }
 0x46f   : > { %v11707_v20 = vadd.f32 %v6308_v9, %v6198_v28  ;;  %v12617_v9 = vld [vmem:[#allocation16_spill] sm:$0xff] }
 0x470   : > { %8226 = vmatmul.msk.bf16.gmra.mxu3 %vm898_vm7, %v6119_v53  ;;  %v5952_v34 = vpop.f32.mrf.mxu2  ;;  %v5059_v0 = vmul.f32 %v11247_v52, %v12617_v9  ;;  %v12621_v9 = vld [vmem:[#allocation38_spill] sm:$0xff] }
 0x471   : > { %v6026_v33 = vadd.f32 %v5952_v34, %v5563_v19 }
 0x472   : > { %v6310_v6 = vpop.f32.mrf.mxu0 }
 0x473   : > { %v11711_v11 = vadd.f32 %v6026_v33, %v5058_v26  ;;  %v5530_v33 = vshll.u32 %v11730_v54, 16 }
 0x474   : > { %8242 = vmatmul.msk.bf16.gmra.mxu0 %vm898_vm7, %v6117_v42  ;;  %v5852_v42 = vor.u32 %v5850_v41, %v5848_v57  ;;  %v12618_v57 = vld [vmem:[#allocation29_spill] sm:$0xff] }
 0x476   : > { %v11713_v48 = vpop.f32.mrf.mxu1  ;;  %v6200_v15 = vpop.f32.mrf.mxu3  ;;  %v5857_v63 = vsel %vm1773_vm8, %v5852_v42, %v5856_v61  ;;  %v5864_v42 = vrot.slane %v5862_v8, 1 }
 0x477   : > { %v11723_v34 = vadd.f32 %v6310_v6, %v6200_v15  ;;  %v12620_v6 = vld [vmem:[#allocation33_spill] sm:$0xff]  ;;  %v5532_v15 = vrot.slane %v5530_v33, 1  ;;  %v12625_v33 = vld [vmem:[#allocation55_spill] sm:$0xff] }
 0x478   : > { %v5954_v40 = vpop.f32.mrf.mxu2  ;;  %v5060_v12 = vmul.f32 %v12620_v6, %v12619_v36  ;;  %v12624_v36 = vld [vmem:[#allocation21_spill] sm:$0xff] }
 0x479   : > { %8134 = vmatmul.msk.bf16.gmra.mxu1 %vm898_vm7, %v11293_v56  ;;  %v6027_v19 = vadd.f32 %v5954_v40, %v5565_v18  ;;  %v5568_v56 = vadd.f32 %v11631_v29, %v12618_v57  ;;  %v5858_v29 = vshrl.u32 %v11515_v30, 16  ;;  %v5061_v6 = vmul.f32 %v12625_v33, %v12624_v36 }
 0x47a   : > { %v6313_v43 = vpop.f32.mrf.mxu0  ;;  %v5870_v36 = vshll.u32 %v11546_v22, 16 }
 0x47b   : > { %v11726_v28 = vadd.f32 %v6027_v19, %v5059_v0  ;;  %v5570_v0 = vadd.f32 %v11643_v4, %v12621_v9  ;;  %v8429_v9 = vld [vmem:[#allocation2 + $0x10] sm:$0xf0] }
 0x47e   : > { %8209 = vmatmul.msk.bf16.gmra.mxu2 %vm898_vm7, %v5857_v63  ;;  %v11733_v52 = vpop.f32.mrf.mxu1  ;;  %v6203_v26 = vpop.f32.mrf.mxu3  ;;  %v12622_v63 = vld [vmem:[#allocation31_spill] sm:$0xff] }
 0x47f   : > { %v11740_v18 = vadd.f32 %v6313_v43, %v6203_v26  ;;  %v11752_v57 = vrot.slane %v12622_v63, 1  ;;  %v12623_v43 = vld [vmem:[#allocation79_spill] sm:$0xff]  ;;  %v5860_v26 = vor.u32 %v5858_v29, %v5856_v61  ;;  %v12628_v63 = vld [vmem:[#allocation62_spill] sm:$0xff] }
 0x480   : > { %8227 = vmatmul.msk.bf16.gmra.mxu3 %vm898_vm7, %v6121_v13  ;;  %v5957_v14 = vpop.f32.mrf.mxu2 }
 0x481   : > { %v6028_v41 = vadd.f32 %v5957_v14, %v5568_v56  ;;  %v5865_v4 = vsel %vm1773_vm8, %v5860_v26, %v5864_v42  ;;  %v6123_v8 = vsel %vm2628_vm11, %v6120_v27, %v11752_v57  ;;  %v5866_v27 = vshrl.u32 %v11544_v49, 16 }
 0x482   : > { %v6315_v19 = vpop.f32.mrf.mxu0 }
 0x483   : > { %v11744_v40 = vadd.f32 %v6028_v41, %v5060_v12 }
 0x484   : > { %8243 = vmatmul.msk.bf16.gmra.mxu0 %vm898_vm7, %v6119_v53  ;;  %v5533_v53 = vsel %vm1773_vm8, %v12623_v43, %v5532_v15  ;;  %v12626_v15 = vld [vmem:[#allocation43_spill] sm:$0xff] }
 0x485   : > { %v5573_v29 = vadd.f32 %v11655_v58, %v12626_v15  ;;  %v5868_v58 = vor.u32 %v5866_v27, %v5864_v42  ;;  %v12630_v15 = vld [vmem:[#allocation67_spill] sm:$0xff] }
 0x486   : > { %v11746_v38 = vpop.f32.mrf.mxu1  ;;  %v6205_v14 = vpop.f32.mrf.mxu3 }
 0x487   : > { %v11759_v12 = vadd.f32 %v6315_v19, %v6205_v14  ;;  %v12627_v19 = vld [vmem:[#allocation25_spill] sm:$0xff] }
 0x488   : > { %v5959_v56 = vpop.f32.mrf.mxu2  ;;  %v5062_v43 = vmul.f32 %v12628_v63, %v12627_v19  ;;  %v6124_v19 = vrot.slane %v12630_v15, 1  ;;  %v12632_v63 = vld [vmem:[#allocation27_spill] sm:$0xff] }
 0x489   : > { %8135 = vmatmul.msk.bf16.gmra.mxu1 %vm898_vm7, %v5533_v53  ;;  %v6029_v30 = vadd.f32 %v5959_v56, %v5570_v0  ;;  %v8430_v56 = vld [vmem:[#allocation2 + $0x10] sm:$0xe] }
 0x48a   : > { %v8431_v14 = vor.u32 %v8430_v56, %v8429_v9 }
 0x48b   : > { %v11762_v41 = vadd.f32 %v6029_v30, %v5061_v6  ;;  %v12629_v30 = vld [vmem:[#allocation57_spill] sm:$0xff] }
 0x48c   : > { %v6384_v6 = vrot.slane %v8431_v14, 1  ;;  %v12634_v14 = vld [vmem:[#allocation73_spill] sm:$0xff] }
 0x48d   : > { %v5578_v27 = vadd.f32 %v11684_v17, %v12634_v14  ;;  %v12638_v17 = vld [vmem:[#allocation87_spill] sm:$0xff]  ;;  %v12639_v14 = vld [vmem:[#allocation34_spill] sm:$0xff] }
 0x48e   : > { %8210 = vmatmul.msk.bf16.gmra.mxu2 %vm898_vm7, %v5865_v4  ;;  %v11768_v61 = vpop.f32.mrf.mxu1  ;;  %v5575_v4 = vadd.f32 %v11672_v2, %v12629_v30  ;;  %v6125_v2 = vsel %vm2628_vm11, %v11752_v57, %v6124_v19  ;;  %v12636_v30 = vld [vmem:[#allocation85_spill] sm:$0xff] }
 0x490   : > { %8228 = vmatmul.msk.bf16.gmra.mxu3 %vm898_vm7, %v6123_v8  ;;  %v5962_v0 = vpop.f32.mrf.mxu2 }
 0x491   : > { %v6030_v53 = vadd.f32 %v5962_v0, %v5573_v29  ;;  %v12631_v29 = vrot.slane %v11094_v24, 1  ;;  %v5872_v0 = vrot.slane %v5870_v36, 1 }
 0x493   : > { %v11775_v26 = vadd.f32 %v6030_v53, %v5062_v43  ;;  %v12633_v43 = vld [vmem:[#allocation77_spill] sm:$0xff]  ;;  %v5873_v56 = vsel %vm1773_vm8, %v5868_v58, %v5872_v0  ;;  %v5878_v58 = vshll.u32 %v11551_v45, 16 }
 0x494   : > { %8244 = vmatmul.msk.bf16.gmra.mxu0 %vm898_vm7, %v6121_v13  ;;  %v6386_v13 = vsel %vm2628_vm11, %v6384_v6, %v12631_v29  ;;  %v5063_v49 = vmul.f32 %v12633_v43, %v12632_v63  ;;  %v12635_v6 = vld [vmem:[#allocation30_spill] sm:$0xff] }
 0x495   : > { %v5064_v15 = vmul.f32 %v12636_v30, %v12635_v6  ;;  %v5880_v43 = vrot.slane %v5878_v58, 1  ;;  %v12640_v6 = vld [vmem:[#allocation89_spill] sm:$0xff] }
 0x496   : > { %v11779_v33 = vpop.f32.mrf.mxu1 }
 0x498   : > { %v5964_v9 = vpop.f32.mrf.mxu2 }
 0x499   : > { %8248 = vmatmul.msk.bf16.vlgmr.msra.gmra.mxu1 %vm898_vm7, %v6386_v13  ;;  %v6031_v53 = vadd.f32 %v5964_v9, %v5575_v4  ;;  %v5874_v13 = vshrl.u32 %v11546_v22, 16 }
 0x49b   : > { %v11791_v42 = vadd.f32 %v6031_v53, %v5063_v49  ;;  %v5876_v63 = vor.u32 %v5874_v13, %v5872_v0  ;;  %v12637_v49 = vld [vmem:[#allocation83_spill] sm:$0xff] }
 0x49c   : > { %v5580_v53 = vadd.f32 %v11701_v3, %v12637_v49  ;;  %v6275_v3 = vrot.slane %v11730_v54, 1  ;;  %v12643_v49 = vld [vmem:[#allocation37_spill] sm:$0xff] }
 0x49e   : > { %8211 = vmatmul.msk.bf16.gmra.mxu2 %vm898_vm7, %v5873_v56  ;;  %v5594_v24 = vpop.f32.mrf.mxu1  ;;  %v6126_v56 = vrot.slane %v12638_v17, 1  ;;  %v6276_v13 = vsel %vm2628_vm11, %v11752_v57, %v6275_v3  ;;  %v12644_v17 = vld [vmem:[#allocation90_spill] sm:$0xff] }
 0x49f   : > { %v5585_v54 = vadd.f32 %v11733_v52, %v12644_v17 }
 0x4a0   : > { %8229 = vmatmul.msk.bf16.gmra.mxu3 %vm898_vm7, %v6125_v2  ;;  %v5967_v36 = vpop.f32.mrf.mxu2  ;;  %v6127_v22 = vsel %vm2628_vm11, %v6124_v19, %v6126_v56 }
 0x4a1   : > { %v6032_v4 = vadd.f32 %v5967_v36, %v5578_v27  ;;  %v5065_v27 = vmul.f32 %v12640_v6, %v12639_v14  ;;  %v12641_v36 = vld [vmem:[#allocation22_spill] sm:$0xff]  ;;  %v12646_v14 = vld [vmem:[#allocation3_spill] sm:$0xff] }
 0x4a3   : > { %v11803_v29 = vadd.f32 %v6032_v4, %v5064_v15  ;;  %v12642_v15 = vld [vmem:[#allocation23_spill] sm:$0xff] }
 0x4a4   : > { %8245 = vmatmul.msk.bf16.gmra.mxu0 %vm898_vm7, %v6123_v8  ;;  %v5881_v8 = vsel %vm1773_vm8, %v5876_v63, %v5880_v43  ;;  %v5583_v4 = vadd.f32 %v11713_v48, %v12642_v15  ;;  %v5066_v63 = vmul.f32 %v11369_v37, %v12643_v49  ;;  %v12648_v15 = vld [vmem:[#allocation92_spill] sm:$0xff]  ;;  %v12650_v49 = vld [vmem:[#allocation35_spill] sm:$0xff] }
 0x4a6   : > { %v5597_v9 = vpop.f32.mrf.mxu1 }
 0x4a8   : > { %v5969_v2 = vpop.f32.mrf.mxu2 }
 0x4a9   : > { %8249 = vmatmul.msk.bf16.gmra.mxu1 %vm898_vm7, %v12641_v36  ;;  %v6033_v45 = vadd.f32 %v5969_v2, %v5580_v53  ;;  %v12645_v2 = vld [vmem:[#allocation40_spill] sm:$0xff] }
 0x4aa   : > { %v5067_v48 = vmul.f32 %v11385_v31, %v12645_v2  ;;  %v5590_v31 = vadd.f32 %v11768_v61, %v12648_v15 }
 0x4ab   : > { %v11814_v30 = vadd.f32 %v6033_v45, %v5065_v27  ;;  %v5588_v27 = vadd.f32 %v11746_v38, %v11380_v50  ;;  %v12647_v45 = vld [vmem:[#allocation44_spill] sm:$0xff] }
 0x4ae   : > { %8212 = vmatmul.msk.bf16.gmra.mxu2 %vm898_vm7, %v5881_v8  ;;  %v5599_v0 = vpop.f32.mrf.mxu1  ;;  %v5068_v8 = vmul.f32 %v11398_v25, %v12647_v45 }
 0x4b0   : > { %8230 = vmatmul.msk.bf16.gmra.mxu3 %vm898_vm7, %v6127_v22  ;;  %v5972_v58 = vpop.f32.mrf.mxu2 }
 0x4b1   : > { %v6034_v43 = vadd.f32 %v5972_v58, %v5583_v4  ;;  %v12649_v58 = vld [vmem:[#allocation46_spill] sm:$0xff] }
 0x4b3   : > { %v11827_v53 = vadd.f32 %v6034_v43, %v5066_v63  ;;  %v12651_v43 = vld [vmem:[#allocation94_spill] sm:$0xff] }
 0x4b4   : > { %8246 = vmatmul.msk.bf16.gmra.mxu0 %vm898_vm7, %v6276_v13  ;;  %v5069_v13 = vmul.f32 %v11415_v1, %v12649_v58  ;;  %v5593_v25 = vadd.f32 %v11779_v33, %v12651_v43 }
 0x4b6   : > { %v5602_v19 = vpop.f32.mrf.mxu1 }
 0x4b8   : > { %v5974_v56 = vpop.f32.mrf.mxu2 }
 0x4b9   : > { %8250 = vmatmul.msk.bf16.gmra.mxu1 %vm898_vm7, %v12646_v14  ;;  %v6035_v57 = vadd.f32 %v5974_v56, %v5585_v54  ;;  %v12652_v54 = vld [vmem:[#allocation48_spill] sm:$0xff] }
 0x4ba   : > { %v12653_v56 = vld [vmem:[#allocation96_spill] sm:$0xff] }
 0x4bb   : > { %v11835_v6 = vadd.f32 %v6035_v57, %v5067_v48  ;;  %v5070_v2 = vmul.f32 %v12653_v56, %v12652_v54  ;;  %v12654_v57 = vld [vmem:[#allocation95_spill] sm:$0xff]  ;;  %v12661_v56 = vld [vmem:[#allocation54_spill] sm:$0xff] }
 0x4bc   : > { %v5595_v1 = vadd.f32 %v5594_v24, %v12654_v57  ;;  %v12663_v57 = vld [vmem:[#allocation71_spill] sm:$0xff] }
 0x4be   : > { %v5604_v37 = vpop.f32.mrf.mxu1 }
 0x4c0   : > { %v5977_v36 = vpop.f32.mrf.mxu2 }
 0x4c1   : > { %v6036_v22 = vadd.f32 %v5977_v36, %v5588_v27  ;;  %v12655_v36 = vld [vmem:[#allocation50_spill] sm:$0xff] }
 0x4c2   : > { %v5071_v45 = vmul.f32 %v11445_v5, %v12655_v36  ;;  %v12664_v36 = vld [vmem:[#allocation102_spill] sm:$0xff] }
 0x4c3   : > { %v11841_v52 = vadd.f32 %v6036_v22, %v5068_v8  ;;  %v12656_v8 = vld [vmem:[#allocation41_spill] sm:$0xff] }
 0x4c6   : > { %v5607_v3 = vpop.f32.mrf.mxu1 }
 0x4c8   : > { %v5979_v4 = vpop.f32.mrf.mxu2 }
 0x4c9   : > { %8251 = vmatmul.msk.bf16.gmra.mxu1 %vm898_vm7, %v12650_v49  ;;  %v6037_v63 = vadd.f32 %v5979_v4, %v5590_v31  ;;  %v12657_v31 = vld [vmem:[#allocation98_spill] sm:$0xff]  ;;  %v12659_v49 = vld [vmem:[#allocation100_spill] sm:$0xff] }
 0x4ca   : > { %v5598_v4 = vadd.f32 %v5597_v9, %v12657_v31  ;;  %v12666_v31 = vld [vmem:[#allocation105_spill] sm:$0xff] }
 0x4cb   : > { %v11849_v50 = vadd.f32 %v6037_v63, %v5069_v13  ;;  %v12658_v13 = vld [vmem:[#allocation52_spill] sm:$0xff] }
 0x4cc   : > { %v5072_v63 = vmul.f32 %v12659_v49, %v12658_v13  ;;  %v12667_v49 = vld [vmem:[#allocation104_spill] sm:$0xff] }
 0x4ce   : > { %v5609_v38 = vpop.f32.mrf.mxu1 }
 0x4d0   : > { %v5982_v17 = vpop.f32.mrf.mxu2 }
 0x4d1   : > { %v6038_v48 = vadd.f32 %v5982_v17, %v5593_v25  ;;  %v12660_v17 = vld [vmem:[#allocation99_spill] sm:$0xff] }
 0x4d2   : > { %v5600_v5 = vadd.f32 %v5599_v0, %v12660_v17  ;;  %v12668_v17 = vld [vmem:[#allocation60_spill] sm:$0xff] }
 0x4d3   : > { %v11855_v61 = vadd.f32 %v6038_v48, %v5070_v2  ;;  %v12662_v2 = vld [vmem:[#allocation103_spill] sm:$0xff] }
 0x4d4   : > { %v5073_v48 = vmul.f32 %v12662_v2, %v12661_v56  ;;  %v12670_v56 = vld [vmem:[#allocation5_spill] sm:$0xff] }
 0x4d6   : > { %v5612_v14 = vpop.f32.mrf.mxu1 }
 0x4d8   : > { %v5984_v27 = vpop.f32.mrf.mxu2 }
 0x4d9   : > { %8252 = vmatmul.msk.bf16.gmra.mxu1 %vm898_vm7, %v12656_v8  ;;  %v6039_v22 = vadd.f32 %v5984_v27, %v5595_v1 }
 0x4db   : > { %v11862_v15 = vadd.f32 %v6039_v22, %v5071_v45  ;;  %v5603_v45 = vadd.f32 %v5602_v19, %v12664_v36  ;;  %v12665_v22 = vld [vmem:[#allocation58_spill] sm:$0xff] }
 0x4de   : > { %v5614_v33 = vpop.f32.mrf.mxu1 }
 0x4e0   : > { %v5987_v58 = vpop.f32.mrf.mxu2 }
 0x4e1   : > { %v6040_v43 = vadd.f32 %v5987_v58, %v5598_v4  ;;  %v5074_v4 = vmul.f32 %v12666_v31, %v12665_v22 }
 0x4e3   : > { %v11867_v25 = vadd.f32 %v6040_v43, %v5072_v63  ;;  %v5605_v63 = vadd.f32 %v5604_v37, %v12667_v49 }
 0x4e6   : > { %v11869_v24 = vpop.f32.mrf.mxu1 }
 0x4e8   : > { %v5989_v54 = vpop.f32.mrf.mxu2 }
 0x4e9   : > { %8253 = vmatmul.msk.bf16.gmra.mxu1 %vm898_vm7, %v12663_v57  ;;  %v6041_v1 = vadd.f32 %v5989_v54, %v5600_v5  ;;  %v12669_v5 = vld [vmem:[#allocation108_spill] sm:$0xff]  ;;  %v12671_v57 = vld [vmem:[#allocation107_spill] sm:$0xff] }
 0x4ea   : > { %v5075_v54 = vmul.f32 %v12669_v5, %v12668_v17  ;;  %v12676_v5 = vld [vmem:[#allocation65_spill] sm:$0xff] }
 0x4eb   : > { %v11876_v9 = vadd.f32 %v6041_v1, %v5073_v48  ;;  %v5608_v1 = vadd.f32 %v5607_v3, %v12671_v57  ;;  %v12679_v57 = vld [vmem:[#allocation112_spill] sm:$0xff] }
 0x4ee   : > { %v11878_v27 = vpop.f32.mrf.mxu1 }
 0x4f0   : > { %v5992_v8 = vpop.f32.mrf.mxu2 }
 0x4f1   : > { %v6042_v58 = vadd.f32 %v5992_v8, %v5603_v45  ;;  %v12672_v45 = vld [vmem:[#allocation63_spill] sm:$0xff]  ;;  %v12673_v8 = vld [vmem:[#allocation110_spill] sm:$0xff] }
 0x4f2   : > { %v5076_v22 = vmul.f32 %v12673_v8, %v12672_v45  ;;  %v12680_v45 = vld [vmem:[#allocation68_spill] sm:$0xff]  ;;  %v12681_v8 = vld [vmem:[#allocation115_spill] sm:$0xff] }
 0x4f3   : > { %v11883_v0 = vadd.f32 %v6042_v58, %v5074_v4  ;;  %v12675_v58 = vld [vmem:[#allocation109_spill] sm:$0xff] }
 0x4f4   : > { %v5610_v49 = vadd.f32 %v5609_v38, %v12675_v58 }
 0x4f6   : > { %v11885_v13 = vpop.f32.mrf.mxu1 }
 0x4f8   : > { %v5994_v43 = vpop.f32.mrf.mxu2 }
 0x4f9   : > { %8254 = vmatmul.msk.bf16.gmra.mxu1 %vm898_vm7, %v12670_v56  ;;  %v6043_v2 = vadd.f32 %v5994_v43, %v5605_v63  ;;  %v12677_v63 = vld [vmem:[#allocation113_spill] sm:$0xff] }
 0x4fa   : > { %v5077_v43 = vmul.f32 %v12677_v63, %v12676_v5  ;;  %v12682_v63 = vld [vmem:[#allocation9_spill] sm:$0xff] }
 0x4fb   : > { %v11892_v19 = vadd.f32 %v6043_v2, %v5075_v54  ;;  %v12678_v54 = vld [vmem:[#allocation91_spill] sm:$0xff] }
 0x4fe   : > { %v11894_v48 = vpop.f32.mrf.mxu1 }
 0x500   : > { %v5997_v36 = vpop.f32.mrf.mxu2 }
 0x501   : > { %v6044_v31 = vadd.f32 %v5997_v36, %v5608_v1  ;;  %v5613_v1 = vadd.f32 %v5612_v14, %v12679_v57 }
 0x503   : > { %v11899_v37 = vadd.f32 %v6044_v31, %v5076_v22  ;;  %v5078_v22 = vmul.f32 %v12681_v8, %v12680_v45 }
 0x505   : > { %12674 = vst [vmem:[#allocation6_spill] sm:$0xff] %v11899_v37 }
 0x506   : > { %v11901_v4 = vpop.f32.mrf.mxu1 }
 0x508   : > { %v5999_v17 = vpop.f32.mrf.mxu2 }
 0x509   : > { %8255 = vmatmul.msk.bf16.gmra.mxu1 %vm898_vm7, %v12678_v54  ;;  %v6045_v56 = vadd.f32 %v5999_v17, %v5610_v49  ;;  %v11922_v49 = vld [vmem:[%s12286_s4] ss:$0 sm:$0xff]  ;;  %v12683_v17 = vld [vmem:[#allocation93_spill] sm:$0xff] }
 0x50b   : > { %v11908_v3 = vadd.f32 %v6045_v56, %v5077_v43  ;;  %v12684_v56 = vld [vmem:[#allocation114_spill] sm:$0xff] }
 0x50c   : > { %v5615_v57 = vadd.f32 %v5614_v33, %v12684_v56  ;;  %v12687_v33 = vld [vmem:[#allocation97_spill] sm:$0xff] }
 0x50e   : > { %v11910_v2 = vpop.f32.mrf.mxu1 }
 0x510   : > { %v6002_v36 = vpop.f32.mrf.mxu2 }
 0x511   : > { %v6046_v31 = vadd.f32 %v6002_v36, %v5613_v1 }
 0x513   : > { %v11915_v38 = vadd.f32 %v6046_v31, %v5078_v22 }
 0x516   : > { %v6477_v58 = vpop.f32.mrf.mxu1 }
 0x517   : > { %v6557_v5 = vadd.f32 %v6477_v58, %v11649_v16  ;;  %v12685_v16 = vld [vmem:[#allocation70_spill] sm:$0xff] }
 0x518   : > { %v6004_v36 = vpop.f32.mrf.mxu2  ;;  %v5079_v45 = vmul.f32 %v11568_v10, %v12685_v16 }
 0x519   : > { %v6589_v37 = vmul.f32 %v6557_v5, %v12682_v63  ;;  %8256 = vmatmul.msk.bf16.gmra.mxu1 %vm898_vm7, %v12683_v17  ;;  %v6047_v8 = vadd.f32 %v6004_v36, %v5615_v57  ;;  %v12686_v5 = vld [vmem:[#allocation11_spill] sm:$0xff]  ;;  %v12688_v57 = vld [vmem:[#allocation74_spill] sm:$0xff] }
 0x51b   : > { %v6621_v14 = vadd.f32 %v6589_v37, %v11653_v35  ;;  %v11932_v58 = vadd.f32 %v6047_v8, %v5079_v45  ;;  %v12689_v8 = vld [vmem:[#allocation12_spill] sm:$0xff] }
 0x51d   : > { %v6656_v43 = vadd.f32 %v11922_v49, %v6621_v14 }
 0x51e   : > { %v6479_v22 = vpop.f32.mrf.mxu1 }
 0x51f   : > { %v6688_v54 = vsub.f32 0.0, %v6656_v43  ;;  %v6558_v31 = vadd.f32 %v6479_v22, %v11664_v23 }
 0x520   : > { %v6007_v56 = vpop.f32.mrf.mxu2 }
 0x521   : > { %v6720_v1 = vmul.f32 1.442695, %v6688_v54  ;;  %v6590_v63 = vmul.f32 %v6558_v31, %v12686_v5  ;;  %v5618_v54 = vadd.f32 %v11869_v24, %v11564_v47 }
 0x523   : > { %8576 = vpow2.f32 %v6720_v1  ;;  %v6622_v35 = vadd.f32 %v6590_v63, %v11667_v46  ;;  %v5080_v1 = vmul.f32 %v11583_v21, %v12688_v57  ;;  %v6048_v46 = vadd.f32 %v6007_v56, %v5618_v54  ;;  %v12690_v57 = vld [vmem:[#allocation101_spill] sm:$0xff] }
 0x524   : > { %v5620_v54 = vadd.f32 %v11878_v27, %v11580_v32 }
 0x525   : > { %v11937_v17 = vadd.f32 %v11922_v49, %v6622_v35  ;;  %v11947_v45 = vadd.f32 %v6048_v46, %v5080_v1  ;;  %v12691_v1 = vld [vmem:[#allocation76_spill] sm:$0xff] }
 0x526   : > { %v6482_v36 = vpop.f32.mrf.mxu1  ;;  %v12692_v46 = vld [vmem:[#allocation120_spill] sm:$0xff] }
 0x527   : > { %v6689_v10 = vsub.f32 0.0, %v11937_v17  ;;  %v6559_v16 = vadd.f32 %v6482_v36, %v11678_v62  ;;  %v5081_v36 = vmul.f32 %v12692_v46, %v12691_v1  ;;  %v12694_v1 = vld [vmem:[#allocation119_spill] sm:$0xff] }
 0x528   : > { %v5623_v46 = vadd.f32 %v11885_v13, %v12694_v1 }
 0x529   : > { %v8577_v37 = vpop.eup %8576  ;;  %8257 = vmatmul.msk.bf16.gmra.mxu1 %vm898_vm7, %v12687_v33  ;;  %v6722_v23 = vmul.f32 1.442695, %v6689_v10  ;;  %v6591_v22 = vmul.f32 %v6559_v16, %v12689_v8 }
 0x52a   : > { %v6784_v14 = vadd.f32 1.0, %v8577_v37 }
 0x52b   : > { %v6623_v63 = vadd.f32 %v6591_v22, %v11682_v51  ;;  %v6009_v51 = vpop.f32.mrf.mxu2 }
 0x52c   : > { %8578 = vrcp.f32 %v6784_v14  ;;  %v6827_v37 = vand.u32 2147483648, %v6784_v14  ;;  %v6825_v10 = vand.u32 2147483647, %v6784_v14  ;;  %vm6821_vm5 = vweird.f32 %v6784_v14 }
 0x52d   : > { %8580 = vpow2.f32 %v6722_v23  ;;  %v11952_v35 = vadd.f32 %v11922_v49, %v6623_v63  ;;  %v6049_v8 = vadd.f32 %v6009_v51, %v5620_v54 }
 0x52e   : > { %v6828_v16 = vor.u32 1.1754944e-38, %v6827_v37  ;;  %v6484_v22 = vpop.f32.mrf.mxu1  ;;  %vm6826_vm10 = vcmp.eq.f32.partialorder %v6825_v10, 8.507059e+37 }
 0x52f   : > { %v6690_v62 = vsub.f32 0.0, %v11952_v35  ;;  %v6560_v32 = vadd.f32 %v6484_v22, %v11693_v39 }
 0x531   : > { %v6724_v56 = vmul.f32 1.442695, %v6690_v62 }
 0x532   : > { %v8579_v31 = vpop.eup %8578 }
 0x533   : > { %v6817_v5 = vmul.f32 %v8579_v31, %v6784_v14  ;;  %v8581_v47 = vpop.eup %8580  ;;  %vm6822_vm0 = vweird.f32 %v8579_v31  ;;  %v11962_v14 = vadd.f32 %v6049_v8, %v5081_v36  ;;  %v12695_v8 = vld [vmem:[#allocation80_spill] sm:$0xff] }
 0x534   : > { %v6785_v21 = vadd.f32 1.0, %v8581_v47  ;;  %vm6823_vm8 = vmor %vm6821_vm5, %vm6822_vm0  ;;  %v12693_v47 = vld [vmem:[#allocation15_spill] sm:$0xff]  ;;  %v5082_v22 = vmul.f32 %v11606_v59, %v12695_v8  ;;  %v12698_v8 = vld [vmem:[#allocation82_spill] sm:$0xff] }
 0x535   : > { %v6818_v24 = vsub.f32 1.0, %v6817_v5 }
 0x536   : > { %8582 = vrcp.f32 %v6785_v21  ;;  %v6842_v54 = vand.u32 2147483648, %v6785_v21  ;;  %v6840_v51 = vand.u32 2147483647, %v6785_v21  ;;  %vm6836_vm14 = vweird.f32 %v6785_v21 }
 0x537   : > { %v6819_v33 = vmul.f32 %v8579_v31, %v6818_v24  ;;  %8584 = vpow2.f32 %v6724_v56  ;;  %v6592_v24 = vmul.f32 %v6560_v32, %v12693_v47 }
 0x538   : > { %vm6841_vm2 = vcmp.eq.f32.partialorder %v6840_v51, 8.507059e+37 }
 0x539   : > { %v6820_v23 = vadd.f32 %v8579_v31, %v6819_v33  ;;  %8258 = vmatmul.msk.bf16.gmra.mxu1 %vm898_vm7, %v12690_v57  ;;  %v6624_v10 = vadd.f32 %v6592_v24, %v11696_v44 }
 0x53b   : > { %v6824_v5 = vsel %vm6823_vm8, %v8579_v31, %v6820_v23 }
 0x53c   : > { %v6829_v27 = vsel %vm6826_vm10, %v6828_v16, %v6824_v5  ;;  %v8583_v33 = vpop.eup %8582  ;;  %v6012_v16 = vpop.f32.mrf.mxu2  ;;  %v6843_v5 = vor.u32 1.1754944e-38, %v6842_v54 }
 0x53d   : > { %v7296_v63 = vmul.f32 %v6829_v27, %v6656_v43  ;;  %v6832_v31 = vmul.f32 %v8583_v33, %v6785_v21  ;;  %v8585_v62 = vpop.eup %8584  ;;  %v11976_v43 = vadd.f32 %v11922_v49, %v6624_v10  ;;  %vm6837_vm11 = vweird.f32 %v8583_v33  ;;  %v6487_v27 = vpop.f32.mrf.mxu1  ;;  %v12697_v10 = vld [vmem:[#allocation106_spill] sm:$0xff] }
 0x53e   : > { %v6786_v23 = vadd.f32 1.0, %v8585_v62  ;;  %vm6838_vm15 = vmor %vm6836_vm14, %vm6837_vm11  ;;  %v6050_v32 = vadd.f32 %v6012_v16, %v5623_v46  ;;  %v6561_v47 = vadd.f32 %v6487_v27, %v11707_v20 }
 0x53f   : > { %v7328_v37 = vpack.c.bf16 %v7296_v63, %v7296_v63  ;;  %v6833_v39 = vsub.f32 1.0, %v6832_v31  ;;  %v6691_v57 = vsub.f32 0.0, %v11976_v43 }
 0x540   : > { %8586 = vrcp.f32 %v6786_v23  ;;  %v11984_v13 = vadd.f32 %v6050_v32, %v5082_v22  ;;  %v6857_v51 = vand.u32 2147483648, %v6786_v23  ;;  %v6855_v1 = vand.u32 2147483647, %v6786_v23  ;;  %v12699_v22 = vld [vmem:[#allocation122_spill] sm:$0xff] }
 0x541   : > { %7360 = vst.msk [vmem:[%s11970_s21] sm:$0xf] %vm376_vm1, %v7328_v37  ;;  %v6834_v56 = vmul.f32 %v8583_v33, %v6833_v39  ;;  %v6726_v44 = vmul.f32 1.442695, %v6691_v57  ;;  %v12696_v37 = vld [vmem:[#allocation17_spill] sm:$0xff]  ;;  %vm6851_vm4 = vweird.f32 %v6786_v23 }
 0x542   : > { %v6593_v31 = vmul.f32 %v6561_v47, %v12696_v37  ;;  %v6858_v32 = vor.u32 1.1754944e-38, %v6857_v51  ;;  %vm6856_vm12 = vcmp.eq.f32.partialorder %v6855_v1, 8.507059e+37 }
 0x543   : > { %v6835_v36 = vadd.f32 %v8583_v33, %v6834_v56  ;;  %8588 = vpow2.f32 %v6726_v44 }
 0x544   : > { %v6625_v54 = vadd.f32 %v6593_v31, %v11711_v11  ;;  %v6014_v16 = vpop.f32.mrf.mxu2 }
 0x545   : > { %v6839_v63 = vsel %vm6838_vm15, %v8583_v33, %v6835_v36  ;;  %v5625_v36 = vadd.f32 %v11894_v48, %v11603_v55 }
 0x546   : > { %v6844_v24 = vsel %vm6841_vm2, %v6843_v5, %v6839_v63  ;;  %v8587_v59 = vpop.eup %8586  ;;  %v11994_v20 = vadd.f32 %v11922_v49, %v6625_v54  ;;  %v5083_v5 = vmul.f32 %v12699_v22, %v12698_v8  ;;  %v6489_v63 = vpop.f32.mrf.mxu1 }
 0x547   : > { %v7297_v21 = vmul.f32 %v6844_v24, %v11937_v17  ;;  %v6847_v39 = vmul.f32 %v8587_v59, %v6786_v23  ;;  %vm6852_vm3 = vweird.f32 %v8587_v59  ;;  %v6051_v27 = vadd.f32 %v6014_v16, %v5625_v36  ;;  %v12700_v23 = vld [vmem:[#allocation20_spill] sm:$0xff]  ;;  %v12703_v16 = vld [vmem:[#allocation86_spill] sm:$0xff] }
 0x548   : > { %v6692_v46 = vsub.f32 0.0, %v11994_v20  ;;  %vm6853_vm9 = vmor %vm6851_vm4, %vm6852_vm3  ;;  %v6562_v24 = vadd.f32 %v6489_v63, %v11723_v34  ;;  %v12701_v34 = vld [vmem:[#allocation111_spill] sm:$0xff]  ;;  %v5084_v8 = vmul.f32 %v11629_v7, %v12703_v16 }
 0x549   : > { %8259 = vmatmul.msk.bf16.gmra.mxu1 %vm898_vm7, %v12697_v10  ;;  %v7329_v62 = vpack.c.bf16 %v7297_v21, %v7297_v21  ;;  %v8589_v33 = vpop.eup %8588  ;;  %v6848_v56 = vsub.f32 1.0, %v6847_v39  ;;  %v12002_v55 = vadd.f32 %v6051_v27, %v5083_v5 }
 0x54a   : > { %v6787_v57 = vadd.f32 1.0, %v8589_v33  ;;  %v6728_v11 = vmul.f32 1.442695, %v6692_v46  ;;  %v6594_v37 = vmul.f32 %v6562_v24, %v12700_v23  ;;  %v12702_v46 = vld [vmem:[#allocation121_spill] sm:$0xff]  ;;  %v12704_v24 = vld [vmem:[#allocation24_spill] sm:$0xff] }
 0x54b   : > { %7361 = vst.msk [vmem:[%s11970_s21 + $0x4] sm:$0xf] %vm376_vm1, %v7329_v62  ;;  %v6849_v17 = vmul.f32 %v8587_v59, %v6848_v56 }
 0x54c   : > { %8590 = vrcp.f32 %v6787_v57  ;;  %v6626_v39 = vadd.f32 %v6594_v37, %v11726_v28  ;;  %v6872_v56 = vand.u32 2147483648, %v6787_v57  ;;  %v5628_v28 = vadd.f32 %v11901_v4, %v12702_v46  ;;  %v12707_v46 = vld [vmem:[#allocation123_spill] sm:$0xff] }
 0x54d   : > { %v6850_v44 = vadd.f32 %v8587_v59, %v6849_v17  ;;  %8592 = vpow2.f32 %v6728_v11  ;;  %v6870_v17 = vand.u32 2147483647, %v6787_v57  ;;  %vm6866_vm6 = vweird.f32 %v6787_v57  ;;  %v6017_v11 = vpop.f32.mrf.mxu2 }
 0x54e   : > { %v12010_v33 = vadd.f32 %v11922_v49, %v6626_v39  ;;  %v6873_v22 = vor.u32 1.1754944e-38, %v6872_v56  ;;  %v6052_v5 = vadd.f32 %v6017_v11, %v5628_v28 }
 0x54f   : > { %v6854_v47 = vsel %vm6853_vm9, %v8587_v59, %v6850_v44  ;;  %vm6871_vm5 = vcmp.eq.f32.partialorder %v6870_v17, 8.507059e+37  ;;  %v12705_v17 = vld [vmem:[#allocation116_spill] sm:$0xff] }
 0x550   : > { %v6859_v21 = vsel %vm6856_vm12, %v6858_v32, %v6854_v47  ;;  %v6693_v1 = vsub.f32 0.0, %v12010_v33  ;;  %v6492_v32 = vpop.f32.mrf.mxu1  ;;  %v12020_v4 = vadd.f32 %v6052_v5, %v5084_v8 }
 0x551   : > { %v7298_v48 = vmul.f32 %v6859_v21, %v11952_v35  ;;  %v6563_v63 = vadd.f32 %v6492_v32, %v11740_v18 }
 0x552   : > { %v8591_v31 = vpop.eup %8590  ;;  %v6730_v44 = vmul.f32 1.442695, %v6693_v1  ;;  %v12706_v1 = vld [vmem:[#allocation88_spill] sm:$0xff] }
 0x553   : > { %v7330_v10 = vpack.c.bf16 %v7298_v48, %v7298_v48  ;;  %v6862_v62 = vmul.f32 %v8591_v31, %v6787_v57  ;;  %v8593_v54 = vpop.eup %8592  ;;  %vm6867_vm13 = vweird.f32 %v8591_v31  ;;  %v6595_v21 = vmul.f32 %v6563_v63, %v12704_v24  ;;  %v6208_v24 = vpop.f32.mrf.mxu3 }
 0x554   : > { %v6788_v51 = vadd.f32 1.0, %v8593_v54  ;;  %vm6868_vm0 = vmor %vm6866_vm6, %vm6867_vm13  ;;  %v5085_v28 = vmul.f32 %v12707_v46, %v12706_v1  ;;  %v12710_v1 = vld [vmem:[#allocation117_spill] sm:$0xff] }
 0x555   : > { %7362 = vst.msk [vmem:[%s11970_s21 + $0x8] sm:$0xf] %vm376_vm1, %v7330_v10  ;;  %v6863_v59 = vsub.f32 1.0, %v6862_v62  ;;  %v6627_v37 = vadd.f32 %v6595_v21, %v11744_v40 }
 0x556   : > { %8594 = vrcp.f32 %v6788_v51  ;;  %v6887_v18 = vand.u32 2147483648, %v6788_v51  ;;  %vm6881_vm10 = vweird.f32 %v6788_v51 }
 0x557   : > { %v6864_v35 = vmul.f32 %v8591_v31, %v6863_v59  ;;  %8596 = vpow2.f32 %v6730_v44  ;;  %v12028_v62 = vadd.f32 %v11922_v49, %v6627_v37  ;;  %v6885_v59 = vand.u32 2147483647, %v6788_v51 }
 0x558   : > { %v6494_v11 = vpop.f32.mrf.mxu1 }
 0x559   : > { %8260 = vmatmul.msk.bf16.gmra.mxu1 %vm898_vm7, %v12701_v34  ;;  %v6865_v36 = vadd.f32 %v8591_v31, %v6864_v35  ;;  %v5630_v34 = vadd.f32 %v11910_v2, %v11626_v60  ;;  %v6019_v35 = vpop.f32.mrf.mxu2  ;;  %vm6886_vm14 = vcmp.eq.f32.partialorder %v6885_v59, 8.507059e+37  ;;  %v6564_v60 = vadd.f32 %v6494_v11, %v11759_v12 }
 0x55b   : > { %v6869_v27 = vsel %vm6868_vm0, %v8591_v31, %v6865_v36  ;;  %v6888_v36 = vor.u32 1.1754944e-38, %v6887_v18  ;;  %v6053_v44 = vadd.f32 %v6019_v35, %v5630_v34 }
 0x55c   : > { %v6874_v47 = vsel %vm6871_vm5, %v6873_v22, %v6869_v27  ;;  %v8595_v48 = vpop.eup %8594  ;;  %v12708_v22 = vld [vmem:[#allocation26_spill] sm:$0xff] }
 0x55d   : > { %v7299_v57 = vmul.f32 %v6874_v47, %v11976_v43  ;;  %v6877_v7 = vmul.f32 %v8595_v48, %v6788_v51  ;;  %v8597_v10 = vpop.eup %8596  ;;  %vm6882_vm8 = vweird.f32 %v8595_v48  ;;  %v6694_v43 = vsub.f32 0.0, %v12028_v62 }
 0x55e   : > { %v6789_v39 = vadd.f32 1.0, %v8597_v10  ;;  %vm6883_vm11 = vmor %vm6881_vm10, %vm6882_vm8  ;;  %v12038_v51 = vadd.f32 %v6053_v44, %v5085_v28  ;;  %v6596_v5 = vmul.f32 %v6564_v60, %v12708_v22 }
 0x55f   : > { %v7331_v23 = vpack.c.bf16 %v7299_v57, %v7299_v57  ;;  %v6878_v31 = vsub.f32 1.0, %v6877_v7  ;;  %v6732_v40 = vmul.f32 1.442695, %v6694_v43  ;;  %v6318_v7 = vpop.f32.mrf.mxu0 }
 0x560   : > { %8598 = vrcp.f32 %v6789_v39  ;;  %v6628_v47 = vadd.f32 %v6596_v5, %v11762_v41  ;;  %v6902_v12 = vand.u32 2147483648, %v6789_v39  ;;  %vm6896_vm2 = vweird.f32 %v6789_v39 }
 0x561   : > { %7363 = vst.msk [vmem:[%s11970_s21 + $0xc] sm:$0xf] %vm376_vm1, %v7331_v23  ;;  %v6879_v54 = vmul.f32 %v8595_v48, %v6878_v31  ;;  %8600 = vpow2.f32 %v6732_v40  ;;  %v6319_v31 = vadd.f32 %v6318_v7, %v6208_v24  ;;  %v12709_v40 = vld [vmem:[#allocation28_spill] sm:$0xff] }
 0x562   : > { %v6903_v59 = vor.u32 1.1754944e-38, %v6902_v12  ;;  %v12711_v7 = vld [vmem:[#allocation32_spill] sm:$0xff] }
 0x563   : > { %v6880_v56 = vadd.f32 %v8595_v48, %v6879_v54  ;;  %v6497_v54 = vpop.f32.mrf.mxu1 }
 0x564   : > { %v6565_v43 = vadd.f32 %v6497_v54, %v6319_v31 }
 0x565   : > { %v6884_v16 = vsel %vm6883_vm11, %v8595_v48, %v6880_v56  ;;  %v12046_v48 = vadd.f32 %v11922_v49, %v6628_v47 }
 0x566   : > { %v6889_v2 = vsel %vm6886_vm14, %v6888_v36, %v6884_v16  ;;  %v8599_v32 = vpop.eup %8598  ;;  %v6597_v35 = vmul.f32 %v6565_v43, %v12709_v40  ;;  %v6210_v16 = vpop.f32.mrf.mxu3 }
 0x567   : > { %v7300_v8 = vmul.f32 %v6889_v2, %v11994_v20  ;;  %v6892_v63 = vmul.f32 %v8599_v32, %v6789_v39  ;;  %v8601_v57 = vpop.eup %8600  ;;  %vm6897_vm15 = vweird.f32 %v8599_v32  ;;  %v6900_v20 = vand.u32 2147483647, %v6789_v39  ;;  %v6320_v22 = vpop.f32.mrf.mxu0 }
 0x568   : > { %v6790_v23 = vadd.f32 1.0, %v8601_v57  ;;  %v6695_v10 = vsub.f32 0.0, %v12046_v48  ;;  %vm6898_vm3 = vmor %vm6896_vm2, %vm6897_vm15  ;;  %v6629_v39 = vadd.f32 %v6597_v35, %v11775_v26 }
 0x569   : > { %8261 = vmatmul.msk.bf16.gmra.mxu1 %vm898_vm7, %v12705_v17  ;;  %v7332_v27 = vpack.c.bf16 %v7300_v8, %v7300_v8  ;;  %v6893_v21 = vsub.f32 1.0, %v6892_v63  ;;  %vm6901_vm4 = vcmp.eq.f32.partialorder %v6900_v20, 8.507059e+37 }
 0x56a   : > { %8602 = vrcp.f32 %v6790_v23  ;;  %v6734_v41 = vmul.f32 1.442695, %v6695_v10  ;;  %v12055_v44 = vadd.f32 %v11922_v49, %v6629_v39  ;;  %v6917_v2 = vand.u32 2147483648, %v6790_v23 }
 0x56b   : > { %7364 = vst.msk [vmem:[%s11970_s21 + $0x10] sm:$0xf] %vm376_vm1, %v7332_v27  ;;  %v6894_v37 = vmul.f32 %v8599_v32, %v6893_v21  ;;  %v6321_v27 = vadd.f32 %v6320_v22, %v6210_v16  ;;  %vm6911_vm12 = vweird.f32 %v6790_v23  ;;  %v6499_v47 = vpop.f32.mrf.mxu1 }
 0x56c   : > { %8604 = vpow2.f32 %v6734_v41  ;;  %v6918_v57 = vor.u32 1.1754944e-38, %v6917_v2  ;;  %v12713_v2 = vld [vmem:[#allocation36_spill] sm:$0xff] }
 0x56d   : > { %v6895_v18 = vadd.f32 %v8599_v32, %v6894_v37  ;;  %v6566_v24 = vadd.f32 %v6499_v47, %v6321_v27 }
 0x56f   : > { %v6899_v34 = vsel %vm6898_vm3, %v8599_v32, %v6895_v18  ;;  %v6915_v32 = vand.u32 2147483647, %v6790_v23  ;;  %v6598_v37 = vmul.f32 %v6566_v24, %v12711_v7  ;;  %v6323_v35 = vpop.f32.mrf.mxu0 }
 0x570   : > { %v6904_v56 = vsel %vm6901_vm4, %v6903_v59, %v6899_v34  ;;  %v8603_v46 = vpop.eup %8602  ;;  %v6213_v59 = vpop.f32.mrf.mxu3  ;;  %v12712_v34 = vld [vmem:[#allocation118_spill] sm:$0xff] }
 0x571   : > { %v7301_v17 = vmul.f32 %v6904_v56, %v12010_v33  ;;  %v6907_v36 = vmul.f32 %v8603_v46, %v6790_v23  ;;  %v6696_v33 = vsub.f32 0.0, %v12055_v44  ;;  %vm6912_vm9 = vweird.f32 %v8603_v46 }
 0x572   : > { %v8605_v11 = vpop.eup %8604  ;;  %vm6913_vm13 = vmor %vm6911_vm12, %vm6912_vm9  ;;  %vm6916_vm6 = vcmp.eq.f32.partialorder %v6915_v32, 8.507059e+37  ;;  %v6630_v31 = vadd.f32 %v6598_v37, %v11791_v42 }
 0x573   : > { %v7333_v28 = vpack.c.bf16 %v7301_v17, %v7301_v17  ;;  %v6908_v60 = vsub.f32 1.0, %v6907_v36  ;;  %v6791_v8 = vadd.f32 1.0, %v8605_v11  ;;  %v6736_v63 = vmul.f32 1.442695, %v6696_v33 }
 0x574   : > { %v12064_v23 = vadd.f32 %v11922_v49, %v6630_v31 }
 0x575   : > { %7365 = vst.msk [vmem:[%s11970_s21 + $0x14] sm:$0xf] %vm376_vm1, %v7333_v28  ;;  %v6909_v5 = vmul.f32 %v8603_v46, %v6908_v60  ;;  %8606 = vrcp.f32 %v6791_v8  ;;  %v6932_v56 = vand.u32 2147483648, %v6791_v8  ;;  %v6930_v42 = vand.u32 2147483647, %v6791_v8  ;;  %v6502_v28 = vpop.f32.mrf.mxu1 }
 0x576   : > { %8608 = vpow2.f32 %v6736_v63  ;;  %vm6926_vm5 = vweird.f32 %v6791_v8 }
 0x577   : > { %v6910_v26 = vadd.f32 %v8603_v46, %v6909_v5  ;;  %v6933_v36 = vor.u32 1.1754944e-38, %v6932_v56  ;;  %v6325_v7 = vpop.f32.mrf.mxu0 }
 0x578   : > { %v6215_v47 = vpop.f32.mrf.mxu3 }
 0x579   : > { %8262 = vmatmul.msk.bf16.gmra.mxu1 %vm898_vm7, %v12710_v1  ;;  %v6914_v21 = vsel %vm6913_vm13, %v8603_v46, %v6910_v26  ;;  %v6324_v1 = vadd.f32 %v6323_v35, %v6213_v59 }
 0x57a   : > { %v6919_v12 = vsel %vm6916_vm6, %v6918_v57, %v6914_v21 }
 0x57b   : > { %v7302_v20 = vmul.f32 %v6919_v12, %v12028_v62  ;;  %v8607_v10 = vpop.eup %8606  ;;  %v6697_v62 = vsub.f32 0.0, %v12064_v23  ;;  %v6567_v11 = vadd.f32 %v6502_v28, %v6324_v1 }
 0x57c   : > { %v6922_v41 = vmul.f32 %v8607_v10, %v6791_v8  ;;  %v8609_v54 = vpop.eup %8608  ;;  %vm6927_vm0 = vweird.f32 %v8607_v10 }
 0x57d   : > { %v7334_v18 = vpack.c.bf16 %v7302_v20, %v7302_v20  ;;  %v6792_v40 = vadd.f32 1.0, %v8609_v54  ;;  %v6738_v39 = vmul.f32 1.442695, %v6697_v62  ;;  %vm6928_vm8 = vmor %vm6926_vm5, %vm6927_vm0  ;;  %v6599_v33 = vmul.f32 %v6567_v11, %v12713_v2  ;;  %v6504_v31 = vpop.f32.mrf.mxu1 }
 0x57e   : > { %v6923_v43 = vsub.f32 1.0, %v6922_v41  ;;  %v6326_v20 = vadd.f32 %v6325_v7, %v6215_v47 }
 0x57f   : > { %7366 = vst.msk [vmem:[%s11970_s21 + $0x18] sm:$0xf] %vm376_vm1, %v7334_v18  ;;  %8610 = vrcp.f32 %v6792_v40  ;;  %v6631_v32 = vadd.f32 %v6599_v33, %v11803_v29  ;;  %v6947_v24 = vand.u32 2147483648, %v6792_v40  ;;  %vm6941_vm11 = vweird.f32 %v6792_v40 }
 0x580   : > { %v6924_v17 = vmul.f32 %v8607_v10, %v6923_v43  ;;  %8612 = vpow2.f32 %v6738_v39  ;;  %v6568_v41 = vadd.f32 %v6504_v31, %v6326_v20  ;;  %v12714_v43 = vld [vmem:[#allocation39_spill] sm:$0xff] }
 0x581   : > { %v12075_v8 = vadd.f32 %v11922_v49, %v6631_v32  ;;  %v6948_v18 = vor.u32 1.1754944e-38, %v6947_v24 }
 0x582   : > { %v6925_v46 = vadd.f32 %v8607_v10, %v6924_v17 }
 0x583   : > { %v6698_v12 = vsub.f32 0.0, %v12075_v8 }
 0x584   : > { %v6929_v16 = vsel %vm6928_vm8, %v8607_v10, %v6925_v46  ;;  %v6218_v46 = vpop.f32.mrf.mxu3 }
 0x585   : > { %v8611_v5 = vpop.eup %8610  ;;  %v6740_v10 = vmul.f32 1.442695, %v6698_v12 }
 0x586   : > { %v6937_v26 = vmul.f32 %v8611_v5, %v6792_v40  ;;  %v8613_v63 = vpop.eup %8612  ;;  %vm6942_vm10 = vweird.f32 %v8611_v5 }
 0x587   : > { %v6793_v21 = vadd.f32 1.0, %v8613_v63  ;;  %vm6943_vm14 = vmor %vm6941_vm11, %vm6942_vm10  ;;  %v12715_v63 = vld [vmem:[#allocation42_spill] sm:$0xff] }
 0x588   : > { %v6938_v57 = vsub.f32 1.0, %v6937_v26 }
 0x589   : > { %8263 = vmatmul.msk.bf16.gmra.mxu1 %vm898_vm7, %v12712_v34  ;;  %vm6931_vm7 = vcmp.eq.f32.partialorder %v6930_v42, 8.507059e+37  ;;  %8614 = vrcp.f32 %v6793_v21  ;;  %v6600_v34 = vmul.f32 %v6568_v41, %v12714_v43  ;;  %v6962_v28 = vand.u32 2147483648, %v6793_v21 }
 0x58a   : > { %v6934_v60 = vsel %vm6931_vm7, %v6933_v36, %v6929_v16  ;;  %v6939_v37 = vmul.f32 %v8611_v5, %v6938_v57  ;;  %8616 = vpow2.f32 %v6740_v10  ;;  %v6328_v16 = vpop.f32.mrf.mxu0  ;;  %vm6956_vm3 = vweird.f32 %v6793_v21 }
 0x58b   : > { %v7303_v22 = vmul.f32 %v6934_v60, %v12046_v48  ;;  %v6945_v48 = vand.u32 2147483647, %v6792_v40  ;;  %v6632_v35 = vadd.f32 %v6600_v34, %v11814_v30  ;;  %v6329_v2 = vadd.f32 %v6328_v16, %v6218_v46 }
 0x58c   : > { %v6940_v29 = vadd.f32 %v8611_v5, %v6939_v37  ;;  %v6220_v20 = vpop.f32.mrf.mxu3 }
 0x58d   : > { %v7335_v27 = vpack.c.bf16 %v7303_v22, %v7303_v22  ;;  %vm6946_vm15 = vcmp.eq.f32.partialorder %v6945_v48, 8.507059e+37  ;;  %v12084_v40 = vadd.f32 %v11922_v49, %v6632_v35  ;;  %v6507_v22 = vpop.f32.mrf.mxu1 }
 0x58e   : > { %v6944_v54 = vsel %vm6943_vm14, %v8611_v5, %v6940_v29  ;;  %v6963_v5 = vor.u32 1.1754944e-38, %v6962_v28  ;;  %v6569_v32 = vadd.f32 %v6507_v22, %v6329_v2 }
 0x58f   : > { %7367 = vst.msk [vmem:[%s11970_s21 + $0x1c] sm:$0xf] %vm376_vm1, %v7335_v27  ;;  %v6949_v59 = vsel %vm6946_vm15, %v6948_v18, %v6944_v54  ;;  %v8615_v62 = vpop.eup %8614  ;;  %v6699_v11 = vsub.f32 0.0, %v12084_v40 }
 0x590   : > { %v7304_v56 = vmul.f32 %v6949_v59, %v12055_v44  ;;  %v6952_v42 = vmul.f32 %v8615_v62, %v6793_v21  ;;  %v8617_v1 = vpop.eup %8616  ;;  %vm6957_vm2 = vweird.f32 %v8615_v62  ;;  %v6960_v44 = vand.u32 2147483647, %v6793_v21 }
 0x591   : > { %v6794_v36 = vadd.f32 1.0, %v8617_v1  ;;  %v6742_v33 = vmul.f32 1.442695, %v6699_v11  ;;  %vm6958_vm4 = vmor %vm6956_vm3, %vm6957_vm2  ;;  %v6601_v47 = vmul.f32 %v6569_v32, %v12715_v63 }
 0x592   : > { %v7336_v17 = vpack.c.bf16 %v7304_v56, %v7304_v56  ;;  %v6953_v39 = vsub.f32 1.0, %v6952_v42  ;;  %vm6961_vm9 = vcmp.eq.f32.partialorder %v6960_v44, 8.507059e+37  ;;  %v6330_v41 = vpop.f32.mrf.mxu0  ;;  %v12716_v42 = vld [vmem:[#allocation45_spill] sm:$0xff] }
 0x593   : > { %8618 = vrcp.f32 %v6794_v36  ;;  %v6633_v12 = vadd.f32 %v6601_v47, %v11827_v53  ;;  %v6977_v10 = vand.u32 2147483648, %v6794_v36  ;;  %v6331_v59 = vadd.f32 %v6330_v41, %v6220_v20 }
 0x594   : > { %7368 = vst.msk [vmem:[%s11970_s21 + $0x20] sm:$0xf] %vm376_vm1, %v7336_v17  ;;  %v6954_v60 = vmul.f32 %v8615_v62, %v6953_v39  ;;  %8620 = vpow2.f32 %v6742_v33  ;;  %vm6971_vm13 = vweird.f32 %v6794_v36  ;;  %v6223_v44 = vpop.f32.mrf.mxu3 }
 0x595   : > { %v12093_v21 = vadd.f32 %v11922_v49, %v6633_v12  ;;  %v6509_v34 = vpop.f32.mrf.mxu1  ;;  %v6978_v56 = vor.u32 1.1754944e-38, %v6977_v10 }
 0x596   : > { %v6955_v30 = vadd.f32 %v8615_v62, %v6954_v60 }
 0x597   : > { %v6700_v18 = vsub.f32 0.0, %v12093_v21 }
 0x598   : > { %v6959_v27 = vsel %vm6958_vm4, %v8615_v62, %v6955_v30  ;;  %v6570_v62 = vadd.f32 %v6509_v34, %v6331_v59 }
 0x599   : > { %v6964_v26 = vsel %vm6961_vm9, %v6963_v5, %v6959_v27  ;;  %v8619_v24 = vpop.eup %8618  ;;  %v6744_v43 = vmul.f32 1.442695, %v6700_v18 }
 0x59a   : > { %v7305_v57 = vmul.f32 %v6964_v26, %v12064_v23  ;;  %v6967_v37 = vmul.f32 %v8619_v24, %v6794_v36  ;;  %v8621_v48 = vpop.eup %8620  ;;  %vm6972_vm12 = vweird.f32 %v8619_v24  ;;  %v6975_v23 = vand.u32 2147483647, %v6794_v36  ;;  %v6333_v5 = vpop.f32.mrf.mxu0 }
 0x59b   : > { %v6795_v31 = vadd.f32 1.0, %v8621_v48  ;;  %vm6973_vm6 = vmor %vm6971_vm13, %vm6972_vm12  ;;  %v6602_v1 = vmul.f32 %v6570_v62, %v12716_v42  ;;  %v6334_v27 = vadd.f32 %v6333_v5, %v6223_v44 }
 0x59c   : > { %v7337_v7 = vpack.c.bf16 %v7305_v57, %v7305_v57  ;;  %v6968_v29 = vsub.f32 1.0, %v6967_v37  ;;  %vm6976_vm0 = vcmp.eq.f32.partialorder %v6975_v23, 8.507059e+37 }
 0x59d   : > { %8622 = vrcp.f32 %v6795_v31  ;;  %v6634_v28 = vadd.f32 %v6602_v1, %v11835_v6  ;;  %v6992_v30 = vand.u32 2147483648, %v6795_v31  ;;  %vm6986_vm8 = vweird.f32 %v6795_v31  ;;  %v6512_v63 = vpop.f32.mrf.mxu1 }
 0x59e   : > { %7369 = vst.msk [vmem:[%s11970_s21 + $0x24] sm:$0xf] %vm376_vm1, %v7337_v7  ;;  %v6969_v54 = vmul.f32 %v8619_v24, %v6968_v29  ;;  %8624 = vpow2.f32 %v6744_v43  ;;  %v6571_v57 = vadd.f32 %v6512_v63, %v6334_v27  ;;  %v12717_v7 = vld [vmem:[#allocation47_spill] sm:$0xff] }
 0x59f   : > { %v12102_v36 = vadd.f32 %v11922_v49, %v6634_v28  ;;  %v6993_v47 = vor.u32 1.1754944e-38, %v6992_v30  ;;  %v12718_v28 = vld [vmem:[#allocation49_spill] sm:$0xff] }
 0x5a0   : > { %v6970_v53 = vadd.f32 %v8619_v24, %v6969_v54  ;;  %v6603_v37 = vmul.f32 %v6571_v57, %v12717_v7  ;;  %v6225_v54 = vpop.f32.mrf.mxu3 }
 0x5a1   : > { %v6701_v22 = vsub.f32 0.0, %v12102_v36 }
 0x5a2   : > { %v6974_v35 = vsel %vm6973_vm6, %v8619_v24, %v6970_v53  ;;  %v6635_v29 = vadd.f32 %v6603_v37, %v11841_v52  ;;  %v6335_v34 = vpop.f32.mrf.mxu0 }
 0x5a3   : > { %v6979_v17 = vsel %vm6976_vm0, %v6978_v56, %v6974_v35  ;;  %v8623_v39 = vpop.eup %8622  ;;  %v6746_v26 = vmul.f32 1.442695, %v6701_v22  ;;  %v6336_v62 = vadd.f32 %v6335_v34, %v6225_v54 }
 0x5a4   : > { %v7306_v46 = vmul.f32 %v6979_v17, %v12075_v8  ;;  %v6982_v16 = vmul.f32 %v8623_v39, %v6795_v31  ;;  %v8625_v60 = vpop.eup %8624  ;;  %vm6987_vm5 = vweird.f32 %v8623_v39  ;;  %v6990_v8 = vand.u32 2147483647, %v6795_v31 }
 0x5a5   : > { %v6796_v33 = vadd.f32 1.0, %v8625_v60  ;;  %vm6988_vm7 = vmor %vm6986_vm8, %vm6987_vm5  ;;  %v12111_v31 = vadd.f32 %v11922_v49, %v6635_v29  ;;  %v6514_v17 = vpop.f32.mrf.mxu1 }
 0x5a6   : > { %v7338_v11 = vpack.c.bf16 %v7306_v46, %v7306_v46  ;;  %v6983_v2 = vsub.f32 1.0, %v6982_v16  ;;  %vm6991_vm10 = vcmp.eq.f32.partialorder %v6990_v8, 8.507059e+37  ;;  %v6572_v1 = vadd.f32 %v6514_v17, %v6336_v62 }
 0x5a7   : > { %8626 = vrcp.f32 %v6796_v33  ;;  %v7007_v59 = vand.u32 2147483648, %v6796_v33  ;;  %v6702_v43 = vsub.f32 0.0, %v12111_v31  ;;  %vm7001_vm14 = vweird.f32 %v6796_v33 }
 0x5a8   : > { %7370 = vst.msk [vmem:[%s11970_s21 + $0x28] sm:$0xf] %vm376_vm1, %v7338_v11  ;;  %v6984_v32 = vmul.f32 %v8623_v39, %v6983_v2  ;;  %8628 = vpow2.f32 %v6746_v26  ;;  %v6604_v11 = vmul.f32 %v6572_v1, %v12718_v28  ;;  %v6228_v5 = vpop.f32.mrf.mxu3 }
 0x5a9   : > { %v6748_v35 = vmul.f32 1.442695, %v6702_v43  ;;  %v7008_v42 = vor.u32 1.1754944e-38, %v7007_v59 }
 0x5aa   : > { %v6985_v6 = vadd.f32 %v8623_v39, %v6984_v32  ;;  %v6636_v44 = vadd.f32 %v6604_v11, %v11849_v50  ;;  %v6338_v26 = vpop.f32.mrf.mxu0  ;;  %v12720_v11 = vld [vmem:[#allocation53_spill] sm:$0xff] }
 0x5ac   : > { %v6989_v24 = vsel %vm6988_vm7, %v8623_v39, %v6985_v6 }
 0x5ad   : > { %v6994_v12 = vsel %vm6991_vm10, %v6993_v47, %v6989_v24  ;;  %v8627_v20 = vpop.eup %8626  ;;  %v6339_v47 = vadd.f32 %v6338_v26, %v6228_v5  ;;  %v6517_v24 = vpop.f32.mrf.mxu1  ;;  %v12140_v5 = vld [vmem:[%s12286_s4] ss:$0 sm:$0xff] }
 0x5ae   : > { %v7307_v48 = vmul.f32 %v6994_v12, %v12084_v40  ;;  %v6997_v18 = vmul.f32 %v8627_v20, %v6796_v33  ;;  %v8629_v41 = vpop.eup %8628  ;;  %vm7002_vm11 = vweird.f32 %v8627_v20  ;;  %v7005_v40 = vand.u32 2147483647, %v6796_v33 }
 0x5af   : > { %v6797_v53 = vadd.f32 1.0, %v8629_v41  ;;  %vm7003_vm15 = vmor %vm7001_vm14, %vm7002_vm11  ;;  %v12120_v33 = vadd.f32 %v11922_v49, %v6636_v44  ;;  %v6573_v7 = vadd.f32 %v6517_v24, %v6339_v47 }
 0x5b0   : > { %v7339_v10 = vpack.c.bf16 %v7307_v48, %v7307_v48  ;;  %v6998_v23 = vsub.f32 1.0, %v6997_v18  ;;  %vm7006_vm2 = vcmp.eq.f32.partialorder %v7005_v40, 8.507059e+37  ;;  %v6230_v43 = vpop.f32.mrf.mxu3 }
 0x5b1   : > { %8630 = vrcp.f32 %v6797_v53  ;;  %v7022_v8 = vand.u32 2147483648, %v6797_v53  ;;  %v6703_v6 = vsub.f32 0.0, %v12120_v33  ;;  %vm7016_vm4 = vweird.f32 %v6797_v53 }
 0x5b2   : > { %7371 = vst.msk [vmem:[%s11970_s21 + $0x2c] sm:$0xf] %vm376_vm1, %v7339_v10  ;;  %v6999_v56 = vmul.f32 %v8627_v20, %v6998_v23  ;;  %8632 = vpow2.f32 %v6748_v35 }
 0x5b3   : > { %v6750_v57 = vmul.f32 1.442695, %v6703_v6  ;;  %v7023_v12 = vor.u32 1.1754944e-38, %v7022_v8 }
 0x5b4   : > { %v7000_v52 = vadd.f32 %v8627_v20, %v6999_v56 }
 0x5b6   : > { %v7004_v46 = vsel %vm7003_vm15, %v8627_v20, %v7000_v52  ;;  %v12719_v20 = vld [vmem:[#allocation51_spill] sm:$0xff]  ;;  %v6340_v52 = vpop.f32.mrf.mxu0 }
 0x5b7   : > { %v7009_v39 = vsel %vm7006_vm2, %v7008_v42, %v7004_v46  ;;  %v8631_v60 = vpop.eup %8630  ;;  %v6605_v29 = vmul.f32 %v6573_v7, %v12719_v20  ;;  %v6341_v17 = vadd.f32 %v6340_v52, %v6230_v43 }
 0x5b8   : > { %v7308_v16 = vmul.f32 %v7009_v39, %v12093_v21  ;;  %v7012_v30 = vmul.f32 %v8631_v60, %v6797_v53  ;;  %v8633_v22 = vpop.eup %8632  ;;  %vm7017_vm3 = vweird.f32 %v8631_v60  ;;  %v7020_v21 = vand.u32 2147483647, %v6797_v53 }
 0x5b9   : > { %v6798_v27 = vadd.f32 1.0, %v8633_v22  ;;  %vm7018_vm9 = vmor %vm7016_vm4, %vm7017_vm3  ;;  %v6637_v41 = vadd.f32 %v6605_v29, %v11855_v61  ;;  %v12721_v29 = vld [vmem:[#allocation56_spill] sm:$0xff] }
 0x5ba   : > { %v7340_v2 = vpack.c.bf16 %v7308_v16, %v7308_v16  ;;  %v7013_v32 = vsub.f32 1.0, %v7012_v30  ;;  %vm7021_vm12 = vcmp.eq.f32.partialorder %v7020_v21, 8.507059e+37 }
 0x5bb   : > { %8634 = vrcp.f32 %v6798_v27  ;;  %v12129_v59 = vadd.f32 %v11922_v49, %v6637_v41  ;;  %v7037_v56 = vand.u32 2147483648, %v6798_v27  ;;  %vm7031_vm6 = vweird.f32 %v6798_v27  ;;  %v6519_v49 = vpop.f32.mrf.mxu1 }
 0x5bc   : > { %7372 = vst.msk [vmem:[%s11970_s21 + $0x30] sm:$0xf] %vm376_vm1, %v7340_v2  ;;  %v7014_v63 = vmul.f32 %v8631_v60, %v7013_v32  ;;  %8636 = vpow2.f32 %v6750_v57  ;;  %v6574_v46 = vadd.f32 %v6519_v49, %v6341_v17 }
 0x5bd   : > { %v6704_v62 = vsub.f32 0.0, %v12129_v59  ;;  %v7038_v1 = vor.u32 1.1754944e-38, %v7037_v56 }
 0x5be   : > { %v7015_v50 = vadd.f32 %v8631_v60, %v7014_v63  ;;  %v6606_v16 = vmul.f32 %v6574_v46, %v12720_v11  ;;  %v12722_v11 = vld [vmem:[#allocation59_spill] sm:$0xff] }
 0x5bf   : > { %v6752_v42 = vmul.f32 1.442695, %v6704_v62 }
 0x5c0   : > { %v7019_v37 = vsel %vm7018_vm9, %v8631_v60, %v7015_v50  ;;  %v6638_v2 = vadd.f32 %v6606_v16, %v11862_v15  ;;  %v6343_v15 = vpop.f32.mrf.mxu0 }
 0x5c1   : > { %v7024_v48 = vsel %vm7021_vm12, %v7023_v12, %v7019_v37  ;;  %v8635_v18 = vpop.eup %8634 }
 0x5c2   : > { %v7309_v10 = vmul.f32 %v7024_v48, %v12102_v36  ;;  %v7027_v23 = vmul.f32 %v8635_v18, %v6798_v27  ;;  %v8637_v53 = vpop.eup %8636  ;;  %vm7032_vm13 = vweird.f32 %v8635_v18  ;;  %v7035_v36 = vand.u32 2147483647, %v6798_v27  ;;  %v6233_v27 = vpop.f32.mrf.mxu3 }
 0x5c3   : > { %v6799_v40 = vadd.f32 1.0, %v8637_v53  ;;  %vm7033_vm0 = vmor %vm7031_vm6, %vm7032_vm13  ;;  %v12143_v32 = vadd.f32 %v12140_v5, %v6638_v2  ;;  %v6344_v50 = vadd.f32 %v6343_v15, %v6233_v27  ;;  %v6522_v12 = vpop.f32.mrf.mxu1 }
 0x5c4   : > { %v7341_v54 = vpack.c.bf16 %v7309_v10, %v7309_v10  ;;  %v7028_v34 = vsub.f32 1.0, %v7027_v23  ;;  %vm7036_vm5 = vcmp.eq.f32.partialorder %v7035_v36, 8.507059e+37 }
 0x5c5   : > { %8638 = vrcp.f32 %v6799_v40  ;;  %v7052_v26 = vand.u32 2147483648, %v6799_v40  ;;  %v6705_v63 = vsub.f32 0.0, %v12143_v32  ;;  %v7050_v47 = vand.u32 2147483647, %v6799_v40 }
 0x5c6   : > { %7373 = vst.msk [vmem:[%s11970_s21 + $0x34] sm:$0xf] %vm376_vm1, %v7341_v54  ;;  %v7029_v35 = vmul.f32 %v8635_v18, %v7028_v34  ;;  %8640 = vpow2.f32 %v6752_v42  ;;  %vm7046_vm7 = vweird.f32 %v6799_v40  ;;  %v6575_v37 = vadd.f32 %v6522_v12, %v6344_v50 }
 0x5c7   : > { %v6754_v24 = vmul.f32 1.442695, %v6705_v63  ;;  %v7053_v7 = vor.u32 1.1754944e-38, %v7052_v26  ;;  %vm7051_vm11 = vcmp.eq.f32.partialorder %v7050_v47, 8.507059e+37 }
 0x5c8   : > { %v7030_v61 = vadd.f32 %v8635_v18, %v7029_v35  ;;  %v6607_v10 = vmul.f32 %v6575_v37, %v12721_v29  ;;  %v6345_v36 = vpop.f32.mrf.mxu0 }
 0x5ca   : > { %v7034_v39 = vsel %vm7033_vm0, %v8635_v18, %v7030_v61  ;;  %v6639_v54 = vadd.f32 %v6607_v10, %v11867_v25  ;;  %v6235_v56 = vpop.f32.mrf.mxu3 }
 0x5cb   : > { %v7039_v28 = vsel %vm7036_vm5, %v7038_v1, %v7034_v39  ;;  %v8639_v44 = vpop.eup %8638  ;;  %v6346_v61 = vadd.f32 %v6345_v36, %v6235_v56  ;;  %v6524_v49 = vpop.f32.mrf.mxu1 }
 0x5cc   : > { %v7310_v60 = vmul.f32 %v7039_v28, %v12111_v31  ;;  %v7042_v22 = vmul.f32 %v8639_v44, %v6799_v40  ;;  %v8641_v8 = vpop.eup %8640  ;;  %vm7047_vm8 = vweird.f32 %v8639_v44  ;;  %v12152_v43 = vadd.f32 %v12140_v5, %v6639_v54 }
 0x5cd   : > { %v6800_v31 = vadd.f32 1.0, %v8641_v8  ;;  %vm7048_vm10 = vmor %vm7046_vm7, %vm7047_vm8  ;;  %v6576_v46 = vadd.f32 %v6524_v49, %v6346_v61 }
 0x5ce   : > { %v7342_v30 = vpack.c.bf16 %v7310_v60, %v7310_v60  ;;  %v7043_v6 = vsub.f32 1.0, %v7042_v22  ;;  %v6706_v35 = vsub.f32 0.0, %v12152_v43 }
 0x5cf   : > { %8642 = vrcp.f32 %v6800_v31  ;;  %v7067_v62 = vand.u32 2147483648, %v6800_v31  ;;  %vm7061_vm15 = vweird.f32 %v6800_v31  ;;  %v6608_v16 = vmul.f32 %v6576_v46, %v12722_v11 }
 0x5d0   : > { %7374 = vst.msk [vmem:[%s11970_s21 + $0x38] sm:$0xf] %vm376_vm1, %v7342_v30  ;;  %v7044_v21 = vmul.f32 %v8639_v44, %v7043_v6  ;;  %8644 = vpow2.f32 %v6754_v24  ;;  %v6756_v42 = vmul.f32 1.442695, %v6706_v35 }
 0x5d1   : > { %v7068_v1 = vor.u32 1.1754944e-38, %v7067_v62  ;;  %v6640_v2 = vadd.f32 %v6608_v16, %v11876_v9 }
 0x5d2   : > { %v7045_v57 = vadd.f32 %v8639_v44, %v7044_v21  ;;  %v6238_v6 = vpop.f32.mrf.mxu3  ;;  %v6348_v21 = vpop.f32.mrf.mxu0 }
 0x5d3   : > { %v12161_v8 = vadd.f32 %v12140_v5, %v6640_v2  ;;  %v6349_v50 = vadd.f32 %v6348_v21, %v6238_v6  ;;  %v6527_v24 = vpop.f32.mrf.mxu1 }
 0x5d4   : > { %v7049_v48 = vsel %vm7048_vm10, %v8639_v44, %v7045_v57 }
 0x5d5   : > { %v7054_v20 = vsel %vm7051_vm11, %v7053_v7, %v7049_v48  ;;  %v8643_v41 = vpop.eup %8642  ;;  %v6707_v15 = vsub.f32 0.0, %v12161_v8  ;;  %v6577_v7 = vadd.f32 %v6527_v24, %v6349_v50 }
 0x5d6   : > { %v7311_v18 = vmul.f32 %v7054_v20, %v12120_v33  ;;  %v7057_v53 = vmul.f32 %v8643_v41, %v6800_v31  ;;  %v8645_v34 = vpop.eup %8644  ;;  %vm7062_vm14 = vweird.f32 %v8643_v41  ;;  %v7065_v33 = vand.u32 2147483647, %v6800_v31  ;;  %v12723_v20 = vld [vmem:[#allocation61_spill] sm:$0xff] }
 0x5d7   : > { %v6801_v52 = vadd.f32 1.0, %v8645_v34  ;;  %vm7063_vm2 = vmor %vm7061_vm15, %vm7062_vm14  ;;  %v6758_v57 = vmul.f32 1.442695, %v6707_v15  ;;  %v6609_v29 = vmul.f32 %v6577_v7, %v12723_v20  ;;  %v12725_v7 = vld [vmem:[#allocation66_spill] sm:$0xff] }
 0x5d8   : > { %v7343_v23 = vpack.c.bf16 %v7311_v18, %v7311_v18  ;;  %v7058_v40 = vsub.f32 1.0, %v7057_v53  ;;  %vm7066_vm3 = vcmp.eq.f32.partialorder %v7065_v33, 8.507059e+37 }
 0x5d9   : > { %8646 = vrcp.f32 %v6801_v52  ;;  %v7082_v31 = vand.u32 2147483648, %v6801_v52  ;;  %vm7076_vm9 = vweird.f32 %v6801_v52 }
 0x5da   : > { %7375 = vst.msk [vmem:[%s11970_s21 + $0x3c] sm:$0xf] %vm376_vm1, %v7343_v23  ;;  %v7059_v17 = vmul.f32 %v8643_v41, %v7058_v40  ;;  %8648 = vpow2.f32 %v6756_v42  ;;  %v6240_v56 = vpop.f32.mrf.mxu3  ;;  %v6350_v36 = vpop.f32.mrf.mxu0 }
 0x5db   : > { %v7083_v12 = vor.u32 1.1754944e-38, %v7082_v31  ;;  %v6351_v33 = vadd.f32 %v6350_v36, %v6240_v56 }
 0x5dc   : > { %v7060_v25 = vadd.f32 %v8643_v41, %v7059_v17 }
 0x5de   : > { %v7064_v39 = vsel %vm7063_vm2, %v8643_v41, %v7060_v25  ;;  %v6641_v41 = vadd.f32 %v6609_v29, %v11883_v0  ;;  %v6529_v25 = vpop.f32.mrf.mxu1  ;;  %v12726_v29 = vld [vmem:[#allocation6_spill] sm:$0xff] }
 0x5df   : > { %v7069_v28 = vsel %vm7066_vm3, %v7068_v1, %v7064_v39  ;;  %v8647_v44 = vpop.eup %8646  ;;  %v6578_v49 = vadd.f32 %v6529_v25, %v6351_v33  ;;  %v12724_v39 = vld [vmem:[#allocation64_spill] sm:$0xff] }
 0x5e0   : > { %v7312_v60 = vmul.f32 %v7069_v28, %v12129_v59  ;;  %v7072_v22 = vmul.f32 %v8647_v44, %v6801_v52  ;;  %v8649_v27 = vpop.eup %8648  ;;  %vm7077_vm4 = vweird.f32 %v8647_v44  ;;  %v7080_v59 = vand.u32 2147483647, %v6801_v52 }
 0x5e1   : > { %v6802_v63 = vadd.f32 1.0, %v8649_v27  ;;  %vm7078_vm12 = vmor %vm7076_vm9, %vm7077_vm4  ;;  %v12170_v53 = vadd.f32 %v12140_v5, %v6641_v41  ;;  %v6610_v28 = vmul.f32 %v6578_v49, %v12724_v39 }
 0x5e2   : > { %v7344_v30 = vpack.c.bf16 %v7312_v60, %v7312_v60  ;;  %v7073_v26 = vsub.f32 1.0, %v7072_v22  ;;  %vm7081_vm13 = vcmp.eq.f32.partialorder %v7080_v59, 8.507059e+37  ;;  %v6243_v27 = vpop.f32.mrf.mxu3  ;;  %v6353_v15 = vpop.f32.mrf.mxu0 }
 0x5e3   : > { %8650 = vrcp.f32 %v6802_v63  ;;  %v7097_v62 = vand.u32 2147483648, %v6802_v63  ;;  %v6708_v35 = vsub.f32 0.0, %v12170_v53  ;;  %vm7091_vm0 = vweird.f32 %v6802_v63 }
 0x5e4   : > { %7376 = vst.msk [vmem:[%s11970_s21 + $0x40] sm:$0xf] %vm376_vm1, %v7344_v30  ;;  %v7074_v47 = vmul.f32 %v8647_v44, %v7073_v26  ;;  %8652 = vpow2.f32 %v6758_v57  ;;  %v6642_v60 = vadd.f32 %v6610_v28, %v11892_v19 }
 0x5e5   : > { %v6760_v61 = vmul.f32 1.442695, %v6708_v35  ;;  %v7098_v42 = vor.u32 1.1754944e-38, %v7097_v62 }
 0x5e6   : > { %v7075_v9 = vadd.f32 %v8647_v44, %v7074_v47  ;;  %v12179_v30 = vadd.f32 %v12140_v5, %v6642_v60  ;;  %v6354_v47 = vadd.f32 %v6353_v15, %v6243_v27  ;;  %v6532_v50 = vpop.f32.mrf.mxu1 }
 0x5e8   : > { %v7079_v37 = vsel %vm7078_vm12, %v8647_v44, %v7075_v9  ;;  %v6579_v57 = vadd.f32 %v6532_v50, %v6354_v47 }
 0x5e9   : > { %v7084_v48 = vsel %vm7081_vm13, %v7083_v12, %v7079_v37  ;;  %v8651_v18 = vpop.eup %8650 }
 0x5ea   : > { %v7313_v10 = vmul.f32 %v7084_v48, %v12143_v32  ;;  %v7087_v23 = vmul.f32 %v8651_v18, %v6802_v63  ;;  %v8653_v34 = vpop.eup %8652  ;;  %vm7092_vm6 = vweird.f32 %v8651_v18  ;;  %v7095_v32 = vand.u32 2147483647, %v6802_v63  ;;  %v6355_v35 = vpop.f32.mrf.mxu0 }
 0x5eb   : > { %v6803_v52 = vadd.f32 1.0, %v8653_v34  ;;  %vm7093_vm5 = vmor %vm7091_vm0, %vm7092_vm6  ;;  %v6709_v63 = vsub.f32 0.0, %v12179_v30  ;;  %v6611_v37 = vmul.f32 %v6579_v57, %v12725_v7  ;;  %v6245_v34 = vpop.f32.mrf.mxu3  ;;  %v12728_v57 = vld [vmem:[#allocation72_spill] sm:$0xff] }
 0x5ec   : > { %v7345_v54 = vpack.c.bf16 %v7313_v10, %v7313_v10  ;;  %v7088_v40 = vsub.f32 1.0, %v7087_v23  ;;  %vm7096_vm8 = vcmp.eq.f32.partialorder %v7095_v32, 8.507059e+37 }
 0x5ed   : > { %8654 = vrcp.f32 %v6803_v52  ;;  %v7112_v26 = vand.u32 2147483648, %v6803_v52  ;;  %vm7106_vm10 = vweird.f32 %v6803_v52  ;;  %v6762_v59 = vmul.f32 1.442695, %v6709_v63 }
 0x5ee   : > { %7377 = vst.msk [vmem:[%s11970_s21 + $0x44] sm:$0xf] %vm376_vm1, %v7345_v54  ;;  %v7089_v17 = vmul.f32 %v8651_v18, %v7088_v40  ;;  %8656 = vpow2.f32 %v6760_v61  ;;  %v6643_v10 = vadd.f32 %v6611_v37, %v12726_v29 }
 0x5ef   : > { %v7113_v9 = vor.u32 1.1754944e-38, %v7112_v26 }
 0x5f0   : > { %v7090_v0 = vadd.f32 %v8651_v18, %v7089_v17  ;;  %v12188_v54 = vadd.f32 %v12140_v5, %v6643_v10  ;;  %v6356_v17 = vadd.f32 %v6355_v35, %v6245_v34 }
 0x5f2   : > { %v7094_v1 = vsel %vm7093_vm5, %v8651_v18, %v7090_v0  ;;  %v6534_v0 = vpop.f32.mrf.mxu1  ;;  %v6358_v63 = vpop.f32.mrf.mxu0 }
 0x5f3   : > { %v7099_v46 = vsel %vm7096_vm8, %v7098_v42, %v7094_v1  ;;  %v8655_v16 = vpop.eup %8654  ;;  %v6580_v25 = vadd.f32 %v6534_v0, %v6356_v17  ;;  %v12727_v1 = vld [vmem:[#allocation69_spill] sm:$0xff]  ;;  %v12729_v0 = vld [vmem:[#allocation75_spill] sm:$0xff] }
 0x5f4   : > { %v7314_v11 = vmul.f32 %v7099_v46, %v12152_v43  ;;  %v7102_v2 = vmul.f32 %v8655_v16, %v6803_v52  ;;  %v8657_v22 = vpop.eup %8656  ;;  %vm7107_vm7 = vweird.f32 %v8655_v16  ;;  %v7110_v43 = vand.u32 2147483647, %v6803_v52 }
 0x5f5   : > { %v6804_v31 = vadd.f32 1.0, %v8657_v22  ;;  %vm7108_vm11 = vmor %vm7106_vm10, %vm7107_vm7  ;;  %v6710_v52 = vsub.f32 0.0, %v12188_v54  ;;  %v6612_v46 = vmul.f32 %v6580_v25, %v12727_v1  ;;  %v6248_v22 = vpop.f32.mrf.mxu3 }
 0x5f6   : > { %v7346_v44 = vpack.c.bf16 %v7314_v11, %v7314_v11  ;;  %v7103_v6 = vsub.f32 1.0, %v7102_v2  ;;  %vm7111_vm14 = vcmp.eq.f32.partialorder %v7110_v43, 8.507059e+37 }
 0x5f7   : > { %8658 = vrcp.f32 %v6804_v31  ;;  %v7127_v40 = vand.u32 2147483648, %v6804_v31  ;;  %vm7121_vm2 = vweird.f32 %v6804_v31  ;;  %v6764_v33 = vmul.f32 1.442695, %v6710_v52 }
 0x5f8   : > { %7378 = vst.msk [vmem:[%s11970_s21 + $0x48] sm:$0xf] %vm376_vm1, %v7346_v44  ;;  %v7104_v21 = vmul.f32 %v8655_v16, %v7103_v6  ;;  %8660 = vpow2.f32 %v6762_v59  ;;  %v6644_v11 = vadd.f32 %v6612_v46, %v11908_v3 }
 0x5f9   : > { %v7128_v61 = vor.u32 1.1754944e-38, %v7127_v40 }
 0x5fa   : > { %v7105_v19 = vadd.f32 %v8655_v16, %v7104_v21  ;;  %v12197_v44 = vadd.f32 %v12140_v5, %v6644_v11  ;;  %v6359_v21 = vadd.f32 %v6358_v63, %v6248_v22  ;;  %v6537_v47 = vpop.f32.mrf.mxu1  ;;  %v6360_v40 = vpop.f32.mrf.mxu0 }
 0x5fc   : > { %v7109_v24 = vsel %vm7108_vm11, %v8655_v16, %v7105_v19  ;;  %v6581_v59 = vadd.f32 %v6537_v47, %v6359_v21 }
 0x5fd   : > { %v7114_v12 = vsel %vm7111_vm14, %v7113_v9, %v7109_v24  ;;  %v8659_v20 = vpop.eup %8658 }
 0x5fe   : > { %v7315_v48 = vmul.f32 %v7114_v12, %v12161_v8  ;;  %v7117_v41 = vmul.f32 %v8659_v20, %v6804_v31  ;;  %v8661_v23 = vpop.eup %8660  ;;  %vm7122_vm15 = vweird.f32 %v8659_v20  ;;  %v7125_v8 = vand.u32 2147483647, %v6804_v31 }
 0x5ff   : > { %v6805_v62 = vadd.f32 1.0, %v8661_v23  ;;  %vm7123_vm3 = vmor %vm7121_vm2, %vm7122_vm15  ;;  %v6711_v31 = vsub.f32 0.0, %v12197_v44  ;;  %v6613_v24 = vmul.f32 %v6581_v59, %v12728_v57 }
 0x600   : > { %v7347_v18 = vpack.c.bf16 %v7315_v48, %v7315_v48  ;;  %v7118_v56 = vsub.f32 1.0, %v7117_v41  ;;  %vm7126_vm4 = vcmp.eq.f32.partialorder %v7125_v8, 8.507059e+37 }
 0x601   : > { %8662 = vrcp.f32 %v6805_v62  ;;  %v7142_v6 = vand.u32 2147483648, %v6805_v62  ;;  %vm7136_vm12 = vweird.f32 %v6805_v62  ;;  %v6766_v43 = vmul.f32 1.442695, %v6711_v31 }
 0x602   : > { %7379 = vst.msk [vmem:[%s11970_s21 + $0x4c] sm:$0xf] %vm376_vm1, %v7347_v18  ;;  %v7119_v36 = vmul.f32 %v8659_v20, %v7118_v56  ;;  %8664 = vpow2.f32 %v6764_v33  ;;  %v6645_v37 = vadd.f32 %v6613_v24, %v11915_v38  ;;  %v6250_v18 = vpop.f32.mrf.mxu3 }
 0x603   : > { %v7143_v19 = vor.u32 1.1754944e-38, %v7142_v6  ;;  %v6361_v52 = vadd.f32 %v6360_v40, %v6250_v18 }
 0x604   : > { %v7120_v32 = vadd.f32 %v8659_v20, %v7119_v36  ;;  %v12206_v29 = vadd.f32 %v12140_v5, %v6645_v37  ;;  %v6539_v36 = vpop.f32.mrf.mxu1 }
 0x605   : > { %v6582_v17 = vadd.f32 %v6539_v36, %v6361_v52 }
 0x606   : > { %v7124_v42 = vsel %vm7123_vm3, %v8659_v20, %v7120_v32  ;;  %v6712_v56 = vsub.f32 0.0, %v12206_v29 }
 0x607   : > { %v7129_v49 = vsel %vm7126_vm4, %v7128_v61, %v7124_v42  ;;  %v8663_v28 = vpop.eup %8662  ;;  %v6614_v61 = vmul.f32 %v6582_v17, %v12729_v0 }
 0x608   : > { %v7316_v39 = vmul.f32 %v7129_v49, %v12170_v53  ;;  %v7132_v60 = vmul.f32 %v8663_v28, %v6805_v62  ;;  %v8665_v2 = vpop.eup %8664  ;;  %vm7137_vm9 = vweird.f32 %v8663_v28  ;;  %v7140_v53 = vand.u32 2147483647, %v6805_v62 }
 0x609   : > { %v6806_v26 = vadd.f32 1.0, %v8665_v2  ;;  %vm7138_vm13 = vmor %vm7136_vm12, %vm7137_vm9  ;;  %v6768_v35 = vmul.f32 1.442695, %v6712_v56  ;;  %v6646_v49 = vadd.f32 %v6614_v61, %v11932_v58 }
 0x60a   : > { %v7348_v16 = vpack.c.bf16 %v7316_v39, %v7316_v39  ;;  %v7133_v27 = vsub.f32 1.0, %v7132_v60  ;;  %vm7141_vm6 = vcmp.eq.f32.partialorder %v7140_v53, 8.507059e+37  ;;  %v6253_v11 = vpop.f32.mrf.mxu3 }
 0x60b   : > { %8666 = vrcp.f32 %v6806_v26  ;;  %v7157_v23 = vand.u32 2147483648, %v6806_v26  ;;  %vm7151_vm5 = vweird.f32 %v6806_v26  ;;  %v12215_v39 = vadd.f32 %v12140_v5, %v6646_v49 }
 0x60c   : > { %7380 = vst.msk [vmem:[%s11970_s21 + $0x50] sm:$0xf] %vm376_vm1, %v7348_v16  ;;  %v7134_v15 = vmul.f32 %v8663_v28, %v7133_v27  ;;  %8668 = vpow2.f32 %v6766_v43  ;;  %v6363_v27 = vpop.f32.mrf.mxu0  ;;  %v6542_v63 = vpop.f32.mrf.mxu1  ;;  %v12730_v43 = vld [vmem:[#allocation78_spill] sm:$0xff] }
 0x60d   : > { %v7158_v8 = vor.u32 1.1754944e-38, %v7157_v23  ;;  %v6713_v22 = vsub.f32 0.0, %v12215_v39 }
 0x60e   : > { %v7135_v3 = vadd.f32 %v8663_v28, %v7134_v15 }
 0x60f   : > { %v6770_v31 = vmul.f32 1.442695, %v6713_v22 }
 0x610   : > { %v7139_v50 = vsel %vm7138_vm13, %v8663_v28, %v7135_v3 }
 0x611   : > { %v7144_v9 = vsel %vm7141_vm6, %v7143_v19, %v7139_v50  ;;  %v8667_v7 = vpop.eup %8666 }
 0x612   : > { %v7317_v12 = vmul.f32 %v7144_v9, %v12179_v30  ;;  %v7147_v20 = vmul.f32 %v8667_v7, %v6806_v26  ;;  %v8669_v10 = vpop.eup %8668  ;;  %vm7152_vm0 = vweird.f32 %v8667_v7  ;;  %v7155_v30 = vand.u32 2147483647, %v6806_v26 }
 0x613   : > { %v6807_v34 = vadd.f32 1.0, %v8669_v10  ;;  %vm7153_vm8 = vmor %vm7151_vm5, %vm7152_vm0  ;;  %v6364_v26 = vadd.f32 %v6363_v27, %v6253_v11 }
 0x614   : > { %v7349_v48 = vpack.c.bf16 %v7317_v12, %v7317_v12  ;;  %v7148_v41 = vsub.f32 1.0, %v7147_v20  ;;  %vm7156_vm7 = vcmp.eq.f32.partialorder %v7155_v30, 8.507059e+37  ;;  %v6365_v18 = vpop.f32.mrf.mxu0  ;;  %v6544_v56 = vpop.f32.mrf.mxu1 }
 0x615   : > { %8670 = vrcp.f32 %v6807_v34  ;;  %v7172_v60 = vand.u32 2147483648, %v6807_v34  ;;  %vm7166_vm11 = vweird.f32 %v6807_v34  ;;  %v6583_v53 = vadd.f32 %v6542_v63, %v6364_v26  ;;  %v12732_v26 = vld [vmem:[#allocation84_spill] sm:$0xff] }
 0x616   : > { %7381 = vst.msk [vmem:[%s11970_s21 + $0x54] sm:$0xf] %vm376_vm1, %v7349_v48  ;;  %v7149_v62 = vmul.f32 %v8667_v7, %v7148_v41  ;;  %8672 = vpow2.f32 %v6768_v35 }
 0x617   : > { %v7173_v15 = vor.u32 1.1754944e-38, %v7172_v60  ;;  %v6615_v47 = vmul.f32 %v6583_v53, %v12730_v43 }
 0x618   : > { %v7150_v38 = vadd.f32 %v8667_v7, %v7149_v62 }
 0x619   : > { %v6647_v50 = vadd.f32 %v6615_v47, %v11947_v45 }
 0x61a   : > { %v7154_v32 = vsel %vm7153_vm8, %v8667_v7, %v7150_v38  ;;  %v6255_v7 = vpop.f32.mrf.mxu3  ;;  %v12731_v38 = vld [vmem:[#allocation81_spill] sm:$0xff] }
 0x61b   : > { %v7159_v33 = vsel %vm7156_vm7, %v7158_v8, %v7154_v32  ;;  %v8671_v42 = vpop.eup %8670  ;;  %v12224_v24 = vadd.f32 %v12140_v5, %v6647_v50  ;;  %v6366_v23 = vadd.f32 %v6365_v18, %v6255_v7 }
 0x61c   : > { %v7318_v25 = vmul.f32 %v7159_v33, %v12188_v54  ;;  %v7162_v46 = vmul.f32 %v8671_v42, %v6807_v34  ;;  %v8673_v28 = vpop.eup %8672  ;;  %vm7167_vm10 = vweird.f32 %v8671_v42  ;;  %v7170_v54 = vand.u32 2147483647, %v6807_v34 }
 0x61d   : > { %v6808_v2 = vadd.f32 1.0, %v8673_v28  ;;  %vm7168_vm14 = vmor %vm7166_vm11, %vm7167_vm10  ;;  %v6714_v10 = vsub.f32 0.0, %v12224_v24  ;;  %v6584_v62 = vadd.f32 %v6544_v56, %v6366_v23  ;;  %v6368_v28 = vpop.f32.mrf.mxu0 }
 0x61e   : > { %v7350_v1 = vpack.c.bf16 %v7318_v25, %v7318_v25  ;;  %v7163_v16 = vsub.f32 1.0, %v7162_v46  ;;  %vm7171_vm15 = vcmp.eq.f32.partialorder %v7170_v54, 8.507059e+37 }
 0x61f   : > { %8674 = vrcp.f32 %v6808_v2  ;;  %v7187_v48 = vand.u32 2147483648, %v6808_v2  ;;  %vm7181_vm3 = vweird.f32 %v6808_v2  ;;  %v6772_v34 = vmul.f32 1.442695, %v6714_v10 }
 0x620   : > { %7382 = vst.msk [vmem:[%s11970_s21 + $0x58] sm:$0xf] %vm376_vm1, %v7350_v1  ;;  %v7164_v6 = vmul.f32 %v8671_v42, %v7163_v16  ;;  %8676 = vpow2.f32 %v6770_v31  ;;  %v6616_v35 = vmul.f32 %v6584_v62, %v12731_v38 }
 0x621   : > { %v7188_v40 = vor.u32 1.1754944e-38, %v7187_v48 }
 0x622   : > { %v7165_v58 = vadd.f32 %v8671_v42, %v7164_v6  ;;  %v6648_v17 = vadd.f32 %v6616_v35, %v11962_v14  ;;  %v6258_v25 = vpop.f32.mrf.mxu3 }
 0x623   : > { %v6369_v16 = vadd.f32 %v6368_v28, %v6258_v25 }
 0x624   : > { %v7169_v21 = vsel %vm7168_vm14, %v8671_v42, %v7165_v58  ;;  %v12233_v0 = vadd.f32 %v12140_v5, %v6648_v17 }
 0x625   : > { %v7174_v3 = vsel %vm7171_vm15, %v7173_v15, %v7169_v21  ;;  %v8675_v59 = vpop.eup %8674 }
 0x626   : > { %v7319_v19 = vmul.f32 %v7174_v3, %v12197_v44  ;;  %v7177_v57 = vmul.f32 %v8675_v59, %v6808_v2  ;;  %v8677_v12 = vpop.eup %8676  ;;  %vm7182_vm2 = vweird.f32 %v8675_v59  ;;  %v7185_v44 = vand.u32 2147483647, %v6808_v2  ;;  %v6547_v2 = vpop.f32.mrf.mxu1 }
 0x627   : > { %v6809_v20 = vadd.f32 1.0, %v8677_v12  ;;  %vm7183_vm4 = vmor %vm7181_vm3, %vm7182_vm2  ;;  %v6715_v46 = vsub.f32 0.0, %v12233_v0  ;;  %v6585_v27 = vadd.f32 %v6547_v2, %v6369_v16 }
 0x628   : > { %v7351_v9 = vpack.c.bf16 %v7319_v19, %v7319_v19  ;;  %v7178_v37 = vsub.f32 1.0, %v7177_v57  ;;  %vm7186_vm9 = vcmp.eq.f32.partialorder %v7185_v44, 8.507059e+37  ;;  %v6370_v57 = vpop.f32.mrf.mxu0  ;;  %v12733_v44 = vld [vmem:[#allocation13_spill] sm:$0xff] }
 0x629   : > { %8678 = vrcp.f32 %v6809_v20  ;;  %v7202_v49 = vand.u32 2147483648, %v6809_v20  ;;  %vm7196_vm13 = vweird.f32 %v6809_v20  ;;  %v6774_v60 = vmul.f32 1.442695, %v6715_v46 }
 0x62a   : > { %7383 = vst.msk [vmem:[%s11970_s21 + $0x5c] sm:$0xf] %vm376_vm1, %v7351_v9  ;;  %v7179_v41 = vmul.f32 %v8675_v59, %v7178_v37  ;;  %8680 = vpow2.f32 %v6772_v34  ;;  %v6617_v58 = vmul.f32 %v6585_v27, %v12732_v26  ;;  %v6260_v47 = vpop.f32.mrf.mxu3 }
 0x62b   : > { %v7203_v22 = vor.u32 1.1754944e-38, %v7202_v49  ;;  %v6371_v7 = vadd.f32 %v6370_v57, %v6260_v47  ;;  %v12735_v57 = vld [vmem:[#allocation4_spill] sm:$0xff] }
 0x62c   : > { %v7180_v45 = vadd.f32 %v8675_v59, %v7179_v41  ;;  %v6649_v15 = vadd.f32 %v6617_v58, %v11984_v13 }
 0x62e   : > { %v7184_v30 = vsel %vm7183_vm4, %v8675_v59, %v7180_v45  ;;  %v12242_v3 = vadd.f32 %v12140_v5, %v6649_v15  ;;  %v6549_v48 = vpop.f32.mrf.mxu1 }
 0x62f   : > { %v7189_v52 = vsel %vm7186_vm9, %v7188_v40, %v7184_v30  ;;  %v8679_v8 = vpop.eup %8678  ;;  %v6586_v10 = vadd.f32 %v6549_v48, %v6371_v7 }
 0x630   : > { %v7320_v36 = vmul.f32 %v7189_v52, %v12206_v29  ;;  %v7192_v33 = vmul.f32 %v8679_v8, %v6809_v20  ;;  %v8681_v61 = vpop.eup %8680  ;;  %vm7197_vm12 = vweird.f32 %v8679_v8  ;;  %v7200_v29 = vand.u32 2147483647, %v6809_v20 }
 0x631   : > { %v6810_v1 = vadd.f32 1.0, %v8681_v61  ;;  %vm7198_vm6 = vmor %vm7196_vm13, %vm7197_vm12  ;;  %v6716_v9 = vsub.f32 0.0, %v12242_v3  ;;  %v6618_v23 = vmul.f32 %v6586_v10, %v12733_v44 }
 0x632   : > { %v7352_v32 = vpack.c.bf16 %v7320_v36, %v7320_v36  ;;  %v7193_v42 = vsub.f32 1.0, %v7192_v33  ;;  %vm7201_vm0 = vcmp.eq.f32.partialorder %v7200_v29, 8.507059e+37  ;;  %v6263_v38 = vpop.f32.mrf.mxu3 }
 0x633   : > { %8682 = vrcp.f32 %v6810_v1  ;;  %v7217_v59 = vand.u32 2147483648, %v6810_v1  ;;  %vm7211_vm8 = vweird.f32 %v6810_v1  ;;  %v6776_v37 = vmul.f32 1.442695, %v6716_v9 }
 0x634   : > { %7384 = vst.msk [vmem:[%s11970_s21 + $0x60] sm:$0xf] %vm376_vm1, %v7352_v32  ;;  %v7194_v11 = vmul.f32 %v8679_v8, %v7193_v42  ;;  %8684 = vpow2.f32 %v6774_v60  ;;  %v6650_v56 = vadd.f32 %v6618_v23, %v12002_v55  ;;  %v6373_v32 = vpop.f32.mrf.mxu0 }
 0x635   : > { %v7218_v20 = vor.u32 1.1754944e-38, %v7217_v59  ;;  %v6374_v61 = vadd.f32 %v6373_v32, %v6263_v38 }
 0x636   : > { %v7195_v14 = vadd.f32 %v8679_v8, %v7194_v11  ;;  %v12251_v30 = vadd.f32 %v12140_v5, %v6650_v56  ;;  %v6552_v42 = vpop.f32.mrf.mxu1  ;;  %v12734_v11 = vld [vmem:[#allocation18_spill] sm:$0xff] }
 0x638   : > { %v7199_v6 = vsel %vm7198_vm6, %v8679_v8, %v7195_v14  ;;  %v6717_v17 = vsub.f32 0.0, %v12251_v30 }
 0x639   : > { %v7204_v54 = vsel %vm7201_vm0, %v7203_v22, %v7199_v6  ;;  %v8683_v63 = vpop.eup %8682 }
 0x63a   : > { %v7321_v31 = vmul.f32 %v7204_v54, %v12215_v39  ;;  %v7207_v21 = vmul.f32 %v8683_v63, %v6810_v1  ;;  %v8685_v43 = vpop.eup %8684  ;;  %vm7212_vm5 = vweird.f32 %v8683_v63  ;;  %v7215_v39 = vand.u32 2147483647, %v6810_v1  ;;  %v6265_v54 = vpop.f32.mrf.mxu3 }
 0x63b   : > { %v6811_v50 = vadd.f32 1.0, %v8685_v43  ;;  %vm7213_vm7 = vmor %vm7211_vm8, %vm7212_vm5  ;;  %v6778_v25 = vmul.f32 1.442695, %v6717_v17  ;;  %v6587_v1 = vadd.f32 %v6552_v42, %v6374_v61 }
 0x63c   : > { %v7353_v53 = vpack.c.bf16 %v7321_v31, %v7321_v31  ;;  %v7208_v19 = vsub.f32 1.0, %v7207_v21  ;;  %vm7216_vm10 = vcmp.eq.f32.partialorder %v7215_v39, 8.507059e+37  ;;  %v6375_v15 = vpop.f32.mrf.mxu0 }
 0x63d   : > { %8686 = vrcp.f32 %v6811_v50  ;;  %v7232_v36 = vand.u32 2147483648, %v6811_v50  ;;  %vm7226_vm14 = vweird.f32 %v6811_v50  ;;  %v6619_v29 = vmul.f32 %v6587_v1, %v12734_v11 }
 0x63e   : > { %7385 = vst.msk [vmem:[%s11970_s21 + $0x64] sm:$0xf] %vm376_vm1, %v7353_v53  ;;  %v7209_v12 = vmul.f32 %v8683_v63, %v7208_v19  ;;  %8688 = vpow2.f32 %v6776_v37  ;;  %v6376_v21 = vadd.f32 %v6375_v15, %v6265_v54  ;;  %v6554_v47 = vpop.f32.mrf.mxu1 }
 0x63f   : > { %v7233_v49 = vor.u32 1.1754944e-38, %v7232_v36  ;;  %v6651_v60 = vadd.f32 %v6619_v29, %v12020_v4 }
 0x640   : > { %v7210_v13 = vadd.f32 %v8683_v63, %v7209_v12  ;;  %v6588_v59 = vadd.f32 %v6554_v47, %v6376_v21 }
 0x641   : > { %v12260_v27 = vadd.f32 %v12140_v5, %v6651_v60 }
 0x642   : > { %v7214_v18 = vsel %vm7213_vm7, %v8683_v63, %v7210_v13  ;;  %v6620_v12 = vmul.f32 %v6588_v59, %v12735_v57 }
 0x643   : > { %v7219_v41 = vsel %vm7216_vm10, %v7218_v20, %v7214_v18  ;;  %v8687_v34 = vpop.eup %8686  ;;  %v6718_v63 = vsub.f32 0.0, %v12260_v27 }
 0x644   : > { %v7322_v45 = vmul.f32 %v7219_v41, %v12224_v24  ;;  %v7222_v62 = vmul.f32 %v8687_v34, %v6811_v50  ;;  %v8689_v52 = vpop.eup %8688  ;;  %vm7227_vm11 = vweird.f32 %v8687_v34  ;;  %v7230_v24 = vand.u32 2147483647, %v6811_v50 }
 0x645   : > { %v6812_v8 = vadd.f32 1.0, %v8689_v52  ;;  %vm7228_vm15 = vmor %vm7226_vm14, %vm7227_vm11  ;;  %v6780_v43 = vmul.f32 1.442695, %v6718_v63  ;;  %v6652_v13 = vadd.f32 %v6620_v12, %v12038_v51 }
 0x646   : > { %v7354_v40 = vpack.c.bf16 %v7322_v45, %v7322_v45  ;;  %v7223_v35 = vsub.f32 1.0, %v7222_v62  ;;  %vm7231_vm2 = vcmp.eq.f32.partialorder %v7230_v24, 8.507059e+37 }
 0x647   : > { %8690 = vrcp.f32 %v6812_v8  ;;  %v7247_v58 = vand.u32 2147483648, %v6812_v8  ;;  %vm7241_vm4 = vweird.f32 %v6812_v8  ;;  %v6687_v20 = vadd.f32 %v12140_v5, %v6652_v13 }
 0x648   : > { %7386 = vst.msk [vmem:[%s11970_s21 + $0x68] sm:$0xf] %vm376_vm1, %v7354_v40  ;;  %v7224_v33 = vmul.f32 %v8687_v34, %v7223_v35  ;;  %8692 = vpow2.f32 %v6778_v25 }
 0x649   : > { %v7248_v19 = vor.u32 1.1754944e-38, %v7247_v58  ;;  %v6719_v23 = vsub.f32 0.0, %v6687_v20 }
 0x64a   : > { %v7225_v55 = vadd.f32 %v8687_v34, %v7224_v33 }
 0x64b   : > { %v6782_v56 = vmul.f32 1.442695, %v6719_v23 }
 0x64c   : > { %v7229_v46 = vsel %vm7228_vm15, %v8687_v34, %v7225_v55 }
 0x64d   : > { %v7234_v28 = vsel %vm7231_vm2, %v7233_v49, %v7229_v46  ;;  %v8691_v14 = vpop.eup %8690 }
 0x64e   : > { %v7323_v16 = vmul.f32 %v7234_v28, %v12233_v0  ;;  %v7237_v22 = vmul.f32 %v8691_v14, %v6812_v8  ;;  %v8693_v6 = vpop.eup %8692  ;;  %vm7242_vm3 = vweird.f32 %v8691_v14  ;;  %v7245_v0 = vand.u32 2147483647, %v6812_v8 }
 0x64f   : > { %v6813_v31 = vadd.f32 1.0, %v8693_v6  ;;  %vm7243_vm9 = vmor %vm7241_vm4, %vm7242_vm3 }
 0x650   : > { %v7355_v2 = vpack.c.bf16 %v7323_v16, %v7323_v16  ;;  %v7238_v26 = vsub.f32 1.0, %v7237_v22  ;;  %vm7246_vm12 = vcmp.eq.f32.partialorder %v7245_v0, 8.507059e+37 }
 0x651   : > { %8694 = vrcp.f32 %v6813_v31  ;;  %v7262_v41 = vand.u32 2147483648, %v6813_v31  ;;  %v7260_v34 = vand.u32 2147483647, %v6813_v31  ;;  %vm7256_vm6 = vweird.f32 %v6813_v31 }
 0x652   : > { %7387 = vst.msk [vmem:[%s11970_s21 + $0x6c] sm:$0xf] %vm376_vm1, %v7355_v2  ;;  %v7239_v53 = vmul.f32 %v8691_v14, %v7238_v26  ;;  %8696 = vpow2.f32 %v6780_v43 }
 0x653   : > { %v7263_v51 = vor.u32 1.1754944e-38, %v7262_v41  ;;  %vm7261_vm5 = vcmp.eq.f32.partialorder %v7260_v34, 8.507059e+37 }
 0x654   : > { %v7240_v4 = vadd.f32 %v8691_v14, %v7239_v53 }
 0x656   : > { %v7244_v50 = vsel %vm7243_vm9, %v8691_v14, %v7240_v4 }
 0x657   : > { %v7249_v9 = vsel %vm7246_vm12, %v7248_v19, %v7244_v50  ;;  %v8695_v7 = vpop.eup %8694 }
 0x658   : > { %v7324_v39 = vmul.f32 %v7249_v9, %v12242_v3  ;;  %v7252_v48 = vmul.f32 %v8695_v7, %v6813_v31  ;;  %v8697_v10 = vpop.eup %8696  ;;  %vm7257_vm13 = vweird.f32 %v8695_v7 }
 0x659   : > { %v6814_v44 = vadd.f32 1.0, %v8697_v10  ;;  %vm7258_vm0 = vmor %vm7256_vm6, %vm7257_vm13 }
 0x65a   : > { %v7356_v37 = vpack.c.bf16 %v7324_v39, %v7324_v39  ;;  %v7253_v18 = vsub.f32 1.0, %v7252_v48 }
 0x65b   : > { %8698 = vrcp.f32 %v6814_v44  ;;  %v7277_v17 = vand.u32 2147483648, %v6814_v44  ;;  %v7275_v24 = vand.u32 2147483647, %v6814_v44  ;;  %vm7271_vm7 = vweird.f32 %v6814_v44 }
 0x65c   : > { %7388 = vst.msk [vmem:[%s11970_s21 + $0x70] sm:$0xf] %vm376_vm1, %v7356_v37  ;;  %v7254_v45 = vmul.f32 %v8695_v7, %v7253_v18  ;;  %8700 = vpow2.f32 %v6782_v56 }
 0x65d   : > { %v7278_v55 = vor.u32 1.1754944e-38, %v7277_v17  ;;  %vm7276_vm11 = vcmp.eq.f32.partialorder %v7275_v24, 8.507059e+37 }
 0x65e   : > { %v7255_v3 = vadd.f32 %v8695_v7, %v7254_v45 }
 0x660   : > { %v7259_v40 = vsel %vm7258_vm0, %v8695_v7, %v7255_v3 }
 0x661   : > { %v7264_v5 = vsel %vm7261_vm5, %v7263_v51, %v7259_v40  ;;  %v8699_v52 = vpop.eup %8698 }
 0x662   : > { %v7325_v62 = vmul.f32 %v7264_v5, %v12251_v30  ;;  %v7267_v35 = vmul.f32 %v8699_v52, %v6814_v44  ;;  %v8701_v36 = vpop.eup %8700  ;;  %vm7272_vm8 = vweird.f32 %v8699_v52 }
 0x663   : > { %v6815_v32 = vadd.f32 1.0, %v8701_v36  ;;  %vm7273_vm10 = vmor %vm7271_vm7, %vm7272_vm8 }
 0x664   : > { %v7357_v38 = vpack.c.bf16 %v7325_v62, %v7325_v62  ;;  %v7268_v8 = vsub.f32 1.0, %v7267_v35 }
 0x665   : > { %8702 = vrcp.f32 %v6815_v32  ;;  %v7292_v11 = vand.u32 2147483648, %v6815_v32  ;;  %v7290_v16 = vand.u32 2147483647, %v6815_v32  ;;  %vm7286_vm15 = vweird.f32 %v6815_v32 }
 0x666   : > { %7389 = vst.msk [vmem:[%s11970_s21 + $0x74] sm:$0xf] %vm376_vm1, %v7357_v38  ;;  %v7269_v33 = vmul.f32 %v8699_v52, %v7268_v8 }
 0x667   : > { %v7293_v60 = vor.u32 1.1754944e-38, %v7292_v11  ;;  %vm7291_vm3 = vcmp.eq.f32.partialorder %v7290_v16, 8.507059e+37 }
 0x668   : > { %v7270_v61 = vadd.f32 %v8699_v52, %v7269_v33 }
 0x66a   : > { %v7274_v25 = vsel %vm7273_vm10, %v8699_v52, %v7270_v61 }
 0x66b   : > { %v7279_v30 = vsel %vm7276_vm11, %v7278_v55, %v7274_v25  ;;  %v8703_v49 = vpop.eup %8702 }
 0x66c   : > { %v7326_v42 = vmul.f32 %v7279_v30, %v12260_v27  ;;  %v7282_v46 = vmul.f32 %v8703_v49, %v6815_v32  ;;  %vm7287_vm14 = vweird.f32 %v8703_v49 }
 0x66d   : > { %vm7288_vm2 = vmor %vm7286_vm15, %vm7287_vm14 }
 0x66e   : > { %v7358_v1 = vpack.c.bf16 %v7326_v42, %v7326_v42  ;;  %v7283_v28 = vsub.f32 1.0, %v7282_v46 }
 0x670   : > { %7390 = vst.msk [vmem:[%s11970_s21 + $0x78] sm:$0xf] %vm376_vm1, %v7358_v1  ;;  %v7284_v29 = vmul.f32 %v8703_v49, %v7283_v28 }
 0x672   : > { %v7285_v14 = vadd.f32 %v8703_v49, %v7284_v29 }
 0x674   : > { %v7289_v2 = vsel %vm7288_vm2, %v8703_v49, %v7285_v14 }
 0x675   : > { %v7294_v22 = vsel %vm7291_vm3, %v7293_v60, %v7289_v2 }
 0x676   : > { %v7327_v6 = vmul.f32 %v7294_v22, %v6687_v20 }
 0x678   : > { %v7359_v27 = vpack.c.bf16 %v7327_v6, %v7327_v6 }
 0x67a   : > { %7391 = vst.msk [vmem:[%s11970_s21 + $0x7c] sm:$0xf] %vm376_vm1, %v7359_v27 }
 0x67b PF: > { %s17_s24 = sadd.s32 1, %s8757_s24  }
 0x67c   : > { %p14_p4 = scmp.ge.s32.totalorder %s17_s24, 4  }
 0x67e   :  { %16 = sbr.rel (!%p14_p4) target bundleno = 1 (0x1), region = 94 }

</bundles_post_ra>
